<compile_context>
chip_gen: v5e
topology: v5e:2x2
jax: 0.10.0
libtpu: 0.0.40
codegen_flags: <defaults>
</compile_context>

<pallas_src>
import functools

import jax
import jax.numpy as jnp
from jax.experimental import pallas as pl
from jax.experimental.pallas import tpu as pltpu

_BN_EPS = 1e-5
_VMEM_LIMIT = 48 * 1024 * 1024  # comfortably under v7x's 64 MiB physical VMEM


# --------------------------------------------------------------------------
# Tiling helpers
# --------------------------------------------------------------------------
def _round_up(x, m):
    return ((x + m - 1) // m) * m


def _pick_rows(m, cap):
    """Row (sublane-dim) tile + padded row count for a 2-D slab."""
    if m <= cap:
        return m, m                          # single full-extent block (always legal)
    for t in (2048, 1024, 512, 256, 128, 64, 32, 16, 8):
        if t <= cap and m % t == 0:
            return t, m
    mp = _round_up(m, cap)
    return cap, mp


def _pick_k_tile(k):
    """K-reduction tile (multiple of 128) with minimal zero-padding waste."""
    for tk in (512, 384, 256, 128):          # exact fit first
        if k % tk == 0:
            return tk, k
    for tk in (512, 384, 256, 128):          # then small (<=15%) padding waste
        kp = _round_up(k, tk)
        if kp - k <= 0.15 * k:
            return tk, kp
    kp = _round_up(k, 128)
    for tk in (512, 384, 256, 128):
        if kp % tk == 0:
            return tk, kp
    return 128, kp


def _pick_n_tile(n):
    if n % 128 == 0:
        return 256 if n % 256 == 0 else 128
    return n                                  # full-extent block (e.g. cout = 64)


def _lane_dense(x2d):
    """(M, 64) -> (M//2, 128) row-major view: unmasked lane-dense stores."""
    m, c = x2d.shape
    if c == 64 and m % 2 == 0 and m >= 2:
        return x2d.reshape(m // 2, 128), True
    return x2d, False


# --------------------------------------------------------------------------
# Pallas kernels
# --------------------------------------------------------------------------
def _mm_kernel(a_ref, b_ref, o_ref, acc_ref):
    @pl.when(pl.program_id(2) == 0)
    def _():
        acc_ref[...] = jnp.zeros_like(acc_ref)

    acc_ref[...] += jnp.dot(a_ref[...], b_ref[...],
                            preferred_element_type=jnp.float32)

    @pl.when(pl.program_id(2) == pl.num_programs(2) - 1)
    def _():
        o_ref[...] = acc_ref[...]


def _mm_bias_kernel(a_ref, b_ref, bias_ref, o_ref, acc_ref):
    @pl.when(pl.program_id(2) == 0)
    def _():
        acc_ref[...] = jnp.zeros_like(acc_ref)

    acc_ref[...] += jnp.dot(a_ref[...], b_ref[...],
                            preferred_element_type=jnp.float32)

    @pl.when(pl.program_id(2) == pl.num_programs(2) - 1)
    def _():
        o_ref[...] = acc_ref[...] + bias_ref[...]


def _bn_stats_kernel(x_ref, s_ref, ssq_ref):
    # Accumulate per-channel sum / sum-of-squares over the row-grid ("arbitrary").
    @pl.when(pl.program_id(0) == 0)
    def _():
        s_ref[...] = jnp.zeros_like(s_ref)
        ssq_ref[...] = jnp.zeros_like(ssq_ref)

    x = x_ref[...]
    s_ref[...] += jnp.sum(x, axis=0, keepdims=True)
    ssq_ref[...] += jnp.sum(x * x, axis=0, keepdims=True)


def _bn_apply_kernel(x_ref, sc_ref, sh_ref, o_ref, *, relu):
    y = x_ref[...] * sc_ref[...] + sh_ref[...]
    if relu:
        y = jnp.maximum(y, 0.0)
    o_ref[...] = y


def _bn_apply_res_kernel(x_ref, sc_ref, sh_ref, r_ref, o_ref, *, relu):
    y = x_ref[...] * sc_ref[...] + sh_ref[...] + r_ref[...]
    if relu:
        y = jnp.maximum(y, 0.0)
    o_ref[...] = y


def _max_tree_kernel(*refs):
    x_refs, o_ref = refs[:-1], refs[-1]
    acc = x_refs[0][...]
    for r in x_refs[1:]:
        acc = jnp.maximum(acc, r[...])
    o_ref[...] = acc


def _avgpool_kernel(x_ref, o_ref):
    o_ref[...] = jnp.mean(x_ref[...], axis=1)


# --------------------------------------------------------------------------
# Pallas wrappers
# --------------------------------------------------------------------------
def pallas_matmul(a, b, bias=None):
    """a:(M,K) bf16 @ b:(K,N) bf16 -> (M,N) f32, optional bias (1,N) f32."""
    m, k = a.shape
    k2, n = b.shape
    assert k == k2
    tm, mp = _pick_rows(m, 256)
    tk, kp = _pick_k_tile(k)
    tn = _pick_n_tile(n)

    if (mp, kp) != (m, k):
        a = jnp.pad(a, ((0, mp - m), (0, kp - k)))
    if kp != k:
        b = jnp.pad(b, ((0, kp - k), (0, 0)))

    grid = (mp // tm, n // tn, kp // tk)
    in_specs = [
        pl.BlockSpec((tm, tk), lambda i, j, l: (i, l)),
        pl.BlockSpec((tk, tn), lambda i, j, l: (l, j)),
    ]
    args = (a, b)
    kernel = _mm_kernel
    if bias is not None:
        in_specs.append(pl.BlockSpec((1, tn), lambda i, j, l: (0, j)))
        args = (a, b, bias)
        kernel = _mm_bias_kernel

    out = pl.pallas_call(
        kernel,
        out_shape=jax.ShapeDtypeStruct((mp, n), jnp.float32),
        grid_spec=pltpu.PrefetchScalarGridSpec(
            num_scalar_prefetch=0,
            grid=grid,
            in_specs=in_specs,
            out_specs=pl.BlockSpec((tm, tn), lambda i, j, l: (i, j)),
            scratch_shapes=[pltpu.VMEM((tm, tn), jnp.float32)],
        ),
        compiler_params=pltpu.CompilerParams(
            dimension_semantics=("parallel", "parallel", "arbitrary"),
            vmem_limit_bytes=_VMEM_LIMIT,
        ),
        cost_estimate=pl.CostEstimate(
            flops=2 * mp * n * kp,
            transcendentals=0,
            bytes_accessed=(mp * kp + kp * n) * 2 + mp * n * 4,
        ),
    )(*args)
    return out[:m] if mp != m else out


def bn_act(x2d, bn_params, residual=None, relu=True):
    """Training-mode BatchNorm over rows, fused with optional residual + ReLU."""
    gamma, beta = bn_params
    m, c = x2d.shape

    xd, folded = _lane_dense(x2d)
    rd = None
    if residual is not None:
        rd, rfolded = _lane_dense(residual)
        assert rfolded == folded
    md, cd = xd.shape

    tr, mdp = _pick_rows(md, 2048)
    xs = xd if mdp == md else jnp.pad(xd, ((0, mdp - md), (0, 0)))

    # ---- pass 1: per-channel statistics (grid-accumulated, "arbitrary") ----
    ssum, ssq = pl.pallas_call(
        _bn_stats_kernel,
        out_shape=(jax.ShapeDtypeStruct((1, cd), jnp.float32),
                   jax.ShapeDtypeStruct((1, cd), jnp.float32)),
        grid_spec=pltpu.PrefetchScalarGridSpec(
            num_scalar_prefetch=0,
            grid=(mdp // tr,),
            in_specs=[pl.BlockSpec((tr, cd), lambda i: (i, 0))],
            out_specs=(pl.BlockSpec((1, cd), lambda i: (0, 0)),
                       pl.BlockSpec((1, cd), lambda i: (0, 0))),
        ),
        compiler_params=pltpu.CompilerParams(
            dimension_semantics=("arbitrary",),
            vmem_limit_bytes=_VMEM_LIMIT),
    )(xs)

    if folded:  # fold the two 64-channel halves back together
        ssum = ssum[:, :64] + ssum[:, 64:]
        ssq = ssq[:, :64] + ssq[:, 64:]
    count = float(m)
    mean = ssum / count
    var = ssq / count - mean * mean
    scale = gamma.reshape(1, c).astype(jnp.float32) * jax.lax.rsqrt(var + _BN_EPS)
    shift = beta.reshape(1, c).astype(jnp.float32) - mean * scale
    if folded:
        scale = jnp.tile(scale, (1, 2))
        shift = jnp.tile(shift, (1, 2))

    # ---- pass 2: tiled normalize (+residual) (+ReLU), "parallel" over rows ----
    if rd is None:
        kernel = functools.partial(_bn_apply_kernel, relu=relu)
        in_specs = [pl.BlockSpec((tr, cd), lambda i: (i, 0)),
                    pl.BlockSpec((1, cd), lambda i: (0, 0)),
                    pl.BlockSpec((1, cd), lambda i: (0, 0))]
        args = (xs, scale, shift)
    else:
        rs = rd if mdp == md else jnp.pad(rd, ((0, mdp - md), (0, 0)))
        kernel = functools.partial(_bn_apply_res_kernel, relu=relu)
        in_specs = [pl.BlockSpec((tr, cd), lambda i: (i, 0)),
                    pl.BlockSpec((1, cd), lambda i: (0, 0)),
                    pl.BlockSpec((1, cd), lambda i: (0, 0)),
                    pl.BlockSpec((tr, cd), lambda i: (i, 0))]
        args = (xs, scale, shift, rs)

    y = pl.pallas_call(
        kernel,
        out_shape=jax.ShapeDtypeStruct((mdp, cd), jnp.float32),
        grid_spec=pltpu.PrefetchScalarGridSpec(
            num_scalar_prefetch=0,
            grid=(mdp // tr,),
            in_specs=in_specs,
            out_specs=pl.BlockSpec((tr, cd), lambda i: (i, 0)),
        ),
        compiler_params=pltpu.CompilerParams(
            dimension_semantics=("parallel",),
            vmem_limit_bytes=_VMEM_LIMIT),
    )(*args)
    if mdp != md:
        y = y[:md]
    return y.reshape(m, c)


def im2col(x, kh, kw, stride, pad):
    # x: (N, H, W, C) -> (N*Ho*Wo, kh*kw*C), feature order (dy, dx, c).
    n, h, w, c = x.shape
    xp = jnp.pad(x, ((0, 0), (pad, pad), (pad, pad), (0, 0)))
    hp, wp = h + 2 * pad, w + 2 * pad
    ho = (hp - kh) // stride + 1
    wo = (wp - kw) // stride + 1
    cols = []
    for dy in range(kh):
        for dx in range(kw):
            cols.append(xp[:, dy:dy + stride * ho:stride,
                           dx:dx + stride * wo:stride, :])
    patches = jnp.stack(cols, axis=3)  # (N, Ho, Wo, kh*kw, C)
    return patches.reshape(n * ho * wo, kh * kw * c), (n, ho, wo)
# TODO(synk): replace materialized im2col with implicit im2col (shifted-tile
# BlockSpec reads of the padded NHWC slab inside the matmul K-grid) to remove
# the kh*kw-expanded HBM slab entirely.


def conv2d(x, w_pt, stride, pad):
    # x: (N, H, W, Cin); w_pt: PyTorch layout (Cout, Cin, kh, kw); bias-free.
    cout, cin, kh, kw = w_pt.shape
    cols, dims = im2col(x.astype(jnp.bfloat16), kh, kw, stride, pad)
    wm = jnp.transpose(w_pt, (2, 3, 1, 0)).reshape(kh * kw * cin, cout)
    out = pallas_matmul(cols, wm.astype(jnp.bfloat16))  # (N*Ho*Wo, Cout) f32
    return out, dims


def maxpool2d_3x3_s2(x):
    # x: (N, H, W, C); kernel 3, stride 2, padding 1 (pad value -inf).
    n, h, w, c = x.shape
    xp = jnp.pad(x, ((0, 0), (1, 1), (1, 1), (0, 0)), constant_values=-jnp.inf)
    ho = (h + 2 - 3) // 2 + 1
    wo = (w + 2 - 3) // 2 + 1
    m = n * ho * wo
    wins = []
    for dy in range(3):
        for dx in range(3):
            wins.append(xp[:, dy:dy + 2 * ho:2, dx:dx + 2 * wo:2, :]
                        .reshape(m, c))
    dense = [_lane_dense(wv) for wv in wins]
    wins = [d[0] for d in dense]
    md, cd = wins[0].shape
    tr, mdp = _pick_rows(md, 2048)
    if mdp != md:
        wins = [jnp.pad(wv, ((0, mdp - md), (0, 0))) for wv in wins]

    out = pl.pallas_call(
        _max_tree_kernel,
        out_shape=jax.ShapeDtypeStruct((mdp, cd), jnp.float32),
        grid_spec=pltpu.PrefetchScalarGridSpec(
            num_scalar_prefetch=0,
            grid=(mdp // tr,),
            in_specs=[pl.BlockSpec((tr, cd), lambda i: (i, 0))
                      for _ in range(9)],
            out_specs=pl.BlockSpec((tr, cd), lambda i: (i, 0)),
        ),
        compiler_params=pltpu.CompilerParams(
            dimension_semantics=("parallel",),
            vmem_limit_bytes=_VMEM_LIMIT),
    )(*wins)
    if mdp != md:
        out = out[:md]
    return out.reshape(m, c).reshape(n, ho, wo, c)


def global_avgpool(x):
    # AdaptiveAvgPool2d((1,1)) -> mean over H*W. Small (N, HW, 512) slab.
    n, h, w, c = x.shape
    xr = x.reshape(n, h * w, c)
    return pl.pallas_call(
        _avgpool_kernel,
        out_shape=jax.ShapeDtypeStruct((n, c), jnp.float32),
        in_specs=[pl.BlockSpec(memory_space=pltpu.MemorySpace.VMEM)],
        out_specs=pl.BlockSpec(memory_space=pltpu.MemorySpace.VMEM),
    )(xr)


# --------------------------------------------------------------------------
# ResNet18 structure
# --------------------------------------------------------------------------
def basic_block(x, p, stride):
    n, h, w, cin = x.shape
    cout = p['conv1'].shape[0]

    out, (n, ho, wo) = conv2d(x, p['conv1'], stride=stride, pad=1)
    out = bn_act(out, p['bn1'], relu=True)
    out_img = out.reshape(n, ho, wo, cout)

    out2, _ = conv2d(out_img, p['conv2'], stride=1, pad=1)

    if 'down_conv' in p:
        idn, _ = conv2d(x, p['down_conv'], stride=stride, pad=0)
        idn = bn_act(idn, p['down_bn'], residual=None, relu=False)
    else:
        idn = x.reshape(n * ho * wo, cin)

    out2 = bn_act(out2, p['bn2'], residual=idn, relu=True)
    return out2.reshape(n, ho, wo, cout)


def resnet18_apply(params, x_nchw):
    x = jnp.transpose(x_nchw, (0, 2, 3, 1)).astype(jnp.float32)  # NCHW -> NHWC

    out, (n, ho, wo) = conv2d(x, params['conv1'], stride=2, pad=3)
    out = bn_act(out, params['bn1'], relu=True)
    x = out.reshape(n, ho, wo, 64)
    x = maxpool2d_3x3_s2(x)

    stage_strides = [1, 2, 2, 2]
    for li in range(4):
        blocks = params[f'layer{li + 1}']
        x = basic_block(x, blocks[0], stage_strides[li])
        x = basic_block(x, blocks[1], 1)

    feat = global_avgpool(x)                                      # (N, 512)

    # fc: pad classes to a 128-lane-dense output, slice back afterwards.
    out_classes = params['fc_w'].shape[0]
    ncp = _round_up(out_classes, 128)
    w_fc = jnp.pad(params['fc_w'].T, ((0, 0), (0, ncp - out_classes)))
    b_fc = jnp.pad(params['fc_b'], (0, ncp - out_classes)).reshape(1, ncp)
    logits = pallas_matmul(feat.astype(jnp.bfloat16),
                           w_fc.astype(jnp.bfloat16),
                           bias=b_fc.astype(jnp.float32))
    return logits[:, :out_classes]


_resnet18_apply_jit = jax.jit(resnet18_apply)


def resnet18_forward(params, x_nchw):
    # Mirrors the PyTorch module: returns (model(x), 1).
    return _resnet18_apply_jit(params, x_nchw), 1


# --------------------------------------------------------------------------
# Deterministic synthetic parameters (torchvision resnet18 shapes)
# --------------------------------------------------------------------------
def init_params(key, out_classes):
    keys = iter(jax.random.split(key, 32))

    def conv_w(cout, cin, kh, kw):
        return jax.random.normal(next(keys), (cout, cin, kh, kw),
                                 jnp.float32) * 0.05

    def bn_p(c):
        return (jnp.ones((c,), jnp.float32), jnp.zeros((c,), jnp.float32))

    params = {
        'conv1': conv_w(64, 3, 7, 7),
        'bn1': bn_p(64),
    }

    def make_block(cin, cout, stride):
        p = {
            'conv1': conv_w(cout, cin, 3, 3),
            'bn1': bn_p(cout),
            'conv2': conv_w(cout, cout, 3, 3),
            'bn2': bn_p(cout),
        }
        if stride != 1 or cin != cout:
            p['down_conv'] = conv_w(cout, cin, 1, 1)
            p['down_bn'] = bn_p(cout)
        return p

    cfg = [(64, 64, 1), (64, 128, 2), (128, 256, 2), (256, 512, 2)]
    for i, (cin, cout, stride) in enumerate(cfg):
        params[f'layer{i + 1}'] = [
            make_block(cin, cout, stride),
            make_block(cout, cout, 1),
        ]

    params['fc_w'] = jax.random.normal(next(keys), (out_classes, 512),
                                       jnp.float32) * 0.05
    params['fc_b'] = jnp.zeros((out_classes,), jnp.float32)
    return params


# --------------------------------------------------------------------------
if __name__ == "__main__":
    out_classes = 10
    key = jax.random.PRNGKey(0)
    pkey, xkey = jax.random.split(key)

    params = init_params(pkey, out_classes)
    # Small-but-valid image batch: 32x32 RGB (ResNet18 downsamples by 32x).
    x = jax.random.normal(xkey, (2, 3, 32, 32), jnp.float32)

    logits, extra = resnet18_forward(params, x)
    logits = jax.block_until_ready(logits)

    assert logits.shape == (2, out_classes), logits.shape
    assert bool(jnp.all(jnp.isfinite(logits)))
    assert extra == 1
    print("KERNEL_OK")
</pallas_src>

<mosaic_0001>
module attributes {stable_mosaic.version = 11 : i64} {
  func.func @_mm_kernel(%arg0: i32, %arg1: i32, %arg2: i32, %arg3: memref<256x256xbf16, #tpu.memory_space<vmem>>, %arg4: memref<256x64xbf16, #tpu.memory_space<vmem>>, %arg5: memref<256x64xf32, #tpu.memory_space<vmem>>, %arg6: memref<256x64xf32, #tpu.memory_space<vmem>>) attributes {dimension_semantics = [#tpu.dimension_semantics<parallel>, #tpu.dimension_semantics<parallel>, #tpu.dimension_semantics<arbitrary>], iteration_bounds = array<i64: 2, 1, 1>, scalar_prefetch = 0 : i64, scratch_operands = 1 : i64, tpu.core_type = #tpu.core_type<tc>, window_params = [{transform_indices = @transform_0, window_bounds = array<i64: 256, 256>}, {transform_indices = @transform_1, window_bounds = array<i64: 256, 64>}, {transform_indices = @transform_2, window_bounds = array<i64: 256, 64>}]} {
    %c0_i32 = arith.constant 0 : i32
    %0 = arith.cmpi eq, %arg2, %c0_i32 : i32
    %1 = arith.extui %0 : i1 to i32
    %c0_i32_0 = arith.constant 0 : i32
    %2 = arith.cmpi ne, %1, %c0_i32_0 : i32
    scf.if %2 {
      %cst_10 = arith.constant 0.000000e+00 : f32
      %12 = vector.broadcast %cst_10 : f32 to vector<256x64xf32>
      %c0_11 = arith.constant 0 : index
      %c0_12 = arith.constant 0 : index
      %13 = vector.load %arg6[%c0_11, %c0_12] : memref<256x64xf32, #tpu.memory_space<vmem>>, vector<256x64xf32>
      tpu.vector_store %arg6[%c0_11, %c0_12], %12 {strides = array<i32>} : memref<256x64xf32, #tpu.memory_space<vmem>>, vector<256x64xf32>,
    } else {
    }
    %c0 = arith.constant 0 : index
    %c0_1 = arith.constant 0 : index
    %3 = vector.load %arg6[%c0, %c0_1] : memref<256x64xf32, #tpu.memory_space<vmem>>, vector<256x64xf32>
    %c0_2 = arith.constant 0 : index
    %c0_3 = arith.constant 0 : index
    %4 = vector.load %arg3[%c0_2, %c0_3] : memref<256x256xbf16, #tpu.memory_space<vmem>>, vector<256x256xbf16>
    %c0_4 = arith.constant 0 : index
    %c0_5 = arith.constant 0 : index
    %5 = vector.load %arg4[%c0_4, %c0_5] : memref<256x64xbf16, #tpu.memory_space<vmem>>, vector<256x64xbf16>
    %cst = arith.constant dense<0.000000e+00> : vector<256x64xf32>
    %6 = tpu.matmul %4, %5, %cst {dimension_numbers = #tpu.dot_dimension_numbers<[1], [0], [0], [1], [0, 0, 1, 1], [], []>} : vector<256x256xbf16>, vector<256x64xbf16>, vector<256x64xf32> -> vector<256x64xf32>
    %7 = arith.addf %3, %6 : vector<256x64xf32>
    %c0_6 = arith.constant 0 : index
    %c0_7 = arith.constant 0 : index
    %8 = vector.load %arg6[%c0_6, %c0_7] : memref<256x64xf32, #tpu.memory_space<vmem>>, vector<256x64xf32>
    tpu.vector_store %arg6[%c0_6, %c0_7], %7 {strides = array<i32>} : memref<256x64xf32, #tpu.memory_space<vmem>>, vector<256x64xf32>,
    %c0_i32_8 = arith.constant 0 : i32
    %9 = arith.cmpi eq, %arg2, %c0_i32_8 : i32
    %10 = arith.extui %9 : i1 to i32
    %c0_i32_9 = arith.constant 0 : i32
    %11 = arith.cmpi ne, %10, %c0_i32_9 : i32
    scf.if %11 {
      %c0_10 = arith.constant 0 : index
      %c0_11 = arith.constant 0 : index
      %12 = vector.load %arg6[%c0_10, %c0_11] : memref<256x64xf32, #tpu.memory_space<vmem>>, vector<256x64xf32>
      %c0_12 = arith.constant 0 : index
      %c0_13 = arith.constant 0 : index
      %13 = vector.load %arg5[%c0_12, %c0_13] : memref<256x64xf32, #tpu.memory_space<vmem>>, vector<256x64xf32>
      tpu.vector_store %arg5[%c0_12, %c0_13], %12 {strides = array<i32>} : memref<256x64xf32, #tpu.memory_space<vmem>>, vector<256x64xf32>,
    } else {
    }
    return
  }
  func.func @transform_0(%arg0: i32, %arg1: i32, %arg2: i32) -> (i32, i32) {
    %c0_i32 = arith.constant 0 : i32
    return %arg0, %arg2 : i32, i32
  }
  func.func @transform_1(%arg0: i32, %arg1: i32, %arg2: i32) -> (i32, i32) {
    %c0_i32 = arith.constant 0 : i32
    return %arg2, %arg1 : i32, i32
  }
  func.func @transform_2(%arg0: i32, %arg1: i32, %arg2: i32) -> (i32, i32) {
    %c0_i32 = arith.constant 0 : i32
    return %arg0, %arg1 : i32, i32
  }
}

module attributes {stable_mosaic.version = 11 : i64} {
  func.func @_bn_stats_kernel(%arg0: i32, %arg1: memref<256x128xf32, #tpu.memory_space<vmem>>, %arg2: memref<1x128xf32, #tpu.memory_space<vmem>>, %arg3: memref<1x128xf32, #tpu.memory_space<vmem>>) attributes {dimension_semantics = [#tpu.dimension_semantics<arbitrary>], iteration_bounds = array<i64: 1>, scalar_prefetch = 0 : i64, scratch_operands = 0 : i64, tpu.core_type = #tpu.core_type<tc>, window_params = [{transform_indices = @transform_0, window_bounds = array<i64: 256, 128>}, {pipeline_mode = #tpu.pipeline_mode<synchronous>, transform_indices = @transform_1, window_bounds = array<i64: 1, 128>}, {pipeline_mode = #tpu.pipeline_mode<synchronous>, transform_indices = @transform_2, window_bounds = array<i64: 1, 128>}]} {
    %c0_i32 = arith.constant 0 : i32
    %0 = arith.cmpi eq, %arg0, %c0_i32 : i32
    %1 = arith.extui %0 : i1 to i32
    %c0_i32_0 = arith.constant 0 : i32
    %2 = arith.cmpi ne, %1, %c0_i32_0 : i32
    scf.if %2 {
      %cst_11 = arith.constant 0.000000e+00 : f32
      %15 = vector.broadcast %cst_11 : f32 to vector<1x128xf32>
      %c0_12 = arith.constant 0 : index
      %c0_13 = arith.constant 0 : index
      %16 = vector.load %arg2[%c0_12, %c0_13] : memref<1x128xf32, #tpu.memory_space<vmem>>, vector<1x128xf32>
      tpu.vector_store %arg2[%c0_12, %c0_13], %15 {strides = array<i32>} : memref<1x128xf32, #tpu.memory_space<vmem>>, vector<1x128xf32>,
      %cst_14 = arith.constant 0.000000e+00 : f32
      %17 = vector.broadcast %cst_14 : f32 to vector<1x128xf32>
      %c0_15 = arith.constant 0 : index
      %c0_16 = arith.constant 0 : index
      %18 = vector.load %arg3[%c0_15, %c0_16] : memref<1x128xf32, #tpu.memory_space<vmem>>, vector<1x128xf32>
      tpu.vector_store %arg3[%c0_15, %c0_16], %17 {strides = array<i32>} : memref<1x128xf32, #tpu.memory_space<vmem>>, vector<1x128xf32>,
    } else {
    }
    %c0 = arith.constant 0 : index
    %c0_1 = arith.constant 0 : index
    %3 = vector.load %arg1[%c0, %c0_1] : memref<256x128xf32, #tpu.memory_space<vmem>>, vector<256x128xf32>
    %c0_2 = arith.constant 0 : index
    %c0_3 = arith.constant 0 : index
    %4 = vector.load %arg2[%c0_2, %c0_3] : memref<1x128xf32, #tpu.memory_space<vmem>>, vector<1x128xf32>
    %cst = arith.constant dense<0.000000e+00> : vector<128xf32>
    %5 = vector.multi_reduction <add>, %3, %cst [0] : vector<256x128xf32> to vector<128xf32>
    %6 = vector.shape_cast %5 : vector<128xf32> to vector<1x128xf32>
    %7 = arith.addf %4, %6 : vector<1x128xf32>
    %c0_4 = arith.constant 0 : index
    %c0_5 = arith.constant 0 : index
    %8 = vector.load %arg2[%c0_4, %c0_5] : memref<1x128xf32, #tpu.memory_space<vmem>>, vector<1x128xf32>
    tpu.vector_store %arg2[%c0_4, %c0_5], %7 {strides = array<i32>} : memref<1x128xf32, #tpu.memory_space<vmem>>, vector<1x128xf32>,
    %c0_6 = arith.constant 0 : index
    %c0_7 = arith.constant 0 : index
    %9 = vector.load %arg3[%c0_6, %c0_7] : memref<1x128xf32, #tpu.memory_space<vmem>>, vector<1x128xf32>
    %10 = arith.mulf %3, %3 : vector<256x128xf32>
    %cst_8 = arith.constant dense<0.000000e+00> : vector<128xf32>
    %11 = vector.multi_reduction <add>, %10, %cst_8 [0] : vector<256x128xf32> to vector<128xf32>
    %12 = vector.shape_cast %11 : vector<128xf32> to vector<1x128xf32>
    %13 = arith.addf %9, %12 : vector<1x128xf32>
    %c0_9 = arith.constant 0 : index
    %c0_10 = arith.constant 0 : index
    %14 = vector.load %arg3[%c0_9, %c0_10] : memref<1x128xf32, #tpu.memory_space<vmem>>, vector<1x128xf32>
    tpu.vector_store %arg3[%c0_9, %c0_10], %13 {strides = array<i32>} : memref<1x128xf32, #tpu.memory_space<vmem>>, vector<1x128xf32>,
    return
  }
  func.func @transform_0(%arg0: i32) -> (i32, i32) {
    %c0_i32 = arith.constant 0 : i32
    %c0_i32_0 = arith.constant 0 : i32
    return %arg0, %c0_i32 : i32, i32
  }
  func.func @transform_1(%arg0: i32) -> (i32, i32) {
    %c0_i32 = arith.constant 0 : i32
    %c0_i32_0 = arith.constant 0 : i32
    %c0_i32_1 = arith.constant 0 : i32
    return %c0_i32, %c0_i32_0 : i32, i32
  }
  func.func @transform_2(%arg0: i32) -> (i32, i32) {
    %c0_i32 = arith.constant 0 : i32
    %c0_i32_0 = arith.constant 0 : i32
    %c0_i32_1 = arith.constant 0 : i32
    return %c0_i32, %c0_i32_0 : i32, i32
  }
}

module attributes {stable_mosaic.version = 11 : i64} {
  func.func @_bn_apply_kernel(%arg0: i32, %arg1: memref<256x128xf32, #tpu.memory_space<vmem>>, %arg2: memref<1x128xf32, #tpu.memory_space<vmem>>, %arg3: memref<1x128xf32, #tpu.memory_space<vmem>>, %arg4: memref<256x128xf32, #tpu.memory_space<vmem>>) attributes {dimension_semantics = [#tpu.dimension_semantics<parallel>], iteration_bounds = array<i64: 1>, scalar_prefetch = 0 : i64, scratch_operands = 0 : i64, tpu.core_type = #tpu.core_type<tc>, window_params = [{transform_indices = @transform_0, window_bounds = array<i64: 256, 128>}, {pipeline_mode = #tpu.pipeline_mode<synchronous>, transform_indices = @transform_1, window_bounds = array<i64: 1, 128>}, {pipeline_mode = #tpu.pipeline_mode<synchronous>, transform_indices = @transform_2, window_bounds = array<i64: 1, 128>}, {transform_indices = @transform_3, window_bounds = array<i64: 256, 128>}]} {
    %c0 = arith.constant 0 : index
    %c0_0 = arith.constant 0 : index
    %0 = vector.load %arg1[%c0, %c0_0] : memref<256x128xf32, #tpu.memory_space<vmem>>, vector<256x128xf32>
    %c0_1 = arith.constant 0 : index
    %c0_2 = arith.constant 0 : index
    %1 = vector.load %arg2[%c0_1, %c0_2] : memref<1x128xf32, #tpu.memory_space<vmem>>, vector<1x128xf32>
    %2 = vector.broadcast %1 : vector<1x128xf32> to vector<256x128xf32>
    %3 = arith.mulf %0, %2 : vector<256x128xf32>
    %c0_3 = arith.constant 0 : index
    %c0_4 = arith.constant 0 : index
    %4 = vector.load %arg3[%c0_3, %c0_4] : memref<1x128xf32, #tpu.memory_space<vmem>>, vector<1x128xf32>
    %5 = vector.broadcast %4 : vector<1x128xf32> to vector<256x128xf32>
    %6 = arith.addf %3, %5 : vector<256x128xf32>
    %cst = arith.constant 0.000000e+00 : f32
    %7 = vector.broadcast %cst : f32 to vector<256x128xf32>
    %8 = arith.maximumf %6, %7 : vector<256x128xf32>
    %c0_5 = arith.constant 0 : index
    %c0_6 = arith.constant 0 : index
    %9 = vector.load %arg4[%c0_5, %c0_6] : memref<256x128xf32, #tpu.memory_space<vmem>>, vector<256x128xf32>
    tpu.vector_store %arg4[%c0_5, %c0_6], %8 {strides = array<i32>} : memref<256x128xf32, #tpu.memory_space<vmem>>, vector<256x128xf32>,
    return
  }
  func.func @transform_0(%arg0: i32) -> (i32, i32) {
    %c0_i32 = arith.constant 0 : i32
    %c0_i32_0 = arith.constant 0 : i32
    return %arg0, %c0_i32 : i32, i32
  }
  func.func @transform_1(%arg0: i32) -> (i32, i32) {
    %c0_i32 = arith.constant 0 : i32
    %c0_i32_0 = arith.constant 0 : i32
    %c0_i32_1 = arith.constant 0 : i32
    return %c0_i32, %c0_i32_0 : i32, i32
  }
  func.func @transform_2(%arg0: i32) -> (i32, i32) {
    %c0_i32 = arith.constant 0 : i32
    %c0_i32_0 = arith.constant 0 : i32
    %c0_i32_1 = arith.constant 0 : i32
    return %c0_i32, %c0_i32_0 : i32, i32
  }
  func.func @transform_3(%arg0: i32) -> (i32, i32) {
    %c0_i32 = arith.constant 0 : i32
    %c0_i32_0 = arith.constant 0 : i32
    return %arg0, %c0_i32 : i32, i32
  }
}

module attributes {stable_mosaic.version = 11 : i64} {
  func.func @_max_tree_kernel(%arg0: i32, %arg1: memref<64x128xf32, #tpu.memory_space<vmem>>, %arg2: memref<64x128xf32, #tpu.memory_space<vmem>>, %arg3: memref<64x128xf32, #tpu.memory_space<vmem>>, %arg4: memref<64x128xf32, #tpu.memory_space<vmem>>, %arg5: memref<64x128xf32, #tpu.memory_space<vmem>>, %arg6: memref<64x128xf32, #tpu.memory_space<vmem>>, %arg7: memref<64x128xf32, #tpu.memory_space<vmem>>, %arg8: memref<64x128xf32, #tpu.memory_space<vmem>>, %arg9: memref<64x128xf32, #tpu.memory_space<vmem>>, %arg10: memref<64x128xf32, #tpu.memory_space<vmem>>) attributes {dimension_semantics = [#tpu.dimension_semantics<parallel>], iteration_bounds = array<i64: 1>, scalar_prefetch = 0 : i64, scratch_operands = 0 : i64, tpu.core_type = #tpu.core_type<tc>, window_params = [{transform_indices = @transform_0, window_bounds = array<i64: 64, 128>}, {transform_indices = @transform_1, window_bounds = array<i64: 64, 128>}, {transform_indices = @transform_2, window_bounds = array<i64: 64, 128>}, {transform_indices = @transform_3, window_bounds = array<i64: 64, 128>}, {transform_indices = @transform_4, window_bounds = array<i64: 64, 128>}, {transform_indices = @transform_5, window_bounds = array<i64: 64, 128>}, {transform_indices = @transform_6, window_bounds = array<i64: 64, 128>}, {transform_indices = @transform_7, window_bounds = array<i64: 64, 128>}, {transform_indices = @transform_8, window_bounds = array<i64: 64, 128>}, {transform_indices = @transform_9, window_bounds = array<i64: 64, 128>}]} {
    %c0 = arith.constant 0 : index
    %c0_0 = arith.constant 0 : index
    %0 = vector.load %arg1[%c0, %c0_0] : memref<64x128xf32, #tpu.memory_space<vmem>>, vector<64x128xf32>
    %c0_1 = arith.constant 0 : index
    %c0_2 = arith.constant 0 : index
    %1 = vector.load %arg2[%c0_1, %c0_2] : memref<64x128xf32, #tpu.memory_space<vmem>>, vector<64x128xf32>
    %2 = arith.maximumf %0, %1 : vector<64x128xf32>
    %c0_3 = arith.constant 0 : index
    %c0_4 = arith.constant 0 : index
    %3 = vector.load %arg3[%c0_3, %c0_4] : memref<64x128xf32, #tpu.memory_space<vmem>>, vector<64x128xf32>
    %4 = arith.maximumf %2, %3 : vector<64x128xf32>
    %c0_5 = arith.constant 0 : index
    %c0_6 = arith.constant 0 : index
    %5 = vector.load %arg4[%c0_5, %c0_6] : memref<64x128xf32, #tpu.memory_space<vmem>>, vector<64x128xf32>
    %6 = arith.maximumf %4, %5 : vector<64x128xf32>
    %c0_7 = arith.constant 0 : index
    %c0_8 = arith.constant 0 : index
    %7 = vector.load %arg5[%c0_7, %c0_8] : memref<64x128xf32, #tpu.memory_space<vmem>>, vector<64x128xf32>
    %8 = arith.maximumf %6, %7 : vector<64x128xf32>
    %c0_9 = arith.constant 0 : index
    %c0_10 = arith.constant 0 : index
    %9 = vector.load %arg6[%c0_9, %c0_10] : memref<64x128xf32, #tpu.memory_space<vmem>>, vector<64x128xf32>
    %10 = arith.maximumf %8, %9 : vector<64x128xf32>
    %c0_11 = arith.constant 0 : index
    %c0_12 = arith.constant 0 : index
    %11 = vector.load %arg7[%c0_11, %c0_12] : memref<64x128xf32, #tpu.memory_space<vmem>>, vector<64x128xf32>
    %12 = arith.maximumf %10, %11 : vector<64x128xf32>
    %c0_13 = arith.constant 0 : index
    %c0_14 = arith.constant 0 : index
    %13 = vector.load %arg8[%c0_13, %c0_14] : memref<64x128xf32, #tpu.memory_space<vmem>>, vector<64x128xf32>
    %14 = arith.maximumf %12, %13 : vector<64x128xf32>
    %c0_15 = arith.constant 0 : index
    %c0_16 = arith.constant 0 : index
    %15 = vector.load %arg9[%c0_15, %c0_16] : memref<64x128xf32, #tpu.memory_space<vmem>>, vector<64x128xf32>
    %16 = arith.maximumf %14, %15 : vector<64x128xf32>
    %c0_17 = arith.constant 0 : index
    %c0_18 = arith.constant 0 : index
    %17 = vector.load %arg10[%c0_17, %c0_18] : memref<64x128xf32, #tpu.memory_space<vmem>>, vector<64x128xf32>
    tpu.vector_store %arg10[%c0_17, %c0_18], %16 {strides = array<i32>} : memref<64x128xf32, #tpu.memory_space<vmem>>, vector<64x128xf32>,
    return
  }
  func.func @transform_0(%arg0: i32) -> (i32, i32) {
    %c0_i32 = arith.constant 0 : i32
    %c0_i32_0 = arith.constant 0 : i32
    return %arg0, %c0_i32 : i32, i32
  }
  func.func @transform_1(%arg0: i32) -> (i32, i32) {
    %c0_i32 = arith.constant 0 : i32
    %c0_i32_0 = arith.constant 0 : i32
    return %arg0, %c0_i32 : i32, i32
  }
  func.func @transform_2(%arg0: i32) -> (i32, i32) {
    %c0_i32 = arith.constant 0 : i32
    %c0_i32_0 = arith.constant 0 : i32
    return %arg0, %c0_i32 : i32, i32
  }
  func.func @transform_3(%arg0: i32) -> (i32, i32) {
    %c0_i32 = arith.constant 0 : i32
    %c0_i32_0 = arith.constant 0 : i32
    return %arg0, %c0_i32 : i32, i32
  }
  func.func @transform_4(%arg0: i32) -> (i32, i32) {
    %c0_i32 = arith.constant 0 : i32
    %c0_i32_0 = arith.constant 0 : i32
    return %arg0, %c0_i32 : i32, i32
  }
  func.func @transform_5(%arg0: i32) -> (i32, i32) {
    %c0_i32 = arith.constant 0 : i32
    %c0_i32_0 = arith.constant 0 : i32
    return %arg0, %c0_i32 : i32, i32
  }
  func.func @transform_6(%arg0: i32) -> (i32, i32) {
    %c0_i32 = arith.constant 0 : i32
    %c0_i32_0 = arith.constant 0 : i32
    return %arg0, %c0_i32 : i32, i32
  }
  func.func @transform_7(%arg0: i32) -> (i32, i32) {
    %c0_i32 = arith.constant 0 : i32
    %c0_i32_0 = arith.constant 0 : i32
    return %arg0, %c0_i32 : i32, i32
  }
  func.func @transform_8(%arg0: i32) -> (i32, i32) {
    %c0_i32 = arith.constant 0 : i32
    %c0_i32_0 = arith.constant 0 : i32
    return %arg0, %c0_i32 : i32, i32
  }
  func.func @transform_9(%arg0: i32) -> (i32, i32) {
    %c0_i32 = arith.constant 0 : i32
    %c0_i32_0 = arith.constant 0 : i32
    return %arg0, %c0_i32 : i32, i32
  }
}

module attributes {stable_mosaic.version = 11 : i64} {
  func.func @_mm_kernel(%arg0: i32, %arg1: i32, %arg2: i32, %arg3: memref<128x128xbf16, #tpu.memory_space<vmem>>, %arg4: memref<128x64xbf16, #tpu.memory_space<vmem>>, %arg5: memref<128x64xf32, #tpu.memory_space<vmem>>, %arg6: memref<128x64xf32, #tpu.memory_space<vmem>>) attributes {dimension_semantics = [#tpu.dimension_semantics<parallel>, #tpu.dimension_semantics<parallel>, #tpu.dimension_semantics<arbitrary>], iteration_bounds = array<i64: 1, 1, 5>, scalar_prefetch = 0 : i64, scratch_operands = 1 : i64, tpu.core_type = #tpu.core_type<tc>, window_params = [{transform_indices = @transform_0, window_bounds = array<i64: 128, 128>}, {transform_indices = @transform_1, window_bounds = array<i64: 128, 64>}, {transform_indices = @transform_2, window_bounds = array<i64: 128, 64>}]} {
    %c0_i32 = arith.constant 0 : i32
    %0 = arith.cmpi eq, %arg2, %c0_i32 : i32
    %1 = arith.extui %0 : i1 to i32
    %c0_i32_0 = arith.constant 0 : i32
    %2 = arith.cmpi ne, %1, %c0_i32_0 : i32
    scf.if %2 {
      %cst_9 = arith.constant 0.000000e+00 : f32
      %12 = vector.broadcast %cst_9 : f32 to vector<128x64xf32>
      %c0_10 = arith.constant 0 : index
      %c0_11 = arith.constant 0 : index
      %13 = vector.load %arg6[%c0_10, %c0_11] : memref<128x64xf32, #tpu.memory_space<vmem>>, vector<128x64xf32>
      tpu.vector_store %arg6[%c0_10, %c0_11], %12 {strides = array<i32>} : memref<128x64xf32, #tpu.memory_space<vmem>>, vector<128x64xf32>,
    } else {
    }
    %c0 = arith.constant 0 : index
    %c0_1 = arith.constant 0 : index
    %3 = vector.load %arg6[%c0, %c0_1] : memref<128x64xf32, #tpu.memory_space<vmem>>, vector<128x64xf32>
    %c0_2 = arith.constant 0 : index
    %c0_3 = arith.constant 0 : index
    %4 = vector.load %arg3[%c0_2, %c0_3] : memref<128x128xbf16, #tpu.memory_space<vmem>>, vector<128x128xbf16>
    %c0_4 = arith.constant 0 : index
    %c0_5 = arith.constant 0 : index
    %5 = vector.load %arg4[%c0_4, %c0_5] : memref<128x64xbf16, #tpu.memory_space<vmem>>, vector<128x64xbf16>
    %cst = arith.constant dense<0.000000e+00> : vector<128x64xf32>
    %6 = tpu.matmul %4, %5, %cst {dimension_numbers = #tpu.dot_dimension_numbers<[1], [0], [0], [1], [0, 0, 1, 1], [], []>} : vector<128x128xbf16>, vector<128x64xbf16>, vector<128x64xf32> -> vector<128x64xf32>
    %7 = arith.addf %3, %6 : vector<128x64xf32>
    %c0_6 = arith.constant 0 : index
    %c0_7 = arith.constant 0 : index
    %8 = vector.load %arg6[%c0_6, %c0_7] : memref<128x64xf32, #tpu.memory_space<vmem>>, vector<128x64xf32>
    tpu.vector_store %arg6[%c0_6, %c0_7], %7 {strides = array<i32>} : memref<128x64xf32, #tpu.memory_space<vmem>>, vector<128x64xf32>,
    %c4_i32 = arith.constant 4 : i32
    %9 = arith.cmpi eq, %arg2, %c4_i32 : i32
    %10 = arith.extui %9 : i1 to i32
    %c0_i32_8 = arith.constant 0 : i32
    %11 = arith.cmpi ne, %10, %c0_i32_8 : i32
    scf.if %11 {
      %c0_9 = arith.constant 0 : index
      %c0_10 = arith.constant 0 : index
      %12 = vector.load %arg6[%c0_9, %c0_10] : memref<128x64xf32, #tpu.memory_space<vmem>>, vector<128x64xf32>
      %c0_11 = arith.constant 0 : index
      %c0_12 = arith.constant 0 : index
      %13 = vector.load %arg5[%c0_11, %c0_12] : memref<128x64xf32, #tpu.memory_space<vmem>>, vector<128x64xf32>
      tpu.vector_store %arg5[%c0_11, %c0_12], %12 {strides = array<i32>} : memref<128x64xf32, #tpu.memory_space<vmem>>, vector<128x64xf32>,
    } else {
    }
    return
  }
  func.func @transform_0(%arg0: i32, %arg1: i32, %arg2: i32) -> (i32, i32) {
    %c0_i32 = arith.constant 0 : i32
    return %arg0, %arg2 : i32, i32
  }
  func.func @transform_1(%arg0: i32, %arg1: i32, %arg2: i32) -> (i32, i32) {
    %c0_i32 = arith.constant 0 : i32
    return %arg2, %arg1 : i32, i32
  }
  func.func @transform_2(%arg0: i32, %arg1: i32, %arg2: i32) -> (i32, i32) {
    %c0_i32 = arith.constant 0 : i32
    return %arg0, %arg1 : i32, i32
  }
}

module attributes {stable_mosaic.version = 11 : i64} {
  func.func @_bn_apply_kernel(%arg0: i32, %arg1: memref<64x128xf32, #tpu.memory_space<vmem>>, %arg2: memref<1x128xf32, #tpu.memory_space<vmem>>, %arg3: memref<1x128xf32, #tpu.memory_space<vmem>>, %arg4: memref<64x128xf32, #tpu.memory_space<vmem>>) attributes {dimension_semantics = [#tpu.dimension_semantics<parallel>], iteration_bounds = array<i64: 1>, scalar_prefetch = 0 : i64, scratch_operands = 0 : i64, tpu.core_type = #tpu.core_type<tc>, window_params = [{transform_indices = @transform_0, window_bounds = array<i64: 64, 128>}, {pipeline_mode = #tpu.pipeline_mode<synchronous>, transform_indices = @transform_1, window_bounds = array<i64: 1, 128>}, {pipeline_mode = #tpu.pipeline_mode<synchronous>, transform_indices = @transform_2, window_bounds = array<i64: 1, 128>}, {transform_indices = @transform_3, window_bounds = array<i64: 64, 128>}]} {
    %c0 = arith.constant 0 : index
    %c0_0 = arith.constant 0 : index
    %0 = vector.load %arg1[%c0, %c0_0] : memref<64x128xf32, #tpu.memory_space<vmem>>, vector<64x128xf32>
    %c0_1 = arith.constant 0 : index
    %c0_2 = arith.constant 0 : index
    %1 = vector.load %arg2[%c0_1, %c0_2] : memref<1x128xf32, #tpu.memory_space<vmem>>, vector<1x128xf32>
    %2 = vector.broadcast %1 : vector<1x128xf32> to vector<64x128xf32>
    %3 = arith.mulf %0, %2 : vector<64x128xf32>
    %c0_3 = arith.constant 0 : index
    %c0_4 = arith.constant 0 : index
    %4 = vector.load %arg3[%c0_3, %c0_4] : memref<1x128xf32, #tpu.memory_space<vmem>>, vector<1x128xf32>
    %5 = vector.broadcast %4 : vector<1x128xf32> to vector<64x128xf32>
    %6 = arith.addf %3, %5 : vector<64x128xf32>
    %cst = arith.constant 0.000000e+00 : f32
    %7 = vector.broadcast %cst : f32 to vector<64x128xf32>
    %8 = arith.maximumf %6, %7 : vector<64x128xf32>
    %c0_5 = arith.constant 0 : index
    %c0_6 = arith.constant 0 : index
    %9 = vector.load %arg4[%c0_5, %c0_6] : memref<64x128xf32, #tpu.memory_space<vmem>>, vector<64x128xf32>
    tpu.vector_store %arg4[%c0_5, %c0_6], %8 {strides = array<i32>} : memref<64x128xf32, #tpu.memory_space<vmem>>, vector<64x128xf32>,
    return
  }
  func.func @transform_0(%arg0: i32) -> (i32, i32) {
    %c0_i32 = arith.constant 0 : i32
    %c0_i32_0 = arith.constant 0 : i32
    return %arg0, %c0_i32 : i32, i32
  }
  func.func @transform_1(%arg0: i32) -> (i32, i32) {
    %c0_i32 = arith.constant 0 : i32
    %c0_i32_0 = arith.constant 0 : i32
    %c0_i32_1 = arith.constant 0 : i32
    return %c0_i32, %c0_i32_0 : i32, i32
  }
  func.func @transform_2(%arg0: i32) -> (i32, i32) {
    %c0_i32 = arith.constant 0 : i32
    %c0_i32_0 = arith.constant 0 : i32
    %c0_i32_1 = arith.constant 0 : i32
    return %c0_i32, %c0_i32_0 : i32, i32
  }
  func.func @transform_3(%arg0: i32) -> (i32, i32) {
    %c0_i32 = arith.constant 0 : i32
    %c0_i32_0 = arith.constant 0 : i32
    return %arg0, %c0_i32 : i32, i32
  }
}

module attributes {stable_mosaic.version = 11 : i64} {
  func.func @_bn_apply_res_kernel(%arg0: i32, %arg1: memref<64x128xf32, #tpu.memory_space<vmem>>, %arg2: memref<1x128xf32, #tpu.memory_space<vmem>>, %arg3: memref<1x128xf32, #tpu.memory_space<vmem>>, %arg4: memref<64x128xf32, #tpu.memory_space<vmem>>, %arg5: memref<64x128xf32, #tpu.memory_space<vmem>>) attributes {dimension_semantics = [#tpu.dimension_semantics<parallel>], iteration_bounds = array<i64: 1>, scalar_prefetch = 0 : i64, scratch_operands = 0 : i64, tpu.core_type = #tpu.core_type<tc>, window_params = [{transform_indices = @transform_0, window_bounds = array<i64: 64, 128>}, {pipeline_mode = #tpu.pipeline_mode<synchronous>, transform_indices = @transform_1, window_bounds = array<i64: 1, 128>}, {pipeline_mode = #tpu.pipeline_mode<synchronous>, transform_indices = @transform_2, window_bounds = array<i64: 1, 128>}, {transform_indices = @transform_3, window_bounds = array<i64: 64, 128>}, {transform_indices = @transform_4, window_bounds = array<i64: 64, 128>}]} {
    %c0 = arith.constant 0 : index
    %c0_0 = arith.constant 0 : index
    %0 = vector.load %arg1[%c0, %c0_0] : memref<64x128xf32, #tpu.memory_space<vmem>>, vector<64x128xf32>
    %c0_1 = arith.constant 0 : index
    %c0_2 = arith.constant 0 : index
    %1 = vector.load %arg2[%c0_1, %c0_2] : memref<1x128xf32, #tpu.memory_space<vmem>>, vector<1x128xf32>
    %2 = vector.broadcast %1 : vector<1x128xf32> to vector<64x128xf32>
    %3 = arith.mulf %0, %2 : vector<64x128xf32>
    %c0_3 = arith.constant 0 : index
    %c0_4 = arith.constant 0 : index
    %4 = vector.load %arg3[%c0_3, %c0_4] : memref<1x128xf32, #tpu.memory_space<vmem>>, vector<1x128xf32>
    %5 = vector.broadcast %4 : vector<1x128xf32> to vector<64x128xf32>
    %6 = arith.addf %3, %5 : vector<64x128xf32>
    %c0_5 = arith.constant 0 : index
    %c0_6 = arith.constant 0 : index
    %7 = vector.load %arg4[%c0_5, %c0_6] : memref<64x128xf32, #tpu.memory_space<vmem>>, vector<64x128xf32>
    %8 = arith.addf %6, %7 : vector<64x128xf32>
    %cst = arith.constant 0.000000e+00 : f32
    %9 = vector.broadcast %cst : f32 to vector<64x128xf32>
    %10 = arith.maximumf %8, %9 : vector<64x128xf32>
    %c0_7 = arith.constant 0 : index
    %c0_8 = arith.constant 0 : index
    %11 = vector.load %arg5[%c0_7, %c0_8] : memref<64x128xf32, #tpu.memory_space<vmem>>, vector<64x128xf32>
    tpu.vector_store %arg5[%c0_7, %c0_8], %10 {strides = array<i32>} : memref<64x128xf32, #tpu.memory_space<vmem>>, vector<64x128xf32>,
    return
  }
  func.func @transform_0(%arg0: i32) -> (i32, i32) {
    %c0_i32 = arith.constant 0 : i32
    %c0_i32_0 = arith.constant 0 : i32
    return %arg0, %c0_i32 : i32, i32
  }
  func.func @transform_1(%arg0: i32) -> (i32, i32) {
    %c0_i32 = arith.constant 0 : i32
    %c0_i32_0 = arith.constant 0 : i32
    %c0_i32_1 = arith.constant 0 : i32
    return %c0_i32, %c0_i32_0 : i32, i32
  }
  func.func @transform_2(%arg0: i32) -> (i32, i32) {
    %c0_i32 = arith.constant 0 : i32
    %c0_i32_0 = arith.constant 0 : i32
    %c0_i32_1 = arith.constant 0 : i32
    return %c0_i32, %c0_i32_0 : i32, i32
  }
  func.func @transform_3(%arg0: i32) -> (i32, i32) {
    %c0_i32 = arith.constant 0 : i32
    %c0_i32_0 = arith.constant 0 : i32
    return %arg0, %c0_i32 : i32, i32
  }
  func.func @transform_4(%arg0: i32) -> (i32, i32) {
    %c0_i32 = arith.constant 0 : i32
    %c0_i32_0 = arith.constant 0 : i32
    return %arg0, %c0_i32 : i32, i32
  }
}

module attributes {stable_mosaic.version = 11 : i64} {
  func.func @_bn_stats_kernel(%arg0: i32, %arg1: memref<64x128xf32, #tpu.memory_space<vmem>>, %arg2: memref<1x128xf32, #tpu.memory_space<vmem>>, %arg3: memref<1x128xf32, #tpu.memory_space<vmem>>) attributes {dimension_semantics = [#tpu.dimension_semantics<arbitrary>], iteration_bounds = array<i64: 1>, scalar_prefetch = 0 : i64, scratch_operands = 0 : i64, tpu.core_type = #tpu.core_type<tc>, window_params = [{transform_indices = @transform_0, window_bounds = array<i64: 64, 128>}, {pipeline_mode = #tpu.pipeline_mode<synchronous>, transform_indices = @transform_1, window_bounds = array<i64: 1, 128>}, {pipeline_mode = #tpu.pipeline_mode<synchronous>, transform_indices = @transform_2, window_bounds = array<i64: 1, 128>}]} {
    %c0_i32 = arith.constant 0 : i32
    %0 = arith.cmpi eq, %arg0, %c0_i32 : i32
    %1 = arith.extui %0 : i1 to i32
    %c0_i32_0 = arith.constant 0 : i32
    %2 = arith.cmpi ne, %1, %c0_i32_0 : i32
    scf.if %2 {
      %cst_11 = arith.constant 0.000000e+00 : f32
      %15 = vector.broadcast %cst_11 : f32 to vector<1x128xf32>
      %c0_12 = arith.constant 0 : index
      %c0_13 = arith.constant 0 : index
      %16 = vector.load %arg2[%c0_12, %c0_13] : memref<1x128xf32, #tpu.memory_space<vmem>>, vector<1x128xf32>
      tpu.vector_store %arg2[%c0_12, %c0_13], %15 {strides = array<i32>} : memref<1x128xf32, #tpu.memory_space<vmem>>, vector<1x128xf32>,
      %cst_14 = arith.constant 0.000000e+00 : f32
      %17 = vector.broadcast %cst_14 : f32 to vector<1x128xf32>
      %c0_15 = arith.constant 0 : index
      %c0_16 = arith.constant 0 : index
      %18 = vector.load %arg3[%c0_15, %c0_16] : memref<1x128xf32, #tpu.memory_space<vmem>>, vector<1x128xf32>
      tpu.vector_store %arg3[%c0_15, %c0_16], %17 {strides = array<i32>} : memref<1x128xf32, #tpu.memory_space<vmem>>, vector<1x128xf32>,
    } else {
    }
    %c0 = arith.constant 0 : index
    %c0_1 = arith.constant 0 : index
    %3 = vector.load %arg1[%c0, %c0_1] : memref<64x128xf32, #tpu.memory_space<vmem>>, vector<64x128xf32>
    %c0_2 = arith.constant 0 : index
    %c0_3 = arith.constant 0 : index
    %4 = vector.load %arg2[%c0_2, %c0_3] : memref<1x128xf32, #tpu.memory_space<vmem>>, vector<1x128xf32>
    %cst = arith.constant dense<0.000000e+00> : vector<128xf32>
    %5 = vector.multi_reduction <add>, %3, %cst [0] : vector<64x128xf32> to vector<128xf32>
    %6 = vector.shape_cast %5 : vector<128xf32> to vector<1x128xf32>
    %7 = arith.addf %4, %6 : vector<1x128xf32>
    %c0_4 = arith.constant 0 : index
    %c0_5 = arith.constant 0 : index
    %8 = vector.load %arg2[%c0_4, %c0_5] : memref<1x128xf32, #tpu.memory_space<vmem>>, vector<1x128xf32>
    tpu.vector_store %arg2[%c0_4, %c0_5], %7 {strides = array<i32>} : memref<1x128xf32, #tpu.memory_space<vmem>>, vector<1x128xf32>,
    %c0_6 = arith.constant 0 : index
    %c0_7 = arith.constant 0 : index
    %9 = vector.load %arg3[%c0_6, %c0_7] : memref<1x128xf32, #tpu.memory_space<vmem>>, vector<1x128xf32>
    %10 = arith.mulf %3, %3 : vector<64x128xf32>
    %cst_8 = arith.constant dense<0.000000e+00> : vector<128xf32>
    %11 = vector.multi_reduction <add>, %10, %cst_8 [0] : vector<64x128xf32> to vector<128xf32>
    %12 = vector.shape_cast %11 : vector<128xf32> to vector<1x128xf32>
    %13 = arith.addf %9, %12 : vector<1x128xf32>
    %c0_9 = arith.constant 0 : index
    %c0_10 = arith.constant 0 : index
    %14 = vector.load %arg3[%c0_9, %c0_10] : memref<1x128xf32, #tpu.memory_space<vmem>>, vector<1x128xf32>
    tpu.vector_store %arg3[%c0_9, %c0_10], %13 {strides = array<i32>} : memref<1x128xf32, #tpu.memory_space<vmem>>, vector<1x128xf32>,
    return
  }
  func.func @transform_0(%arg0: i32) -> (i32, i32) {
    %c0_i32 = arith.constant 0 : i32
    %c0_i32_0 = arith.constant 0 : i32
    return %arg0, %c0_i32 : i32, i32
  }
  func.func @transform_1(%arg0: i32) -> (i32, i32) {
    %c0_i32 = arith.constant 0 : i32
    %c0_i32_0 = arith.constant 0 : i32
    %c0_i32_1 = arith.constant 0 : i32
    return %c0_i32, %c0_i32_0 : i32, i32
  }
  func.func @transform_2(%arg0: i32) -> (i32, i32) {
    %c0_i32 = arith.constant 0 : i32
    %c0_i32_0 = arith.constant 0 : i32
    %c0_i32_1 = arith.constant 0 : i32
    return %c0_i32, %c0_i32_0 : i32, i32
  }
}

module attributes {stable_mosaic.version = 11 : i64} {
  func.func @_mm_kernel(%arg0: i32, %arg1: i32, %arg2: i32, %arg3: memref<32x128xbf16, #tpu.memory_space<vmem>>, %arg4: memref<128x128xbf16, #tpu.memory_space<vmem>>, %arg5: memref<32x128xf32, #tpu.memory_space<vmem>>, %arg6: memref<32x128xf32, #tpu.memory_space<vmem>>) attributes {dimension_semantics = [#tpu.dimension_semantics<parallel>, #tpu.dimension_semantics<parallel>, #tpu.dimension_semantics<arbitrary>], iteration_bounds = array<i64: 1, 1, 1>, scalar_prefetch = 0 : i64, scratch_operands = 1 : i64, tpu.core_type = #tpu.core_type<tc>, window_params = [{transform_indices = @transform_0, window_bounds = array<i64: 32, 128>}, {transform_indices = @transform_1, window_bounds = array<i64: 128, 128>}, {transform_indices = @transform_2, window_bounds = array<i64: 32, 128>}]} {
    %c0_i32 = arith.constant 0 : i32
    %0 = arith.cmpi eq, %arg2, %c0_i32 : i32
    %1 = arith.extui %0 : i1 to i32
    %c0_i32_0 = arith.constant 0 : i32
    %2 = arith.cmpi ne, %1, %c0_i32_0 : i32
    scf.if %2 {
      %cst_10 = arith.constant 0.000000e+00 : f32
      %12 = vector.broadcast %cst_10 : f32 to vector<32x128xf32>
      %c0_11 = arith.constant 0 : index
      %c0_12 = arith.constant 0 : index
      %13 = vector.load %arg6[%c0_11, %c0_12] : memref<32x128xf32, #tpu.memory_space<vmem>>, vector<32x128xf32>
      tpu.vector_store %arg6[%c0_11, %c0_12], %12 {strides = array<i32>} : memref<32x128xf32, #tpu.memory_space<vmem>>, vector<32x128xf32>,
    } else {
    }
    %c0 = arith.constant 0 : index
    %c0_1 = arith.constant 0 : index
    %3 = vector.load %arg6[%c0, %c0_1] : memref<32x128xf32, #tpu.memory_space<vmem>>, vector<32x128xf32>
    %c0_2 = arith.constant 0 : index
    %c0_3 = arith.constant 0 : index
    %4 = vector.load %arg3[%c0_2, %c0_3] : memref<32x128xbf16, #tpu.memory_space<vmem>>, vector<32x128xbf16>
    %c0_4 = arith.constant 0 : index
    %c0_5 = arith.constant 0 : index
    %5 = vector.load %arg4[%c0_4, %c0_5] : memref<128x128xbf16, #tpu.memory_space<vmem>>, vector<128x128xbf16>
    %cst = arith.constant dense<0.000000e+00> : vector<32x128xf32>
    %6 = tpu.matmul %4, %5, %cst {dimension_numbers = #tpu.dot_dimension_numbers<[1], [0], [0], [1], [0, 0, 1, 1], [], []>} : vector<32x128xbf16>, vector<128x128xbf16>, vector<32x128xf32> -> vector<32x128xf32>
    %7 = arith.addf %3, %6 : vector<32x128xf32>
    %c0_6 = arith.constant 0 : index
    %c0_7 = arith.constant 0 : index
    %8 = vector.load %arg6[%c0_6, %c0_7] : memref<32x128xf32, #tpu.memory_space<vmem>>, vector<32x128xf32>
    tpu.vector_store %arg6[%c0_6, %c0_7], %7 {strides = array<i32>} : memref<32x128xf32, #tpu.memory_space<vmem>>, vector<32x128xf32>,
    %c0_i32_8 = arith.constant 0 : i32
    %9 = arith.cmpi eq, %arg2, %c0_i32_8 : i32
    %10 = arith.extui %9 : i1 to i32
    %c0_i32_9 = arith.constant 0 : i32
    %11 = arith.cmpi ne, %10, %c0_i32_9 : i32
    scf.if %11 {
      %c0_10 = arith.constant 0 : index
      %c0_11 = arith.constant 0 : index
      %12 = vector.load %arg6[%c0_10, %c0_11] : memref<32x128xf32, #tpu.memory_space<vmem>>, vector<32x128xf32>
      %c0_12 = arith.constant 0 : index
      %c0_13 = arith.constant 0 : index
      %13 = vector.load %arg5[%c0_12, %c0_13] : memref<32x128xf32, #tpu.memory_space<vmem>>, vector<32x128xf32>
      tpu.vector_store %arg5[%c0_12, %c0_13], %12 {strides = array<i32>} : memref<32x128xf32, #tpu.memory_space<vmem>>, vector<32x128xf32>,
    } else {
    }
    return
  }
  func.func @transform_0(%arg0: i32, %arg1: i32, %arg2: i32) -> (i32, i32) {
    %c0_i32 = arith.constant 0 : i32
    return %arg0, %arg2 : i32, i32
  }
  func.func @transform_1(%arg0: i32, %arg1: i32, %arg2: i32) -> (i32, i32) {
    %c0_i32 = arith.constant 0 : i32
    return %arg2, %arg1 : i32, i32
  }
  func.func @transform_2(%arg0: i32, %arg1: i32, %arg2: i32) -> (i32, i32) {
    %c0_i32 = arith.constant 0 : i32
    return %arg0, %arg1 : i32, i32
  }
}

module attributes {stable_mosaic.version = 11 : i64} {
  func.func @_bn_stats_kernel(%arg0: i32, %arg1: memref<32x128xf32, #tpu.memory_space<vmem>>, %arg2: memref<1x128xf32, #tpu.memory_space<vmem>>, %arg3: memref<1x128xf32, #tpu.memory_space<vmem>>) attributes {dimension_semantics = [#tpu.dimension_semantics<arbitrary>], iteration_bounds = array<i64: 1>, scalar_prefetch = 0 : i64, scratch_operands = 0 : i64, tpu.core_type = #tpu.core_type<tc>, window_params = [{transform_indices = @transform_0, window_bounds = array<i64: 32, 128>}, {pipeline_mode = #tpu.pipeline_mode<synchronous>, transform_indices = @transform_1, window_bounds = array<i64: 1, 128>}, {pipeline_mode = #tpu.pipeline_mode<synchronous>, transform_indices = @transform_2, window_bounds = array<i64: 1, 128>}]} {
    %c0_i32 = arith.constant 0 : i32
    %0 = arith.cmpi eq, %arg0, %c0_i32 : i32
    %1 = arith.extui %0 : i1 to i32
    %c0_i32_0 = arith.constant 0 : i32
    %2 = arith.cmpi ne, %1, %c0_i32_0 : i32
    scf.if %2 {
      %cst_11 = arith.constant 0.000000e+00 : f32
      %15 = vector.broadcast %cst_11 : f32 to vector<1x128xf32>
      %c0_12 = arith.constant 0 : index
      %c0_13 = arith.constant 0 : index
      %16 = vector.load %arg2[%c0_12, %c0_13] : memref<1x128xf32, #tpu.memory_space<vmem>>, vector<1x128xf32>
      tpu.vector_store %arg2[%c0_12, %c0_13], %15 {strides = array<i32>} : memref<1x128xf32, #tpu.memory_space<vmem>>, vector<1x128xf32>,
      %cst_14 = arith.constant 0.000000e+00 : f32
      %17 = vector.broadcast %cst_14 : f32 to vector<1x128xf32>
      %c0_15 = arith.constant 0 : index
      %c0_16 = arith.constant 0 : index
      %18 = vector.load %arg3[%c0_15, %c0_16] : memref<1x128xf32, #tpu.memory_space<vmem>>, vector<1x128xf32>
      tpu.vector_store %arg3[%c0_15, %c0_16], %17 {strides = array<i32>} : memref<1x128xf32, #tpu.memory_space<vmem>>, vector<1x128xf32>,
    } else {
    }
    %c0 = arith.constant 0 : index
    %c0_1 = arith.constant 0 : index
    %3 = vector.load %arg1[%c0, %c0_1] : memref<32x128xf32, #tpu.memory_space<vmem>>, vector<32x128xf32>
    %c0_2 = arith.constant 0 : index
    %c0_3 = arith.constant 0 : index
    %4 = vector.load %arg2[%c0_2, %c0_3] : memref<1x128xf32, #tpu.memory_space<vmem>>, vector<1x128xf32>
    %cst = arith.constant dense<0.000000e+00> : vector<128xf32>
    %5 = vector.multi_reduction <add>, %3, %cst [0] : vector<32x128xf32> to vector<128xf32>
    %6 = vector.shape_cast %5 : vector<128xf32> to vector<1x128xf32>
    %7 = arith.addf %4, %6 : vector<1x128xf32>
    %c0_4 = arith.constant 0 : index
    %c0_5 = arith.constant 0 : index
    %8 = vector.load %arg2[%c0_4, %c0_5] : memref<1x128xf32, #tpu.memory_space<vmem>>, vector<1x128xf32>
    tpu.vector_store %arg2[%c0_4, %c0_5], %7 {strides = array<i32>} : memref<1x128xf32, #tpu.memory_space<vmem>>, vector<1x128xf32>,
    %c0_6 = arith.constant 0 : index
    %c0_7 = arith.constant 0 : index
    %9 = vector.load %arg3[%c0_6, %c0_7] : memref<1x128xf32, #tpu.memory_space<vmem>>, vector<1x128xf32>
    %10 = arith.mulf %3, %3 : vector<32x128xf32>
    %cst_8 = arith.constant dense<0.000000e+00> : vector<128xf32>
    %11 = vector.multi_reduction <add>, %10, %cst_8 [0] : vector<32x128xf32> to vector<128xf32>
    %12 = vector.shape_cast %11 : vector<128xf32> to vector<1x128xf32>
    %13 = arith.addf %9, %12 : vector<1x128xf32>
    %c0_9 = arith.constant 0 : index
    %c0_10 = arith.constant 0 : index
    %14 = vector.load %arg3[%c0_9, %c0_10] : memref<1x128xf32, #tpu.memory_space<vmem>>, vector<1x128xf32>
    tpu.vector_store %arg3[%c0_9, %c0_10], %13 {strides = array<i32>} : memref<1x128xf32, #tpu.memory_space<vmem>>, vector<1x128xf32>,
    return
  }
  func.func @transform_0(%arg0: i32) -> (i32, i32) {
    %c0_i32 = arith.constant 0 : i32
    %c0_i32_0 = arith.constant 0 : i32
    return %arg0, %c0_i32 : i32, i32
  }
  func.func @transform_1(%arg0: i32) -> (i32, i32) {
    %c0_i32 = arith.constant 0 : i32
    %c0_i32_0 = arith.constant 0 : i32
    %c0_i32_1 = arith.constant 0 : i32
    return %c0_i32, %c0_i32_0 : i32, i32
  }
  func.func @transform_2(%arg0: i32) -> (i32, i32) {
    %c0_i32 = arith.constant 0 : i32
    %c0_i32_0 = arith.constant 0 : i32
    %c0_i32_1 = arith.constant 0 : i32
    return %c0_i32, %c0_i32_0 : i32, i32
  }
}

module attributes {stable_mosaic.version = 11 : i64} {
  func.func @_bn_apply_kernel(%arg0: i32, %arg1: memref<32x128xf32, #tpu.memory_space<vmem>>, %arg2: memref<1x128xf32, #tpu.memory_space<vmem>>, %arg3: memref<1x128xf32, #tpu.memory_space<vmem>>, %arg4: memref<32x128xf32, #tpu.memory_space<vmem>>) attributes {dimension_semantics = [#tpu.dimension_semantics<parallel>], iteration_bounds = array<i64: 1>, scalar_prefetch = 0 : i64, scratch_operands = 0 : i64, tpu.core_type = #tpu.core_type<tc>, window_params = [{transform_indices = @transform_0, window_bounds = array<i64: 32, 128>}, {pipeline_mode = #tpu.pipeline_mode<synchronous>, transform_indices = @transform_1, window_bounds = array<i64: 1, 128>}, {pipeline_mode = #tpu.pipeline_mode<synchronous>, transform_indices = @transform_2, window_bounds = array<i64: 1, 128>}, {transform_indices = @transform_3, window_bounds = array<i64: 32, 128>}]} {
    %c0 = arith.constant 0 : index
    %c0_0 = arith.constant 0 : index
    %0 = vector.load %arg1[%c0, %c0_0] : memref<32x128xf32, #tpu.memory_space<vmem>>, vector<32x128xf32>
    %c0_1 = arith.constant 0 : index
    %c0_2 = arith.constant 0 : index
    %1 = vector.load %arg2[%c0_1, %c0_2] : memref<1x128xf32, #tpu.memory_space<vmem>>, vector<1x128xf32>
    %2 = vector.broadcast %1 : vector<1x128xf32> to vector<32x128xf32>
    %3 = arith.mulf %0, %2 : vector<32x128xf32>
    %c0_3 = arith.constant 0 : index
    %c0_4 = arith.constant 0 : index
    %4 = vector.load %arg3[%c0_3, %c0_4] : memref<1x128xf32, #tpu.memory_space<vmem>>, vector<1x128xf32>
    %5 = vector.broadcast %4 : vector<1x128xf32> to vector<32x128xf32>
    %6 = arith.addf %3, %5 : vector<32x128xf32>
    %c0_5 = arith.constant 0 : index
    %c0_6 = arith.constant 0 : index
    %7 = vector.load %arg4[%c0_5, %c0_6] : memref<32x128xf32, #tpu.memory_space<vmem>>, vector<32x128xf32>
    tpu.vector_store %arg4[%c0_5, %c0_6], %6 {strides = array<i32>} : memref<32x128xf32, #tpu.memory_space<vmem>>, vector<32x128xf32>,
    return
  }
  func.func @transform_0(%arg0: i32) -> (i32, i32) {
    %c0_i32 = arith.constant 0 : i32
    %c0_i32_0 = arith.constant 0 : i32
    return %arg0, %c0_i32 : i32, i32
  }
  func.func @transform_1(%arg0: i32) -> (i32, i32) {
    %c0_i32 = arith.constant 0 : i32
    %c0_i32_0 = arith.constant 0 : i32
    %c0_i32_1 = arith.constant 0 : i32
    return %c0_i32, %c0_i32_0 : i32, i32
  }
  func.func @transform_2(%arg0: i32) -> (i32, i32) {
    %c0_i32 = arith.constant 0 : i32
    %c0_i32_0 = arith.constant 0 : i32
    %c0_i32_1 = arith.constant 0 : i32
    return %c0_i32, %c0_i32_0 : i32, i32
  }
  func.func @transform_3(%arg0: i32) -> (i32, i32) {
    %c0_i32 = arith.constant 0 : i32
    %c0_i32_0 = arith.constant 0 : i32
    return %arg0, %c0_i32 : i32, i32
  }
}

module attributes {stable_mosaic.version = 11 : i64} {
  func.func @_mm_kernel(%arg0: i32, %arg1: i32, %arg2: i32, %arg3: memref<32x128xbf16, #tpu.memory_space<vmem>>, %arg4: memref<128x128xbf16, #tpu.memory_space<vmem>>, %arg5: memref<32x128xf32, #tpu.memory_space<vmem>>, %arg6: memref<32x128xf32, #tpu.memory_space<vmem>>) attributes {dimension_semantics = [#tpu.dimension_semantics<parallel>, #tpu.dimension_semantics<parallel>, #tpu.dimension_semantics<arbitrary>], iteration_bounds = array<i64: 1, 1, 5>, scalar_prefetch = 0 : i64, scratch_operands = 1 : i64, tpu.core_type = #tpu.core_type<tc>, window_params = [{transform_indices = @transform_0, window_bounds = array<i64: 32, 128>}, {transform_indices = @transform_1, window_bounds = array<i64: 128, 128>}, {transform_indices = @transform_2, window_bounds = array<i64: 32, 128>}]} {
    %c0_i32 = arith.constant 0 : i32
    %0 = arith.cmpi eq, %arg2, %c0_i32 : i32
    %1 = arith.extui %0 : i1 to i32
    %c0_i32_0 = arith.constant 0 : i32
    %2 = arith.cmpi ne, %1, %c0_i32_0 : i32
    scf.if %2 {
      %cst_9 = arith.constant 0.000000e+00 : f32
      %12 = vector.broadcast %cst_9 : f32 to vector<32x128xf32>
      %c0_10 = arith.constant 0 : index
      %c0_11 = arith.constant 0 : index
      %13 = vector.load %arg6[%c0_10, %c0_11] : memref<32x128xf32, #tpu.memory_space<vmem>>, vector<32x128xf32>
      tpu.vector_store %arg6[%c0_10, %c0_11], %12 {strides = array<i32>} : memref<32x128xf32, #tpu.memory_space<vmem>>, vector<32x128xf32>,
    } else {
    }
    %c0 = arith.constant 0 : index
    %c0_1 = arith.constant 0 : index
    %3 = vector.load %arg6[%c0, %c0_1] : memref<32x128xf32, #tpu.memory_space<vmem>>, vector<32x128xf32>
    %c0_2 = arith.constant 0 : index
    %c0_3 = arith.constant 0 : index
    %4 = vector.load %arg3[%c0_2, %c0_3] : memref<32x128xbf16, #tpu.memory_space<vmem>>, vector<32x128xbf16>
    %c0_4 = arith.constant 0 : index
    %c0_5 = arith.constant 0 : index
    %5 = vector.load %arg4[%c0_4, %c0_5] : memref<128x128xbf16, #tpu.memory_space<vmem>>, vector<128x128xbf16>
    %cst = arith.constant dense<0.000000e+00> : vector<32x128xf32>
    %6 = tpu.matmul %4, %5, %cst {dimension_numbers = #tpu.dot_dimension_numbers<[1], [0], [0], [1], [0, 0, 1, 1], [], []>} : vector<32x128xbf16>, vector<128x128xbf16>, vector<32x128xf32> -> vector<32x128xf32>
    %7 = arith.addf %3, %6 : vector<32x128xf32>
    %c0_6 = arith.constant 0 : index
    %c0_7 = arith.constant 0 : index
    %8 = vector.load %arg6[%c0_6, %c0_7] : memref<32x128xf32, #tpu.memory_space<vmem>>, vector<32x128xf32>
    tpu.vector_store %arg6[%c0_6, %c0_7], %7 {strides = array<i32>} : memref<32x128xf32, #tpu.memory_space<vmem>>, vector<32x128xf32>,
    %c4_i32 = arith.constant 4 : i32
    %9 = arith.cmpi eq, %arg2, %c4_i32 : i32
    %10 = arith.extui %9 : i1 to i32
    %c0_i32_8 = arith.constant 0 : i32
    %11 = arith.cmpi ne, %10, %c0_i32_8 : i32
    scf.if %11 {
      %c0_9 = arith.constant 0 : index
      %c0_10 = arith.constant 0 : index
      %12 = vector.load %arg6[%c0_9, %c0_10] : memref<32x128xf32, #tpu.memory_space<vmem>>, vector<32x128xf32>
      %c0_11 = arith.constant 0 : index
      %c0_12 = arith.constant 0 : index
      %13 = vector.load %arg5[%c0_11, %c0_12] : memref<32x128xf32, #tpu.memory_space<vmem>>, vector<32x128xf32>
      tpu.vector_store %arg5[%c0_11, %c0_12], %12 {strides = array<i32>} : memref<32x128xf32, #tpu.memory_space<vmem>>, vector<32x128xf32>,
    } else {
    }
    return
  }
  func.func @transform_0(%arg0: i32, %arg1: i32, %arg2: i32) -> (i32, i32) {
    %c0_i32 = arith.constant 0 : i32
    return %arg0, %arg2 : i32, i32
  }
  func.func @transform_1(%arg0: i32, %arg1: i32, %arg2: i32) -> (i32, i32) {
    %c0_i32 = arith.constant 0 : i32
    return %arg2, %arg1 : i32, i32
  }
  func.func @transform_2(%arg0: i32, %arg1: i32, %arg2: i32) -> (i32, i32) {
    %c0_i32 = arith.constant 0 : i32
    return %arg0, %arg1 : i32, i32
  }
}

module attributes {stable_mosaic.version = 11 : i64} {
  func.func @_bn_apply_kernel(%arg0: i32, %arg1: memref<32x128xf32, #tpu.memory_space<vmem>>, %arg2: memref<1x128xf32, #tpu.memory_space<vmem>>, %arg3: memref<1x128xf32, #tpu.memory_space<vmem>>, %arg4: memref<32x128xf32, #tpu.memory_space<vmem>>) attributes {dimension_semantics = [#tpu.dimension_semantics<parallel>], iteration_bounds = array<i64: 1>, scalar_prefetch = 0 : i64, scratch_operands = 0 : i64, tpu.core_type = #tpu.core_type<tc>, window_params = [{transform_indices = @transform_0, window_bounds = array<i64: 32, 128>}, {pipeline_mode = #tpu.pipeline_mode<synchronous>, transform_indices = @transform_1, window_bounds = array<i64: 1, 128>}, {pipeline_mode = #tpu.pipeline_mode<synchronous>, transform_indices = @transform_2, window_bounds = array<i64: 1, 128>}, {transform_indices = @transform_3, window_bounds = array<i64: 32, 128>}]} {
    %c0 = arith.constant 0 : index
    %c0_0 = arith.constant 0 : index
    %0 = vector.load %arg1[%c0, %c0_0] : memref<32x128xf32, #tpu.memory_space<vmem>>, vector<32x128xf32>
    %c0_1 = arith.constant 0 : index
    %c0_2 = arith.constant 0 : index
    %1 = vector.load %arg2[%c0_1, %c0_2] : memref<1x128xf32, #tpu.memory_space<vmem>>, vector<1x128xf32>
    %2 = vector.broadcast %1 : vector<1x128xf32> to vector<32x128xf32>
    %3 = arith.mulf %0, %2 : vector<32x128xf32>
    %c0_3 = arith.constant 0 : index
    %c0_4 = arith.constant 0 : index
    %4 = vector.load %arg3[%c0_3, %c0_4] : memref<1x128xf32, #tpu.memory_space<vmem>>, vector<1x128xf32>
    %5 = vector.broadcast %4 : vector<1x128xf32> to vector<32x128xf32>
    %6 = arith.addf %3, %5 : vector<32x128xf32>
    %cst = arith.constant 0.000000e+00 : f32
    %7 = vector.broadcast %cst : f32 to vector<32x128xf32>
    %8 = arith.maximumf %6, %7 : vector<32x128xf32>
    %c0_5 = arith.constant 0 : index
    %c0_6 = arith.constant 0 : index
    %9 = vector.load %arg4[%c0_5, %c0_6] : memref<32x128xf32, #tpu.memory_space<vmem>>, vector<32x128xf32>
    tpu.vector_store %arg4[%c0_5, %c0_6], %8 {strides = array<i32>} : memref<32x128xf32, #tpu.memory_space<vmem>>, vector<32x128xf32>,
    return
  }
  func.func @transform_0(%arg0: i32) -> (i32, i32) {
    %c0_i32 = arith.constant 0 : i32
    %c0_i32_0 = arith.constant 0 : i32
    return %arg0, %c0_i32 : i32, i32
  }
  func.func @transform_1(%arg0: i32) -> (i32, i32) {
    %c0_i32 = arith.constant 0 : i32
    %c0_i32_0 = arith.constant 0 : i32
    %c0_i32_1 = arith.constant 0 : i32
    return %c0_i32, %c0_i32_0 : i32, i32
  }
  func.func @transform_2(%arg0: i32) -> (i32, i32) {
    %c0_i32 = arith.constant 0 : i32
    %c0_i32_0 = arith.constant 0 : i32
    %c0_i32_1 = arith.constant 0 : i32
    return %c0_i32, %c0_i32_0 : i32, i32
  }
  func.func @transform_3(%arg0: i32) -> (i32, i32) {
    %c0_i32 = arith.constant 0 : i32
    %c0_i32_0 = arith.constant 0 : i32
    return %arg0, %c0_i32 : i32, i32
  }
}

module attributes {stable_mosaic.version = 11 : i64} {
  func.func @_mm_kernel(%arg0: i32, %arg1: i32, %arg2: i32, %arg3: memref<32x384xbf16, #tpu.memory_space<vmem>>, %arg4: memref<384x128xbf16, #tpu.memory_space<vmem>>, %arg5: memref<32x128xf32, #tpu.memory_space<vmem>>, %arg6: memref<32x128xf32, #tpu.memory_space<vmem>>) attributes {dimension_semantics = [#tpu.dimension_semantics<parallel>, #tpu.dimension_semantics<parallel>, #tpu.dimension_semantics<arbitrary>], iteration_bounds = array<i64: 1, 1, 3>, scalar_prefetch = 0 : i64, scratch_operands = 1 : i64, tpu.core_type = #tpu.core_type<tc>, window_params = [{transform_indices = @transform_0, window_bounds = array<i64: 32, 384>}, {transform_indices = @transform_1, window_bounds = array<i64: 384, 128>}, {transform_indices = @transform_2, window_bounds = array<i64: 32, 128>}]} {
    %c0_i32 = arith.constant 0 : i32
    %0 = arith.cmpi eq, %arg2, %c0_i32 : i32
    %1 = arith.extui %0 : i1 to i32
    %c0_i32_0 = arith.constant 0 : i32
    %2 = arith.cmpi ne, %1, %c0_i32_0 : i32
    scf.if %2 {
      %cst_9 = arith.constant 0.000000e+00 : f32
      %12 = vector.broadcast %cst_9 : f32 to vector<32x128xf32>
      %c0_10 = arith.constant 0 : index
      %c0_11 = arith.constant 0 : index
      %13 = vector.load %arg6[%c0_10, %c0_11] : memref<32x128xf32, #tpu.memory_space<vmem>>, vector<32x128xf32>
      tpu.vector_store %arg6[%c0_10, %c0_11], %12 {strides = array<i32>} : memref<32x128xf32, #tpu.memory_space<vmem>>, vector<32x128xf32>,
    } else {
    }
    %c0 = arith.constant 0 : index
    %c0_1 = arith.constant 0 : index
    %3 = vector.load %arg6[%c0, %c0_1] : memref<32x128xf32, #tpu.memory_space<vmem>>, vector<32x128xf32>
    %c0_2 = arith.constant 0 : index
    %c0_3 = arith.constant 0 : index
    %4 = vector.load %arg3[%c0_2, %c0_3] : memref<32x384xbf16, #tpu.memory_space<vmem>>, vector<32x384xbf16>
    %c0_4 = arith.constant 0 : index
    %c0_5 = arith.constant 0 : index
    %5 = vector.load %arg4[%c0_4, %c0_5] : memref<384x128xbf16, #tpu.memory_space<vmem>>, vector<384x128xbf16>
    %cst = arith.constant dense<0.000000e+00> : vector<32x128xf32>
    %6 = tpu.matmul %4, %5, %cst {dimension_numbers = #tpu.dot_dimension_numbers<[1], [0], [0], [1], [0, 0, 1, 1], [], []>} : vector<32x384xbf16>, vector<384x128xbf16>, vector<32x128xf32> -> vector<32x128xf32>
    %7 = arith.addf %3, %6 : vector<32x128xf32>
    %c0_6 = arith.constant 0 : index
    %c0_7 = arith.constant 0 : index
    %8 = vector.load %arg6[%c0_6, %c0_7] : memref<32x128xf32, #tpu.memory_space<vmem>>, vector<32x128xf32>
    tpu.vector_store %arg6[%c0_6, %c0_7], %7 {strides = array<i32>} : memref<32x128xf32, #tpu.memory_space<vmem>>, vector<32x128xf32>,
    %c2_i32 = arith.constant 2 : i32
    %9 = arith.cmpi eq, %arg2, %c2_i32 : i32
    %10 = arith.extui %9 : i1 to i32
    %c0_i32_8 = arith.constant 0 : i32
    %11 = arith.cmpi ne, %10, %c0_i32_8 : i32
    scf.if %11 {
      %c0_9 = arith.constant 0 : index
      %c0_10 = arith.constant 0 : index
      %12 = vector.load %arg6[%c0_9, %c0_10] : memref<32x128xf32, #tpu.memory_space<vmem>>, vector<32x128xf32>
      %c0_11 = arith.constant 0 : index
      %c0_12 = arith.constant 0 : index
      %13 = vector.load %arg5[%c0_11, %c0_12] : memref<32x128xf32, #tpu.memory_space<vmem>>, vector<32x128xf32>
      tpu.vector_store %arg5[%c0_11, %c0_12], %12 {strides = array<i32>} : memref<32x128xf32, #tpu.memory_space<vmem>>, vector<32x128xf32>,
    } else {
    }
    return
  }
  func.func @transform_0(%arg0: i32, %arg1: i32, %arg2: i32) -> (i32, i32) {
    %c0_i32 = arith.constant 0 : i32
    return %arg0, %arg2 : i32, i32
  }
  func.func @transform_1(%arg0: i32, %arg1: i32, %arg2: i32) -> (i32, i32) {
    %c0_i32 = arith.constant 0 : i32
    return %arg2, %arg1 : i32, i32
  }
  func.func @transform_2(%arg0: i32, %arg1: i32, %arg2: i32) -> (i32, i32) {
    %c0_i32 = arith.constant 0 : i32
    return %arg0, %arg1 : i32, i32
  }
}

module attributes {stable_mosaic.version = 11 : i64} {
  func.func @_bn_apply_res_kernel(%arg0: i32, %arg1: memref<32x128xf32, #tpu.memory_space<vmem>>, %arg2: memref<1x128xf32, #tpu.memory_space<vmem>>, %arg3: memref<1x128xf32, #tpu.memory_space<vmem>>, %arg4: memref<32x128xf32, #tpu.memory_space<vmem>>, %arg5: memref<32x128xf32, #tpu.memory_space<vmem>>) attributes {dimension_semantics = [#tpu.dimension_semantics<parallel>], iteration_bounds = array<i64: 1>, scalar_prefetch = 0 : i64, scratch_operands = 0 : i64, tpu.core_type = #tpu.core_type<tc>, window_params = [{transform_indices = @transform_0, window_bounds = array<i64: 32, 128>}, {pipeline_mode = #tpu.pipeline_mode<synchronous>, transform_indices = @transform_1, window_bounds = array<i64: 1, 128>}, {pipeline_mode = #tpu.pipeline_mode<synchronous>, transform_indices = @transform_2, window_bounds = array<i64: 1, 128>}, {transform_indices = @transform_3, window_bounds = array<i64: 32, 128>}, {transform_indices = @transform_4, window_bounds = array<i64: 32, 128>}]} {
    %c0 = arith.constant 0 : index
    %c0_0 = arith.constant 0 : index
    %0 = vector.load %arg1[%c0, %c0_0] : memref<32x128xf32, #tpu.memory_space<vmem>>, vector<32x128xf32>
    %c0_1 = arith.constant 0 : index
    %c0_2 = arith.constant 0 : index
    %1 = vector.load %arg2[%c0_1, %c0_2] : memref<1x128xf32, #tpu.memory_space<vmem>>, vector<1x128xf32>
    %2 = vector.broadcast %1 : vector<1x128xf32> to vector<32x128xf32>
    %3 = arith.mulf %0, %2 : vector<32x128xf32>
    %c0_3 = arith.constant 0 : index
    %c0_4 = arith.constant 0 : index
    %4 = vector.load %arg3[%c0_3, %c0_4] : memref<1x128xf32, #tpu.memory_space<vmem>>, vector<1x128xf32>
    %5 = vector.broadcast %4 : vector<1x128xf32> to vector<32x128xf32>
    %6 = arith.addf %3, %5 : vector<32x128xf32>
    %c0_5 = arith.constant 0 : index
    %c0_6 = arith.constant 0 : index
    %7 = vector.load %arg4[%c0_5, %c0_6] : memref<32x128xf32, #tpu.memory_space<vmem>>, vector<32x128xf32>
    %8 = arith.addf %6, %7 : vector<32x128xf32>
    %cst = arith.constant 0.000000e+00 : f32
    %9 = vector.broadcast %cst : f32 to vector<32x128xf32>
    %10 = arith.maximumf %8, %9 : vector<32x128xf32>
    %c0_7 = arith.constant 0 : index
    %c0_8 = arith.constant 0 : index
    %11 = vector.load %arg5[%c0_7, %c0_8] : memref<32x128xf32, #tpu.memory_space<vmem>>, vector<32x128xf32>
    tpu.vector_store %arg5[%c0_7, %c0_8], %10 {strides = array<i32>} : memref<32x128xf32, #tpu.memory_space<vmem>>, vector<32x128xf32>,
    return
  }
  func.func @transform_0(%arg0: i32) -> (i32, i32) {
    %c0_i32 = arith.constant 0 : i32
    %c0_i32_0 = arith.constant 0 : i32
    return %arg0, %c0_i32 : i32, i32
  }
  func.func @transform_1(%arg0: i32) -> (i32, i32) {
    %c0_i32 = arith.constant 0 : i32
    %c0_i32_0 = arith.constant 0 : i32
    %c0_i32_1 = arith.constant 0 : i32
    return %c0_i32, %c0_i32_0 : i32, i32
  }
  func.func @transform_2(%arg0: i32) -> (i32, i32) {
    %c0_i32 = arith.constant 0 : i32
    %c0_i32_0 = arith.constant 0 : i32
    %c0_i32_1 = arith.constant 0 : i32
    return %c0_i32, %c0_i32_0 : i32, i32
  }
  func.func @transform_3(%arg0: i32) -> (i32, i32) {
    %c0_i32 = arith.constant 0 : i32
    %c0_i32_0 = arith.constant 0 : i32
    return %arg0, %c0_i32 : i32, i32
  }
  func.func @transform_4(%arg0: i32) -> (i32, i32) {
    %c0_i32 = arith.constant 0 : i32
    %c0_i32_0 = arith.constant 0 : i32
    return %arg0, %c0_i32 : i32, i32
  }
}

module attributes {stable_mosaic.version = 11 : i64} {
  func.func @_bn_stats_kernel(%arg0: i32, %arg1: memref<8x256xf32, #tpu.memory_space<vmem>>, %arg2: memref<1x256xf32, #tpu.memory_space<vmem>>, %arg3: memref<1x256xf32, #tpu.memory_space<vmem>>) attributes {dimension_semantics = [#tpu.dimension_semantics<arbitrary>], iteration_bounds = array<i64: 1>, scalar_prefetch = 0 : i64, scratch_operands = 0 : i64, tpu.core_type = #tpu.core_type<tc>, window_params = [{transform_indices = @transform_0, window_bounds = array<i64: 8, 256>}, {pipeline_mode = #tpu.pipeline_mode<synchronous>, transform_indices = @transform_1, window_bounds = array<i64: 1, 256>}, {pipeline_mode = #tpu.pipeline_mode<synchronous>, transform_indices = @transform_2, window_bounds = array<i64: 1, 256>}]} {
    %c0_i32 = arith.constant 0 : i32
    %0 = arith.cmpi eq, %arg0, %c0_i32 : i32
    %1 = arith.extui %0 : i1 to i32
    %c0_i32_0 = arith.constant 0 : i32
    %2 = arith.cmpi ne, %1, %c0_i32_0 : i32
    scf.if %2 {
      %cst_11 = arith.constant 0.000000e+00 : f32
      %15 = vector.broadcast %cst_11 : f32 to vector<1x256xf32>
      %c0_12 = arith.constant 0 : index
      %c0_13 = arith.constant 0 : index
      %16 = vector.load %arg2[%c0_12, %c0_13] : memref<1x256xf32, #tpu.memory_space<vmem>>, vector<1x256xf32>
      tpu.vector_store %arg2[%c0_12, %c0_13], %15 {strides = array<i32>} : memref<1x256xf32, #tpu.memory_space<vmem>>, vector<1x256xf32>,
      %cst_14 = arith.constant 0.000000e+00 : f32
      %17 = vector.broadcast %cst_14 : f32 to vector<1x256xf32>
      %c0_15 = arith.constant 0 : index
      %c0_16 = arith.constant 0 : index
      %18 = vector.load %arg3[%c0_15, %c0_16] : memref<1x256xf32, #tpu.memory_space<vmem>>, vector<1x256xf32>
      tpu.vector_store %arg3[%c0_15, %c0_16], %17 {strides = array<i32>} : memref<1x256xf32, #tpu.memory_space<vmem>>, vector<1x256xf32>,
    } else {
    }
    %c0 = arith.constant 0 : index
    %c0_1 = arith.constant 0 : index
    %3 = vector.load %arg1[%c0, %c0_1] : memref<8x256xf32, #tpu.memory_space<vmem>>, vector<8x256xf32>
    %c0_2 = arith.constant 0 : index
    %c0_3 = arith.constant 0 : index
    %4 = vector.load %arg2[%c0_2, %c0_3] : memref<1x256xf32, #tpu.memory_space<vmem>>, vector<1x256xf32>
    %cst = arith.constant dense<0.000000e+00> : vector<256xf32>
    %5 = vector.multi_reduction <add>, %3, %cst [0] : vector<8x256xf32> to vector<256xf32>
    %6 = vector.shape_cast %5 : vector<256xf32> to vector<1x256xf32>
    %7 = arith.addf %4, %6 : vector<1x256xf32>
    %c0_4 = arith.constant 0 : index
    %c0_5 = arith.constant 0 : index
    %8 = vector.load %arg2[%c0_4, %c0_5] : memref<1x256xf32, #tpu.memory_space<vmem>>, vector<1x256xf32>
    tpu.vector_store %arg2[%c0_4, %c0_5], %7 {strides = array<i32>} : memref<1x256xf32, #tpu.memory_space<vmem>>, vector<1x256xf32>,
    %c0_6 = arith.constant 0 : index
    %c0_7 = arith.constant 0 : index
    %9 = vector.load %arg3[%c0_6, %c0_7] : memref<1x256xf32, #tpu.memory_space<vmem>>, vector<1x256xf32>
    %10 = arith.mulf %3, %3 : vector<8x256xf32>
    %cst_8 = arith.constant dense<0.000000e+00> : vector<256xf32>
    %11 = vector.multi_reduction <add>, %10, %cst_8 [0] : vector<8x256xf32> to vector<256xf32>
    %12 = vector.shape_cast %11 : vector<256xf32> to vector<1x256xf32>
    %13 = arith.addf %9, %12 : vector<1x256xf32>
    %c0_9 = arith.constant 0 : index
    %c0_10 = arith.constant 0 : index
    %14 = vector.load %arg3[%c0_9, %c0_10] : memref<1x256xf32, #tpu.memory_space<vmem>>, vector<1x256xf32>
    tpu.vector_store %arg3[%c0_9, %c0_10], %13 {strides = array<i32>} : memref<1x256xf32, #tpu.memory_space<vmem>>, vector<1x256xf32>,
    return
  }
  func.func @transform_0(%arg0: i32) -> (i32, i32) {
    %c0_i32 = arith.constant 0 : i32
    %c0_i32_0 = arith.constant 0 : i32
    return %arg0, %c0_i32 : i32, i32
  }
  func.func @transform_1(%arg0: i32) -> (i32, i32) {
    %c0_i32 = arith.constant 0 : i32
    %c0_i32_0 = arith.constant 0 : i32
    %c0_i32_1 = arith.constant 0 : i32
    return %c0_i32, %c0_i32_0 : i32, i32
  }
  func.func @transform_2(%arg0: i32) -> (i32, i32) {
    %c0_i32 = arith.constant 0 : i32
    %c0_i32_0 = arith.constant 0 : i32
    %c0_i32_1 = arith.constant 0 : i32
    return %c0_i32, %c0_i32_0 : i32, i32
  }
}

module attributes {stable_mosaic.version = 11 : i64} {
  func.func @_mm_kernel(%arg0: i32, %arg1: i32, %arg2: i32, %arg3: memref<8x128xbf16, #tpu.memory_space<vmem>>, %arg4: memref<128x256xbf16, #tpu.memory_space<vmem>>, %arg5: memref<8x256xf32, #tpu.memory_space<vmem>>, %arg6: memref<8x256xf32, #tpu.memory_space<vmem>>) attributes {dimension_semantics = [#tpu.dimension_semantics<parallel>, #tpu.dimension_semantics<parallel>, #tpu.dimension_semantics<arbitrary>], iteration_bounds = array<i64: 1, 1, 1>, scalar_prefetch = 0 : i64, scratch_operands = 1 : i64, tpu.core_type = #tpu.core_type<tc>, window_params = [{transform_indices = @transform_0, window_bounds = array<i64: 8, 128>}, {transform_indices = @transform_1, window_bounds = array<i64: 128, 256>}, {transform_indices = @transform_2, window_bounds = array<i64: 8, 256>}]} {
    %c0_i32 = arith.constant 0 : i32
    %0 = arith.cmpi eq, %arg2, %c0_i32 : i32
    %1 = arith.extui %0 : i1 to i32
    %c0_i32_0 = arith.constant 0 : i32
    %2 = arith.cmpi ne, %1, %c0_i32_0 : i32
    scf.if %2 {
      %cst_10 = arith.constant 0.000000e+00 : f32
      %12 = vector.broadcast %cst_10 : f32 to vector<8x256xf32>
      %c0_11 = arith.constant 0 : index
      %c0_12 = arith.constant 0 : index
      %13 = vector.load %arg6[%c0_11, %c0_12] : memref<8x256xf32, #tpu.memory_space<vmem>>, vector<8x256xf32>
      tpu.vector_store %arg6[%c0_11, %c0_12], %12 {strides = array<i32>} : memref<8x256xf32, #tpu.memory_space<vmem>>, vector<8x256xf32>,
    } else {
    }
    %c0 = arith.constant 0 : index
    %c0_1 = arith.constant 0 : index
    %3 = vector.load %arg6[%c0, %c0_1] : memref<8x256xf32, #tpu.memory_space<vmem>>, vector<8x256xf32>
    %c0_2 = arith.constant 0 : index
    %c0_3 = arith.constant 0 : index
    %4 = vector.load %arg3[%c0_2, %c0_3] : memref<8x128xbf16, #tpu.memory_space<vmem>>, vector<8x128xbf16>
    %c0_4 = arith.constant 0 : index
    %c0_5 = arith.constant 0 : index
    %5 = vector.load %arg4[%c0_4, %c0_5] : memref<128x256xbf16, #tpu.memory_space<vmem>>, vector<128x256xbf16>
    %cst = arith.constant dense<0.000000e+00> : vector<8x256xf32>
    %6 = tpu.matmul %4, %5, %cst {dimension_numbers = #tpu.dot_dimension_numbers<[1], [0], [0], [1], [0, 0, 1, 1], [], []>} : vector<8x128xbf16>, vector<128x256xbf16>, vector<8x256xf32> -> vector<8x256xf32>
    %7 = arith.addf %3, %6 : vector<8x256xf32>
    %c0_6 = arith.constant 0 : index
    %c0_7 = arith.constant 0 : index
    %8 = vector.load %arg6[%c0_6, %c0_7] : memref<8x256xf32, #tpu.memory_space<vmem>>, vector<8x256xf32>
    tpu.vector_store %arg6[%c0_6, %c0_7], %7 {strides = array<i32>} : memref<8x256xf32, #tpu.memory_space<vmem>>, vector<8x256xf32>,
    %c0_i32_8 = arith.constant 0 : i32
    %9 = arith.cmpi eq, %arg2, %c0_i32_8 : i32
    %10 = arith.extui %9 : i1 to i32
    %c0_i32_9 = arith.constant 0 : i32
    %11 = arith.cmpi ne, %10, %c0_i32_9 : i32
    scf.if %11 {
      %c0_10 = arith.constant 0 : index
      %c0_11 = arith.constant 0 : index
      %12 = vector.load %arg6[%c0_10, %c0_11] : memref<8x256xf32, #tpu.memory_space<vmem>>, vector<8x256xf32>
      %c0_12 = arith.constant 0 : index
      %c0_13 = arith.constant 0 : index
      %13 = vector.load %arg5[%c0_12, %c0_13] : memref<8x256xf32, #tpu.memory_space<vmem>>, vector<8x256xf32>
      tpu.vector_store %arg5[%c0_12, %c0_13], %12 {strides = array<i32>} : memref<8x256xf32, #tpu.memory_space<vmem>>, vector<8x256xf32>,
    } else {
    }
    return
  }
  func.func @transform_0(%arg0: i32, %arg1: i32, %arg2: i32) -> (i32, i32) {
    %c0_i32 = arith.constant 0 : i32
    return %arg0, %arg2 : i32, i32
  }
  func.func @transform_1(%arg0: i32, %arg1: i32, %arg2: i32) -> (i32, i32) {
    %c0_i32 = arith.constant 0 : i32
    return %arg2, %arg1 : i32, i32
  }
  func.func @transform_2(%arg0: i32, %arg1: i32, %arg2: i32) -> (i32, i32) {
    %c0_i32 = arith.constant 0 : i32
    return %arg0, %arg1 : i32, i32
  }
}

module attributes {stable_mosaic.version = 11 : i64} {
  func.func @_bn_apply_kernel(%arg0: i32, %arg1: memref<8x256xf32, #tpu.memory_space<vmem>>, %arg2: memref<1x256xf32, #tpu.memory_space<vmem>>, %arg3: memref<1x256xf32, #tpu.memory_space<vmem>>, %arg4: memref<8x256xf32, #tpu.memory_space<vmem>>) attributes {dimension_semantics = [#tpu.dimension_semantics<parallel>], iteration_bounds = array<i64: 1>, scalar_prefetch = 0 : i64, scratch_operands = 0 : i64, tpu.core_type = #tpu.core_type<tc>, window_params = [{transform_indices = @transform_0, window_bounds = array<i64: 8, 256>}, {pipeline_mode = #tpu.pipeline_mode<synchronous>, transform_indices = @transform_1, window_bounds = array<i64: 1, 256>}, {pipeline_mode = #tpu.pipeline_mode<synchronous>, transform_indices = @transform_2, window_bounds = array<i64: 1, 256>}, {transform_indices = @transform_3, window_bounds = array<i64: 8, 256>}]} {
    %c0 = arith.constant 0 : index
    %c0_0 = arith.constant 0 : index
    %0 = vector.load %arg1[%c0, %c0_0] : memref<8x256xf32, #tpu.memory_space<vmem>>, vector<8x256xf32>
    %c0_1 = arith.constant 0 : index
    %c0_2 = arith.constant 0 : index
    %1 = vector.load %arg2[%c0_1, %c0_2] : memref<1x256xf32, #tpu.memory_space<vmem>>, vector<1x256xf32>
    %2 = vector.broadcast %1 : vector<1x256xf32> to vector<8x256xf32>
    %3 = arith.mulf %0, %2 : vector<8x256xf32>
    %c0_3 = arith.constant 0 : index
    %c0_4 = arith.constant 0 : index
    %4 = vector.load %arg3[%c0_3, %c0_4] : memref<1x256xf32, #tpu.memory_space<vmem>>, vector<1x256xf32>
    %5 = vector.broadcast %4 : vector<1x256xf32> to vector<8x256xf32>
    %6 = arith.addf %3, %5 : vector<8x256xf32>
    %c0_5 = arith.constant 0 : index
    %c0_6 = arith.constant 0 : index
    %7 = vector.load %arg4[%c0_5, %c0_6] : memref<8x256xf32, #tpu.memory_space<vmem>>, vector<8x256xf32>
    tpu.vector_store %arg4[%c0_5, %c0_6], %6 {strides = array<i32>} : memref<8x256xf32, #tpu.memory_space<vmem>>, vector<8x256xf32>,
    return
  }
  func.func @transform_0(%arg0: i32) -> (i32, i32) {
    %c0_i32 = arith.constant 0 : i32
    %c0_i32_0 = arith.constant 0 : i32
    return %arg0, %c0_i32 : i32, i32
  }
  func.func @transform_1(%arg0: i32) -> (i32, i32) {
    %c0_i32 = arith.constant 0 : i32
    %c0_i32_0 = arith.constant 0 : i32
    %c0_i32_1 = arith.constant 0 : i32
    return %c0_i32, %c0_i32_0 : i32, i32
  }
  func.func @transform_2(%arg0: i32) -> (i32, i32) {
    %c0_i32 = arith.constant 0 : i32
    %c0_i32_0 = arith.constant 0 : i32
    %c0_i32_1 = arith.constant 0 : i32
    return %c0_i32, %c0_i32_0 : i32, i32
  }
  func.func @transform_3(%arg0: i32) -> (i32, i32) {
    %c0_i32 = arith.constant 0 : i32
    %c0_i32_0 = arith.constant 0 : i32
    return %arg0, %c0_i32 : i32, i32
  }
}

module attributes {stable_mosaic.version = 11 : i64} {
  func.func @_mm_kernel(%arg0: i32, %arg1: i32, %arg2: i32, %arg3: memref<8x384xbf16, #tpu.memory_space<vmem>>, %arg4: memref<384x256xbf16, #tpu.memory_space<vmem>>, %arg5: memref<8x256xf32, #tpu.memory_space<vmem>>, %arg6: memref<8x256xf32, #tpu.memory_space<vmem>>) attributes {dimension_semantics = [#tpu.dimension_semantics<parallel>, #tpu.dimension_semantics<parallel>, #tpu.dimension_semantics<arbitrary>], iteration_bounds = array<i64: 1, 1, 3>, scalar_prefetch = 0 : i64, scratch_operands = 1 : i64, tpu.core_type = #tpu.core_type<tc>, window_params = [{transform_indices = @transform_0, window_bounds = array<i64: 8, 384>}, {transform_indices = @transform_1, window_bounds = array<i64: 384, 256>}, {transform_indices = @transform_2, window_bounds = array<i64: 8, 256>}]} {
    %c0_i32 = arith.constant 0 : i32
    %0 = arith.cmpi eq, %arg2, %c0_i32 : i32
    %1 = arith.extui %0 : i1 to i32
    %c0_i32_0 = arith.constant 0 : i32
    %2 = arith.cmpi ne, %1, %c0_i32_0 : i32
    scf.if %2 {
      %cst_9 = arith.constant 0.000000e+00 : f32
      %12 = vector.broadcast %cst_9 : f32 to vector<8x256xf32>
      %c0_10 = arith.constant 0 : index
      %c0_11 = arith.constant 0 : index
      %13 = vector.load %arg6[%c0_10, %c0_11] : memref<8x256xf32, #tpu.memory_space<vmem>>, vector<8x256xf32>
      tpu.vector_store %arg6[%c0_10, %c0_11], %12 {strides = array<i32>} : memref<8x256xf32, #tpu.memory_space<vmem>>, vector<8x256xf32>,
    } else {
    }
    %c0 = arith.constant 0 : index
    %c0_1 = arith.constant 0 : index
    %3 = vector.load %arg6[%c0, %c0_1] : memref<8x256xf32, #tpu.memory_space<vmem>>, vector<8x256xf32>
    %c0_2 = arith.constant 0 : index
    %c0_3 = arith.constant 0 : index
    %4 = vector.load %arg3[%c0_2, %c0_3] : memref<8x384xbf16, #tpu.memory_space<vmem>>, vector<8x384xbf16>
    %c0_4 = arith.constant 0 : index
    %c0_5 = arith.constant 0 : index
    %5 = vector.load %arg4[%c0_4, %c0_5] : memref<384x256xbf16, #tpu.memory_space<vmem>>, vector<384x256xbf16>
    %cst = arith.constant dense<0.000000e+00> : vector<8x256xf32>
    %6 = tpu.matmul %4, %5, %cst {dimension_numbers = #tpu.dot_dimension_numbers<[1], [0], [0], [1], [0, 0, 1, 1], [], []>} : vector<8x384xbf16>, vector<384x256xbf16>, vector<8x256xf32> -> vector<8x256xf32>
    %7 = arith.addf %3, %6 : vector<8x256xf32>
    %c0_6 = arith.constant 0 : index
    %c0_7 = arith.constant 0 : index
    %8 = vector.load %arg6[%c0_6, %c0_7] : memref<8x256xf32, #tpu.memory_space<vmem>>, vector<8x256xf32>
    tpu.vector_store %arg6[%c0_6, %c0_7], %7 {strides = array<i32>} : memref<8x256xf32, #tpu.memory_space<vmem>>, vector<8x256xf32>,
    %c2_i32 = arith.constant 2 : i32
    %9 = arith.cmpi eq, %arg2, %c2_i32 : i32
    %10 = arith.extui %9 : i1 to i32
    %c0_i32_8 = arith.constant 0 : i32
    %11 = arith.cmpi ne, %10, %c0_i32_8 : i32
    scf.if %11 {
      %c0_9 = arith.constant 0 : index
      %c0_10 = arith.constant 0 : index
      %12 = vector.load %arg6[%c0_9, %c0_10] : memref<8x256xf32, #tpu.memory_space<vmem>>, vector<8x256xf32>
      %c0_11 = arith.constant 0 : index
      %c0_12 = arith.constant 0 : index
      %13 = vector.load %arg5[%c0_11, %c0_12] : memref<8x256xf32, #tpu.memory_space<vmem>>, vector<8x256xf32>
      tpu.vector_store %arg5[%c0_11, %c0_12], %12 {strides = array<i32>} : memref<8x256xf32, #tpu.memory_space<vmem>>, vector<8x256xf32>,
    } else {
    }
    return
  }
  func.func @transform_0(%arg0: i32, %arg1: i32, %arg2: i32) -> (i32, i32) {
    %c0_i32 = arith.constant 0 : i32
    return %arg0, %arg2 : i32, i32
  }
  func.func @transform_1(%arg0: i32, %arg1: i32, %arg2: i32) -> (i32, i32) {
    %c0_i32 = arith.constant 0 : i32
    return %arg2, %arg1 : i32, i32
  }
  func.func @transform_2(%arg0: i32, %arg1: i32, %arg2: i32) -> (i32, i32) {
    %c0_i32 = arith.constant 0 : i32
    return %arg0, %arg1 : i32, i32
  }
}

module attributes {stable_mosaic.version = 11 : i64} {
  func.func @_bn_apply_kernel(%arg0: i32, %arg1: memref<8x256xf32, #tpu.memory_space<vmem>>, %arg2: memref<1x256xf32, #tpu.memory_space<vmem>>, %arg3: memref<1x256xf32, #tpu.memory_space<vmem>>, %arg4: memref<8x256xf32, #tpu.memory_space<vmem>>) attributes {dimension_semantics = [#tpu.dimension_semantics<parallel>], iteration_bounds = array<i64: 1>, scalar_prefetch = 0 : i64, scratch_operands = 0 : i64, tpu.core_type = #tpu.core_type<tc>, window_params = [{transform_indices = @transform_0, window_bounds = array<i64: 8, 256>}, {pipeline_mode = #tpu.pipeline_mode<synchronous>, transform_indices = @transform_1, window_bounds = array<i64: 1, 256>}, {pipeline_mode = #tpu.pipeline_mode<synchronous>, transform_indices = @transform_2, window_bounds = array<i64: 1, 256>}, {transform_indices = @transform_3, window_bounds = array<i64: 8, 256>}]} {
    %c0 = arith.constant 0 : index
    %c0_0 = arith.constant 0 : index
    %0 = vector.load %arg1[%c0, %c0_0] : memref<8x256xf32, #tpu.memory_space<vmem>>, vector<8x256xf32>
    %c0_1 = arith.constant 0 : index
    %c0_2 = arith.constant 0 : index
    %1 = vector.load %arg2[%c0_1, %c0_2] : memref<1x256xf32, #tpu.memory_space<vmem>>, vector<1x256xf32>
    %2 = vector.broadcast %1 : vector<1x256xf32> to vector<8x256xf32>
    %3 = arith.mulf %0, %2 : vector<8x256xf32>
    %c0_3 = arith.constant 0 : index
    %c0_4 = arith.constant 0 : index
    %4 = vector.load %arg3[%c0_3, %c0_4] : memref<1x256xf32, #tpu.memory_space<vmem>>, vector<1x256xf32>
    %5 = vector.broadcast %4 : vector<1x256xf32> to vector<8x256xf32>
    %6 = arith.addf %3, %5 : vector<8x256xf32>
    %cst = arith.constant 0.000000e+00 : f32
    %7 = vector.broadcast %cst : f32 to vector<8x256xf32>
    %8 = arith.maximumf %6, %7 : vector<8x256xf32>
    %c0_5 = arith.constant 0 : index
    %c0_6 = arith.constant 0 : index
    %9 = vector.load %arg4[%c0_5, %c0_6] : memref<8x256xf32, #tpu.memory_space<vmem>>, vector<8x256xf32>
    tpu.vector_store %arg4[%c0_5, %c0_6], %8 {strides = array<i32>} : memref<8x256xf32, #tpu.memory_space<vmem>>, vector<8x256xf32>,
    return
  }
  func.func @transform_0(%arg0: i32) -> (i32, i32) {
    %c0_i32 = arith.constant 0 : i32
    %c0_i32_0 = arith.constant 0 : i32
    return %arg0, %c0_i32 : i32, i32
  }
  func.func @transform_1(%arg0: i32) -> (i32, i32) {
    %c0_i32 = arith.constant 0 : i32
    %c0_i32_0 = arith.constant 0 : i32
    %c0_i32_1 = arith.constant 0 : i32
    return %c0_i32, %c0_i32_0 : i32, i32
  }
  func.func @transform_2(%arg0: i32) -> (i32, i32) {
    %c0_i32 = arith.constant 0 : i32
    %c0_i32_0 = arith.constant 0 : i32
    %c0_i32_1 = arith.constant 0 : i32
    return %c0_i32, %c0_i32_0 : i32, i32
  }
  func.func @transform_3(%arg0: i32) -> (i32, i32) {
    %c0_i32 = arith.constant 0 : i32
    %c0_i32_0 = arith.constant 0 : i32
    return %arg0, %c0_i32 : i32, i32
  }
}

module attributes {stable_mosaic.version = 11 : i64} {
  func.func @_mm_kernel(%arg0: i32, %arg1: i32, %arg2: i32, %arg3: memref<8x384xbf16, #tpu.memory_space<vmem>>, %arg4: memref<384x256xbf16, #tpu.memory_space<vmem>>, %arg5: memref<8x256xf32, #tpu.memory_space<vmem>>, %arg6: memref<8x256xf32, #tpu.memory_space<vmem>>) attributes {dimension_semantics = [#tpu.dimension_semantics<parallel>, #tpu.dimension_semantics<parallel>, #tpu.dimension_semantics<arbitrary>], iteration_bounds = array<i64: 1, 1, 6>, scalar_prefetch = 0 : i64, scratch_operands = 1 : i64, tpu.core_type = #tpu.core_type<tc>, window_params = [{transform_indices = @transform_0, window_bounds = array<i64: 8, 384>}, {transform_indices = @transform_1, window_bounds = array<i64: 384, 256>}, {transform_indices = @transform_2, window_bounds = array<i64: 8, 256>}]} {
    %c0_i32 = arith.constant 0 : i32
    %0 = arith.cmpi eq, %arg2, %c0_i32 : i32
    %1 = arith.extui %0 : i1 to i32
    %c0_i32_0 = arith.constant 0 : i32
    %2 = arith.cmpi ne, %1, %c0_i32_0 : i32
    scf.if %2 {
      %cst_9 = arith.constant 0.000000e+00 : f32
      %12 = vector.broadcast %cst_9 : f32 to vector<8x256xf32>
      %c0_10 = arith.constant 0 : index
      %c0_11 = arith.constant 0 : index
      %13 = vector.load %arg6[%c0_10, %c0_11] : memref<8x256xf32, #tpu.memory_space<vmem>>, vector<8x256xf32>
      tpu.vector_store %arg6[%c0_10, %c0_11], %12 {strides = array<i32>} : memref<8x256xf32, #tpu.memory_space<vmem>>, vector<8x256xf32>,
    } else {
    }
    %c0 = arith.constant 0 : index
    %c0_1 = arith.constant 0 : index
    %3 = vector.load %arg6[%c0, %c0_1] : memref<8x256xf32, #tpu.memory_space<vmem>>, vector<8x256xf32>
    %c0_2 = arith.constant 0 : index
    %c0_3 = arith.constant 0 : index
    %4 = vector.load %arg3[%c0_2, %c0_3] : memref<8x384xbf16, #tpu.memory_space<vmem>>, vector<8x384xbf16>
    %c0_4 = arith.constant 0 : index
    %c0_5 = arith.constant 0 : index
    %5 = vector.load %arg4[%c0_4, %c0_5] : memref<384x256xbf16, #tpu.memory_space<vmem>>, vector<384x256xbf16>
    %cst = arith.constant dense<0.000000e+00> : vector<8x256xf32>
    %6 = tpu.matmul %4, %5, %cst {dimension_numbers = #tpu.dot_dimension_numbers<[1], [0], [0], [1], [0, 0, 1, 1], [], []>} : vector<8x384xbf16>, vector<384x256xbf16>, vector<8x256xf32> -> vector<8x256xf32>
    %7 = arith.addf %3, %6 : vector<8x256xf32>
    %c0_6 = arith.constant 0 : index
    %c0_7 = arith.constant 0 : index
    %8 = vector.load %arg6[%c0_6, %c0_7] : memref<8x256xf32, #tpu.memory_space<vmem>>, vector<8x256xf32>
    tpu.vector_store %arg6[%c0_6, %c0_7], %7 {strides = array<i32>} : memref<8x256xf32, #tpu.memory_space<vmem>>, vector<8x256xf32>,
    %c5_i32 = arith.constant 5 : i32
    %9 = arith.cmpi eq, %arg2, %c5_i32 : i32
    %10 = arith.extui %9 : i1 to i32
    %c0_i32_8 = arith.constant 0 : i32
    %11 = arith.cmpi ne, %10, %c0_i32_8 : i32
    scf.if %11 {
      %c0_9 = arith.constant 0 : index
      %c0_10 = arith.constant 0 : index
      %12 = vector.load %arg6[%c0_9, %c0_10] : memref<8x256xf32, #tpu.memory_space<vmem>>, vector<8x256xf32>
      %c0_11 = arith.constant 0 : index
      %c0_12 = arith.constant 0 : index
      %13 = vector.load %arg5[%c0_11, %c0_12] : memref<8x256xf32, #tpu.memory_space<vmem>>, vector<8x256xf32>
      tpu.vector_store %arg5[%c0_11, %c0_12], %12 {strides = array<i32>} : memref<8x256xf32, #tpu.memory_space<vmem>>, vector<8x256xf32>,
    } else {
    }
    return
  }
  func.func @transform_0(%arg0: i32, %arg1: i32, %arg2: i32) -> (i32, i32) {
    %c0_i32 = arith.constant 0 : i32
    return %arg0, %arg2 : i32, i32
  }
  func.func @transform_1(%arg0: i32, %arg1: i32, %arg2: i32) -> (i32, i32) {
    %c0_i32 = arith.constant 0 : i32
    return %arg2, %arg1 : i32, i32
  }
  func.func @transform_2(%arg0: i32, %arg1: i32, %arg2: i32) -> (i32, i32) {
    %c0_i32 = arith.constant 0 : i32
    return %arg0, %arg1 : i32, i32
  }
}

module attributes {stable_mosaic.version = 11 : i64} {
  func.func @_bn_apply_res_kernel(%arg0: i32, %arg1: memref<8x256xf32, #tpu.memory_space<vmem>>, %arg2: memref<1x256xf32, #tpu.memory_space<vmem>>, %arg3: memref<1x256xf32, #tpu.memory_space<vmem>>, %arg4: memref<8x256xf32, #tpu.memory_space<vmem>>, %arg5: memref<8x256xf32, #tpu.memory_space<vmem>>) attributes {dimension_semantics = [#tpu.dimension_semantics<parallel>], iteration_bounds = array<i64: 1>, scalar_prefetch = 0 : i64, scratch_operands = 0 : i64, tpu.core_type = #tpu.core_type<tc>, window_params = [{transform_indices = @transform_0, window_bounds = array<i64: 8, 256>}, {pipeline_mode = #tpu.pipeline_mode<synchronous>, transform_indices = @transform_1, window_bounds = array<i64: 1, 256>}, {pipeline_mode = #tpu.pipeline_mode<synchronous>, transform_indices = @transform_2, window_bounds = array<i64: 1, 256>}, {transform_indices = @transform_3, window_bounds = array<i64: 8, 256>}, {transform_indices = @transform_4, window_bounds = array<i64: 8, 256>}]} {
    %c0 = arith.constant 0 : index
    %c0_0 = arith.constant 0 : index
    %0 = vector.load %arg1[%c0, %c0_0] : memref<8x256xf32, #tpu.memory_space<vmem>>, vector<8x256xf32>
    %c0_1 = arith.constant 0 : index
    %c0_2 = arith.constant 0 : index
    %1 = vector.load %arg2[%c0_1, %c0_2] : memref<1x256xf32, #tpu.memory_space<vmem>>, vector<1x256xf32>
    %2 = vector.broadcast %1 : vector<1x256xf32> to vector<8x256xf32>
    %3 = arith.mulf %0, %2 : vector<8x256xf32>
    %c0_3 = arith.constant 0 : index
    %c0_4 = arith.constant 0 : index
    %4 = vector.load %arg3[%c0_3, %c0_4] : memref<1x256xf32, #tpu.memory_space<vmem>>, vector<1x256xf32>
    %5 = vector.broadcast %4 : vector<1x256xf32> to vector<8x256xf32>
    %6 = arith.addf %3, %5 : vector<8x256xf32>
    %c0_5 = arith.constant 0 : index
    %c0_6 = arith.constant 0 : index
    %7 = vector.load %arg4[%c0_5, %c0_6] : memref<8x256xf32, #tpu.memory_space<vmem>>, vector<8x256xf32>
    %8 = arith.addf %6, %7 : vector<8x256xf32>
    %cst = arith.constant 0.000000e+00 : f32
    %9 = vector.broadcast %cst : f32 to vector<8x256xf32>
    %10 = arith.maximumf %8, %9 : vector<8x256xf32>
    %c0_7 = arith.constant 0 : index
    %c0_8 = arith.constant 0 : index
    %11 = vector.load %arg5[%c0_7, %c0_8] : memref<8x256xf32, #tpu.memory_space<vmem>>, vector<8x256xf32>
    tpu.vector_store %arg5[%c0_7, %c0_8], %10 {strides = array<i32>} : memref<8x256xf32, #tpu.memory_space<vmem>>, vector<8x256xf32>,
    return
  }
  func.func @transform_0(%arg0: i32) -> (i32, i32) {
    %c0_i32 = arith.constant 0 : i32
    %c0_i32_0 = arith.constant 0 : i32
    return %arg0, %c0_i32 : i32, i32
  }
  func.func @transform_1(%arg0: i32) -> (i32, i32) {
    %c0_i32 = arith.constant 0 : i32
    %c0_i32_0 = arith.constant 0 : i32
    %c0_i32_1 = arith.constant 0 : i32
    return %c0_i32, %c0_i32_0 : i32, i32
  }
  func.func @transform_2(%arg0: i32) -> (i32, i32) {
    %c0_i32 = arith.constant 0 : i32
    %c0_i32_0 = arith.constant 0 : i32
    %c0_i32_1 = arith.constant 0 : i32
    return %c0_i32, %c0_i32_0 : i32, i32
  }
  func.func @transform_3(%arg0: i32) -> (i32, i32) {
    %c0_i32 = arith.constant 0 : i32
    %c0_i32_0 = arith.constant 0 : i32
    return %arg0, %c0_i32 : i32, i32
  }
  func.func @transform_4(%arg0: i32) -> (i32, i32) {
    %c0_i32 = arith.constant 0 : i32
    %c0_i32_0 = arith.constant 0 : i32
    return %arg0, %c0_i32 : i32, i32
  }
}

module attributes {stable_mosaic.version = 11 : i64} {
  func.func @_mm_kernel(%arg0: i32, %arg1: i32, %arg2: i32, %arg3: memref<2x256xbf16, #tpu.memory_space<vmem>>, %arg4: memref<256x256xbf16, #tpu.memory_space<vmem>>, %arg5: memref<2x256xf32, #tpu.memory_space<vmem>>, %arg6: memref<2x256xf32, #tpu.memory_space<vmem>>) attributes {dimension_semantics = [#tpu.dimension_semantics<parallel>, #tpu.dimension_semantics<parallel>, #tpu.dimension_semantics<arbitrary>], iteration_bounds = array<i64: 1, 2, 1>, scalar_prefetch = 0 : i64, scratch_operands = 1 : i64, tpu.core_type = #tpu.core_type<tc>, window_params = [{transform_indices = @transform_0, window_bounds = array<i64: 2, 256>}, {transform_indices = @transform_1, window_bounds = array<i64: 256, 256>}, {transform_indices = @transform_2, window_bounds = array<i64: 2, 256>}]} {
    %c0_i32 = arith.constant 0 : i32
    %0 = arith.cmpi eq, %arg2, %c0_i32 : i32
    %1 = arith.extui %0 : i1 to i32
    %c0_i32_0 = arith.constant 0 : i32
    %2 = arith.cmpi ne, %1, %c0_i32_0 : i32
    scf.if %2 {
      %cst_10 = arith.constant 0.000000e+00 : f32
      %12 = vector.broadcast %cst_10 : f32 to vector<2x256xf32>
      %c0_11 = arith.constant 0 : index
      %c0_12 = arith.constant 0 : index
      %13 = vector.load %arg6[%c0_11, %c0_12] : memref<2x256xf32, #tpu.memory_space<vmem>>, vector<2x256xf32>
      tpu.vector_store %arg6[%c0_11, %c0_12], %12 {strides = array<i32>} : memref<2x256xf32, #tpu.memory_space<vmem>>, vector<2x256xf32>,
    } else {
    }
    %c0 = arith.constant 0 : index
    %c0_1 = arith.constant 0 : index
    %3 = vector.load %arg6[%c0, %c0_1] : memref<2x256xf32, #tpu.memory_space<vmem>>, vector<2x256xf32>
    %c0_2 = arith.constant 0 : index
    %c0_3 = arith.constant 0 : index
    %4 = vector.load %arg3[%c0_2, %c0_3] : memref<2x256xbf16, #tpu.memory_space<vmem>>, vector<2x256xbf16>
    %c0_4 = arith.constant 0 : index
    %c0_5 = arith.constant 0 : index
    %5 = vector.load %arg4[%c0_4, %c0_5] : memref<256x256xbf16, #tpu.memory_space<vmem>>, vector<256x256xbf16>
    %cst = arith.constant dense<0.000000e+00> : vector<2x256xf32>
    %6 = tpu.matmul %4, %5, %cst {dimension_numbers = #tpu.dot_dimension_numbers<[1], [0], [0], [1], [0, 0, 1, 1], [], []>} : vector<2x256xbf16>, vector<256x256xbf16>, vector<2x256xf32> -> vector<2x256xf32>
    %7 = arith.addf %3, %6 : vector<2x256xf32>
    %c0_6 = arith.constant 0 : index
    %c0_7 = arith.constant 0 : index
    %8 = vector.load %arg6[%c0_6, %c0_7] : memref<2x256xf32, #tpu.memory_space<vmem>>, vector<2x256xf32>
    tpu.vector_store %arg6[%c0_6, %c0_7], %7 {strides = array<i32>} : memref<2x256xf32, #tpu.memory_space<vmem>>, vector<2x256xf32>,
    %c0_i32_8 = arith.constant 0 : i32
    %9 = arith.cmpi eq, %arg2, %c0_i32_8 : i32
    %10 = arith.extui %9 : i1 to i32
    %c0_i32_9 = arith.constant 0 : i32
    %11 = arith.cmpi ne, %10, %c0_i32_9 : i32
    scf.if %11 {
      %c0_10 = arith.constant 0 : index
      %c0_11 = arith.constant 0 : index
      %12 = vector.load %arg6[%c0_10, %c0_11] : memref<2x256xf32, #tpu.memory_space<vmem>>, vector<2x256xf32>
      %c0_12 = arith.constant 0 : index
      %c0_13 = arith.constant 0 : index
      %13 = vector.load %arg5[%c0_12, %c0_13] : memref<2x256xf32, #tpu.memory_space<vmem>>, vector<2x256xf32>
      tpu.vector_store %arg5[%c0_12, %c0_13], %12 {strides = array<i32>} : memref<2x256xf32, #tpu.memory_space<vmem>>, vector<2x256xf32>,
    } else {
    }
    return
  }
  func.func @transform_0(%arg0: i32, %arg1: i32, %arg2: i32) -> (i32, i32) {
    %c0_i32 = arith.constant 0 : i32
    return %arg0, %arg2 : i32, i32
  }
  func.func @transform_1(%arg0: i32, %arg1: i32, %arg2: i32) -> (i32, i32) {
    %c0_i32 = arith.constant 0 : i32
    return %arg2, %arg1 : i32, i32
  }
  func.func @transform_2(%arg0: i32, %arg1: i32, %arg2: i32) -> (i32, i32) {
    %c0_i32 = arith.constant 0 : i32
    return %arg0, %arg1 : i32, i32
  }
}

module attributes {stable_mosaic.version = 11 : i64} {
  func.func @_bn_stats_kernel(%arg0: i32, %arg1: memref<2x512xf32, #tpu.memory_space<vmem>>, %arg2: memref<1x512xf32, #tpu.memory_space<vmem>>, %arg3: memref<1x512xf32, #tpu.memory_space<vmem>>) attributes {dimension_semantics = [#tpu.dimension_semantics<arbitrary>], iteration_bounds = array<i64: 1>, scalar_prefetch = 0 : i64, scratch_operands = 0 : i64, tpu.core_type = #tpu.core_type<tc>, window_params = [{transform_indices = @transform_0, window_bounds = array<i64: 2, 512>}, {pipeline_mode = #tpu.pipeline_mode<synchronous>, transform_indices = @transform_1, window_bounds = array<i64: 1, 512>}, {pipeline_mode = #tpu.pipeline_mode<synchronous>, transform_indices = @transform_2, window_bounds = array<i64: 1, 512>}]} {
    %c0_i32 = arith.constant 0 : i32
    %0 = arith.cmpi eq, %arg0, %c0_i32 : i32
    %1 = arith.extui %0 : i1 to i32
    %c0_i32_0 = arith.constant 0 : i32
    %2 = arith.cmpi ne, %1, %c0_i32_0 : i32
    scf.if %2 {
      %cst_11 = arith.constant 0.000000e+00 : f32
      %15 = vector.broadcast %cst_11 : f32 to vector<1x512xf32>
      %c0_12 = arith.constant 0 : index
      %c0_13 = arith.constant 0 : index
      %16 = vector.load %arg2[%c0_12, %c0_13] : memref<1x512xf32, #tpu.memory_space<vmem>>, vector<1x512xf32>
      tpu.vector_store %arg2[%c0_12, %c0_13], %15 {strides = array<i32>} : memref<1x512xf32, #tpu.memory_space<vmem>>, vector<1x512xf32>,
      %cst_14 = arith.constant 0.000000e+00 : f32
      %17 = vector.broadcast %cst_14 : f32 to vector<1x512xf32>
      %c0_15 = arith.constant 0 : index
      %c0_16 = arith.constant 0 : index
      %18 = vector.load %arg3[%c0_15, %c0_16] : memref<1x512xf32, #tpu.memory_space<vmem>>, vector<1x512xf32>
      tpu.vector_store %arg3[%c0_15, %c0_16], %17 {strides = array<i32>} : memref<1x512xf32, #tpu.memory_space<vmem>>, vector<1x512xf32>,
    } else {
    }
    %c0 = arith.constant 0 : index
    %c0_1 = arith.constant 0 : index
    %3 = vector.load %arg1[%c0, %c0_1] : memref<2x512xf32, #tpu.memory_space<vmem>>, vector<2x512xf32>
    %c0_2 = arith.constant 0 : index
    %c0_3 = arith.constant 0 : index
    %4 = vector.load %arg2[%c0_2, %c0_3] : memref<1x512xf32, #tpu.memory_space<vmem>>, vector<1x512xf32>
    %cst = arith.constant dense<0.000000e+00> : vector<512xf32>
    %5 = vector.multi_reduction <add>, %3, %cst [0] : vector<2x512xf32> to vector<512xf32>
    %6 = vector.shape_cast %5 : vector<512xf32> to vector<1x512xf32>
    %7 = arith.addf %4, %6 : vector<1x512xf32>
    %c0_4 = arith.constant 0 : index
    %c0_5 = arith.constant 0 : index
    %8 = vector.load %arg2[%c0_4, %c0_5] : memref<1x512xf32, #tpu.memory_space<vmem>>, vector<1x512xf32>
    tpu.vector_store %arg2[%c0_4, %c0_5], %7 {strides = array<i32>} : memref<1x512xf32, #tpu.memory_space<vmem>>, vector<1x512xf32>,
    %c0_6 = arith.constant 0 : index
    %c0_7 = arith.constant 0 : index
    %9 = vector.load %arg3[%c0_6, %c0_7] : memref<1x512xf32, #tpu.memory_space<vmem>>, vector<1x512xf32>
    %10 = arith.mulf %3, %3 : vector<2x512xf32>
    %cst_8 = arith.constant dense<0.000000e+00> : vector<512xf32>
    %11 = vector.multi_reduction <add>, %10, %cst_8 [0] : vector<2x512xf32> to vector<512xf32>
    %12 = vector.shape_cast %11 : vector<512xf32> to vector<1x512xf32>
    %13 = arith.addf %9, %12 : vector<1x512xf32>
    %c0_9 = arith.constant 0 : index
    %c0_10 = arith.constant 0 : index
    %14 = vector.load %arg3[%c0_9, %c0_10] : memref<1x512xf32, #tpu.memory_space<vmem>>, vector<1x512xf32>
    tpu.vector_store %arg3[%c0_9, %c0_10], %13 {strides = array<i32>} : memref<1x512xf32, #tpu.memory_space<vmem>>, vector<1x512xf32>,
    return
  }
  func.func @transform_0(%arg0: i32) -> (i32, i32) {
    %c0_i32 = arith.constant 0 : i32
    %c0_i32_0 = arith.constant 0 : i32
    return %arg0, %c0_i32 : i32, i32
  }
  func.func @transform_1(%arg0: i32) -> (i32, i32) {
    %c0_i32 = arith.constant 0 : i32
    %c0_i32_0 = arith.constant 0 : i32
    %c0_i32_1 = arith.constant 0 : i32
    return %c0_i32, %c0_i32_0 : i32, i32
  }
  func.func @transform_2(%arg0: i32) -> (i32, i32) {
    %c0_i32 = arith.constant 0 : i32
    %c0_i32_0 = arith.constant 0 : i32
    %c0_i32_1 = arith.constant 0 : i32
    return %c0_i32, %c0_i32_0 : i32, i32
  }
}

module attributes {stable_mosaic.version = 11 : i64} {
  func.func @_bn_apply_kernel(%arg0: i32, %arg1: memref<2x512xf32, #tpu.memory_space<vmem>>, %arg2: memref<1x512xf32, #tpu.memory_space<vmem>>, %arg3: memref<1x512xf32, #tpu.memory_space<vmem>>, %arg4: memref<2x512xf32, #tpu.memory_space<vmem>>) attributes {dimension_semantics = [#tpu.dimension_semantics<parallel>], iteration_bounds = array<i64: 1>, scalar_prefetch = 0 : i64, scratch_operands = 0 : i64, tpu.core_type = #tpu.core_type<tc>, window_params = [{transform_indices = @transform_0, window_bounds = array<i64: 2, 512>}, {pipeline_mode = #tpu.pipeline_mode<synchronous>, transform_indices = @transform_1, window_bounds = array<i64: 1, 512>}, {pipeline_mode = #tpu.pipeline_mode<synchronous>, transform_indices = @transform_2, window_bounds = array<i64: 1, 512>}, {transform_indices = @transform_3, window_bounds = array<i64: 2, 512>}]} {
    %c0 = arith.constant 0 : index
    %c0_0 = arith.constant 0 : index
    %0 = vector.load %arg1[%c0, %c0_0] : memref<2x512xf32, #tpu.memory_space<vmem>>, vector<2x512xf32>
    %c0_1 = arith.constant 0 : index
    %c0_2 = arith.constant 0 : index
    %1 = vector.load %arg2[%c0_1, %c0_2] : memref<1x512xf32, #tpu.memory_space<vmem>>, vector<1x512xf32>
    %2 = vector.broadcast %1 : vector<1x512xf32> to vector<2x512xf32>
    %3 = arith.mulf %0, %2 : vector<2x512xf32>
    %c0_3 = arith.constant 0 : index
    %c0_4 = arith.constant 0 : index
    %4 = vector.load %arg3[%c0_3, %c0_4] : memref<1x512xf32, #tpu.memory_space<vmem>>, vector<1x512xf32>
    %5 = vector.broadcast %4 : vector<1x512xf32> to vector<2x512xf32>
    %6 = arith.addf %3, %5 : vector<2x512xf32>
    %c0_5 = arith.constant 0 : index
    %c0_6 = arith.constant 0 : index
    %7 = vector.load %arg4[%c0_5, %c0_6] : memref<2x512xf32, #tpu.memory_space<vmem>>, vector<2x512xf32>
    tpu.vector_store %arg4[%c0_5, %c0_6], %6 {strides = array<i32>} : memref<2x512xf32, #tpu.memory_space<vmem>>, vector<2x512xf32>,
    return
  }
  func.func @transform_0(%arg0: i32) -> (i32, i32) {
    %c0_i32 = arith.constant 0 : i32
    %c0_i32_0 = arith.constant 0 : i32
    return %arg0, %c0_i32 : i32, i32
  }
  func.func @transform_1(%arg0: i32) -> (i32, i32) {
    %c0_i32 = arith.constant 0 : i32
    %c0_i32_0 = arith.constant 0 : i32
    %c0_i32_1 = arith.constant 0 : i32
    return %c0_i32, %c0_i32_0 : i32, i32
  }
  func.func @transform_2(%arg0: i32) -> (i32, i32) {
    %c0_i32 = arith.constant 0 : i32
    %c0_i32_0 = arith.constant 0 : i32
    %c0_i32_1 = arith.constant 0 : i32
    return %c0_i32, %c0_i32_0 : i32, i32
  }
  func.func @transform_3(%arg0: i32) -> (i32, i32) {
    %c0_i32 = arith.constant 0 : i32
    %c0_i32_0 = arith.constant 0 : i32
    return %arg0, %c0_i32 : i32, i32
  }
}

module attributes {stable_mosaic.version = 11 : i64} {
  func.func @_mm_kernel(%arg0: i32, %arg1: i32, %arg2: i32, %arg3: memref<2x384xbf16, #tpu.memory_space<vmem>>, %arg4: memref<384x256xbf16, #tpu.memory_space<vmem>>, %arg5: memref<2x256xf32, #tpu.memory_space<vmem>>, %arg6: memref<2x256xf32, #tpu.memory_space<vmem>>) attributes {dimension_semantics = [#tpu.dimension_semantics<parallel>, #tpu.dimension_semantics<parallel>, #tpu.dimension_semantics<arbitrary>], iteration_bounds = array<i64: 1, 2, 6>, scalar_prefetch = 0 : i64, scratch_operands = 1 : i64, tpu.core_type = #tpu.core_type<tc>, window_params = [{transform_indices = @transform_0, window_bounds = array<i64: 2, 384>}, {transform_indices = @transform_1, window_bounds = array<i64: 384, 256>}, {transform_indices = @transform_2, window_bounds = array<i64: 2, 256>}]} {
    %c0_i32 = arith.constant 0 : i32
    %0 = arith.cmpi eq, %arg2, %c0_i32 : i32
    %1 = arith.extui %0 : i1 to i32
    %c0_i32_0 = arith.constant 0 : i32
    %2 = arith.cmpi ne, %1, %c0_i32_0 : i32
    scf.if %2 {
      %cst_9 = arith.constant 0.000000e+00 : f32
      %12 = vector.broadcast %cst_9 : f32 to vector<2x256xf32>
      %c0_10 = arith.constant 0 : index
      %c0_11 = arith.constant 0 : index
      %13 = vector.load %arg6[%c0_10, %c0_11] : memref<2x256xf32, #tpu.memory_space<vmem>>, vector<2x256xf32>
      tpu.vector_store %arg6[%c0_10, %c0_11], %12 {strides = array<i32>} : memref<2x256xf32, #tpu.memory_space<vmem>>, vector<2x256xf32>,
    } else {
    }
    %c0 = arith.constant 0 : index
    %c0_1 = arith.constant 0 : index
    %3 = vector.load %arg6[%c0, %c0_1] : memref<2x256xf32, #tpu.memory_space<vmem>>, vector<2x256xf32>
    %c0_2 = arith.constant 0 : index
    %c0_3 = arith.constant 0 : index
    %4 = vector.load %arg3[%c0_2, %c0_3] : memref<2x384xbf16, #tpu.memory_space<vmem>>, vector<2x384xbf16>
    %c0_4 = arith.constant 0 : index
    %c0_5 = arith.constant 0 : index
    %5 = vector.load %arg4[%c0_4, %c0_5] : memref<384x256xbf16, #tpu.memory_space<vmem>>, vector<384x256xbf16>
    %cst = arith.constant dense<0.000000e+00> : vector<2x256xf32>
    %6 = tpu.matmul %4, %5, %cst {dimension_numbers = #tpu.dot_dimension_numbers<[1], [0], [0], [1], [0, 0, 1, 1], [], []>} : vector<2x384xbf16>, vector<384x256xbf16>, vector<2x256xf32> -> vector<2x256xf32>
    %7 = arith.addf %3, %6 : vector<2x256xf32>
    %c0_6 = arith.constant 0 : index
    %c0_7 = arith.constant 0 : index
    %8 = vector.load %arg6[%c0_6, %c0_7] : memref<2x256xf32, #tpu.memory_space<vmem>>, vector<2x256xf32>
    tpu.vector_store %arg6[%c0_6, %c0_7], %7 {strides = array<i32>} : memref<2x256xf32, #tpu.memory_space<vmem>>, vector<2x256xf32>,
    %c5_i32 = arith.constant 5 : i32
    %9 = arith.cmpi eq, %arg2, %c5_i32 : i32
    %10 = arith.extui %9 : i1 to i32
    %c0_i32_8 = arith.constant 0 : i32
    %11 = arith.cmpi ne, %10, %c0_i32_8 : i32
    scf.if %11 {
      %c0_9 = arith.constant 0 : index
      %c0_10 = arith.constant 0 : index
      %12 = vector.load %arg6[%c0_9, %c0_10] : memref<2x256xf32, #tpu.memory_space<vmem>>, vector<2x256xf32>
      %c0_11 = arith.constant 0 : index
      %c0_12 = arith.constant 0 : index
      %13 = vector.load %arg5[%c0_11, %c0_12] : memref<2x256xf32, #tpu.memory_space<vmem>>, vector<2x256xf32>
      tpu.vector_store %arg5[%c0_11, %c0_12], %12 {strides = array<i32>} : memref<2x256xf32, #tpu.memory_space<vmem>>, vector<2x256xf32>,
    } else {
    }
    return
  }
  func.func @transform_0(%arg0: i32, %arg1: i32, %arg2: i32) -> (i32, i32) {
    %c0_i32 = arith.constant 0 : i32
    return %arg0, %arg2 : i32, i32
  }
  func.func @transform_1(%arg0: i32, %arg1: i32, %arg2: i32) -> (i32, i32) {
    %c0_i32 = arith.constant 0 : i32
    return %arg2, %arg1 : i32, i32
  }
  func.func @transform_2(%arg0: i32, %arg1: i32, %arg2: i32) -> (i32, i32) {
    %c0_i32 = arith.constant 0 : i32
    return %arg0, %arg1 : i32, i32
  }
}

module attributes {stable_mosaic.version = 11 : i64} {
  func.func @_bn_apply_kernel(%arg0: i32, %arg1: memref<2x512xf32, #tpu.memory_space<vmem>>, %arg2: memref<1x512xf32, #tpu.memory_space<vmem>>, %arg3: memref<1x512xf32, #tpu.memory_space<vmem>>, %arg4: memref<2x512xf32, #tpu.memory_space<vmem>>) attributes {dimension_semantics = [#tpu.dimension_semantics<parallel>], iteration_bounds = array<i64: 1>, scalar_prefetch = 0 : i64, scratch_operands = 0 : i64, tpu.core_type = #tpu.core_type<tc>, window_params = [{transform_indices = @transform_0, window_bounds = array<i64: 2, 512>}, {pipeline_mode = #tpu.pipeline_mode<synchronous>, transform_indices = @transform_1, window_bounds = array<i64: 1, 512>}, {pipeline_mode = #tpu.pipeline_mode<synchronous>, transform_indices = @transform_2, window_bounds = array<i64: 1, 512>}, {transform_indices = @transform_3, window_bounds = array<i64: 2, 512>}]} {
    %c0 = arith.constant 0 : index
    %c0_0 = arith.constant 0 : index
    %0 = vector.load %arg1[%c0, %c0_0] : memref<2x512xf32, #tpu.memory_space<vmem>>, vector<2x512xf32>
    %c0_1 = arith.constant 0 : index
    %c0_2 = arith.constant 0 : index
    %1 = vector.load %arg2[%c0_1, %c0_2] : memref<1x512xf32, #tpu.memory_space<vmem>>, vector<1x512xf32>
    %2 = vector.broadcast %1 : vector<1x512xf32> to vector<2x512xf32>
    %3 = arith.mulf %0, %2 : vector<2x512xf32>
    %c0_3 = arith.constant 0 : index
    %c0_4 = arith.constant 0 : index
    %4 = vector.load %arg3[%c0_3, %c0_4] : memref<1x512xf32, #tpu.memory_space<vmem>>, vector<1x512xf32>
    %5 = vector.broadcast %4 : vector<1x512xf32> to vector<2x512xf32>
    %6 = arith.addf %3, %5 : vector<2x512xf32>
    %cst = arith.constant 0.000000e+00 : f32
    %7 = vector.broadcast %cst : f32 to vector<2x512xf32>
    %8 = arith.maximumf %6, %7 : vector<2x512xf32>
    %c0_5 = arith.constant 0 : index
    %c0_6 = arith.constant 0 : index
    %9 = vector.load %arg4[%c0_5, %c0_6] : memref<2x512xf32, #tpu.memory_space<vmem>>, vector<2x512xf32>
    tpu.vector_store %arg4[%c0_5, %c0_6], %8 {strides = array<i32>} : memref<2x512xf32, #tpu.memory_space<vmem>>, vector<2x512xf32>,
    return
  }
  func.func @transform_0(%arg0: i32) -> (i32, i32) {
    %c0_i32 = arith.constant 0 : i32
    %c0_i32_0 = arith.constant 0 : i32
    return %arg0, %c0_i32 : i32, i32
  }
  func.func @transform_1(%arg0: i32) -> (i32, i32) {
    %c0_i32 = arith.constant 0 : i32
    %c0_i32_0 = arith.constant 0 : i32
    %c0_i32_1 = arith.constant 0 : i32
    return %c0_i32, %c0_i32_0 : i32, i32
  }
  func.func @transform_2(%arg0: i32) -> (i32, i32) {
    %c0_i32 = arith.constant 0 : i32
    %c0_i32_0 = arith.constant 0 : i32
    %c0_i32_1 = arith.constant 0 : i32
    return %c0_i32, %c0_i32_0 : i32, i32
  }
  func.func @transform_3(%arg0: i32) -> (i32, i32) {
    %c0_i32 = arith.constant 0 : i32
    %c0_i32_0 = arith.constant 0 : i32
    return %arg0, %c0_i32 : i32, i32
  }
}

module attributes {stable_mosaic.version = 11 : i64} {
  func.func @_mm_kernel(%arg0: i32, %arg1: i32, %arg2: i32, %arg3: memref<2x512xbf16, #tpu.memory_space<vmem>>, %arg4: memref<512x256xbf16, #tpu.memory_space<vmem>>, %arg5: memref<2x256xf32, #tpu.memory_space<vmem>>, %arg6: memref<2x256xf32, #tpu.memory_space<vmem>>) attributes {dimension_semantics = [#tpu.dimension_semantics<parallel>, #tpu.dimension_semantics<parallel>, #tpu.dimension_semantics<arbitrary>], iteration_bounds = array<i64: 1, 2, 9>, scalar_prefetch = 0 : i64, scratch_operands = 1 : i64, tpu.core_type = #tpu.core_type<tc>, window_params = [{transform_indices = @transform_0, window_bounds = array<i64: 2, 512>}, {transform_indices = @transform_1, window_bounds = array<i64: 512, 256>}, {transform_indices = @transform_2, window_bounds = array<i64: 2, 256>}]} {
    %c0_i32 = arith.constant 0 : i32
    %0 = arith.cmpi eq, %arg2, %c0_i32 : i32
    %1 = arith.extui %0 : i1 to i32
    %c0_i32_0 = arith.constant 0 : i32
    %2 = arith.cmpi ne, %1, %c0_i32_0 : i32
    scf.if %2 {
      %cst_9 = arith.constant 0.000000e+00 : f32
      %12 = vector.broadcast %cst_9 : f32 to vector<2x256xf32>
      %c0_10 = arith.constant 0 : index
      %c0_11 = arith.constant 0 : index
      %13 = vector.load %arg6[%c0_10, %c0_11] : memref<2x256xf32, #tpu.memory_space<vmem>>, vector<2x256xf32>
      tpu.vector_store %arg6[%c0_10, %c0_11], %12 {strides = array<i32>} : memref<2x256xf32, #tpu.memory_space<vmem>>, vector<2x256xf32>,
    } else {
    }
    %c0 = arith.constant 0 : index
    %c0_1 = arith.constant 0 : index
    %3 = vector.load %arg6[%c0, %c0_1] : memref<2x256xf32, #tpu.memory_space<vmem>>, vector<2x256xf32>
    %c0_2 = arith.constant 0 : index
    %c0_3 = arith.constant 0 : index
    %4 = vector.load %arg3[%c0_2, %c0_3] : memref<2x512xbf16, #tpu.memory_space<vmem>>, vector<2x512xbf16>
    %c0_4 = arith.constant 0 : index
    %c0_5 = arith.constant 0 : index
    %5 = vector.load %arg4[%c0_4, %c0_5] : memref<512x256xbf16, #tpu.memory_space<vmem>>, vector<512x256xbf16>
    %cst = arith.constant dense<0.000000e+00> : vector<2x256xf32>
    %6 = tpu.matmul %4, %5, %cst {dimension_numbers = #tpu.dot_dimension_numbers<[1], [0], [0], [1], [0, 0, 1, 1], [], []>} : vector<2x512xbf16>, vector<512x256xbf16>, vector<2x256xf32> -> vector<2x256xf32>
    %7 = arith.addf %3, %6 : vector<2x256xf32>
    %c0_6 = arith.constant 0 : index
    %c0_7 = arith.constant 0 : index
    %8 = vector.load %arg6[%c0_6, %c0_7] : memref<2x256xf32, #tpu.memory_space<vmem>>, vector<2x256xf32>
    tpu.vector_store %arg6[%c0_6, %c0_7], %7 {strides = array<i32>} : memref<2x256xf32, #tpu.memory_space<vmem>>, vector<2x256xf32>,
    %c8_i32 = arith.constant 8 : i32
    %9 = arith.cmpi eq, %arg2, %c8_i32 : i32
    %10 = arith.extui %9 : i1 to i32
    %c0_i32_8 = arith.constant 0 : i32
    %11 = arith.cmpi ne, %10, %c0_i32_8 : i32
    scf.if %11 {
      %c0_9 = arith.constant 0 : index
      %c0_10 = arith.constant 0 : index
      %12 = vector.load %arg6[%c0_9, %c0_10] : memref<2x256xf32, #tpu.memory_space<vmem>>, vector<2x256xf32>
      %c0_11 = arith.constant 0 : index
      %c0_12 = arith.constant 0 : index
      %13 = vector.load %arg5[%c0_11, %c0_12] : memref<2x256xf32, #tpu.memory_space<vmem>>, vector<2x256xf32>
      tpu.vector_store %arg5[%c0_11, %c0_12], %12 {strides = array<i32>} : memref<2x256xf32, #tpu.memory_space<vmem>>, vector<2x256xf32>,
    } else {
    }
    return
  }
  func.func @transform_0(%arg0: i32, %arg1: i32, %arg2: i32) -> (i32, i32) {
    %c0_i32 = arith.constant 0 : i32
    return %arg0, %arg2 : i32, i32
  }
  func.func @transform_1(%arg0: i32, %arg1: i32, %arg2: i32) -> (i32, i32) {
    %c0_i32 = arith.constant 0 : i32
    return %arg2, %arg1 : i32, i32
  }
  func.func @transform_2(%arg0: i32, %arg1: i32, %arg2: i32) -> (i32, i32) {
    %c0_i32 = arith.constant 0 : i32
    return %arg0, %arg1 : i32, i32
  }
}

module attributes {stable_mosaic.version = 11 : i64} {
  func.func @_bn_apply_res_kernel(%arg0: i32, %arg1: memref<2x512xf32, #tpu.memory_space<vmem>>, %arg2: memref<1x512xf32, #tpu.memory_space<vmem>>, %arg3: memref<1x512xf32, #tpu.memory_space<vmem>>, %arg4: memref<2x512xf32, #tpu.memory_space<vmem>>, %arg5: memref<2x512xf32, #tpu.memory_space<vmem>>) attributes {dimension_semantics = [#tpu.dimension_semantics<parallel>], iteration_bounds = array<i64: 1>, scalar_prefetch = 0 : i64, scratch_operands = 0 : i64, tpu.core_type = #tpu.core_type<tc>, window_params = [{transform_indices = @transform_0, window_bounds = array<i64: 2, 512>}, {pipeline_mode = #tpu.pipeline_mode<synchronous>, transform_indices = @transform_1, window_bounds = array<i64: 1, 512>}, {pipeline_mode = #tpu.pipeline_mode<synchronous>, transform_indices = @transform_2, window_bounds = array<i64: 1, 512>}, {transform_indices = @transform_3, window_bounds = array<i64: 2, 512>}, {transform_indices = @transform_4, window_bounds = array<i64: 2, 512>}]} {
    %c0 = arith.constant 0 : index
    %c0_0 = arith.constant 0 : index
    %0 = vector.load %arg1[%c0, %c0_0] : memref<2x512xf32, #tpu.memory_space<vmem>>, vector<2x512xf32>
    %c0_1 = arith.constant 0 : index
    %c0_2 = arith.constant 0 : index
    %1 = vector.load %arg2[%c0_1, %c0_2] : memref<1x512xf32, #tpu.memory_space<vmem>>, vector<1x512xf32>
    %2 = vector.broadcast %1 : vector<1x512xf32> to vector<2x512xf32>
    %3 = arith.mulf %0, %2 : vector<2x512xf32>
    %c0_3 = arith.constant 0 : index
    %c0_4 = arith.constant 0 : index
    %4 = vector.load %arg3[%c0_3, %c0_4] : memref<1x512xf32, #tpu.memory_space<vmem>>, vector<1x512xf32>
    %5 = vector.broadcast %4 : vector<1x512xf32> to vector<2x512xf32>
    %6 = arith.addf %3, %5 : vector<2x512xf32>
    %c0_5 = arith.constant 0 : index
    %c0_6 = arith.constant 0 : index
    %7 = vector.load %arg4[%c0_5, %c0_6] : memref<2x512xf32, #tpu.memory_space<vmem>>, vector<2x512xf32>
    %8 = arith.addf %6, %7 : vector<2x512xf32>
    %cst = arith.constant 0.000000e+00 : f32
    %9 = vector.broadcast %cst : f32 to vector<2x512xf32>
    %10 = arith.maximumf %8, %9 : vector<2x512xf32>
    %c0_7 = arith.constant 0 : index
    %c0_8 = arith.constant 0 : index
    %11 = vector.load %arg5[%c0_7, %c0_8] : memref<2x512xf32, #tpu.memory_space<vmem>>, vector<2x512xf32>
    tpu.vector_store %arg5[%c0_7, %c0_8], %10 {strides = array<i32>} : memref<2x512xf32, #tpu.memory_space<vmem>>, vector<2x512xf32>,
    return
  }
  func.func @transform_0(%arg0: i32) -> (i32, i32) {
    %c0_i32 = arith.constant 0 : i32
    %c0_i32_0 = arith.constant 0 : i32
    return %arg0, %c0_i32 : i32, i32
  }
  func.func @transform_1(%arg0: i32) -> (i32, i32) {
    %c0_i32 = arith.constant 0 : i32
    %c0_i32_0 = arith.constant 0 : i32
    %c0_i32_1 = arith.constant 0 : i32
    return %c0_i32, %c0_i32_0 : i32, i32
  }
  func.func @transform_2(%arg0: i32) -> (i32, i32) {
    %c0_i32 = arith.constant 0 : i32
    %c0_i32_0 = arith.constant 0 : i32
    %c0_i32_1 = arith.constant 0 : i32
    return %c0_i32, %c0_i32_0 : i32, i32
  }
  func.func @transform_3(%arg0: i32) -> (i32, i32) {
    %c0_i32 = arith.constant 0 : i32
    %c0_i32_0 = arith.constant 0 : i32
    return %arg0, %c0_i32 : i32, i32
  }
  func.func @transform_4(%arg0: i32) -> (i32, i32) {
    %c0_i32 = arith.constant 0 : i32
    %c0_i32_0 = arith.constant 0 : i32
    return %arg0, %c0_i32 : i32, i32
  }
}

module attributes {stable_mosaic.version = 11 : i64} {
  func.func @_avgpool_kernel(%arg0: memref<2x1x512xf32, #tpu.memory_space<vmem>>, %arg1: memref<2x512xf32, #tpu.memory_space<vmem>>) attributes {dimension_semantics = [], scalar_prefetch = 0 : i64, scratch_operands = 0 : i64, tpu.core_type = #tpu.core_type<tc>} {
    %c0 = arith.constant 0 : index
    %c0_0 = arith.constant 0 : index
    %c0_1 = arith.constant 0 : index
    %0 = vector.load %arg0[%c0, %c0_0, %c0_1] : memref<2x1x512xf32, #tpu.memory_space<vmem>>, vector<2x1x512xf32>
    %cst = arith.constant dense<0.000000e+00> : vector<2x512xf32>
    %1 = vector.multi_reduction <add>, %0, %cst [1] : vector<2x1x512xf32> to vector<2x512xf32>
    %cst_2 = arith.constant 1.000000e+00 : f32
    %2 = vector.broadcast %cst_2 : f32 to vector<2x512xf32>
    %3 = arith.divf %1, %2 : vector<2x512xf32>
    %c0_3 = arith.constant 0 : index
    %c0_4 = arith.constant 0 : index
    %4 = vector.load %arg1[%c0_3, %c0_4] : memref<2x512xf32, #tpu.memory_space<vmem>>, vector<2x512xf32>
    tpu.vector_store %arg1[%c0_3, %c0_4], %3 {strides = array<i32>} : memref<2x512xf32, #tpu.memory_space<vmem>>, vector<2x512xf32>,
    return
  }
}

module attributes {stable_mosaic.version = 11 : i64} {
  func.func @_mm_bias_kernel(%arg0: i32, %arg1: i32, %arg2: i32, %arg3: memref<2x512xbf16, #tpu.memory_space<vmem>>, %arg4: memref<512x128xbf16, #tpu.memory_space<vmem>>, %arg5: memref<1x128xf32, #tpu.memory_space<vmem>>, %arg6: memref<2x128xf32, #tpu.memory_space<vmem>>, %arg7: memref<2x128xf32, #tpu.memory_space<vmem>>) attributes {dimension_semantics = [#tpu.dimension_semantics<parallel>, #tpu.dimension_semantics<parallel>, #tpu.dimension_semantics<arbitrary>], iteration_bounds = array<i64: 1, 1, 1>, scalar_prefetch = 0 : i64, scratch_operands = 1 : i64, tpu.core_type = #tpu.core_type<tc>, window_params = [{transform_indices = @transform_0, window_bounds = array<i64: 2, 512>}, {transform_indices = @transform_1, window_bounds = array<i64: 512, 128>}, {transform_indices = @transform_2, window_bounds = array<i64: 1, 128>}, {transform_indices = @transform_3, window_bounds = array<i64: 2, 128>}]} {
    %c0_i32 = arith.constant 0 : i32
    %0 = arith.cmpi eq, %arg2, %c0_i32 : i32
    %1 = arith.extui %0 : i1 to i32
    %c0_i32_0 = arith.constant 0 : i32
    %2 = arith.cmpi ne, %1, %c0_i32_0 : i32
    scf.if %2 {
      %cst_10 = arith.constant 0.000000e+00 : f32
      %12 = vector.broadcast %cst_10 : f32 to vector<2x128xf32>
      %c0_11 = arith.constant 0 : index
      %c0_12 = arith.constant 0 : index
      %13 = vector.load %arg7[%c0_11, %c0_12] : memref<2x128xf32, #tpu.memory_space<vmem>>, vector<2x128xf32>
      tpu.vector_store %arg7[%c0_11, %c0_12], %12 {strides = array<i32>} : memref<2x128xf32, #tpu.memory_space<vmem>>, vector<2x128xf32>,
    } else {
    }
    %c0 = arith.constant 0 : index
    %c0_1 = arith.constant 0 : index
    %3 = vector.load %arg7[%c0, %c0_1] : memref<2x128xf32, #tpu.memory_space<vmem>>, vector<2x128xf32>
    %c0_2 = arith.constant 0 : index
    %c0_3 = arith.constant 0 : index
    %4 = vector.load %arg3[%c0_2, %c0_3] : memref<2x512xbf16, #tpu.memory_space<vmem>>, vector<2x512xbf16>
    %c0_4 = arith.constant 0 : index
    %c0_5 = arith.constant 0 : index
    %5 = vector.load %arg4[%c0_4, %c0_5] : memref<512x128xbf16, #tpu.memory_space<vmem>>, vector<512x128xbf16>
    %cst = arith.constant dense<0.000000e+00> : vector<2x128xf32>
    %6 = tpu.matmul %4, %5, %cst {dimension_numbers = #tpu.dot_dimension_numbers<[1], [0], [0], [1], [0, 0, 1, 1], [], []>} : vector<2x512xbf16>, vector<512x128xbf16>, vector<2x128xf32> -> vector<2x128xf32>
    %7 = arith.addf %3, %6 : vector<2x128xf32>
    %c0_6 = arith.constant 0 : index
    %c0_7 = arith.constant 0 : index
    %8 = vector.load %arg7[%c0_6, %c0_7] : memref<2x128xf32, #tpu.memory_space<vmem>>, vector<2x128xf32>
    tpu.vector_store %arg7[%c0_6, %c0_7], %7 {strides = array<i32>} : memref<2x128xf32, #tpu.memory_space<vmem>>, vector<2x128xf32>,
    %c0_i32_8 = arith.constant 0 : i32
    %9 = arith.cmpi eq, %arg2, %c0_i32_8 : i32
    %10 = arith.extui %9 : i1 to i32
    %c0_i32_9 = arith.constant 0 : i32
    %11 = arith.cmpi ne, %10, %c0_i32_9 : i32
    scf.if %11 {
      %c0_10 = arith.constant 0 : index
      %c0_11 = arith.constant 0 : index
      %12 = vector.load %arg7[%c0_10, %c0_11] : memref<2x128xf32, #tpu.memory_space<vmem>>, vector<2x128xf32>
      %c0_12 = arith.constant 0 : index
      %c0_13 = arith.constant 0 : index
      %13 = vector.load %arg5[%c0_12, %c0_13] : memref<1x128xf32, #tpu.memory_space<vmem>>, vector<1x128xf32>
      %14 = vector.broadcast %13 : vector<1x128xf32> to vector<2x128xf32>
      %15 = arith.addf %12, %14 : vector<2x128xf32>
      %c0_14 = arith.constant 0 : index
      %c0_15 = arith.constant 0 : index
      %16 = vector.load %arg6[%c0_14, %c0_15] : memref<2x128xf32, #tpu.memory_space<vmem>>, vector<2x128xf32>
      tpu.vector_store %arg6[%c0_14, %c0_15], %15 {strides = array<i32>} : memref<2x128xf32, #tpu.memory_space<vmem>>, vector<2x128xf32>,
    } else {
    }
    return
  }
  func.func @transform_0(%arg0: i32, %arg1: i32, %arg2: i32) -> (i32, i32) {
    %c0_i32 = arith.constant 0 : i32
    return %arg0, %arg2 : i32, i32
  }
  func.func @transform_1(%arg0: i32, %arg1: i32, %arg2: i32) -> (i32, i32) {
    %c0_i32 = arith.constant 0 : i32
    return %arg2, %arg1 : i32, i32
  }
  func.func @transform_2(%arg0: i32, %arg1: i32, %arg2: i32) -> (i32, i32) {
    %c0_i32 = arith.constant 0 : i32
    %c0_i32_0 = arith.constant 0 : i32
    return %c0_i32, %arg1 : i32, i32
  }
  func.func @transform_3(%arg0: i32, %arg1: i32, %arg2: i32) -> (i32, i32) {
    %c0_i32 = arith.constant 0 : i32
    return %arg0, %arg1 : i32, i32
  }
}

</mosaic_0001>

<bundles_post_ra>
// kernel: resnet18_apply.64
= control target key start
LH: loop header
LB: loop body
LE: loop exit
PB: predicated region body
PF: predicated region fallthrough
CT: control target
= control target key end

     0   :  { %v169_v0 = vmov 0.0   ;;  %s299_s1 = inlined_call_operand.vmem [shape: f32[1,128], index: 1, kind: output, shape index: {0}]   ;;  %s300_s2 = inlined_call_operand.vmem [shape: f32[1,128], index: 2, kind: output, shape index: {1}]   ;;  %s301_s0 = inlined_call_operand.vmem [shape: f32[256,128], index: 0, kind: input, shape index: {}]  }
   0x1   :  { %14 = vst [vmem:[%s299_s1] sm:$0x1] %v169_v0  ;;  %v16_v1 = vld [vmem:[%s301_s0] sm:$0xff]  ;;  %v17_v2 = vld [vmem:[%s301_s0 + $0x8] sm:$0xff]  ;;  %v18_v3 = vld [vmem:[%s301_s0 + $0x10] sm:$0xff] }
   0x2   :  { %15 = vst [vmem:[%s300_s2] sm:$0x1] %v169_v0  ;;  %v19_v4 = vld [vmem:[%s301_s0 + $0x18] sm:$0xff]  ;;  %v49_v5 = vadd.f32 %v17_v2, %v16_v1  ;;  %v89_v6 = vmul.f32 %v16_v1, %v16_v1  ;;  %v90_v7 = vmul.f32 %v17_v2, %v17_v2  ;;  %v91_v8 = vmul.f32 %v18_v3, %v18_v3  ;;  %v20_v9 = vld [vmem:[%s301_s0 + $0x20] sm:$0xff]  ;;  %v21_v13 = vld [vmem:[%s301_s0 + $0x28] sm:$0xff] }
   0x3   :  { %v92_v11 = vmul.f32 %v19_v4, %v19_v4  ;;  %v93_v15 = vmul.f32 %v20_v9, %v20_v9  ;;  %v22_v17 = vld [vmem:[%s301_s0 + $0x30] sm:$0xff]  ;;  %v94_v19 = vmul.f32 %v21_v13, %v21_v13  ;;  %v23_v21 = vld [vmem:[%s301_s0 + $0x38] sm:$0xff]  ;;  %v24_v25 = vld [vmem:[%s301_s0 + $0x40] sm:$0xff] }
   0x4   :  { %v50_v10 = vadd.f32 %v49_v5, %v18_v3  ;;  %v121_v12 = vadd.f32 %v90_v7, %v89_v6  ;;  %v95_v23 = vmul.f32 %v22_v17, %v22_v17  ;;  %v96_v27 = vmul.f32 %v23_v21, %v23_v21  ;;  %v25_v29 = vld [vmem:[%s301_s0 + $0x48] sm:$0xff]  ;;  %v26_v33 = vld [vmem:[%s301_s0 + $0x50] sm:$0xff]  ;;  %v27_v37 = vld [vmem:[%s301_s0 + $0x58] sm:$0xff] }
   0x5   :  { %v97_v31 = vmul.f32 %v24_v25, %v24_v25  ;;  %v98_v35 = vmul.f32 %v25_v29, %v25_v29  ;;  %v99_v39 = vmul.f32 %v26_v33, %v26_v33  ;;  %v28_v41 = vld [vmem:[%s301_s0 + $0x60] sm:$0xff]  ;;  %v100_v43 = vmul.f32 %v27_v37, %v27_v37  ;;  %v29_v45 = vld [vmem:[%s301_s0 + $0x68] sm:$0xff]  ;;  %v30_v49 = vld [vmem:[%s301_s0 + $0x70] sm:$0xff] }
   0x6   :  { %v51_v14 = vadd.f32 %v50_v10, %v19_v4  ;;  %v122_v16 = vadd.f32 %v121_v12, %v91_v8  ;;  %v101_v47 = vmul.f32 %v28_v41, %v28_v41  ;;  %v102_v51 = vmul.f32 %v29_v45, %v29_v45  ;;  %v31_v53 = vld [vmem:[%s301_s0 + $0x78] sm:$0xff]  ;;  %v32_v57 = vld [vmem:[%s301_s0 + $0x80] sm:$0xff]  ;;  %v33_v61 = vld [vmem:[%s301_s0 + $0x88] sm:$0xff] }
   0x7   :  { %v103_v55 = vmul.f32 %v30_v49, %v30_v49  ;;  %v104_v59 = vmul.f32 %v31_v53, %v31_v53  ;;  %v105_v63 = vmul.f32 %v32_v57, %v32_v57  ;;  %v34_v1 = vld [vmem:[%s301_s0 + $0x90] sm:$0xff]  ;;  %v106_v3 = vmul.f32 %v33_v61, %v33_v61  ;;  %v35_v5 = vld [vmem:[%s301_s0 + $0x98] sm:$0xff] }
   0x8   :  { %v52_v18 = vadd.f32 %v51_v14, %v20_v9  ;;  %v123_v20 = vadd.f32 %v122_v16, %v92_v11  ;;  %v107_v7 = vmul.f32 %v34_v1, %v34_v1  ;;  %v36_v9 = vld [vmem:[%s301_s0 + $0xa0] sm:$0xff]  ;;  %v108_v11 = vmul.f32 %v35_v5, %v35_v5 }
   0xa   :  { %v53_v22 = vadd.f32 %v52_v18, %v21_v13  ;;  %v124_v24 = vadd.f32 %v123_v20, %v93_v15  ;;  %v37_v13 = vld [vmem:[%s301_s0 + $0xa8] sm:$0xff]  ;;  %v109_v15 = vmul.f32 %v36_v9, %v36_v9 }
   0xc   :  { %v54_v26 = vadd.f32 %v53_v22, %v22_v17  ;;  %v125_v28 = vadd.f32 %v124_v24, %v94_v19  ;;  %v38_v17 = vld [vmem:[%s301_s0 + $0xb0] sm:$0xff]  ;;  %v110_v19 = vmul.f32 %v37_v13, %v37_v13 }
   0xe   :  { %v55_v30 = vadd.f32 %v54_v26, %v23_v21  ;;  %v126_v32 = vadd.f32 %v125_v28, %v95_v23  ;;  %v39_v21 = vld [vmem:[%s301_s0 + $0xb8] sm:$0xff]  ;;  %v111_v23 = vmul.f32 %v38_v17, %v38_v17 }
  0x10   :  { %v56_v34 = vadd.f32 %v55_v30, %v24_v25  ;;  %v127_v36 = vadd.f32 %v126_v32, %v96_v27  ;;  %v40_v25 = vld [vmem:[%s301_s0 + $0xc0] sm:$0xff]  ;;  %v112_v27 = vmul.f32 %v39_v21, %v39_v21 }
  0x12   :  { %v57_v38 = vadd.f32 %v56_v34, %v25_v29  ;;  %v128_v40 = vadd.f32 %v127_v36, %v97_v31  ;;  %v41_v29 = vld [vmem:[%s301_s0 + $0xc8] sm:$0xff]  ;;  %v113_v31 = vmul.f32 %v40_v25, %v40_v25 }
  0x14   :  { %v58_v42 = vadd.f32 %v57_v38, %v26_v33  ;;  %v129_v44 = vadd.f32 %v128_v40, %v98_v35  ;;  %v42_v33 = vld [vmem:[%s301_s0 + $0xd0] sm:$0xff]  ;;  %v114_v35 = vmul.f32 %v41_v29, %v41_v29 }
  0x16   :  { %v59_v46 = vadd.f32 %v58_v42, %v27_v37  ;;  %v130_v48 = vadd.f32 %v129_v44, %v99_v39  ;;  %v43_v37 = vld [vmem:[%s301_s0 + $0xd8] sm:$0xff]  ;;  %v115_v39 = vmul.f32 %v42_v33, %v42_v33 }
  0x18   :  { %v60_v50 = vadd.f32 %v59_v46, %v28_v41  ;;  %v131_v52 = vadd.f32 %v130_v48, %v100_v43  ;;  %v44_v41 = vld [vmem:[%s301_s0 + $0xe0] sm:$0xff]  ;;  %v116_v43 = vmul.f32 %v43_v37, %v43_v37 }
  0x1a   :  { %v61_v54 = vadd.f32 %v60_v50, %v29_v45  ;;  %v132_v56 = vadd.f32 %v131_v52, %v101_v47  ;;  %v45_v45 = vld [vmem:[%s301_s0 + $0xe8] sm:$0xff]  ;;  %v117_v47 = vmul.f32 %v44_v41, %v44_v41 }
  0x1c   :  { %v62_v58 = vadd.f32 %v61_v54, %v30_v49  ;;  %v133_v60 = vadd.f32 %v132_v56, %v102_v51  ;;  %v46_v49 = vld [vmem:[%s301_s0 + $0xf0] sm:$0xff]  ;;  %v118_v51 = vmul.f32 %v45_v45, %v45_v45 }
  0x1e   :  { %v63_v62 = vadd.f32 %v62_v58, %v31_v53  ;;  %v134_v0 = vadd.f32 %v133_v60, %v103_v55  ;;  %v47_v53 = vld [vmem:[%s301_s0 + $0xf8] sm:$0xff]  ;;  %v119_v55 = vmul.f32 %v46_v49, %v46_v49 }
  0x1f   :  { %v120_v58 = vmul.f32 %v47_v53, %v47_v53 }
  0x20   :  { %v64_v2 = vadd.f32 %v63_v62, %v32_v57  ;;  %v135_v4 = vadd.f32 %v134_v0, %v104_v59 }
  0x22   :  { %v65_v6 = vadd.f32 %v64_v2, %v33_v61  ;;  %v136_v8 = vadd.f32 %v135_v4, %v105_v63 }
  0x24   :  { %v66_v10 = vadd.f32 %v65_v6, %v34_v1  ;;  %v137_v12 = vadd.f32 %v136_v8, %v106_v3 }
  0x26   :  { %v67_v14 = vadd.f32 %v66_v10, %v35_v5  ;;  %v138_v16 = vadd.f32 %v137_v12, %v107_v7  ;;  %v48_v7 = vld [vmem:[%s299_s1] sm:$0x1] }
  0x27   :  { %v88_v12 = vld [vmem:[%s300_s2] sm:$0x1] }
  0x28   :  { %v68_v18 = vadd.f32 %v67_v14, %v36_v9  ;;  %v139_v20 = vadd.f32 %v138_v16, %v108_v11 }
  0x2a   :  { %v69_v22 = vadd.f32 %v68_v18, %v37_v13  ;;  %v140_v24 = vadd.f32 %v139_v20, %v109_v15 }
  0x2c   :  { %v70_v26 = vadd.f32 %v69_v22, %v38_v17  ;;  %v141_v28 = vadd.f32 %v140_v24, %v110_v19 }
  0x2e   :  { %v71_v30 = vadd.f32 %v70_v26, %v39_v21  ;;  %v142_v32 = vadd.f32 %v141_v28, %v111_v23 }
  0x30   :  { %v72_v34 = vadd.f32 %v71_v30, %v40_v25  ;;  %v143_v36 = vadd.f32 %v142_v32, %v112_v27 }
  0x32   :  { %v73_v38 = vadd.f32 %v72_v34, %v41_v29  ;;  %v144_v40 = vadd.f32 %v143_v36, %v113_v31 }
  0x34   :  { %v74_v42 = vadd.f32 %v73_v38, %v42_v33  ;;  %v145_v44 = vadd.f32 %v144_v40, %v114_v35 }
  0x36   :  { %v75_v46 = vadd.f32 %v74_v42, %v43_v37  ;;  %v146_v48 = vadd.f32 %v145_v44, %v115_v39 }
  0x38   :  { %v76_v50 = vadd.f32 %v75_v46, %v44_v41  ;;  %v147_v52 = vadd.f32 %v146_v48, %v116_v43 }
  0x3a   :  { %v77_v54 = vadd.f32 %v76_v50, %v45_v45  ;;  %v148_v56 = vadd.f32 %v147_v52, %v117_v47 }
  0x3c   :  { %v78_v57 = vadd.f32 %v77_v54, %v46_v49  ;;  %v149_v59 = vadd.f32 %v148_v56, %v118_v51 }
  0x3e   :  { %v79_v60 = vadd.f32 %v78_v57, %v47_v53  ;;  %v150_v61 = vadd.f32 %v149_v59, %v119_v55 }
  0x40   :  { %v80_v62 = vrot.slane %v79_v60, 4  ;;  %v151_v63 = vadd.f32 %v150_v61, %v120_v58 }
  0x42   :  { %v81_v0 = vadd.f32 %v80_v62, %v79_v60  ;;  %v152_v1 = vrot.slane %v151_v63, 4 }
  0x44   :  { %v82_v2 = vrot.slane %v81_v0, 2  ;;  %v153_v3 = vadd.f32 %v152_v1, %v151_v63 }
  0x46   :  { %v83_v4 = vadd.f32 %v82_v2, %v81_v0  ;;  %v154_v5 = vrot.slane %v153_v3, 2 }
  0x48   :  { %v84_v6 = vrot.slane %v83_v4, 1  ;;  %v155_v8 = vadd.f32 %v154_v5, %v153_v3 }
  0x4a   :  { %v85_v9 = vadd.f32 %v84_v6, %v83_v4  ;;  %v156_v10 = vrot.slane %v155_v8, 1 }
  0x4c   :  { %v86_v11 = vadd.f32 %v85_v9, %v48_v7  ;;  %v157_v13 = vadd.f32 %v156_v10, %v155_v8 }
  0x4e   :  { %87 = vst [vmem:[%s299_s1] sm:$0x1] %v86_v11  ;;  %v158_v14 = vadd.f32 %v157_v13, %v88_v12 }
  0x50   :  { %159 = vst [vmem:[%s300_s2] sm:$0x1] %v158_v14 }

// kernel: resnet18_apply.65
= control target key start
LH: loop header
LB: loop body
LE: loop exit
PB: predicated region body
PF: predicated region fallthrough
CT: control target
= control target key end

     0   :  { %s474_s0 = inlined_call_operand.vmem [shape: f32[256,128], index: 0, kind: input, shape index: {}]   ;;  %s475_s1 = inlined_call_operand.vmem [shape: f32[1,128], index: 1, kind: input, shape index: {}]   ;;  %s476_s2 = inlined_call_operand.vmem [shape: f32[1,128], index: 2, kind: input, shape index: {}]   ;;  %s477_s3 = inlined_call_operand.vmem [shape: f32[256,128], index: 3, kind: output, shape index: {}]  }
   0x1   :  { %v14_v0 = vld [vmem:[%s474_s0] sm:$0xff]  ;;  %v15_v3 = vld [vmem:[%s474_s0 + $0x8] sm:$0xff]  ;;  %v16_v6 = vld [vmem:[%s474_s0 + $0x10] sm:$0xff] }
   0x2   :  { %v214_v1 = vld [vmem:[%s475_s1] ss:$0 sm:$0xff]  ;;  %v17_v7 = vld [vmem:[%s474_s0 + $0x18] sm:$0xff]  ;;  %v19_v12 = vld [vmem:[%s474_s0 + $0x28] sm:$0xff] }
   0x3   :  { %v219_v2 = vld [vmem:[%s476_s2] ss:$0 sm:$0xff]  ;;  %v50_v4 = vmul.f32 %v214_v1, %v14_v0  ;;  %v51_v5 = vmul.f32 %v214_v1, %v15_v3  ;;  %v52_v9 = vmul.f32 %v214_v1, %v16_v6  ;;  %v53_v10 = vmul.f32 %v214_v1, %v17_v7  ;;  %v20_v13 = vld [vmem:[%s474_s0 + $0x30] sm:$0xff]  ;;  %v21_v14 = vld [vmem:[%s474_s0 + $0x38] sm:$0xff] }
   0x4   :  { %v18_v8 = vld [vmem:[%s474_s0 + $0x20] sm:$0xff]  ;;  %v55_v17 = vmul.f32 %v214_v1, %v19_v12  ;;  %v56_v18 = vmul.f32 %v214_v1, %v20_v13  ;;  %v57_v22 = vmul.f32 %v214_v1, %v21_v14  ;;  %v23_v24 = vld [vmem:[%s474_s0 + $0x48] sm:$0xff]  ;;  %v24_v29 = vld [vmem:[%s474_s0 + $0x50] sm:$0xff] }
   0x5   :  { %v54_v11 = vmul.f32 %v214_v1, %v18_v8  ;;  %v86_v15 = vadd.f32 %v219_v2, %v50_v4  ;;  %v87_v16 = vadd.f32 %v219_v2, %v51_v5  ;;  %v88_v19 = vadd.f32 %v219_v2, %v52_v9  ;;  %v22_v23 = vld [vmem:[%s474_s0 + $0x40] sm:$0xff]  ;;  %v25_v30 = vld [vmem:[%s474_s0 + $0x58] sm:$0xff]  ;;  %v27_v35 = vld [vmem:[%s474_s0 + $0x68] sm:$0xff] }
   0x6   :  { %v89_v20 = vadd.f32 %v219_v2, %v53_v10  ;;  %v91_v27 = vadd.f32 %v219_v2, %v55_v17  ;;  %v92_v28 = vadd.f32 %v219_v2, %v56_v18  ;;  %v26_v31 = vld [vmem:[%s474_s0 + $0x60] sm:$0xff]  ;;  %v93_v34 = vadd.f32 %v219_v2, %v57_v22  ;;  %v28_v36 = vld [vmem:[%s474_s0 + $0x70] sm:$0xff]  ;;  %v29_v41 = vld [vmem:[%s474_s0 + $0x78] sm:$0xff] }
   0x7   :  { %v90_v21 = vadd.f32 %v219_v2, %v54_v11  ;;  %v118_v25 = vmax.f32 %v86_v15, 0.0  ;;  %v119_v26 = vmax.f32 %v87_v16, 0.0  ;;  %v120_v32 = vmax.f32 %v88_v19, 0.0  ;;  %v30_v54 = vld [vmem:[%s474_s0 + $0x80] sm:$0xff]  ;;  %v31_v55 = vld [vmem:[%s474_s0 + $0x88] sm:$0xff]  ;;  %v32_v58 = vld [vmem:[%s474_s0 + $0x90] sm:$0xff] }
   0x8   :  { %v121_v33 = vmax.f32 %v89_v20, 0.0  ;;  %v123_v38 = vmax.f32 %v91_v27, 0.0  ;;  %v58_v39 = vmul.f32 %v214_v1, %v22_v23  ;;  %v59_v40 = vmul.f32 %v214_v1, %v23_v24  ;;  %v33_v59 = vld [vmem:[%s474_s0 + $0x98] sm:$0xff]  ;;  %v34_v62 = vld [vmem:[%s474_s0 + $0xa0] sm:$0xff]  ;;  %v35_v5 = vld [vmem:[%s474_s0 + $0xa8] sm:$0xff] }
   0x9   :  { %150 = vst [vmem:[%s477_s3] sm:$0xff] %v118_v25  ;;  %v122_v37 = vmax.f32 %v90_v21, 0.0  ;;  %v124_v42 = vmax.f32 %v92_v28, 0.0  ;;  %v60_v43 = vmul.f32 %v214_v1, %v24_v29  ;;  %v61_v44 = vmul.f32 %v214_v1, %v25_v30  ;;  %v36_v10 = vld [vmem:[%s474_s0 + $0xb0] sm:$0xff]  ;;  %v37_v14 = vld [vmem:[%s474_s0 + $0xb8] sm:$0xff]  ;;  %v38_v18 = vld [vmem:[%s474_s0 + $0xc0] sm:$0xff] }
   0xa   :  { %151 = vst [vmem:[%s477_s3 + $0x8] sm:$0xff] %v119_v26  ;;  %v62_v45 = vmul.f32 %v214_v1, %v26_v31  ;;  %v94_v46 = vadd.f32 %v219_v2, %v58_v39  ;;  %v95_v47 = vadd.f32 %v219_v2, %v59_v40  ;;  %v63_v48 = vmul.f32 %v214_v1, %v27_v35  ;;  %v39_v22 = vld [vmem:[%s474_s0 + $0xc8] sm:$0xff]  ;;  %v40_v26 = vld [vmem:[%s474_s0 + $0xd0] sm:$0xff]  ;;  %v41_v30 = vld [vmem:[%s474_s0 + $0xd8] sm:$0xff] }
   0xb   :  { %152 = vst [vmem:[%s477_s3 + $0x10] sm:$0xff] %v120_v32  ;;  %v64_v49 = vmul.f32 %v214_v1, %v28_v36  ;;  %v125_v50 = vmax.f32 %v93_v34, 0.0  ;;  %v96_v51 = vadd.f32 %v219_v2, %v60_v43  ;;  %v97_v52 = vadd.f32 %v219_v2, %v61_v44  ;;  %v42_v34 = vld [vmem:[%s474_s0 + $0xe0] sm:$0xff] }
   0xc   :  { %153 = vst [vmem:[%s477_s3 + $0x18] sm:$0xff] %v121_v33  ;;  %v65_v53 = vmul.f32 %v214_v1, %v29_v41  ;;  %v126_v56 = vmax.f32 %v94_v46, 0.0  ;;  %v98_v57 = vadd.f32 %v219_v2, %v62_v45  ;;  %v127_v60 = vmax.f32 %v95_v47, 0.0  ;;  %v45_v46 = vld [vmem:[%s474_s0 + $0xf8] sm:$0xff] }
   0xd   :  { %154 = vst [vmem:[%s477_s3 + $0x20] sm:$0xff] %v122_v37  ;;  %v99_v61 = vadd.f32 %v219_v2, %v63_v48  ;;  %v128_v63 = vmax.f32 %v96_v51, 0.0  ;;  %v100_v0 = vadd.f32 %v219_v2, %v64_v49  ;;  %v66_v3 = vmul.f32 %v214_v1, %v30_v54 }
   0xe   :  { %155 = vst [vmem:[%s477_s3 + $0x28] sm:$0xff] %v123_v38  ;;  %v67_v4 = vmul.f32 %v214_v1, %v31_v55  ;;  %v129_v6 = vmax.f32 %v97_v52, 0.0  ;;  %v101_v7 = vadd.f32 %v219_v2, %v65_v53  ;;  %v68_v8 = vmul.f32 %v214_v1, %v32_v58  ;;  %v43_v38 = vld [vmem:[%s474_s0 + $0xe8] sm:$0xff] }
   0xf   :  { %156 = vst [vmem:[%s477_s3 + $0x30] sm:$0xff] %v124_v42  ;;  %v69_v9 = vmul.f32 %v214_v1, %v33_v59  ;;  %v130_v11 = vmax.f32 %v98_v57, 0.0  ;;  %v102_v12 = vadd.f32 %v219_v2, %v66_v3  ;;  %v70_v13 = vmul.f32 %v214_v1, %v34_v62  ;;  %v44_v42 = vld [vmem:[%s474_s0 + $0xf0] sm:$0xff] }
  0x10   :  { %157 = vst [vmem:[%s477_s3 + $0x38] sm:$0xff] %v125_v50  ;;  %v131_v15 = vmax.f32 %v99_v61, 0.0  ;;  %v103_v16 = vadd.f32 %v219_v2, %v67_v4  ;;  %v71_v17 = vmul.f32 %v214_v1, %v35_v5  ;;  %v132_v19 = vmax.f32 %v100_v0, 0.0 }
  0x11   :  { %158 = vst [vmem:[%s477_s3 + $0x40] sm:$0xff] %v126_v56  ;;  %v104_v20 = vadd.f32 %v219_v2, %v68_v8  ;;  %v72_v21 = vmul.f32 %v214_v1, %v36_v10  ;;  %v133_v23 = vmax.f32 %v101_v7, 0.0  ;;  %v105_v24 = vadd.f32 %v219_v2, %v69_v9 }
  0x12   :  { %159 = vst [vmem:[%s477_s3 + $0x48] sm:$0xff] %v127_v60  ;;  %v73_v25 = vmul.f32 %v214_v1, %v37_v14  ;;  %v134_v27 = vmax.f32 %v102_v12, 0.0  ;;  %v106_v28 = vadd.f32 %v219_v2, %v70_v13  ;;  %v74_v29 = vmul.f32 %v214_v1, %v38_v18 }
  0x13   :  { %160 = vst [vmem:[%s477_s3 + $0x50] sm:$0xff] %v128_v63  ;;  %v135_v31 = vmax.f32 %v103_v16, 0.0  ;;  %v107_v32 = vadd.f32 %v219_v2, %v71_v17  ;;  %v75_v33 = vmul.f32 %v214_v1, %v39_v22  ;;  %v136_v35 = vmax.f32 %v104_v20, 0.0 }
  0x14   :  { %161 = vst [vmem:[%s477_s3 + $0x58] sm:$0xff] %v129_v6  ;;  %v108_v36 = vadd.f32 %v219_v2, %v72_v21  ;;  %v76_v37 = vmul.f32 %v214_v1, %v40_v26  ;;  %v137_v39 = vmax.f32 %v105_v24, 0.0  ;;  %v109_v40 = vadd.f32 %v219_v2, %v73_v25 }
  0x15   :  { %162 = vst [vmem:[%s477_s3 + $0x60] sm:$0xff] %v130_v11  ;;  %v77_v41 = vmul.f32 %v214_v1, %v41_v30  ;;  %v138_v43 = vmax.f32 %v106_v28, 0.0  ;;  %v110_v44 = vadd.f32 %v219_v2, %v74_v29  ;;  %v78_v45 = vmul.f32 %v214_v1, %v42_v34 }
  0x16   :  { %163 = vst [vmem:[%s477_s3 + $0x68] sm:$0xff] %v131_v15  ;;  %v139_v47 = vmax.f32 %v107_v32, 0.0  ;;  %v111_v48 = vadd.f32 %v219_v2, %v75_v33  ;;  %v79_v49 = vmul.f32 %v214_v1, %v43_v38  ;;  %v140_v50 = vmax.f32 %v108_v36, 0.0 }
  0x17   :  { %164 = vst [vmem:[%s477_s3 + $0x70] sm:$0xff] %v132_v19  ;;  %v112_v51 = vadd.f32 %v219_v2, %v76_v37  ;;  %v80_v52 = vmul.f32 %v214_v1, %v44_v42  ;;  %v141_v53 = vmax.f32 %v109_v40, 0.0  ;;  %v113_v54 = vadd.f32 %v219_v2, %v77_v41 }
  0x18   :  { %165 = vst [vmem:[%s477_s3 + $0x78] sm:$0xff] %v133_v23  ;;  %v81_v55 = vmul.f32 %v214_v1, %v45_v46  ;;  %v142_v56 = vmax.f32 %v110_v44, 0.0  ;;  %v114_v57 = vadd.f32 %v219_v2, %v78_v45  ;;  %v143_v58 = vmax.f32 %v111_v48, 0.0 }
  0x19   :  { %166 = vst [vmem:[%s477_s3 + $0x80] sm:$0xff] %v134_v27  ;;  %v115_v59 = vadd.f32 %v219_v2, %v79_v49  ;;  %v144_v60 = vmax.f32 %v112_v51, 0.0  ;;  %v116_v1 = vadd.f32 %v219_v2, %v80_v52  ;;  %v145_v61 = vmax.f32 %v113_v54, 0.0 }
  0x1a   :  { %167 = vst [vmem:[%s477_s3 + $0x88] sm:$0xff] %v135_v31  ;;  %v117_v62 = vadd.f32 %v219_v2, %v81_v55  ;;  %v146_v63 = vmax.f32 %v114_v57, 0.0 }
  0x1b   :  { %168 = vst [vmem:[%s477_s3 + $0x90] sm:$0xff] %v136_v35  ;;  %v147_v0 = vmax.f32 %v115_v59, 0.0  ;;  %v148_v3 = vmax.f32 %v116_v1, 0.0 }
  0x1c   :  { %169 = vst [vmem:[%s477_s3 + $0x98] sm:$0xff] %v137_v39  ;;  %v149_v2 = vmax.f32 %v117_v62, 0.0 }
  0x1d   :  { %170 = vst [vmem:[%s477_s3 + $0xa0] sm:$0xff] %v138_v43 }
  0x1e   :  { %171 = vst [vmem:[%s477_s3 + $0xa8] sm:$0xff] %v139_v47 }
  0x1f   :  { %172 = vst [vmem:[%s477_s3 + $0xb0] sm:$0xff] %v140_v50 }
  0x20   :  { %173 = vst [vmem:[%s477_s3 + $0xb8] sm:$0xff] %v141_v53 }
  0x21   :  { %174 = vst [vmem:[%s477_s3 + $0xc0] sm:$0xff] %v142_v56 }
  0x22   :  { %175 = vst [vmem:[%s477_s3 + $0xc8] sm:$0xff] %v143_v58 }
  0x23   :  { %176 = vst [vmem:[%s477_s3 + $0xd0] sm:$0xff] %v144_v60 }
  0x24   :  { %177 = vst [vmem:[%s477_s3 + $0xd8] sm:$0xff] %v145_v61 }
  0x25   :  { %178 = vst [vmem:[%s477_s3 + $0xe0] sm:$0xff] %v146_v63 }
  0x26   :  { %179 = vst [vmem:[%s477_s3 + $0xe8] sm:$0xff] %v147_v0 }
  0x27   :  { %180 = vst [vmem:[%s477_s3 + $0xf0] sm:$0xff] %v148_v3 }
  0x28   :  { %181 = vst [vmem:[%s477_s3 + $0xf8] sm:$0xff] %v149_v2 }

// kernel: resnet18_apply.63
= control target key start
LH: loop header
LB: loop body
LE: loop exit
PB: predicated region body
PF: predicated region fallthrough
CT: control target
= control target key end

     0   :  { %s1362_s9 = smov 0   ;;  %s1364_s10 = smov 0   ;;  %s1649_s0 = inlined_call_operand.vmem [shape: bf16[512,256], index: 0, kind: input, shape index: {}]   ;;  %s1650_s1 = inlined_call_operand.vmem [shape: bf16[256,64], index: 1, kind: input, shape index: {}]   ;;  %s1651_s2 = inlined_call_operand.vmem [shape: f32[512,64], index: 2, kind: output, shape index: {}]  }
   0x1   :  { %s1366_s11 = smov 0  }
   0x2 LB: > { %s31_s12 = sadd.s32 1, %s1340_s10  ;;  %p1032_p0 = scmp.ge.s32.totalorder %s1344_s11, 1  ;;  %s1344_s11 = sphi %s1366_s11, %s12_s11   ;;  %s1340_s10 = sphi %s1364_s10, %s1653_s10   ;;  %s1336_s9 = sphi %s1362_s9, %s1652_s9  }
   0x3   : > { %p33_p1 = scmp.ge.s32.totalorder %s31_s12, 2  ;;  %p158_p2 = scmp.lt.s32.totalorder %s1344_s11, 3 }
   0x5   : > { %s1655_s12 = smov (%p33_p1, %s31_s12), 0  ;;  %p159_p3 = pnand %p1032_p0, %p158_p2 }
   0x6   : > { %s1033_s25 = sshll.u32 (!%p159_p3), %s1336_s9, 5 }
   0x7   : > { %162 = sbr.rel (%p159_p3) target bundleno = 311 (0x137), region = 28  ;;  %p198_p4 = scmp.lt.s32.totalorder (!%p159_p3), %s1033_s25, 63 }
   0xc   : > { %v1272_v0 = vld [vmem:[%s1650_s1 + $0x38] sm:$0xff]  ;;  %v1271_v2 = vld [vmem:[%s1650_s1 + $0x30] sm:$0xff]  ;;  %v1270_v4 = vld [vmem:[%s1650_s1 + $0x28] sm:$0xff]  ;;  %s1657_s25 = smov (!%p198_p4, %s1033_s25), 63  ;;  %vm230_vm0 = vcmask 523264  }
   0xd   : > { %v1280_v1 = vld [vmem:[%s1650_s1 + $0x78] sm:$0xff]  ;;  %615 = vmatpush.bf16.msra.mxu0 %v1272_v0  ;;  %1281 = vmatpush.bf16.msra.mxu2 %v1272_v0  ;;  %v1279_v3 = vld [vmem:[%s1650_s1 + $0x70] sm:$0xff]  ;;  %v1278_v5 = vld [vmem:[%s1650_s1 + $0x68] sm:$0xff]  ;;  %s1232_s13 = sshll.u32 %s1657_s25, 3 }
   0xe   : > { %704 = vmatpush.bf16.msra.mxu1 %v1280_v1  ;;  %1289 = vmatpush.bf16.msra.mxu3 %v1280_v1  ;;  %v1269_v6 = vld [vmem:[%s1650_s1 + $0x20] sm:$0xff]  ;;  %v1268_v8 = vld [vmem:[%s1650_s1 + $0x18] sm:$0xff]  ;;  %v1267_v10 = vld [vmem:[%s1650_s1 + $0x10] sm:$0xff]  ;;  %s1430_s18 = scalar_lea.vmem %s1649_s0, %s1232_s13  ;;  %s1543_s28 = scalar_lea.vmem %s1651_s2, %s1232_s13 }
   0xf   : > { %v1277_v7 = vld [vmem:[%s1650_s1 + $0x60] sm:$0xff]  ;;  %v1276_v9 = vld [vmem:[%s1650_s1 + $0x58] sm:$0xff]  ;;  %v1275_v11 = vld [vmem:[%s1650_s1 + $0x50] sm:$0xff] }
  0x10   : > { %v1266_v12 = vld [vmem:[%s1650_s1 + $0x8] sm:$0xff]  ;;  %v1265_v14 = vld [vmem:[%s1650_s1] sm:$0xff]  ;;  %v1048_v28 = vld [vmem:[%s1430_s18 + $0x10] sm:$0xf] }
  0x11   : > { %616 = vmatpush.bf16.msra.mxu0 %v1271_v2  ;;  %1282 = vmatpush.bf16.msra.mxu2 %v1271_v2  ;;  %v1274_v13 = vld [vmem:[%s1650_s1 + $0x48] sm:$0xff]  ;;  %v1273_v15 = vld [vmem:[%s1650_s1 + $0x40] sm:$0xff]  ;;  %v1236_v29 = vld [vmem:[%s1430_s18 + $0x14] sm:$0xf0] }
  0x12   : > { %705 = vmatpush.bf16.msra.mxu1 %v1279_v3  ;;  %1290 = vmatpush.bf16.msra.mxu3 %v1279_v3  ;;  %v1040_v16 = vld [vmem:[%s1430_s18] sm:$0xf]  ;;  %v1234_v17 = vld [vmem:[%s1430_s18 + $0x4] sm:$0xf0]  ;;  %v1233_v20 = vld [vmem:[%s1430_s18 + $0x4] sm:$0xf]  ;;  %v1049_v36 = vor.u32 %v1236_v29, %v1048_v28 }
  0x13   : > { %v1104_v18 = vld [vmem:[%s1430_s18 + $0x80] sm:$0xf]  ;;  %v1250_v19 = vld [vmem:[%s1430_s18 + $0x84] sm:$0xf0]  ;;  %v1042_v21 = vld [vmem:[%s1430_s18 + $0x8] sm:$0xf0]  ;;  %v1041_v24 = vor.u32 %v1234_v17, %v1040_v16 }
  0x14   : > { %v1249_v22 = vld [vmem:[%s1430_s18 + $0x84] sm:$0xf]  ;;  %v1106_v23 = vld [vmem:[%s1430_s18 + $0x88] sm:$0xf0]  ;;  %v1105_v25 = vor.u32 %v1250_v19, %v1104_v18  ;;  %v1045_v26 = vor.u32 %v1233_v20, %v1042_v21  ;;  %v1112_v30 = vld [vmem:[%s1430_s18 + $0x90] sm:$0xf] }
  0x15   : > { %617 = vmatpush.bf16.msra.mxu0 %v1270_v4  ;;  %1283 = vmatpush.bf16.msra.mxu2 %v1270_v4  ;;  %v1109_v27 = vor.u32 %v1249_v22, %v1106_v23  ;;  %v1252_v31 = vld [vmem:[%s1430_s18 + $0x94] sm:$0xf0]  ;;  %v1235_v32 = vld [vmem:[%s1430_s18 + $0x14] sm:$0xf]  ;;  %v1050_v33 = vld [vmem:[%s1430_s18 + $0x18] sm:$0xf0] }
  0x16   : > { %706 = vmatpush.bf16.msra.mxu1 %v1278_v5  ;;  %1291 = vmatpush.bf16.msra.mxu3 %v1278_v5  ;;  %v1251_v34 = vld [vmem:[%s1430_s18 + $0x94] sm:$0xf]  ;;  %v1114_v35 = vld [vmem:[%s1430_s18 + $0x98] sm:$0xf0]  ;;  %v1113_v37 = vor.u32 %v1252_v31, %v1112_v30  ;;  %v1053_v38 = vor.u32 %v1235_v32, %v1050_v33  ;;  %v1056_v40 = vld [vmem:[%s1430_s18 + $0x20] sm:$0xf] }
  0x17   : > { %v1117_v39 = vor.u32 %v1251_v34, %v1114_v35  ;;  %v1238_v41 = vld [vmem:[%s1430_s18 + $0x24] sm:$0xf0]  ;;  %v1120_v42 = vld [vmem:[%s1430_s18 + $0xa0] sm:$0xf]  ;;  %v1237_v44 = vld [vmem:[%s1430_s18 + $0x24] sm:$0xf] }
  0x18   : > { %v1254_v43 = vld [vmem:[%s1430_s18 + $0xa4] sm:$0xf0]  ;;  %v1058_v45 = vld [vmem:[%s1430_s18 + $0x28] sm:$0xf0]  ;;  %v1253_v46 = vld [vmem:[%s1430_s18 + $0xa4] sm:$0xf]  ;;  %v1057_v48 = vor.u32 %v1238_v41, %v1056_v40 }
  0x19   : > { %618 = vmatpush.bf16.msra.mxu0 %v1269_v6  ;;  %1284 = vmatpush.bf16.msra.mxu2 %v1269_v6  ;;  %v1122_v47 = vld [vmem:[%s1430_s18 + $0xa8] sm:$0xf0]  ;;  %v1121_v49 = vor.u32 %v1254_v43, %v1120_v42  ;;  %v1061_v50 = vor.u32 %v1237_v44, %v1058_v45  ;;  %v1064_v52 = vld [vmem:[%s1430_s18 + $0x30] sm:$0xf]  ;;  %v1240_v53 = vld [vmem:[%s1430_s18 + $0x34] sm:$0xf0] }
  0x1a   : > { %707 = vmatpush.bf16.msra.mxu1 %v1277_v7  ;;  %1292 = vmatpush.bf16.msra.mxu3 %v1277_v7  ;;  %v1125_v51 = vor.u32 %v1253_v46, %v1122_v47  ;;  %v1128_v54 = vld [vmem:[%s1430_s18 + $0xb0] sm:$0xf]  ;;  %v1256_v55 = vld [vmem:[%s1430_s18 + $0xb4] sm:$0xf0]  ;;  %v1239_v56 = vld [vmem:[%s1430_s18 + $0x34] sm:$0xf]  ;;  %v1065_v60 = vor.u32 %v1240_v53, %v1064_v52 }
  0x1b   : > { %v1066_v57 = vld [vmem:[%s1430_s18 + $0x38] sm:$0xf0]  ;;  %v1255_v58 = vld [vmem:[%s1430_s18 + $0xb4] sm:$0xf]  ;;  %v1129_v61 = vor.u32 %v1256_v55, %v1128_v54  ;;  %v1072_v0 = vld [vmem:[%s1430_s18 + $0x40] sm:$0xf] }
  0x1c   : > { %v1130_v59 = vld [vmem:[%s1430_s18 + $0xb8] sm:$0xf0]  ;;  %v1069_v62 = vor.u32 %v1239_v56, %v1066_v57  ;;  %v1242_v1 = vld [vmem:[%s1430_s18 + $0x44] sm:$0xf0]  ;;  %v1136_v2 = vld [vmem:[%s1430_s18 + $0xc0] sm:$0xf] }
  0x1d   : > { %619 = vmatpush.bf16.msra.mxu0 %v1268_v8  ;;  %1285 = vmatpush.bf16.msra.mxu2 %v1268_v8  ;;  %v1133_v63 = vor.u32 %v1255_v58, %v1130_v59  ;;  %v1258_v3 = vld [vmem:[%s1430_s18 + $0xc4] sm:$0xf0]  ;;  %v1241_v4 = vld [vmem:[%s1430_s18 + $0x44] sm:$0xf]  ;;  %v1074_v5 = vld [vmem:[%s1430_s18 + $0x48] sm:$0xf0]  ;;  %v1073_v8 = vor.u32 %v1242_v1, %v1072_v0 }
  0x1e   : > { %708 = vmatpush.bf16.msra.mxu1 %v1276_v9  ;;  %1293 = vmatpush.bf16.msra.mxu3 %v1276_v9  ;;  %v1257_v6 = vld [vmem:[%s1430_s18 + $0xc4] sm:$0xf]  ;;  %v1138_v7 = vld [vmem:[%s1430_s18 + $0xc8] sm:$0xf0]  ;;  %v1137_v9 = vor.u32 %v1258_v3, %v1136_v2  ;;  %v1243_v16 = vld [vmem:[%s1430_s18 + $0x54] sm:$0xf] }
  0x1f   : > { %v1082_v17 = vld [vmem:[%s1430_s18 + $0x58] sm:$0xf0]  ;;  %v1259_v18 = vld [vmem:[%s1430_s18 + $0xd4] sm:$0xf]  ;;  %v1245_v28 = vld [vmem:[%s1430_s18 + $0x64] sm:$0xf] }
  0x20   : > { %v1146_v19 = vld [vmem:[%s1430_s18 + $0xd8] sm:$0xf0]  ;;  %v1085_v22 = vor.u32 %v1243_v16, %v1082_v17  ;;  %v1090_v29 = vld [vmem:[%s1430_s18 + $0x68] sm:$0xf0]  ;;  %v1261_v30 = vld [vmem:[%s1430_s18 + $0xe4] sm:$0xf] }
  0x21   : > { %620 = vmatpush.bf16.msra.mxu0 %v1267_v10  ;;  %1286 = vmatpush.bf16.msra.mxu2 %v1267_v10  ;;  %v1077_v10 = vor.u32 %v1241_v4, %v1074_v5  ;;  %v1149_v23 = vor.u32 %v1259_v18, %v1146_v19  ;;  %v1154_v31 = vld [vmem:[%s1430_s18 + $0xe8] sm:$0xf0]  ;;  %v1093_v34 = vor.u32 %v1245_v28, %v1090_v29  ;;  %v1264_v40 = vld [vmem:[%s1430_s18 + $0xf4] sm:$0xf0]  ;;  %v1247_v41 = vld [vmem:[%s1430_s18 + $0x74] sm:$0xf] }
  0x22   : > { %709 = vmatpush.bf16.msra.mxu1 %v1275_v11  ;;  %1294 = vmatpush.bf16.msra.mxu3 %v1275_v11  ;;  %v1141_v11 = vor.u32 %v1257_v6, %v1138_v7  ;;  %v1157_v35 = vor.u32 %v1261_v30, %v1154_v31  ;;  %v1098_v42 = vld [vmem:[%s1430_s18 + $0x78] sm:$0xf0]  ;;  %v1263_v43 = vld [vmem:[%s1430_s18 + $0xf4] sm:$0xf] }
  0x23   : > { %v1162_v44 = vld [vmem:[%s1430_s18 + $0xf8] sm:$0xf0]  ;;  %v1101_v47 = vor.u32 %v1247_v41, %v1098_v42 }
  0x25   : > { %621 = vmatpush.bf16.msra.mxu0 %v1266_v12  ;;  %1287 = vmatpush.bf16.msra.mxu2 %v1266_v12  ;;  %v1080_v12 = vld [vmem:[%s1430_s18 + $0x50] sm:$0xf] }
  0x26   : > { %710 = vmatpush.bf16.msra.mxu1 %v1274_v13  ;;  %1295 = vmatpush.bf16.msra.mxu3 %v1274_v13  ;;  %v1244_v13 = vld [vmem:[%s1430_s18 + $0x54] sm:$0xf0] }
  0x27   : > { %v1081_v20 = vor.u32 %v1244_v13, %v1080_v12 }
  0x29   : > { %622 = vmatpush.bf16.msra.mxu0 %v1265_v14  ;;  %1288 = vmatpush.bf16.msra.mxu2 %v1265_v14  ;;  %v1144_v14 = vld [vmem:[%s1430_s18 + $0xd0] sm:$0xf] }
  0x2a   : > { %711 = vmatpush.bf16.msra.mxu1 %v1273_v15  ;;  %1296 = vmatpush.bf16.msra.mxu3 %v1273_v15  ;;  %v1260_v15 = vld [vmem:[%s1430_s18 + $0xd4] sm:$0xf0] }
  0x2b   : > { %v1145_v21 = vor.u32 %v1260_v15, %v1144_v14 }
  0x2c   : > { %623 = vmatmul.bf16.vlgmr.msra.gmra.mxu0 %v1041_v24  ;;  %663 = vmatmul.bf16.vlgmr.msra.gmra.mxu2 %v1105_v25  ;;  %v1088_v24 = vld [vmem:[%s1430_s18 + $0x60] sm:$0xf]  ;;  %v1246_v25 = vld [vmem:[%s1430_s18 + $0x64] sm:$0xf0] }
  0x2d   : > { %712 = vmatmul.bf16.vlgmr.msra.gmra.mxu1 %v1045_v26  ;;  %752 = vmatmul.bf16.vlgmr.msra.gmra.mxu3 %v1109_v27  ;;  %v1152_v26 = vld [vmem:[%s1430_s18 + $0xe0] sm:$0xf]  ;;  %v1262_v27 = vld [vmem:[%s1430_s18 + $0xe4] sm:$0xf0]  ;;  %v1089_v32 = vor.u32 %v1246_v25, %v1088_v24 }
  0x2e   : > { %v1153_v33 = vor.u32 %v1262_v27, %v1152_v26 }
  0x3c   : > { %628 = vmatmul.bf16.gmra.mxu0 %v1049_v36  ;;  %668 = vmatmul.bf16.gmra.mxu2 %v1113_v37  ;;  %v1346_v36 = vmov 0.0   ;;  %v1096_v37 = vld [vmem:[%s1430_s18 + $0x70] sm:$0xf] }
  0x3d   : > { %717 = vmatmul.bf16.gmra.mxu1 %v1053_v38  ;;  %757 = vmatmul.bf16.gmra.mxu3 %v1117_v39  ;;  %231 = vst.msk [vmem:[#allocation2] sm:$0xff] %vm230_vm0, %v1346_v36  ;;  %v1248_v38 = vld [vmem:[%s1430_s18 + $0x74] sm:$0xf0]  ;;  %v1160_v39 = vld [vmem:[%s1430_s18 + $0xf0] sm:$0xf] }
  0x3e   : > { %232 = vst.msk [vmem:[#allocation2 + $0x8] sm:$0xff] %vm230_vm0, %v1346_v36  ;;  %v1097_v45 = vor.u32 %v1248_v38, %v1096_v37  ;;  %v1161_v46 = vor.u32 %v1264_v40, %v1160_v39 }
  0x3f   : > { %233 = vst.msk [vmem:[#allocation2 + $0x10] sm:$0xff] %vm230_vm0, %v1346_v36 }
  0x40   : > { %234 = vst.msk [vmem:[#allocation2 + $0x18] sm:$0xff] %vm230_vm0, %v1346_v36 }
  0x41   : > { %235 = vst.msk [vmem:[#allocation2 + $0x20] sm:$0xff] %vm230_vm0, %v1346_v36 }
  0x42   : > { %236 = vst.msk [vmem:[#allocation2 + $0x28] sm:$0xff] %vm230_vm0, %v1346_v36 }
  0x43   : > { %237 = vst.msk [vmem:[#allocation2 + $0x30] sm:$0xff] %vm230_vm0, %v1346_v36 }
  0x44   : > { %238 = vst.msk [vmem:[#allocation2 + $0x38] sm:$0xff] %vm230_vm0, %v1346_v36 }
  0x45   : > { %239 = vst.msk [vmem:[#allocation2 + $0x40] sm:$0xff] %vm230_vm0, %v1346_v36  ;;  %v264_v59 = vld [vmem:[#allocation2 + $0x8] sm:$0xff] }
  0x46   : > { %240 = vst.msk [vmem:[#allocation2 + $0x48] sm:$0xff] %vm230_vm0, %v1346_v36  ;;  %v265_v6 = vld [vmem:[#allocation2 + $0x10] sm:$0xff] }
  0x47   : > { %241 = vst.msk [vmem:[#allocation2 + $0x50] sm:$0xff] %vm230_vm0, %v1346_v36  ;;  %v266_v18 = vld [vmem:[#allocation2 + $0x18] sm:$0xff] }
  0x48   : > { %242 = vst.msk [vmem:[#allocation2 + $0x58] sm:$0xff] %vm230_vm0, %v1346_v36  ;;  %v267_v30 = vld [vmem:[#allocation2 + $0x20] sm:$0xff] }
  0x49   : > { %243 = vst.msk [vmem:[#allocation2 + $0x60] sm:$0xff] %vm230_vm0, %v1346_v36  ;;  %v268_v42 = vld [vmem:[#allocation2 + $0x28] sm:$0xff] }
  0x4a   : > { %244 = vst.msk [vmem:[#allocation2 + $0x68] sm:$0xff] %vm230_vm0, %v1346_v36 }
  0x4b   : > { %245 = vst.msk [vmem:[#allocation2 + $0x70] sm:$0xff] %vm230_vm0, %v1346_v36 }
  0x4c   : > { %633 = vmatmul.bf16.gmra.mxu0 %v1057_v48  ;;  %673 = vmatmul.bf16.gmra.mxu2 %v1121_v49  ;;  %v1165_v48 = vor.u32 %v1263_v43, %v1162_v44  ;;  %246 = vst.msk [vmem:[#allocation2 + $0x78] sm:$0xff] %vm230_vm0, %v1346_v36 }
  0x4d   : > { %722 = vmatmul.bf16.gmra.mxu1 %v1061_v50  ;;  %762 = vmatmul.bf16.gmra.mxu3 %v1125_v51  ;;  %247 = vst.msk [vmem:[#allocation2 + $0x80] sm:$0xff] %vm230_vm0, %v1346_v36  ;;  %v263_v50 = vld [vmem:[#allocation2] sm:$0xff] }
  0x4e   : > { %248 = vst.msk [vmem:[#allocation2 + $0x88] sm:$0xff] %vm230_vm0, %v1346_v36 }
  0x4f   : > { %249 = vst.msk [vmem:[#allocation2 + $0x90] sm:$0xff] %vm230_vm0, %v1346_v36 }
  0x50   : > { %250 = vst.msk [vmem:[#allocation2 + $0x98] sm:$0xff] %vm230_vm0, %v1346_v36 }
  0x51   : > { %251 = vst.msk [vmem:[#allocation2 + $0xa0] sm:$0xff] %vm230_vm0, %v1346_v36 }
  0x52   : > { %252 = vst.msk [vmem:[#allocation2 + $0xa8] sm:$0xff] %vm230_vm0, %v1346_v36 }
  0x53   : > { %253 = vst.msk [vmem:[#allocation2 + $0xb0] sm:$0xff] %vm230_vm0, %v1346_v36 }
  0x54   : > { %254 = vst.msk [vmem:[#allocation2 + $0xb8] sm:$0xff] %vm230_vm0, %v1346_v36  ;;  %v279_v55 = vld [vmem:[#allocation2 + $0x80] sm:$0xff] }
  0x55   : > { %255 = vst.msk [vmem:[#allocation2 + $0xc0] sm:$0xff] %vm230_vm0, %v1346_v36  ;;  %v280_v2 = vld [vmem:[#allocation2 + $0x88] sm:$0xff] }
  0x56   : > { %256 = vst.msk [vmem:[#allocation2 + $0xc8] sm:$0xff] %vm230_vm0, %v1346_v36  ;;  %v281_v14 = vld [vmem:[#allocation2 + $0x90] sm:$0xff] }
  0x57   : > { %257 = vst.msk [vmem:[#allocation2 + $0xd0] sm:$0xff] %vm230_vm0, %v1346_v36  ;;  %v282_v26 = vld [vmem:[#allocation2 + $0x98] sm:$0xff] }
  0x58   : > { %258 = vst.msk [vmem:[#allocation2 + $0xd8] sm:$0xff] %vm230_vm0, %v1346_v36  ;;  %v283_v38 = vld [vmem:[#allocation2 + $0xa0] sm:$0xff] }
  0x59   : > { %259 = vst.msk [vmem:[#allocation2 + $0xe0] sm:$0xff] %vm230_vm0, %v1346_v36 }
  0x5a   : > { %260 = vst.msk [vmem:[#allocation2 + $0xe8] sm:$0xff] %vm230_vm0, %v1346_v36 }
  0x5b   : > { %261 = vst.msk [vmem:[#allocation2 + $0xf0] sm:$0xff] %vm230_vm0, %v1346_v36 }
  0x5c   : > { %638 = vmatmul.bf16.gmra.mxu0 %v1065_v60  ;;  %678 = vmatmul.bf16.gmra.mxu2 %v1129_v61  ;;  %262 = vst.msk [vmem:[#allocation2 + $0xf8] sm:$0xff] %vm230_vm0, %v1346_v36 }
  0x5d   : > { %727 = vmatmul.bf16.gmra.mxu1 %v1069_v62  ;;  %767 = vmatmul.bf16.gmra.mxu3 %v1133_v63 }
  0x6c   : > { %643 = vmatmul.bf16.gmra.mxu0 %v1073_v8  ;;  %683 = vmatmul.bf16.gmra.mxu2 %v1137_v9 }
  0x6d   : > { %732 = vmatmul.bf16.gmra.mxu1 %v1077_v10  ;;  %772 = vmatmul.bf16.gmra.mxu3 %v1141_v11 }
  0x7c   : > { %648 = vmatmul.bf16.gmra.mxu0 %v1081_v20  ;;  %688 = vmatmul.bf16.gmra.mxu2 %v1145_v21 }
  0x7d   : > { %737 = vmatmul.bf16.gmra.mxu1 %v1085_v22  ;;  %777 = vmatmul.bf16.gmra.mxu3 %v1149_v23 }
  0x8c   : > { %653 = vmatmul.bf16.gmra.mxu0 %v1089_v32  ;;  %693 = vmatmul.bf16.gmra.mxu2 %v1153_v33 }
  0x8d   : > { %742 = vmatmul.bf16.gmra.mxu1 %v1093_v34  ;;  %782 = vmatmul.bf16.gmra.mxu3 %v1157_v35 }
  0x9c   : > { %658 = vmatmul.bf16.gmra.mxu0 %v1097_v45  ;;  %698 = vmatmul.bf16.gmra.mxu2 %v1161_v46 }
  0x9d   : > { %747 = vmatmul.bf16.gmra.mxu1 %v1101_v47  ;;  %787 = vmatmul.bf16.gmra.mxu3 %v1165_v48 }
  0xa9   : > { %v624_v49 = vpop.f32.mrf.mxu0 }
  0xaa   : > { %v713_v51 = vpop.f32.mrf.mxu1 }
  0xab   : > { %v714_v52 = vadd.f32 %v713_v51, %v624_v49 }
  0xad   : > { %v793_v53 = vadd.f32 %v714_v52, %v263_v50  ;;  %v284_v50 = vld [vmem:[#allocation2 + $0xa8] sm:$0xff] }
  0xaf   : > { %826 = vst.msk [vmem:[#allocation2] sm:$0xff] %vm230_vm0, %v793_v53  ;;  %v664_v54 = vpop.f32.mrf.mxu2 }
  0xb0   : > { %v753_v56 = vpop.f32.mrf.mxu3 }
  0xb1   : > { %v754_v57 = vadd.f32 %v753_v56, %v664_v54  ;;  %v626_v58 = vpop.f32.mrf.mxu0  ;;  %v269_v54 = vld [vmem:[#allocation2 + $0x30] sm:$0xff] }
  0xb2   : > { %v715_v60 = vpop.f32.mrf.mxu1 }
  0xb3   : > { %v809_v61 = vadd.f32 %v754_v57, %v279_v55  ;;  %v716_v62 = vadd.f32 %v715_v60, %v626_v58 }
  0xb5   : > { %842 = vst.msk [vmem:[#allocation2 + $0x80] sm:$0xff] %vm230_vm0, %v809_v61  ;;  %v794_v63 = vadd.f32 %v716_v62, %v264_v59  ;;  %v285_v62 = vld [vmem:[#allocation2 + $0xb0] sm:$0xff] }
  0xb6   : > { %v861_v0 = vld [vmem:[#allocation2] sm:$0xff] }
  0xb7   : > { %893 = vst.msk [vmem:[%s1543_s28] sm:$0xff] %vm230_vm0, %v861_v0  ;;  %v666_v1 = vpop.f32.mrf.mxu2 }
  0xb8   : > { %827 = vst.msk [vmem:[#allocation2 + $0x8] sm:$0xff] %vm230_vm0, %v794_v63  ;;  %v755_v3 = vpop.f32.mrf.mxu3 }
  0xb9   : > { %v756_v4 = vadd.f32 %v755_v3, %v666_v1  ;;  %v629_v5 = vpop.f32.mrf.mxu0 }
  0xba   : > { %v718_v7 = vpop.f32.mrf.mxu1 }
  0xbb   : > { %v810_v8 = vadd.f32 %v756_v4, %v280_v2  ;;  %v719_v9 = vadd.f32 %v718_v7, %v629_v5  ;;  %v270_v2 = vld [vmem:[#allocation2 + $0x38] sm:$0xff] }
  0xbc   : > { %v877_v10 = vld [vmem:[#allocation2 + $0x80] sm:$0xff] }
  0xbd   : > { %909 = vst.msk [vmem:[%s1543_s28 + $0x80] sm:$0xff] %vm230_vm0, %v877_v10  ;;  %v795_v11 = vadd.f32 %v719_v9, %v265_v6  ;;  %v286_v10 = vld [vmem:[#allocation2 + $0xb8] sm:$0xff] }
  0xbe   : > { %843 = vst.msk [vmem:[#allocation2 + $0x88] sm:$0xff] %vm230_vm0, %v810_v8 }
  0xbf   : > { %v862_v12 = vld [vmem:[#allocation2 + $0x8] sm:$0xff]  ;;  %828 = vst.msk [vmem:[#allocation2 + $0x10] sm:$0xff] %vm230_vm0, %v795_v11  ;;  %v669_v13 = vpop.f32.mrf.mxu2 }
  0xc0   : > { %894 = vst.msk [vmem:[%s1543_s28 + $0x8] sm:$0xff] %vm230_vm0, %v862_v12  ;;  %v758_v15 = vpop.f32.mrf.mxu3 }
  0xc1   : > { %v759_v16 = vadd.f32 %v758_v15, %v669_v13  ;;  %v631_v17 = vpop.f32.mrf.mxu0 }
  0xc2   : > { %v720_v19 = vpop.f32.mrf.mxu1 }
  0xc3   : > { %v811_v20 = vadd.f32 %v759_v16, %v281_v14  ;;  %v721_v21 = vadd.f32 %v720_v19, %v631_v17  ;;  %v271_v14 = vld [vmem:[#allocation2 + $0x40] sm:$0xff] }
  0xc5   : > { %v878_v22 = vld [vmem:[#allocation2 + $0x88] sm:$0xff]  ;;  %844 = vst.msk [vmem:[#allocation2 + $0x90] sm:$0xff] %vm230_vm0, %v811_v20  ;;  %v796_v23 = vadd.f32 %v721_v21, %v266_v18 }
  0xc6   : > { %910 = vst.msk [vmem:[%s1543_s28 + $0x88] sm:$0xff] %vm230_vm0, %v878_v22  ;;  %v863_v24 = vld [vmem:[#allocation2 + $0x10] sm:$0xff]  ;;  %v287_v22 = vld [vmem:[#allocation2 + $0xc0] sm:$0xff] }
  0xc7   : > { %895 = vst.msk [vmem:[%s1543_s28 + $0x10] sm:$0xff] %vm230_vm0, %v863_v24  ;;  %v671_v25 = vpop.f32.mrf.mxu2 }
  0xc8   : > { %829 = vst.msk [vmem:[#allocation2 + $0x18] sm:$0xff] %vm230_vm0, %v796_v23  ;;  %v760_v27 = vpop.f32.mrf.mxu3 }
  0xc9   : > { %v761_v28 = vadd.f32 %v760_v27, %v671_v25  ;;  %v634_v29 = vpop.f32.mrf.mxu0 }
  0xca   : > { %v723_v31 = vpop.f32.mrf.mxu1 }
  0xcb   : > { %v812_v32 = vadd.f32 %v761_v28, %v282_v26  ;;  %v724_v33 = vadd.f32 %v723_v31, %v634_v29  ;;  %v272_v26 = vld [vmem:[#allocation2 + $0x48] sm:$0xff] }
  0xcc   : > { %v879_v34 = vld [vmem:[#allocation2 + $0x90] sm:$0xff] }
  0xcd   : > { %911 = vst.msk [vmem:[%s1543_s28 + $0x90] sm:$0xff] %vm230_vm0, %v879_v34  ;;  %v797_v35 = vadd.f32 %v724_v33, %v267_v30  ;;  %v288_v34 = vld [vmem:[#allocation2 + $0xc8] sm:$0xff] }
  0xce   : > { %845 = vst.msk [vmem:[#allocation2 + $0x98] sm:$0xff] %vm230_vm0, %v812_v32 }
  0xcf   : > { %v864_v36 = vld [vmem:[#allocation2 + $0x18] sm:$0xff]  ;;  %830 = vst.msk [vmem:[#allocation2 + $0x20] sm:$0xff] %vm230_vm0, %v797_v35  ;;  %v674_v37 = vpop.f32.mrf.mxu2 }
  0xd0   : > { %896 = vst.msk [vmem:[%s1543_s28 + $0x18] sm:$0xff] %vm230_vm0, %v864_v36  ;;  %v763_v39 = vpop.f32.mrf.mxu3 }
  0xd1   : > { %v764_v40 = vadd.f32 %v763_v39, %v674_v37  ;;  %v636_v41 = vpop.f32.mrf.mxu0 }
  0xd2   : > { %v725_v43 = vpop.f32.mrf.mxu1 }
  0xd3   : > { %v813_v44 = vadd.f32 %v764_v40, %v283_v38  ;;  %v726_v45 = vadd.f32 %v725_v43, %v636_v41  ;;  %v273_v38 = vld [vmem:[#allocation2 + $0x50] sm:$0xff] }
  0xd5   : > { %v880_v46 = vld [vmem:[#allocation2 + $0x98] sm:$0xff]  ;;  %846 = vst.msk [vmem:[#allocation2 + $0xa0] sm:$0xff] %vm230_vm0, %v813_v44  ;;  %v798_v47 = vadd.f32 %v726_v45, %v268_v42 }
  0xd6   : > { %912 = vst.msk [vmem:[%s1543_s28 + $0x98] sm:$0xff] %vm230_vm0, %v880_v46  ;;  %v865_v48 = vld [vmem:[#allocation2 + $0x20] sm:$0xff]  ;;  %v289_v46 = vld [vmem:[#allocation2 + $0xd0] sm:$0xff] }
  0xd7   : > { %897 = vst.msk [vmem:[%s1543_s28 + $0x20] sm:$0xff] %vm230_vm0, %v865_v48  ;;  %v676_v49 = vpop.f32.mrf.mxu2 }
  0xd8   : > { %831 = vst.msk [vmem:[#allocation2 + $0x28] sm:$0xff] %vm230_vm0, %v798_v47  ;;  %v765_v51 = vpop.f32.mrf.mxu3 }
  0xd9   : > { %v766_v52 = vadd.f32 %v765_v51, %v676_v49  ;;  %v639_v53 = vpop.f32.mrf.mxu0 }
  0xda   : > { %v728_v55 = vpop.f32.mrf.mxu1 }
  0xdb   : > { %v814_v56 = vadd.f32 %v766_v52, %v284_v50  ;;  %v729_v57 = vadd.f32 %v728_v55, %v639_v53  ;;  %v274_v50 = vld [vmem:[#allocation2 + $0x58] sm:$0xff] }
  0xdc   : > { %v881_v58 = vld [vmem:[#allocation2 + $0xa0] sm:$0xff] }
  0xdd   : > { %913 = vst.msk [vmem:[%s1543_s28 + $0xa0] sm:$0xff] %vm230_vm0, %v881_v58  ;;  %v799_v59 = vadd.f32 %v729_v57, %v269_v54  ;;  %v290_v58 = vld [vmem:[#allocation2 + $0xd8] sm:$0xff] }
  0xde   : > { %847 = vst.msk [vmem:[#allocation2 + $0xa8] sm:$0xff] %vm230_vm0, %v814_v56 }
  0xdf   : > { %v866_v60 = vld [vmem:[#allocation2 + $0x28] sm:$0xff]  ;;  %832 = vst.msk [vmem:[#allocation2 + $0x30] sm:$0xff] %vm230_vm0, %v799_v59  ;;  %v679_v61 = vpop.f32.mrf.mxu2 }
  0xe0   : > { %898 = vst.msk [vmem:[%s1543_s28 + $0x28] sm:$0xff] %vm230_vm0, %v866_v60  ;;  %v768_v63 = vpop.f32.mrf.mxu3 }
  0xe1   : > { %v769_v0 = vadd.f32 %v768_v63, %v679_v61  ;;  %v641_v1 = vpop.f32.mrf.mxu0 }
  0xe2   : > { %v730_v3 = vpop.f32.mrf.mxu1 }
  0xe3   : > { %v815_v4 = vadd.f32 %v769_v0, %v285_v62  ;;  %v731_v5 = vadd.f32 %v730_v3, %v641_v1  ;;  %v275_v62 = vld [vmem:[#allocation2 + $0x60] sm:$0xff] }
  0xe5   : > { %v882_v6 = vld [vmem:[#allocation2 + $0xa8] sm:$0xff]  ;;  %848 = vst.msk [vmem:[#allocation2 + $0xb0] sm:$0xff] %vm230_vm0, %v815_v4  ;;  %v800_v7 = vadd.f32 %v731_v5, %v270_v2 }
  0xe6   : > { %914 = vst.msk [vmem:[%s1543_s28 + $0xa8] sm:$0xff] %vm230_vm0, %v882_v6  ;;  %v867_v8 = vld [vmem:[#allocation2 + $0x30] sm:$0xff]  ;;  %v291_v6 = vld [vmem:[#allocation2 + $0xe0] sm:$0xff] }
  0xe7   : > { %899 = vst.msk [vmem:[%s1543_s28 + $0x30] sm:$0xff] %vm230_vm0, %v867_v8  ;;  %v681_v9 = vpop.f32.mrf.mxu2 }
  0xe8   : > { %833 = vst.msk [vmem:[#allocation2 + $0x38] sm:$0xff] %vm230_vm0, %v800_v7  ;;  %v770_v11 = vpop.f32.mrf.mxu3 }
  0xe9   : > { %v771_v12 = vadd.f32 %v770_v11, %v681_v9  ;;  %v644_v13 = vpop.f32.mrf.mxu0 }
  0xea   : > { %v733_v15 = vpop.f32.mrf.mxu1 }
  0xeb   : > { %v816_v16 = vadd.f32 %v771_v12, %v286_v10  ;;  %v734_v17 = vadd.f32 %v733_v15, %v644_v13  ;;  %v276_v10 = vld [vmem:[#allocation2 + $0x68] sm:$0xff] }
  0xec   : > { %v883_v18 = vld [vmem:[#allocation2 + $0xb0] sm:$0xff] }
  0xed   : > { %915 = vst.msk [vmem:[%s1543_s28 + $0xb0] sm:$0xff] %vm230_vm0, %v883_v18  ;;  %v801_v19 = vadd.f32 %v734_v17, %v271_v14  ;;  %v292_v18 = vld [vmem:[#allocation2 + $0xe8] sm:$0xff] }
  0xee   : > { %849 = vst.msk [vmem:[#allocation2 + $0xb8] sm:$0xff] %vm230_vm0, %v816_v16 }
  0xef   : > { %v868_v20 = vld [vmem:[#allocation2 + $0x38] sm:$0xff]  ;;  %834 = vst.msk [vmem:[#allocation2 + $0x40] sm:$0xff] %vm230_vm0, %v801_v19  ;;  %v684_v21 = vpop.f32.mrf.mxu2 }
  0xf0   : > { %900 = vst.msk [vmem:[%s1543_s28 + $0x38] sm:$0xff] %vm230_vm0, %v868_v20  ;;  %v773_v23 = vpop.f32.mrf.mxu3 }
  0xf1   : > { %v774_v24 = vadd.f32 %v773_v23, %v684_v21  ;;  %v646_v25 = vpop.f32.mrf.mxu0 }
  0xf2   : > { %v735_v27 = vpop.f32.mrf.mxu1 }
  0xf3   : > { %v817_v28 = vadd.f32 %v774_v24, %v287_v22  ;;  %v736_v29 = vadd.f32 %v735_v27, %v646_v25  ;;  %v277_v22 = vld [vmem:[#allocation2 + $0x70] sm:$0xff] }
  0xf5   : > { %v884_v30 = vld [vmem:[#allocation2 + $0xb8] sm:$0xff]  ;;  %850 = vst.msk [vmem:[#allocation2 + $0xc0] sm:$0xff] %vm230_vm0, %v817_v28  ;;  %v802_v31 = vadd.f32 %v736_v29, %v272_v26 }
  0xf6   : > { %916 = vst.msk [vmem:[%s1543_s28 + $0xb8] sm:$0xff] %vm230_vm0, %v884_v30  ;;  %v869_v32 = vld [vmem:[#allocation2 + $0x40] sm:$0xff]  ;;  %v293_v30 = vld [vmem:[#allocation2 + $0xf0] sm:$0xff] }
  0xf7   : > { %901 = vst.msk [vmem:[%s1543_s28 + $0x40] sm:$0xff] %vm230_vm0, %v869_v32  ;;  %v686_v33 = vpop.f32.mrf.mxu2 }
  0xf8   : > { %835 = vst.msk [vmem:[#allocation2 + $0x48] sm:$0xff] %vm230_vm0, %v802_v31  ;;  %v775_v35 = vpop.f32.mrf.mxu3 }
  0xf9   : > { %v776_v36 = vadd.f32 %v775_v35, %v686_v33  ;;  %v649_v37 = vpop.f32.mrf.mxu0 }
  0xfa   : > { %v738_v39 = vpop.f32.mrf.mxu1 }
  0xfb   : > { %v818_v40 = vadd.f32 %v776_v36, %v288_v34  ;;  %v739_v41 = vadd.f32 %v738_v39, %v649_v37  ;;  %v278_v34 = vld [vmem:[#allocation2 + $0x78] sm:$0xff] }
  0xfc   : > { %v885_v42 = vld [vmem:[#allocation2 + $0xc0] sm:$0xff] }
  0xfd   : > { %917 = vst.msk [vmem:[%s1543_s28 + $0xc0] sm:$0xff] %vm230_vm0, %v885_v42  ;;  %v803_v43 = vadd.f32 %v739_v41, %v273_v38  ;;  %v294_v42 = vld [vmem:[#allocation2 + $0xf8] sm:$0xff] }
  0xfe   : > { %851 = vst.msk [vmem:[#allocation2 + $0xc8] sm:$0xff] %vm230_vm0, %v818_v40 }
  0xff   : > { %v870_v44 = vld [vmem:[#allocation2 + $0x48] sm:$0xff]  ;;  %836 = vst.msk [vmem:[#allocation2 + $0x50] sm:$0xff] %vm230_vm0, %v803_v43  ;;  %v689_v45 = vpop.f32.mrf.mxu2 }
 0x100   : > { %902 = vst.msk [vmem:[%s1543_s28 + $0x48] sm:$0xff] %vm230_vm0, %v870_v44  ;;  %v778_v47 = vpop.f32.mrf.mxu3 }
 0x101   : > { %v779_v48 = vadd.f32 %v778_v47, %v689_v45  ;;  %v651_v49 = vpop.f32.mrf.mxu0 }
 0x102   : > { %v740_v51 = vpop.f32.mrf.mxu1 }
 0x103   : > { %v819_v52 = vadd.f32 %v779_v48, %v289_v46  ;;  %v741_v53 = vadd.f32 %v740_v51, %v651_v49 }
 0x105   : > { %v886_v54 = vld [vmem:[#allocation2 + $0xc8] sm:$0xff]  ;;  %852 = vst.msk [vmem:[#allocation2 + $0xd0] sm:$0xff] %vm230_vm0, %v819_v52  ;;  %v804_v55 = vadd.f32 %v741_v53, %v274_v50 }
 0x106   : > { %918 = vst.msk [vmem:[%s1543_s28 + $0xc8] sm:$0xff] %vm230_vm0, %v886_v54  ;;  %v871_v56 = vld [vmem:[#allocation2 + $0x50] sm:$0xff] }
 0x107   : > { %903 = vst.msk [vmem:[%s1543_s28 + $0x50] sm:$0xff] %vm230_vm0, %v871_v56  ;;  %v691_v57 = vpop.f32.mrf.mxu2 }
 0x108   : > { %837 = vst.msk [vmem:[#allocation2 + $0x58] sm:$0xff] %vm230_vm0, %v804_v55  ;;  %v780_v59 = vpop.f32.mrf.mxu3 }
 0x109   : > { %v781_v60 = vadd.f32 %v780_v59, %v691_v57  ;;  %v654_v61 = vpop.f32.mrf.mxu0 }
 0x10a   : > { %v743_v63 = vpop.f32.mrf.mxu1 }
 0x10b   : > { %v820_v0 = vadd.f32 %v781_v60, %v290_v58  ;;  %v744_v1 = vadd.f32 %v743_v63, %v654_v61 }
 0x10c   : > { %v887_v2 = vld [vmem:[#allocation2 + $0xd0] sm:$0xff] }
 0x10d   : > { %919 = vst.msk [vmem:[%s1543_s28 + $0xd0] sm:$0xff] %vm230_vm0, %v887_v2  ;;  %v805_v3 = vadd.f32 %v744_v1, %v275_v62 }
 0x10e   : > { %853 = vst.msk [vmem:[#allocation2 + $0xd8] sm:$0xff] %vm230_vm0, %v820_v0 }
 0x10f   : > { %v872_v4 = vld [vmem:[#allocation2 + $0x58] sm:$0xff]  ;;  %838 = vst.msk [vmem:[#allocation2 + $0x60] sm:$0xff] %vm230_vm0, %v805_v3  ;;  %v694_v5 = vpop.f32.mrf.mxu2 }
 0x110   : > { %904 = vst.msk [vmem:[%s1543_s28 + $0x58] sm:$0xff] %vm230_vm0, %v872_v4  ;;  %v783_v7 = vpop.f32.mrf.mxu3 }
 0x111   : > { %v784_v8 = vadd.f32 %v783_v7, %v694_v5  ;;  %v656_v9 = vpop.f32.mrf.mxu0 }
 0x112   : > { %v745_v11 = vpop.f32.mrf.mxu1 }
 0x113   : > { %v821_v12 = vadd.f32 %v784_v8, %v291_v6  ;;  %v746_v13 = vadd.f32 %v745_v11, %v656_v9 }
 0x115   : > { %v888_v14 = vld [vmem:[#allocation2 + $0xd8] sm:$0xff]  ;;  %854 = vst.msk [vmem:[#allocation2 + $0xe0] sm:$0xff] %vm230_vm0, %v821_v12  ;;  %v806_v15 = vadd.f32 %v746_v13, %v276_v10 }
 0x116   : > { %920 = vst.msk [vmem:[%s1543_s28 + $0xd8] sm:$0xff] %vm230_vm0, %v888_v14  ;;  %v873_v16 = vld [vmem:[#allocation2 + $0x60] sm:$0xff] }
 0x117   : > { %905 = vst.msk [vmem:[%s1543_s28 + $0x60] sm:$0xff] %vm230_vm0, %v873_v16  ;;  %v696_v17 = vpop.f32.mrf.mxu2 }
 0x118   : > { %839 = vst.msk [vmem:[#allocation2 + $0x68] sm:$0xff] %vm230_vm0, %v806_v15  ;;  %v785_v19 = vpop.f32.mrf.mxu3 }
 0x119   : > { %v786_v20 = vadd.f32 %v785_v19, %v696_v17  ;;  %v659_v21 = vpop.f32.mrf.mxu0 }
 0x11a   : > { %v748_v23 = vpop.f32.mrf.mxu1 }
 0x11b   : > { %v822_v24 = vadd.f32 %v786_v20, %v292_v18  ;;  %v749_v25 = vadd.f32 %v748_v23, %v659_v21 }
 0x11c   : > { %v889_v26 = vld [vmem:[#allocation2 + $0xe0] sm:$0xff] }
 0x11d   : > { %921 = vst.msk [vmem:[%s1543_s28 + $0xe0] sm:$0xff] %vm230_vm0, %v889_v26  ;;  %v807_v27 = vadd.f32 %v749_v25, %v277_v22 }
 0x11e   : > { %855 = vst.msk [vmem:[#allocation2 + $0xe8] sm:$0xff] %vm230_vm0, %v822_v24 }
 0x11f   : > { %v874_v28 = vld [vmem:[#allocation2 + $0x68] sm:$0xff]  ;;  %840 = vst.msk [vmem:[#allocation2 + $0x70] sm:$0xff] %vm230_vm0, %v807_v27  ;;  %v699_v29 = vpop.f32.mrf.mxu2 }
 0x120   : > { %906 = vst.msk [vmem:[%s1543_s28 + $0x68] sm:$0xff] %vm230_vm0, %v874_v28  ;;  %v788_v31 = vpop.f32.mrf.mxu3 }
 0x121   : > { %v789_v32 = vadd.f32 %v788_v31, %v699_v29  ;;  %v661_v33 = vpop.f32.mrf.mxu0 }
 0x122   : > { %v750_v35 = vpop.f32.mrf.mxu1 }
 0x123   : > { %v823_v36 = vadd.f32 %v789_v32, %v293_v30  ;;  %v751_v37 = vadd.f32 %v750_v35, %v661_v33 }
 0x125   : > { %v890_v38 = vld [vmem:[#allocation2 + $0xe8] sm:$0xff]  ;;  %856 = vst.msk [vmem:[#allocation2 + $0xf0] sm:$0xff] %vm230_vm0, %v823_v36  ;;  %v808_v39 = vadd.f32 %v751_v37, %v278_v34 }
 0x126   : > { %922 = vst.msk [vmem:[%s1543_s28 + $0xe8] sm:$0xff] %vm230_vm0, %v890_v38  ;;  %v875_v40 = vld [vmem:[#allocation2 + $0x70] sm:$0xff] }
 0x127   : > { %907 = vst.msk [vmem:[%s1543_s28 + $0x70] sm:$0xff] %vm230_vm0, %v875_v40  ;;  %v701_v41 = vpop.f32.mrf.mxu2 }
 0x128   : > { %841 = vst.msk [vmem:[#allocation2 + $0x78] sm:$0xff] %vm230_vm0, %v808_v39  ;;  %v790_v43 = vpop.f32.mrf.mxu3 }
 0x129   : > { %v791_v44 = vadd.f32 %v790_v43, %v701_v41 }
 0x12b   : > { %v824_v45 = vadd.f32 %v791_v44, %v294_v42 }
 0x12c   : > { %v891_v46 = vld [vmem:[#allocation2 + $0xf0] sm:$0xff] }
 0x12d   : > { %923 = vst.msk [vmem:[%s1543_s28 + $0xf0] sm:$0xff] %vm230_vm0, %v891_v46 }
 0x12e   : > { %857 = vst.msk [vmem:[#allocation2 + $0xf8] sm:$0xff] %vm230_vm0, %v824_v45 }
 0x12f   : > { %v876_v47 = vld [vmem:[#allocation2 + $0x78] sm:$0xff] }
 0x130   : > { %908 = vst.msk [vmem:[%s1543_s28 + $0x78] sm:$0xff] %vm230_vm0, %v876_v47 }
 0x135   : > { %v892_v48 = vld [vmem:[#allocation2 + $0xf8] sm:$0xff] }
 0x136   : > { %924 = vst.msk [vmem:[%s1543_s28 + $0xf8] sm:$0xff] %vm230_vm0, %v892_v48 }
 0x137 PF: > { %s12_s11 = sadd.s32 1, %s1344_s11   ;;  %s1652_s9 = smov %s1340_s10 }
 0x138   : > { %p9_p5 = scmp.ge.s32.totalorder %s12_s11, 4   ;;  %s1653_s10 = smov %s1655_s12 }
 0x13a   :  { %11 = sbr.rel (!%p9_p5) target bundleno = 2 (0x2), region = 69 }

// kernel: resnet18_apply.66
= control target key start
LH: loop header
LB: loop body
LE: loop exit
PB: predicated region body
PF: predicated region fallthrough
CT: control target
= control target key end

     0   :  { %s470_s0 = inlined_call_operand.vmem [shape: f32[64,128], index: 0, kind: input, shape index: {}]   ;;  %s471_s1 = inlined_call_operand.vmem [shape: f32[64,128], index: 1, kind: input, shape index: {}]   ;;  %s472_s2 = inlined_call_operand.vmem [shape: f32[64,128], index: 2, kind: input, shape index: {}]   ;;  %s473_s3 = inlined_call_operand.vmem [shape: f32[64,128], index: 3, kind: input, shape index: {}]   ;;  %s474_s4 = inlined_call_operand.vmem [shape: f32[64,128], index: 4, kind: input, shape index: {}]   ;;  %s475_s5 = inlined_call_operand.vmem [shape: f32[64,128], index: 5, kind: input, shape index: {}]   ;;  %s476_s6 = inlined_call_operand.vmem [shape: f32[64,128], index: 6, kind: input, shape index: {}]   ;;  %s477_s7 = inlined_call_operand.vmem [shape: f32[64,128], index: 7, kind: input, shape index: {}]   ;;  %s478_s8 = inlined_call_operand.vmem [shape: f32[64,128], index: 8, kind: input, shape index: {}]   ;;  %s479_s9 = inlined_call_operand.vmem [shape: f32[64,128], index: 9, kind: output, shape index: {}]  }
   0x1   :  { %v32_v0 = vld [vmem:[%s470_s0] sm:$0xff]  ;;  %v33_v6 = vld [vmem:[%s470_s0 + $0x8] sm:$0xff]  ;;  %v34_v15 = vld [vmem:[%s470_s0 + $0x10] sm:$0xff] }
   0x2   :  { %v40_v1 = vld [vmem:[%s471_s1] sm:$0xff]  ;;  %v41_v7 = vld [vmem:[%s471_s1 + $0x8] sm:$0xff]  ;;  %v42_v16 = vld [vmem:[%s471_s1 + $0x10] sm:$0xff] }
   0x3   :  { %v56_v2 = vld [vmem:[%s472_s2] sm:$0xff]  ;;  %v48_v3 = vmax.f32 %v32_v0, %v40_v1  ;;  %v57_v8 = vld [vmem:[%s472_s2 + $0x8] sm:$0xff]  ;;  %v49_v10 = vmax.f32 %v33_v6, %v41_v7  ;;  %v58_v17 = vld [vmem:[%s472_s2 + $0x10] sm:$0xff]  ;;  %v50_v20 = vmax.f32 %v34_v15, %v42_v16 }
   0x4   :  { %v72_v4 = vld [vmem:[%s473_s3] sm:$0xff]  ;;  %v73_v13 = vld [vmem:[%s473_s3 + $0x8] sm:$0xff]  ;;  %v74_v24 = vld [vmem:[%s473_s3 + $0x10] sm:$0xff] }
   0x5   :  { %v64_v5 = vmax.f32 %v48_v3, %v56_v2  ;;  %v88_v9 = vld [vmem:[%s474_s4] sm:$0xff]  ;;  %v65_v14 = vmax.f32 %v49_v10, %v57_v8  ;;  %v89_v19 = vld [vmem:[%s474_s4 + $0x8] sm:$0xff]  ;;  %v66_v26 = vmax.f32 %v50_v20, %v58_v17  ;;  %v35_v27 = vld [vmem:[%s470_s0 + $0x18] sm:$0xff] }
   0x6   :  { %v104_v12 = vld [vmem:[%s475_s5] sm:$0xff]  ;;  %v105_v23 = vld [vmem:[%s475_s5 + $0x8] sm:$0xff]  ;;  %v43_v28 = vld [vmem:[%s471_s1 + $0x18] sm:$0xff] }
   0x7   :  { %v80_v11 = vmax.f32 %v64_v5, %v72_v4  ;;  %v120_v21 = vld [vmem:[%s476_s6] sm:$0xff]  ;;  %v81_v22 = vmax.f32 %v65_v14, %v73_v13  ;;  %v59_v29 = vld [vmem:[%s472_s2 + $0x18] sm:$0xff]  ;;  %v90_v33 = vld [vmem:[%s474_s4 + $0x10] sm:$0xff]  ;;  %v51_v34 = vmax.f32 %v35_v27, %v43_v28  ;;  %v82_v37 = vmax.f32 %v66_v26, %v74_v24 }
   0x8   :  { %v136_v30 = vld [vmem:[%s477_s7] sm:$0xff]  ;;  %v121_v36 = vld [vmem:[%s476_s6 + $0x8] sm:$0xff]  ;;  %v106_v38 = vld [vmem:[%s475_s5 + $0x10] sm:$0xff] }
   0x9   :  { %v96_v18 = vmax.f32 %v80_v11, %v88_v9  ;;  %v152_v31 = vld [vmem:[%s478_s8] sm:$0xff]  ;;  %v97_v32 = vmax.f32 %v81_v22, %v89_v19  ;;  %v75_v39 = vld [vmem:[%s473_s3 + $0x18] sm:$0xff]  ;;  %v67_v41 = vmax.f32 %v51_v34, %v59_v29  ;;  %v137_v46 = vld [vmem:[%s477_s7 + $0x8] sm:$0xff]  ;;  %v98_v48 = vmax.f32 %v82_v37, %v90_v33 }
   0xa   :  { %v36_v42 = vld [vmem:[%s470_s0 + $0x20] sm:$0xff]  ;;  %v153_v47 = vld [vmem:[%s478_s8 + $0x8] sm:$0xff]  ;;  %v91_v49 = vld [vmem:[%s474_s4 + $0x18] sm:$0xff] }
   0xb   :  { %v112_v25 = vmax.f32 %v96_v18, %v104_v12  ;;  %v113_v40 = vmax.f32 %v97_v32, %v105_v23  ;;  %v44_v43 = vld [vmem:[%s471_s1 + $0x20] sm:$0xff]  ;;  %v122_v52 = vld [vmem:[%s476_s6 + $0x10] sm:$0xff]  ;;  %v83_v53 = vmax.f32 %v67_v41, %v75_v39  ;;  %v107_v54 = vld [vmem:[%s475_s5 + $0x18] sm:$0xff]  ;;  %v114_v57 = vmax.f32 %v98_v48, %v106_v38 }
   0xc   :  { %v60_v44 = vld [vmem:[%s472_s2 + $0x20] sm:$0xff]  ;;  %v52_v50 = vmax.f32 %v36_v42, %v44_v43  ;;  %v37_v59 = vld [vmem:[%s470_s0 + $0x28] sm:$0xff]  ;;  %v138_v63 = vld [vmem:[%s477_s7 + $0x10] sm:$0xff] }
   0xd   :  { %v128_v35 = vmax.f32 %v112_v25, %v120_v21  ;;  %v129_v51 = vmax.f32 %v113_v40, %v121_v36  ;;  %v76_v55 = vld [vmem:[%s473_s3 + $0x20] sm:$0xff]  ;;  %v45_v60 = vld [vmem:[%s471_s1 + $0x28] sm:$0xff]  ;;  %v154_v0 = vld [vmem:[%s478_s8 + $0x10] sm:$0xff]  ;;  %v99_v1 = vmax.f32 %v83_v53, %v91_v49  ;;  %v130_v4 = vmax.f32 %v114_v57, %v122_v52 }
   0xe   :  { %v68_v58 = vmax.f32 %v52_v50, %v60_v44  ;;  %v61_v61 = vld [vmem:[%s472_s2 + $0x28] sm:$0xff]  ;;  %v92_v2 = vld [vmem:[%s474_s4 + $0x20] sm:$0xff]  ;;  %v53_v3 = vmax.f32 %v37_v59, %v45_v60  ;;  %v123_v5 = vld [vmem:[%s476_s6 + $0x18] sm:$0xff] }
   0xf   :  { %v144_v45 = vmax.f32 %v128_v35, %v136_v30  ;;  %v145_v62 = vmax.f32 %v129_v51, %v137_v46  ;;  %v108_v7 = vld [vmem:[%s475_s5 + $0x20] sm:$0xff]  ;;  %v77_v8 = vld [vmem:[%s473_s3 + $0x28] sm:$0xff]  ;;  %v115_v10 = vmax.f32 %v99_v1, %v107_v54  ;;  %v38_v12 = vld [vmem:[%s470_s0 + $0x30] sm:$0xff]  ;;  %v146_v15 = vmax.f32 %v130_v4, %v138_v63 }
  0x10   :  { %v84_v6 = vmax.f32 %v68_v58, %v76_v55  ;;  %v69_v11 = vmax.f32 %v53_v3, %v61_v61  ;;  %v46_v13 = vld [vmem:[%s471_s1 + $0x30] sm:$0xff]  ;;  %v139_v16 = vld [vmem:[%s477_s7 + $0x18] sm:$0xff]  ;;  %v93_v19 = vld [vmem:[%s474_s4 + $0x28] sm:$0xff] }
  0x11   :  { %v160_v56 = vmax.f32 %v144_v45, %v152_v31  ;;  %v161_v9 = vmax.f32 %v145_v62, %v153_v47  ;;  %v62_v14 = vld [vmem:[%s472_s2 + $0x30] sm:$0xff]  ;;  %v155_v17 = vld [vmem:[%s478_s8 + $0x18] sm:$0xff]  ;;  %v54_v20 = vmax.f32 %v38_v12, %v46_v13  ;;  %v131_v21 = vmax.f32 %v115_v10, %v123_v5  ;;  %v124_v22 = vld [vmem:[%s476_s6 + $0x20] sm:$0xff] }
  0x12   :  { %v100_v18 = vmax.f32 %v84_v6, %v92_v2  ;;  %v85_v23 = vmax.f32 %v69_v11, %v77_v8  ;;  %v109_v24 = vld [vmem:[%s475_s5 + $0x28] sm:$0xff]  ;;  %v78_v25 = vld [vmem:[%s473_s3 + $0x30] sm:$0xff]  ;;  %v162_v26 = vmax.f32 %v146_v15, %v154_v0  ;;  %v39_v29 = vld [vmem:[%s470_s0 + $0x38] sm:$0xff] }
  0x13   :  { %168 = vst [vmem:[%s479_s9] sm:$0xff] %v160_v56  ;;  %v70_v28 = vmax.f32 %v54_v20, %v62_v14  ;;  %v47_v30 = vld [vmem:[%s471_s1 + $0x38] sm:$0xff]  ;;  %v147_v32 = vmax.f32 %v131_v21, %v139_v16  ;;  %v140_v33 = vld [vmem:[%s477_s7 + $0x20] sm:$0xff]  ;;  %v94_v35 = vld [vmem:[%s474_s4 + $0x30] sm:$0xff] }
  0x14   :  { %169 = vst [vmem:[%s479_s9 + $0x8] sm:$0xff] %v161_v9  ;;  %v116_v27 = vmax.f32 %v100_v18, %v108_v7  ;;  %v63_v31 = vld [vmem:[%s472_s2 + $0x38] sm:$0xff]  ;;  %v101_v34 = vmax.f32 %v85_v23, %v93_v19  ;;  %v55_v36 = vmax.f32 %v39_v29, %v47_v30  ;;  %v125_v38 = vld [vmem:[%s476_s6 + $0x28] sm:$0xff]  ;;  %v156_v42 = vld [vmem:[%s478_s8 + $0x20] sm:$0xff] }
  0x15   :  { %170 = vst [vmem:[%s479_s9 + $0x10] sm:$0xff] %v162_v26  ;;  %v86_v39 = vmax.f32 %v70_v28, %v78_v25  ;;  %v79_v40 = vld [vmem:[%s473_s3 + $0x38] sm:$0xff]  ;;  %v163_v41 = vmax.f32 %v147_v32, %v155_v17  ;;  %v110_v44 = vld [vmem:[%s475_s5 + $0x30] sm:$0xff]  ;;  %v141_v47 = vld [vmem:[%s477_s7 + $0x28] sm:$0xff] }
  0x16   :  { %v132_v37 = vmax.f32 %v116_v27, %v124_v22  ;;  %v117_v43 = vmax.f32 %v101_v34, %v109_v24  ;;  %v71_v45 = vmax.f32 %v55_v36, %v63_v31  ;;  %v95_v49 = vld [vmem:[%s474_s4 + $0x38] sm:$0xff]  ;;  %v126_v51 = vld [vmem:[%s476_s6 + $0x30] sm:$0xff]  ;;  %v157_v54 = vld [vmem:[%s478_s8 + $0x28] sm:$0xff] }
  0x17   :  { %v102_v48 = vmax.f32 %v86_v39, %v94_v35  ;;  %171 = vst [vmem:[%s479_s9 + $0x18] sm:$0xff] %v163_v41  ;;  %v111_v56 = vld [vmem:[%s475_s5 + $0x38] sm:$0xff]  ;;  %v142_v58 = vld [vmem:[%s477_s7 + $0x30] sm:$0xff] }
  0x18   :  { %v148_v46 = vmax.f32 %v132_v37, %v140_v33  ;;  %v133_v50 = vmax.f32 %v117_v43, %v125_v38  ;;  %v87_v52 = vmax.f32 %v71_v45, %v79_v40  ;;  %v127_v61 = vld [vmem:[%s476_s6 + $0x38] sm:$0xff]  ;;  %v158_v63 = vld [vmem:[%s478_s8 + $0x30] sm:$0xff] }
  0x19   :  { %v118_v55 = vmax.f32 %v102_v48, %v110_v44  ;;  %v143_v2 = vld [vmem:[%s477_s7 + $0x38] sm:$0xff] }
  0x1a   :  { %v164_v53 = vmax.f32 %v148_v46, %v156_v42  ;;  %v149_v57 = vmax.f32 %v133_v50, %v141_v47  ;;  %v103_v59 = vmax.f32 %v87_v52, %v95_v49  ;;  %v159_v5 = vld [vmem:[%s478_s8 + $0x38] sm:$0xff] }
  0x1b   :  { %v134_v60 = vmax.f32 %v118_v55, %v126_v51 }
  0x1c   :  { %172 = vst [vmem:[%s479_s9 + $0x20] sm:$0xff] %v164_v53  ;;  %v165_v62 = vmax.f32 %v149_v57, %v157_v54  ;;  %v119_v0 = vmax.f32 %v103_v59, %v111_v56 }
  0x1d   :  { %v150_v1 = vmax.f32 %v134_v60, %v142_v58 }
  0x1e   :  { %173 = vst [vmem:[%s479_s9 + $0x28] sm:$0xff] %v165_v62  ;;  %v135_v3 = vmax.f32 %v119_v0, %v127_v61 }
  0x1f   :  { %v166_v4 = vmax.f32 %v150_v1, %v158_v63 }
  0x20   :  { %v151_v6 = vmax.f32 %v135_v3, %v143_v2 }
  0x21   :  { %174 = vst [vmem:[%s479_s9 + $0x30] sm:$0xff] %v166_v4 }
  0x22   :  { %v167_v7 = vmax.f32 %v151_v6, %v159_v5 }
  0x24   :  { %175 = vst [vmem:[%s479_s9 + $0x38] sm:$0xff] %v167_v7 }

// kernel: resnet18_apply.67
= control target key start
LH: loop header
LB: loop body
LE: loop exit
PB: predicated region body
PF: predicated region fallthrough
CT: control target
= control target key end

     0   :  { %s911_s9 = smov 0   ;;  %s913_s10 = smov 0   ;;  %s1112_s0 = inlined_call_operand.vmem [shape: bf16[128,640], index: 0, kind: input, shape index: {}]   ;;  %s1113_s1 = inlined_call_operand.vmem [shape: bf16[640,64], index: 1, kind: input, shape index: {}]   ;;  %s1114_s2 = inlined_call_operand.vmem [shape: f32[128,64], index: 2, kind: output, shape index: {}]  }
   0x1   :  { %s915_s11 = smov 0   ;;  %s917_s12 = smov 0  }
   0x2   :  { %s919_s13 = smov 0  }
   0x3 LB: > { %s24_s14 = sadd.s32 1, %s889_s12  ;;  %p47_p1 = scmp.ne.s32.totalorder %s881_s10, %s877_s9  ;;  %s893_s13 = sphi %s919_s13, %s12_s13   ;;  %s889_s12 = sphi %s917_s12, %s1118_s12   ;;  %s885_s11 = sphi %s915_s11, %s1117_s11   ;;  %s881_s10 = sphi %s913_s10, %s1116_s10   ;;  %s877_s9 = sphi %s911_s9, %s1115_s9  }
   0x4   : > { %p25_p0 = scmp.ge.s32.totalorder %s24_s14, 5  ;;  %p48_p2 = scmp.eq.s32.totalorder %s893_s13, 0 }
   0x5   : > { %s40_s16 = sadd.s32 1, %s881_s10  ;;  %p697_p5 = scmp.ge.s32.totalorder %s893_s13, 5 }
   0x6   : > { %s1120_s14 = smov (%p25_p0, %s24_s14), 0  ;;  %p49_p3 = por %p48_p2, %p47_p1 }
   0x7   : > { %s36_s15 = ssub.s32 %s889_s12, %s1120_s14  ;;  %129 = sbr.rel (%p697_p5) target bundleno = 32 (0x20), region = 16 }
   0x8   : > { %p38_p4 = scmp.eq.s32.totalorder %s36_s15, 0 }
   0xa   : > { %s946_s17 = scalar_select %p38_p4, %s881_s10, %s40_s16  }
   0xc   : > { %132 = sbr.rel (!%p49_p3) target bundleno = 32 (0x20), region = 20  ;;  %s134_s18 = sand.u32 (%p49_p3), 1, %s881_s10  }
   0xd   : > { %s699_s19 = sshll.u32 (%p49_p3), %s889_s12, 2  ;;  %s698_s20 = sshll.u32 (%p49_p3), %s134_s18, 6 }
   0xe   : > { %s954_s23 = scalar_lea.vmem (%p49_p3), %s1112_s0, %s699_s19  ;;  %s136_s24 = scalar_lea.vmem (%p49_p3), [#allocation3], %s698_s20 }
   0xf   : > { %v158_v0 = vld [vmem:[%s954_s23] sm:$0xf] (%p49_p3)  ;;  %v160_v1 = vld [vmem:[%s954_s23 + $0x14] sm:$0xf] (%p49_p3)  ;;  %v162_v2 = vld [vmem:[%s954_s23 + $0x28] sm:$0xf] (%p49_p3) }
  0x10   : > { %159 = vst [vmem:[%s136_s24] sm:$0xf] (%p49_p3), %v158_v0  ;;  %v164_v3 = vld [vmem:[%s954_s23 + $0x3c] sm:$0xf] (%p49_p3)  ;;  %v166_v4 = vld [vmem:[%s954_s23 + $0x50] sm:$0xf] (%p49_p3) }
  0x11   : > { %161 = vst [vmem:[%s136_s24 + $0x4] sm:$0xf] %v160_v1  ;;  %v168_v5 = vld [vmem:[%s954_s23 + $0x64] sm:$0xf]  ;;  %v170_v6 = vld [vmem:[%s954_s23 + $0x78] sm:$0xf] }
  0x12   : > { %163 = vst [vmem:[%s136_s24 + $0x8] sm:$0xf] %v162_v2  ;;  %v172_v7 = vld [vmem:[%s954_s23 + $0x8c] sm:$0xf]  ;;  %v174_v8 = vld [vmem:[%s954_s23 + $0xa0] sm:$0xf] }
  0x13   : > { %165 = vst [vmem:[%s136_s24 + $0xc] sm:$0xf] %v164_v3  ;;  %v176_v9 = vld [vmem:[%s954_s23 + $0xb4] sm:$0xf]  ;;  %v178_v10 = vld [vmem:[%s954_s23 + $0xc8] sm:$0xf] }
  0x14   : > { %167 = vst [vmem:[%s136_s24 + $0x10] sm:$0xf] %v166_v4  ;;  %v180_v11 = vld [vmem:[%s954_s23 + $0xdc] sm:$0xf]  ;;  %v182_v12 = vld [vmem:[%s954_s23 + $0xf0] sm:$0xf] }
  0x15   : > { %169 = vst [vmem:[%s136_s24 + $0x14] sm:$0xf] %v168_v5  ;;  %v184_v13 = vld [vmem:[%s954_s23 + $0x104] sm:$0xf]  ;;  %v186_v14 = vld [vmem:[%s954_s23 + $0x118] sm:$0xf] }
  0x16   : > { %171 = vst [vmem:[%s136_s24 + $0x18] sm:$0xf] %v170_v6  ;;  %v188_v15 = vld [vmem:[%s954_s23 + $0x12c] sm:$0xf] }
  0x17   : > { %173 = vst [vmem:[%s136_s24 + $0x1c] sm:$0xf] %v172_v7 }
  0x18   : > { %175 = vst [vmem:[%s136_s24 + $0x20] sm:$0xf] %v174_v8 }
  0x19   : > { %177 = vst [vmem:[%s136_s24 + $0x24] sm:$0xf] %v176_v9 }
  0x1a   : > { %179 = vst [vmem:[%s136_s24 + $0x28] sm:$0xf] %v178_v10 }
  0x1b   : > { %181 = vst [vmem:[%s136_s24 + $0x2c] sm:$0xf] %v180_v11 }
  0x1c   : > { %183 = vst [vmem:[%s136_s24 + $0x30] sm:$0xf] %v182_v12 }
  0x1d   : > { %185 = vst [vmem:[%s136_s24 + $0x34] sm:$0xf] %v184_v13 }
  0x1e   : > { %187 = vst [vmem:[%s136_s24 + $0x38] sm:$0xf] %v186_v14 }
  0x1f   : > { %189 = vst [vmem:[%s136_s24 + $0x3c] sm:$0xf] %v188_v15 }
  0x20 PF: > { %p700_p6 = scmp.ge.s32.totalorder %s893_s13, 1  ;;  %p256_p7 = scmp.lt.s32.totalorder %s893_s13, 6 }
  0x22   : > { %p257_p8 = pnand %p700_p6, %p256_p7 }
  0x23   : > { %s263_s25 = sand.u32 (!%p257_p8), 1, %s877_s9   ;;  %s702_s26 = sshll.u32 (!%p257_p8), %s885_s11, 4 }
  0x24   : > { %260 = sbr.rel (%p257_p8) target bundleno = 273 (0x111), region = 65  ;;  %s701_s27 = sshll.u32 (!%p257_p8), %s263_s25, 6 }
  0x25   : > { %p297_p9 = scmp.lt.s32.totalorder (!%p257_p8), %s702_s26, 79  ;;  %s981_s4 = scalar_lea.vmem (!%p257_p8), [#allocation3], %s701_s27 }
  0x26   : > { %p704_p10 = scmp.ne.s32.totalorder (!%p257_p8), %s885_s11, 0 }
  0x29   : > { %s1122_s26 = smov (!%p297_p9, %s702_s26), 79  ;;  %317 = sbr.rel (%p704_p10) target bundleno = 63 (0x3f), region = 73 }
  0x2a   : > { %s703_s28 = sshll.u32 %s1122_s26, 2 }
  0x2b   : > { %s979_s3 = scalar_lea.vmem %s1113_s1, %s703_s28 }
  0x2e   : > { %vm318_vm0 = vcmask 523264   ;;  %v895_v16 = vmov 0.0  }
  0x2f   : > { %319 = vst.msk [vmem:[#allocation2] sm:$0xff] %vm318_vm0, %v895_v16 }
  0x30   : > { %320 = vst.msk [vmem:[#allocation2 + $0x8] sm:$0xff] %vm318_vm0, %v895_v16 }
  0x31   : > { %321 = vst.msk [vmem:[#allocation2 + $0x10] sm:$0xff] %vm318_vm0, %v895_v16 }
  0x32   : > { %322 = vst.msk [vmem:[#allocation2 + $0x18] sm:$0xff] %vm318_vm0, %v895_v16 }
  0x33   : > { %323 = vst.msk [vmem:[#allocation2 + $0x20] sm:$0xff] %vm318_vm0, %v895_v16 }
  0x34   : > { %324 = vst.msk [vmem:[#allocation2 + $0x28] sm:$0xff] %vm318_vm0, %v895_v16 }
  0x35   : > { %325 = vst.msk [vmem:[#allocation2 + $0x30] sm:$0xff] %vm318_vm0, %v895_v16 }
  0x36   : > { %326 = vst.msk [vmem:[#allocation2 + $0x38] sm:$0xff] %vm318_vm0, %v895_v16 }
  0x37   : > { %327 = vst.msk [vmem:[#allocation2 + $0x40] sm:$0xff] %vm318_vm0, %v895_v16 }
  0x38   : > { %328 = vst.msk [vmem:[#allocation2 + $0x48] sm:$0xff] %vm318_vm0, %v895_v16 }
  0x39   : > { %329 = vst.msk [vmem:[#allocation2 + $0x50] sm:$0xff] %vm318_vm0, %v895_v16 }
  0x3a   : > { %330 = vst.msk [vmem:[#allocation2 + $0x58] sm:$0xff] %vm318_vm0, %v895_v16 }
  0x3b   : > { %331 = vst.msk [vmem:[#allocation2 + $0x60] sm:$0xff] %vm318_vm0, %v895_v16 }
  0x3c   : > { %332 = vst.msk [vmem:[#allocation2 + $0x68] sm:$0xff] %vm318_vm0, %v895_v16 }
  0x3d   : > { %333 = vst.msk [vmem:[#allocation2 + $0x70] sm:$0xff] %vm318_vm0, %v895_v16 }
  0x3e   : > { %334 = vst.msk [vmem:[#allocation2 + $0x78] sm:$0xff] %vm318_vm0, %v895_v16 }
  0x3f PF: > { %v789_v17 = vld [vmem:[%s979_s3 + $0x38] sm:$0xff]  ;;  %v788_v18 = vld [vmem:[%s979_s3 + $0x30] sm:$0xff]  ;;  %v787_v19 = vld [vmem:[%s979_s3 + $0x28] sm:$0xff]  ;;  %vm544_vm1 = vcmask 523264   ;;  %p769_p11 = scmp.ne.s32.totalorder %s885_s11, 4 }
  0x40   : > { %479 = vmatpush.bf16.msra.mxu0 %v789_v17  ;;  %790 = vmatpush.bf16.msra.mxu1 %v789_v17  ;;  %v786_v20 = vld [vmem:[%s979_s3 + $0x20] sm:$0xff]  ;;  %v785_v21 = vld [vmem:[%s979_s3 + $0x18] sm:$0xff]  ;;  %v784_v22 = vld [vmem:[%s979_s3 + $0x10] sm:$0xff] }
  0x41   : > { %791 = vmatpush.bf16.msra.mxu2 %v789_v17  ;;  %792 = vmatpush.bf16.msra.mxu3 %v789_v17  ;;  %v783_v23 = vld [vmem:[%s979_s3 + $0x8] sm:$0xff]  ;;  %v782_v24 = vld [vmem:[%s979_s3] sm:$0xff]  ;;  %v776_v26 = vld [vmem:[%s981_s4 + $0x10] sm:$0xff] }
  0x42   : > { %v774_v25 = vld [vmem:[%s981_s4] sm:$0xff]  ;;  %v780_v28 = vld [vmem:[%s981_s4 + $0x30] sm:$0xff]  ;;  %v775_v29 = vld [vmem:[%s981_s4 + $0x8] sm:$0xff] }
  0x43   : > { %v778_v27 = vld [vmem:[%s981_s4 + $0x20] sm:$0xff]  ;;  %v777_v30 = vld [vmem:[%s981_s4 + $0x18] sm:$0xff]  ;;  %v779_v31 = vld [vmem:[%s981_s4 + $0x28] sm:$0xff] }
  0x44   : > { %480 = vmatpush.bf16.msra.mxu0 %v788_v18  ;;  %793 = vmatpush.bf16.msra.mxu1 %v788_v18  ;;  %v781_v32 = vld [vmem:[%s981_s4 + $0x38] sm:$0xff]  ;;  %v335_v33 = vld [vmem:[#allocation2] sm:$0xff]  ;;  %v336_v41 = vld [vmem:[#allocation2 + $0x8] sm:$0xff] }
  0x45   : > { %794 = vmatpush.bf16.msra.mxu2 %v788_v18  ;;  %795 = vmatpush.bf16.msra.mxu3 %v788_v18  ;;  %v339_v34 = vld [vmem:[#allocation2 + $0x20] sm:$0xff]  ;;  %v340_v42 = vld [vmem:[#allocation2 + $0x28] sm:$0xff]  ;;  %v337_v53 = vld [vmem:[#allocation2 + $0x10] sm:$0xff] }
  0x46   : > { %v343_v39 = vld [vmem:[#allocation2 + $0x40] sm:$0xff]  ;;  %v344_v51 = vld [vmem:[#allocation2 + $0x48] sm:$0xff]  ;;  %v341_v54 = vld [vmem:[#allocation2 + $0x30] sm:$0xff] }
  0x47   : > { %v347_v40 = vld [vmem:[#allocation2 + $0x60] sm:$0xff]  ;;  %v348_v52 = vld [vmem:[#allocation2 + $0x68] sm:$0xff]  ;;  %v345_v63 = vld [vmem:[#allocation2 + $0x50] sm:$0xff] }
  0x48   : > { %481 = vmatpush.bf16.msra.mxu0 %v787_v19  ;;  %796 = vmatpush.bf16.msra.mxu1 %v787_v19  ;;  %v349_v0 = vld [vmem:[#allocation2 + $0x70] sm:$0xff]  ;;  %v338_v1 = vld [vmem:[#allocation2 + $0x18] sm:$0xff] }
  0x49   : > { %797 = vmatpush.bf16.msra.mxu2 %v787_v19  ;;  %798 = vmatpush.bf16.msra.mxu3 %v787_v19  ;;  %v342_v2 = vld [vmem:[#allocation2 + $0x38] sm:$0xff] }
  0x4a   : > { %v346_v11 = vld [vmem:[#allocation2 + $0x58] sm:$0xff] }
  0x4b   : > { %v350_v12 = vld [vmem:[#allocation2 + $0x78] sm:$0xff] }
  0x4c   : > { %482 = vmatpush.bf16.msra.mxu0 %v786_v20  ;;  %799 = vmatpush.bf16.msra.mxu1 %v786_v20 }
  0x4d   : > { %800 = vmatpush.bf16.msra.mxu2 %v786_v20  ;;  %801 = vmatpush.bf16.msra.mxu3 %v786_v20 }
  0x50   : > { %483 = vmatpush.bf16.msra.mxu0 %v785_v21  ;;  %802 = vmatpush.bf16.msra.mxu1 %v785_v21 }
  0x51   : > { %803 = vmatpush.bf16.msra.mxu2 %v785_v21  ;;  %804 = vmatpush.bf16.msra.mxu3 %v785_v21 }
  0x54   : > { %484 = vmatpush.bf16.msra.mxu0 %v784_v22  ;;  %805 = vmatpush.bf16.msra.mxu1 %v784_v22 }
  0x55   : > { %806 = vmatpush.bf16.msra.mxu2 %v784_v22  ;;  %807 = vmatpush.bf16.msra.mxu3 %v784_v22 }
  0x58   : > { %485 = vmatpush.bf16.msra.mxu0 %v783_v23  ;;  %808 = vmatpush.bf16.msra.mxu1 %v783_v23 }
  0x59   : > { %809 = vmatpush.bf16.msra.mxu2 %v783_v23  ;;  %810 = vmatpush.bf16.msra.mxu3 %v783_v23 }
  0x5c   : > { %486 = vmatpush.bf16.msra.mxu0 %v782_v24  ;;  %811 = vmatpush.bf16.msra.mxu1 %v782_v24 }
  0x5d   : > { %812 = vmatpush.bf16.msra.mxu2 %v782_v24  ;;  %813 = vmatpush.bf16.msra.mxu3 %v782_v24 }
  0x5f   : > { %487 = vmatmul.bf16.vlgmr.msra.gmra.mxu0 %v774_v25  ;;  %497 = vmatmul.bf16.vlgmr.msra.gmra.mxu1 %v776_v26 }
  0x60   : > { %507 = vmatmul.bf16.vlgmr.msra.gmra.mxu2 %v778_v27  ;;  %517 = vmatmul.bf16.vlgmr.msra.gmra.mxu3 %v780_v28 }
  0x6f   : > { %492 = vmatmul.bf16.gmra.mxu0 %v775_v29  ;;  %502 = vmatmul.bf16.gmra.mxu1 %v777_v30 }
  0x70   : > { %512 = vmatmul.bf16.gmra.mxu2 %v779_v31  ;;  %522 = vmatmul.bf16.gmra.mxu3 %v781_v32 }
  0xdc   : > { %v488_v35 = vpop.f32.mrf.mxu0  ;;  %v498_v36 = vpop.f32.mrf.mxu1 }
  0xdd   : > { %v528_v37 = vadd.f32 %v488_v35, %v335_v33  ;;  %v532_v38 = vadd.f32 %v498_v36, %v339_v34 }
  0xdf   : > { %545 = vst.msk [vmem:[#allocation2] sm:$0xff] %vm544_vm1, %v528_v37 }
  0xe0   : > { %549 = vst.msk [vmem:[#allocation2 + $0x20] sm:$0xff] %vm544_vm1, %v532_v38 }
  0xe3   : > { %v508_v43 = vpop.f32.mrf.mxu2  ;;  %v518_v44 = vpop.f32.mrf.mxu3 }
  0xe4   : > { %v536_v45 = vadd.f32 %v508_v43, %v343_v39  ;;  %v540_v46 = vadd.f32 %v518_v44, %v347_v40  ;;  %v490_v47 = vpop.f32.mrf.mxu0  ;;  %v500_v48 = vpop.f32.mrf.mxu1 }
  0xe5   : > { %v529_v49 = vadd.f32 %v490_v47, %v336_v41  ;;  %v533_v50 = vadd.f32 %v500_v48, %v340_v42 }
  0xe6   : > { %553 = vst.msk [vmem:[#allocation2 + $0x40] sm:$0xff] %vm544_vm1, %v536_v45 }
  0xe7   : > { %557 = vst.msk [vmem:[#allocation2 + $0x60] sm:$0xff] %vm544_vm1, %v540_v46 }
  0xe8   : > { %546 = vst.msk [vmem:[#allocation2 + $0x8] sm:$0xff] %vm544_vm1, %v529_v49 }
  0xe9   : > { %550 = vst.msk [vmem:[#allocation2 + $0x28] sm:$0xff] %vm544_vm1, %v533_v50 }
  0xeb   : > { %v510_v55 = vpop.f32.mrf.mxu2  ;;  %v520_v56 = vpop.f32.mrf.mxu3 }
  0xec   : > { %v537_v57 = vadd.f32 %v510_v55, %v344_v51  ;;  %v541_v58 = vadd.f32 %v520_v56, %v348_v52  ;;  %v493_v59 = vpop.f32.mrf.mxu0  ;;  %v503_v60 = vpop.f32.mrf.mxu1 }
  0xed   : > { %v530_v61 = vadd.f32 %v493_v59, %v337_v53  ;;  %v534_v62 = vadd.f32 %v503_v60, %v341_v54 }
  0xee   : > { %554 = vst.msk [vmem:[#allocation2 + $0x48] sm:$0xff] %vm544_vm1, %v537_v57 }
  0xef   : > { %558 = vst.msk [vmem:[#allocation2 + $0x68] sm:$0xff] %vm544_vm1, %v541_v58 }
  0xf0   : > { %547 = vst.msk [vmem:[#allocation2 + $0x10] sm:$0xff] %vm544_vm1, %v530_v61 }
  0xf1   : > { %551 = vst.msk [vmem:[#allocation2 + $0x30] sm:$0xff] %vm544_vm1, %v534_v62 }
  0xf3   : > { %v513_v3 = vpop.f32.mrf.mxu2  ;;  %v523_v4 = vpop.f32.mrf.mxu3 }
  0xf4   : > { %v538_v5 = vadd.f32 %v513_v3, %v345_v63  ;;  %v542_v6 = vadd.f32 %v523_v4, %v349_v0  ;;  %v495_v7 = vpop.f32.mrf.mxu0  ;;  %v505_v8 = vpop.f32.mrf.mxu1 }
  0xf5   : > { %v531_v9 = vadd.f32 %v495_v7, %v338_v1  ;;  %v535_v10 = vadd.f32 %v505_v8, %v342_v2 }
  0xf6   : > { %555 = vst.msk [vmem:[#allocation2 + $0x50] sm:$0xff] %vm544_vm1, %v538_v5 }
  0xf7   : > { %559 = vst.msk [vmem:[#allocation2 + $0x70] sm:$0xff] %vm544_vm1, %v542_v6 }
  0xf8   : > { %548 = vst.msk [vmem:[#allocation2 + $0x18] sm:$0xff] %vm544_vm1, %v531_v9 }
  0xf9   : > { %552 = vst.msk [vmem:[#allocation2 + $0x38] sm:$0xff] %vm544_vm1, %v535_v10 }
  0xfb   : > { %v515_v13 = vpop.f32.mrf.mxu2  ;;  %v525_v14 = vpop.f32.mrf.mxu3  ;;  %564 = sbr.rel (%p769_p11) target bundleno = 273 (0x111), region = 77 }
  0xfc   : > { %v539_v15 = vadd.f32 %v515_v13, %v346_v11  ;;  %v543_v16 = vadd.f32 %v525_v14, %v350_v12 }
  0xfe   : > { %556 = vst.msk [vmem:[#allocation2 + $0x58] sm:$0xff] %vm544_vm1, %v539_v15 }
  0xff   : > { %560 = vst.msk [vmem:[#allocation2 + $0x78] sm:$0xff] %vm544_vm1, %v543_v16 }
 0x100   : > { %v565_v17 = vld [vmem:[#allocation2] sm:$0xff]  ;;  %v566_v18 = vld [vmem:[#allocation2 + $0x8] sm:$0xff]  ;;  %v567_v19 = vld [vmem:[#allocation2 + $0x10] sm:$0xff] }
 0x101   : > { %581 = vst.msk [vmem:[%s1114_s2] sm:$0xff] %vm544_vm1, %v565_v17  ;;  %v568_v20 = vld [vmem:[#allocation2 + $0x18] sm:$0xff]  ;;  %v569_v21 = vld [vmem:[#allocation2 + $0x20] sm:$0xff]  ;;  %v570_v22 = vld [vmem:[#allocation2 + $0x28] sm:$0xff] }
 0x102   : > { %582 = vst.msk [vmem:[%s1114_s2 + $0x8] sm:$0xff] %vm544_vm1, %v566_v18  ;;  %v571_v23 = vld [vmem:[#allocation2 + $0x30] sm:$0xff]  ;;  %v572_v24 = vld [vmem:[#allocation2 + $0x38] sm:$0xff]  ;;  %v573_v25 = vld [vmem:[#allocation2 + $0x40] sm:$0xff] }
 0x103   : > { %583 = vst.msk [vmem:[%s1114_s2 + $0x10] sm:$0xff] %vm544_vm1, %v567_v19  ;;  %v574_v26 = vld [vmem:[#allocation2 + $0x48] sm:$0xff]  ;;  %v575_v27 = vld [vmem:[#allocation2 + $0x50] sm:$0xff]  ;;  %v577_v29 = vld [vmem:[#allocation2 + $0x60] sm:$0xff] }
 0x104   : > { %584 = vst.msk [vmem:[%s1114_s2 + $0x18] sm:$0xff] %vm544_vm1, %v568_v20  ;;  %v578_v30 = vld [vmem:[#allocation2 + $0x68] sm:$0xff]  ;;  %v579_v31 = vld [vmem:[#allocation2 + $0x70] sm:$0xff] }
 0x105   : > { %585 = vst.msk [vmem:[%s1114_s2 + $0x20] sm:$0xff] %vm544_vm1, %v569_v21  ;;  %v576_v28 = vld [vmem:[#allocation2 + $0x58] sm:$0xff] }
 0x106   : > { %586 = vst.msk [vmem:[%s1114_s2 + $0x28] sm:$0xff] %vm544_vm1, %v570_v22  ;;  %v580_v32 = vld [vmem:[#allocation2 + $0x78] sm:$0xff] }
 0x107   : > { %587 = vst.msk [vmem:[%s1114_s2 + $0x30] sm:$0xff] %vm544_vm1, %v571_v23 }
 0x108   : > { %588 = vst.msk [vmem:[%s1114_s2 + $0x38] sm:$0xff] %vm544_vm1, %v572_v24 }
 0x109   : > { %589 = vst.msk [vmem:[%s1114_s2 + $0x40] sm:$0xff] %vm544_vm1, %v573_v25 }
 0x10a   : > { %590 = vst.msk [vmem:[%s1114_s2 + $0x48] sm:$0xff] %vm544_vm1, %v574_v26 }
 0x10b   : > { %591 = vst.msk [vmem:[%s1114_s2 + $0x50] sm:$0xff] %vm544_vm1, %v575_v27 }
 0x10c   : > { %592 = vst.msk [vmem:[%s1114_s2 + $0x58] sm:$0xff] %vm544_vm1, %v576_v28 }
 0x10d   : > { %593 = vst.msk [vmem:[%s1114_s2 + $0x60] sm:$0xff] %vm544_vm1, %v577_v29 }
 0x10e   : > { %594 = vst.msk [vmem:[%s1114_s2 + $0x68] sm:$0xff] %vm544_vm1, %v578_v30 }
 0x10f   : > { %595 = vst.msk [vmem:[%s1114_s2 + $0x70] sm:$0xff] %vm544_vm1, %v579_v31 }
 0x110   : > { %596 = vst.msk [vmem:[%s1114_s2 + $0x78] sm:$0xff] %vm544_vm1, %v580_v32 }
 0x111 PF: > { %s12_s13 = sadd.s32 1, %s893_s13   ;;  %s1115_s9 = smov %s881_s10 }
 0x112   : > { %p9_p12 = scmp.ge.s32.totalorder %s12_s13, 7   ;;  %s1116_s10 = smov %s946_s17 }
 0x113   : > { %s1117_s11 = smov %s889_s12  ;;  %s1118_s12 = smov %s1120_s14 }
 0x114   :  { %11 = sbr.rel (!%p9_p12) target bundleno = 3 (0x3), region = 115 }

// kernel: resnet18_apply.69
= control target key start
LH: loop header
LB: loop body
LE: loop exit
PB: predicated region body
PF: predicated region fallthrough
CT: control target
= control target key end

     0   :  { %s142_s0 = inlined_call_operand.vmem [shape: f32[64,128], index: 0, kind: input, shape index: {}]   ;;  %s143_s1 = inlined_call_operand.vmem [shape: f32[1,128], index: 1, kind: input, shape index: {}]   ;;  %s144_s2 = inlined_call_operand.vmem [shape: f32[1,128], index: 2, kind: input, shape index: {}]   ;;  %s145_s3 = inlined_call_operand.vmem [shape: f32[64,128], index: 3, kind: output, shape index: {}]  }
   0x1   :  { %v14_v0 = vld [vmem:[%s142_s0] sm:$0xff]  ;;  %v15_v3 = vld [vmem:[%s142_s0 + $0x8] sm:$0xff]  ;;  %v16_v6 = vld [vmem:[%s142_s0 + $0x10] sm:$0xff] }
   0x2   :  { %v66_v1 = vld [vmem:[%s143_s1] ss:$0 sm:$0xff]  ;;  %v17_v7 = vld [vmem:[%s142_s0 + $0x18] sm:$0xff]  ;;  %v19_v12 = vld [vmem:[%s142_s0 + $0x28] sm:$0xff] }
   0x3   :  { %v67_v2 = vld [vmem:[%s144_s2] ss:$0 sm:$0xff]  ;;  %v26_v4 = vmul.f32 %v66_v1, %v14_v0  ;;  %v27_v5 = vmul.f32 %v66_v1, %v15_v3  ;;  %v28_v9 = vmul.f32 %v66_v1, %v16_v6  ;;  %v29_v10 = vmul.f32 %v66_v1, %v17_v7  ;;  %v20_v13 = vld [vmem:[%s142_s0 + $0x30] sm:$0xff]  ;;  %v21_v14 = vld [vmem:[%s142_s0 + $0x38] sm:$0xff] }
   0x4   :  { %v18_v8 = vld [vmem:[%s142_s0 + $0x20] sm:$0xff]  ;;  %v31_v17 = vmul.f32 %v66_v1, %v19_v12  ;;  %v32_v18 = vmul.f32 %v66_v1, %v20_v13  ;;  %v33_v22 = vmul.f32 %v66_v1, %v21_v14 }
   0x5   :  { %v30_v11 = vmul.f32 %v66_v1, %v18_v8  ;;  %v38_v15 = vadd.f32 %v67_v2, %v26_v4  ;;  %v39_v16 = vadd.f32 %v67_v2, %v27_v5  ;;  %v40_v19 = vadd.f32 %v67_v2, %v28_v9 }
   0x6   :  { %v41_v20 = vadd.f32 %v67_v2, %v29_v10  ;;  %v43_v25 = vadd.f32 %v67_v2, %v31_v17  ;;  %v44_v26 = vadd.f32 %v67_v2, %v32_v18  ;;  %v45_v29 = vadd.f32 %v67_v2, %v33_v22 }
   0x7   :  { %v42_v21 = vadd.f32 %v67_v2, %v30_v11  ;;  %v46_v23 = vmax.f32 %v38_v15, 0.0  ;;  %v47_v24 = vmax.f32 %v39_v16, 0.0  ;;  %v48_v27 = vmax.f32 %v40_v19, 0.0 }
   0x8   :  { %v49_v28 = vmax.f32 %v41_v20, 0.0  ;;  %v51_v31 = vmax.f32 %v43_v25, 0.0  ;;  %v52_v32 = vmax.f32 %v44_v26, 0.0  ;;  %v53_v33 = vmax.f32 %v45_v29, 0.0 }
   0x9   :  { %54 = vst [vmem:[%s145_s3] sm:$0xff] %v46_v23  ;;  %v50_v30 = vmax.f32 %v42_v21, 0.0 }
   0xa   :  { %55 = vst [vmem:[%s145_s3 + $0x8] sm:$0xff] %v47_v24 }
   0xb   :  { %56 = vst [vmem:[%s145_s3 + $0x10] sm:$0xff] %v48_v27 }
   0xc   :  { %57 = vst [vmem:[%s145_s3 + $0x18] sm:$0xff] %v49_v28 }
   0xd   :  { %58 = vst [vmem:[%s145_s3 + $0x20] sm:$0xff] %v50_v30 }
   0xe   :  { %59 = vst [vmem:[%s145_s3 + $0x28] sm:$0xff] %v51_v31 }
   0xf   :  { %60 = vst [vmem:[%s145_s3 + $0x30] sm:$0xff] %v52_v32 }
  0x10   :  { %61 = vst [vmem:[%s145_s3 + $0x38] sm:$0xff] %v53_v33 }

// kernel: resnet18_apply.72
= control target key start
LH: loop header
LB: loop body
LE: loop exit
PB: predicated region body
PF: predicated region fallthrough
CT: control target
= control target key end

     0   :  { %s190_s0 = inlined_call_operand.vmem [shape: f32[64,128], index: 0, kind: input, shape index: {}]   ;;  %s191_s1 = inlined_call_operand.vmem [shape: f32[1,128], index: 1, kind: input, shape index: {}]   ;;  %s192_s2 = inlined_call_operand.vmem [shape: f32[1,128], index: 2, kind: input, shape index: {}]   ;;  %s193_s3 = inlined_call_operand.vmem [shape: f32[64,128], index: 3, kind: input, shape index: {}]   ;;  %s194_s4 = inlined_call_operand.vmem [shape: f32[64,128], index: 4, kind: output, shape index: {}]  }
   0x1   :  { %v17_v0 = vld [vmem:[%s190_s0] sm:$0xff]  ;;  %v18_v4 = vld [vmem:[%s190_s0 + $0x8] sm:$0xff]  ;;  %v19_v5 = vld [vmem:[%s190_s0 + $0x10] sm:$0xff] }
   0x2   :  { %v85_v1 = vld [vmem:[%s191_s1] ss:$0 sm:$0xff]  ;;  %v50_v8 = vld [vmem:[%s193_s3 + $0x8] sm:$0xff]  ;;  %v20_v10 = vld [vmem:[%s190_s0 + $0x18] sm:$0xff] }
   0x3   :  { %v86_v2 = vld [vmem:[%s192_s2] ss:$0 sm:$0xff]  ;;  %v29_v3 = vmul.f32 %v85_v1, %v17_v0  ;;  %v30_v7 = vmul.f32 %v85_v1, %v18_v4  ;;  %v31_v9 = vmul.f32 %v85_v1, %v19_v5  ;;  %v51_v12 = vld [vmem:[%s193_s3 + $0x10] sm:$0xff]  ;;  %v32_v13 = vmul.f32 %v85_v1, %v20_v10  ;;  %v22_v15 = vld [vmem:[%s190_s0 + $0x28] sm:$0xff] }
   0x4   :  { %v49_v6 = vld [vmem:[%s193_s3] sm:$0xff]  ;;  %v52_v18 = vld [vmem:[%s193_s3 + $0x18] sm:$0xff]  ;;  %v34_v20 = vmul.f32 %v85_v1, %v22_v15  ;;  %v23_v21 = vld [vmem:[%s190_s0 + $0x30] sm:$0xff] }
   0x5   :  { %v41_v11 = vadd.f32 %v86_v2, %v29_v3  ;;  %v21_v14 = vld [vmem:[%s190_s0 + $0x20] sm:$0xff]  ;;  %v42_v16 = vadd.f32 %v86_v2, %v30_v7  ;;  %v43_v17 = vadd.f32 %v86_v2, %v31_v9  ;;  %v44_v23 = vadd.f32 %v86_v2, %v32_v13  ;;  %v54_v25 = vld [vmem:[%s193_s3 + $0x28] sm:$0xff]  ;;  %v24_v27 = vld [vmem:[%s190_s0 + $0x38] sm:$0xff] }
   0x6   :  { %v33_v19 = vmul.f32 %v85_v1, %v21_v14  ;;  %v53_v24 = vld [vmem:[%s193_s3 + $0x20] sm:$0xff]  ;;  %v35_v26 = vmul.f32 %v85_v1, %v23_v21  ;;  %v46_v31 = vadd.f32 %v86_v2, %v34_v20  ;;  %v55_v32 = vld [vmem:[%s193_s3 + $0x30] sm:$0xff]  ;;  %v36_v36 = vmul.f32 %v85_v1, %v24_v27  ;;  %v56_v41 = vld [vmem:[%s193_s3 + $0x38] sm:$0xff] }
   0x7   :  { %v57_v22 = vadd.f32 %v49_v6, %v41_v11  ;;  %v58_v28 = vadd.f32 %v50_v8, %v42_v16  ;;  %v59_v29 = vadd.f32 %v51_v12, %v43_v17  ;;  %v60_v34 = vadd.f32 %v52_v18, %v44_v23 }
   0x8   :  { %v45_v30 = vadd.f32 %v86_v2, %v33_v19  ;;  %v47_v35 = vadd.f32 %v86_v2, %v35_v26  ;;  %v62_v40 = vadd.f32 %v54_v25, %v46_v31  ;;  %v48_v44 = vadd.f32 %v86_v2, %v36_v36 }
   0x9   :  { %v65_v33 = vmax.f32 %v57_v22, 0.0  ;;  %v66_v37 = vmax.f32 %v58_v28, 0.0  ;;  %v67_v38 = vmax.f32 %v59_v29, 0.0  ;;  %v68_v42 = vmax.f32 %v60_v34, 0.0 }
   0xa   :  { %v61_v39 = vadd.f32 %v53_v24, %v45_v30  ;;  %v63_v43 = vadd.f32 %v55_v32, %v47_v35  ;;  %v70_v46 = vmax.f32 %v62_v40, 0.0  ;;  %v64_v48 = vadd.f32 %v56_v41, %v48_v44 }
   0xb   :  { %73 = vst [vmem:[%s194_s4] sm:$0xff] %v65_v33 }
   0xc   :  { %74 = vst [vmem:[%s194_s4 + $0x8] sm:$0xff] %v66_v37  ;;  %v69_v45 = vmax.f32 %v61_v39, 0.0  ;;  %v71_v47 = vmax.f32 %v63_v43, 0.0  ;;  %v72_v49 = vmax.f32 %v64_v48, 0.0 }
   0xd   :  { %75 = vst [vmem:[%s194_s4 + $0x10] sm:$0xff] %v67_v38 }
   0xe   :  { %76 = vst [vmem:[%s194_s4 + $0x18] sm:$0xff] %v68_v42 }
   0xf   :  { %77 = vst [vmem:[%s194_s4 + $0x20] sm:$0xff] %v69_v45 }
  0x10   :  { %78 = vst [vmem:[%s194_s4 + $0x28] sm:$0xff] %v70_v46 }
  0x11   :  { %79 = vst [vmem:[%s194_s4 + $0x30] sm:$0xff] %v71_v47 }
  0x12   :  { %80 = vst [vmem:[%s194_s4 + $0x38] sm:$0xff] %v72_v49 }

// kernel: resnet18_apply.68
= control target key start
LH: loop header
LB: loop body
LE: loop exit
PB: predicated region body
PF: predicated region fallthrough
CT: control target
= control target key end

     0   :  { %v73_v0 = vmov 0.0   ;;  %s131_s1 = inlined_call_operand.vmem [shape: f32[1,128], index: 1, kind: output, shape index: {0}]   ;;  %s132_s2 = inlined_call_operand.vmem [shape: f32[1,128], index: 2, kind: output, shape index: {1}]   ;;  %s133_s0 = inlined_call_operand.vmem [shape: f32[64,128], index: 0, kind: input, shape index: {}]  }
   0x1   :  { %14 = vst [vmem:[%s131_s1] sm:$0x1] %v73_v0  ;;  %v16_v1 = vld [vmem:[%s133_s0] sm:$0xff]  ;;  %v17_v2 = vld [vmem:[%s133_s0 + $0x8] sm:$0xff]  ;;  %v18_v3 = vld [vmem:[%s133_s0 + $0x10] sm:$0xff] }
   0x2   :  { %15 = vst [vmem:[%s132_s2] sm:$0x1] %v73_v0  ;;  %v19_v4 = vld [vmem:[%s133_s0 + $0x18] sm:$0xff]  ;;  %v25_v5 = vadd.f32 %v17_v2, %v16_v1  ;;  %v41_v6 = vmul.f32 %v16_v1, %v16_v1  ;;  %v42_v7 = vmul.f32 %v17_v2, %v17_v2  ;;  %v43_v8 = vmul.f32 %v18_v3, %v18_v3  ;;  %v20_v9 = vld [vmem:[%s133_s0 + $0x20] sm:$0xff]  ;;  %v21_v13 = vld [vmem:[%s133_s0 + $0x28] sm:$0xff] }
   0x3   :  { %v44_v11 = vmul.f32 %v19_v4, %v19_v4  ;;  %v45_v15 = vmul.f32 %v20_v9, %v20_v9  ;;  %v22_v17 = vld [vmem:[%s133_s0 + $0x30] sm:$0xff]  ;;  %v46_v19 = vmul.f32 %v21_v13, %v21_v13  ;;  %v23_v21 = vld [vmem:[%s133_s0 + $0x38] sm:$0xff] }
   0x4   :  { %v26_v10 = vadd.f32 %v25_v5, %v18_v3  ;;  %v49_v12 = vadd.f32 %v42_v7, %v41_v6  ;;  %v47_v23 = vmul.f32 %v22_v17, %v22_v17  ;;  %v48_v26 = vmul.f32 %v23_v21, %v23_v21 }
   0x6   :  { %v27_v14 = vadd.f32 %v26_v10, %v19_v4  ;;  %v50_v16 = vadd.f32 %v49_v12, %v43_v8 }
   0x8   :  { %v28_v18 = vadd.f32 %v27_v14, %v20_v9  ;;  %v51_v20 = vadd.f32 %v50_v16, %v44_v11  ;;  %v24_v40 = vld [vmem:[%s131_s1] sm:$0x1] }
   0x9   :  { %v40_v43 = vld [vmem:[%s132_s2] sm:$0x1] }
   0xa   :  { %v29_v22 = vadd.f32 %v28_v18, %v21_v13  ;;  %v52_v24 = vadd.f32 %v51_v20, %v45_v15 }
   0xc   :  { %v30_v25 = vadd.f32 %v29_v22, %v22_v17  ;;  %v53_v27 = vadd.f32 %v52_v24, %v46_v19 }
   0xe   :  { %v31_v28 = vadd.f32 %v30_v25, %v23_v21  ;;  %v54_v29 = vadd.f32 %v53_v27, %v47_v23 }
  0x10   :  { %v32_v30 = vrot.slane %v31_v28, 4  ;;  %v55_v31 = vadd.f32 %v54_v29, %v48_v26 }
  0x12   :  { %v33_v32 = vadd.f32 %v32_v30, %v31_v28  ;;  %v56_v33 = vrot.slane %v55_v31, 4 }
  0x14   :  { %v34_v34 = vrot.slane %v33_v32, 2  ;;  %v57_v35 = vadd.f32 %v56_v33, %v55_v31 }
  0x16   :  { %v35_v36 = vadd.f32 %v34_v34, %v33_v32  ;;  %v58_v37 = vrot.slane %v57_v35, 2 }
  0x18   :  { %v36_v38 = vrot.slane %v35_v36, 1  ;;  %v59_v39 = vadd.f32 %v58_v37, %v57_v35 }
  0x1a   :  { %v37_v41 = vadd.f32 %v36_v38, %v35_v36  ;;  %v60_v42 = vrot.slane %v59_v39, 1 }
  0x1c   :  { %v38_v44 = vadd.f32 %v37_v41, %v24_v40  ;;  %v61_v45 = vadd.f32 %v60_v42, %v59_v39 }
  0x1e   :  { %39 = vst [vmem:[%s131_s1] sm:$0x1] %v38_v44  ;;  %v62_v46 = vadd.f32 %v61_v45, %v40_v43 }
  0x20   :  { %63 = vst [vmem:[%s132_s2] sm:$0x1] %v62_v46 }

// kernel: resnet18_apply.83
= control target key start
LH: loop header
LB: loop body
LE: loop exit
PB: predicated region body
PF: predicated region fallthrough
CT: control target
= control target key end

     0   :  { %s260_s1 = inlined_call_operand.vmem [shape: bf16[128,128], index: 1, kind: input, shape index: {}]   ;;  %s261_s0 = inlined_call_operand.vmem [shape: bf16[32,128], index: 0, kind: input, shape index: {}]   ;;  %s262_s2 = inlined_call_operand.vmem [shape: f32[32,128], index: 2, kind: output, shape index: {}]  }
   0x1   :  { %v194_v0 = vld [vmem:[%s260_s1 + $0x38] sm:$0xff]  ;;  %v193_v1 = vld [vmem:[%s260_s1 + $0x30] sm:$0xff]  ;;  %v192_v2 = vld [vmem:[%s260_s1 + $0x28] sm:$0xff] }
   0x2   :  { %103 = vmatpush.bf16.msra.mxu0 %v194_v0  ;;  %195 = vmatpush.bf16.msra.mxu1 %v194_v0  ;;  %v191_v3 = vld [vmem:[%s260_s1 + $0x20] sm:$0xff]  ;;  %v190_v4 = vld [vmem:[%s260_s1 + $0x18] sm:$0xff]  ;;  %v189_v5 = vld [vmem:[%s260_s1 + $0x10] sm:$0xff] }
   0x3   :  { %v188_v6 = vld [vmem:[%s260_s1 + $0x8] sm:$0xff]  ;;  %v187_v7 = vld [vmem:[%s260_s1] sm:$0xff] }
   0x4   :  { %v185_v8 = vld [vmem:[%s261_s0] sm:$0xff]  ;;  %v186_v9 = vld [vmem:[%s261_s0 + $0x8] sm:$0xff] }
   0x6   :  { %104 = vmatpush.bf16.msra.mxu0 %v193_v1  ;;  %196 = vmatpush.bf16.msra.mxu1 %v193_v1 }
   0xa   :  { %105 = vmatpush.bf16.msra.mxu0 %v192_v2  ;;  %197 = vmatpush.bf16.msra.mxu1 %v192_v2 }
   0xe   :  { %106 = vmatpush.bf16.msra.mxu0 %v191_v3  ;;  %198 = vmatpush.bf16.msra.mxu1 %v191_v3 }
  0x12   :  { %107 = vmatpush.bf16.msra.mxu0 %v190_v4  ;;  %199 = vmatpush.bf16.msra.mxu1 %v190_v4 }
  0x16   :  { %108 = vmatpush.bf16.msra.mxu0 %v189_v5  ;;  %200 = vmatpush.bf16.msra.mxu1 %v189_v5 }
  0x1a   :  { %109 = vmatpush.bf16.msra.mxu0 %v188_v6  ;;  %201 = vmatpush.bf16.msra.mxu1 %v188_v6 }
  0x1e   :  { %110 = vmatpush.bf16.msra.mxu0 %v187_v7  ;;  %202 = vmatpush.bf16.msra.mxu1 %v187_v7 }
  0x21   :  { %111 = vmatmul.bf16.vlgmr.msra.gmra.mxu0 %v185_v8  ;;  %116 = vmatmul.bf16.vlgmr.msra.gmra.mxu1 %v186_v9 }
  0x9e   :  { %v112_v10 = vpop.f32.mrf.mxu0  ;;  %v117_v11 = vpop.f32.mrf.mxu1 }
  0x9f   :  { %137 = vst [vmem:[%s262_s2] sm:$0xff] %v112_v10 }
  0xa0   :  { %139 = vst [vmem:[%s262_s2 + $0x10] sm:$0xff] %v117_v11 }
  0xa6   :  { %v114_v12 = vpop.f32.mrf.mxu0  ;;  %v119_v13 = vpop.f32.mrf.mxu1 }
  0xa7   :  { %138 = vst [vmem:[%s262_s2 + $0x8] sm:$0xff] %v114_v12 }
  0xa8   :  { %140 = vst [vmem:[%s262_s2 + $0x18] sm:$0xff] %v119_v13 }

// kernel: resnet18_apply.84
= control target key start
LH: loop header
LB: loop body
LE: loop exit
PB: predicated region body
PF: predicated region fallthrough
CT: control target
= control target key end

     0   :  { %v57_v0 = vmov 0.0   ;;  %s103_s1 = inlined_call_operand.vmem [shape: f32[1,128], index: 1, kind: output, shape index: {0}]   ;;  %s104_s2 = inlined_call_operand.vmem [shape: f32[1,128], index: 2, kind: output, shape index: {1}]   ;;  %s105_s0 = inlined_call_operand.vmem [shape: f32[32,128], index: 0, kind: input, shape index: {}]  }
   0x1   :  { %14 = vst [vmem:[%s103_s1] sm:$0x1] %v57_v0  ;;  %v16_v1 = vld [vmem:[%s105_s0] sm:$0xff]  ;;  %v17_v2 = vld [vmem:[%s105_s0 + $0x8] sm:$0xff]  ;;  %v18_v3 = vld [vmem:[%s105_s0 + $0x10] sm:$0xff] }
   0x2   :  { %15 = vst [vmem:[%s104_s2] sm:$0x1] %v57_v0  ;;  %v19_v4 = vld [vmem:[%s105_s0 + $0x18] sm:$0xff]  ;;  %v21_v5 = vadd.f32 %v17_v2, %v16_v1  ;;  %v33_v6 = vmul.f32 %v16_v1, %v16_v1  ;;  %v34_v7 = vmul.f32 %v17_v2, %v17_v2  ;;  %v35_v8 = vmul.f32 %v18_v3, %v18_v3 }
   0x3   :  { %v36_v10 = vmul.f32 %v19_v4, %v19_v4 }
   0x4   :  { %v22_v9 = vadd.f32 %v21_v5, %v18_v3  ;;  %v37_v11 = vadd.f32 %v34_v7, %v33_v6 }
   0x6   :  { %v23_v12 = vadd.f32 %v22_v9, %v19_v4  ;;  %v38_v13 = vadd.f32 %v37_v11, %v35_v8 }
   0x8   :  { %v24_v14 = vrot.slane %v23_v12, 4  ;;  %v39_v15 = vadd.f32 %v38_v13, %v36_v10  ;;  %v20_v24 = vld [vmem:[%s103_s1] sm:$0x1] }
   0x9   :  { %v32_v27 = vld [vmem:[%s104_s2] sm:$0x1] }
   0xa   :  { %v25_v16 = vadd.f32 %v24_v14, %v23_v12  ;;  %v40_v17 = vrot.slane %v39_v15, 4 }
   0xc   :  { %v26_v18 = vrot.slane %v25_v16, 2  ;;  %v41_v19 = vadd.f32 %v40_v17, %v39_v15 }
   0xe   :  { %v27_v20 = vadd.f32 %v26_v18, %v25_v16  ;;  %v42_v21 = vrot.slane %v41_v19, 2 }
  0x10   :  { %v28_v22 = vrot.slane %v27_v20, 1  ;;  %v43_v23 = vadd.f32 %v42_v21, %v41_v19 }
  0x12   :  { %v29_v25 = vadd.f32 %v28_v22, %v27_v20  ;;  %v44_v26 = vrot.slane %v43_v23, 1 }
  0x14   :  { %v30_v28 = vadd.f32 %v29_v25, %v20_v24  ;;  %v45_v29 = vadd.f32 %v44_v26, %v43_v23 }
  0x16   :  { %31 = vst [vmem:[%s103_s1] sm:$0x1] %v30_v28  ;;  %v46_v30 = vadd.f32 %v45_v29, %v32_v27 }
  0x18   :  { %47 = vst [vmem:[%s104_s2] sm:$0x1] %v46_v30 }

// kernel: resnet18_apply.85
= control target key start
LH: loop header
LB: loop body
LE: loop exit
PB: predicated region body
PF: predicated region fallthrough
CT: control target
= control target key end

     0   :  { %s94_s0 = inlined_call_operand.vmem [shape: f32[32,128], index: 0, kind: input, shape index: {}]   ;;  %s95_s1 = inlined_call_operand.vmem [shape: f32[1,128], index: 1, kind: input, shape index: {}]   ;;  %s96_s2 = inlined_call_operand.vmem [shape: f32[1,128], index: 2, kind: input, shape index: {}]   ;;  %s97_s3 = inlined_call_operand.vmem [shape: f32[32,128], index: 3, kind: output, shape index: {}]  }
   0x1   :  { %v14_v0 = vld [vmem:[%s94_s0] sm:$0xff]  ;;  %v15_v3 = vld [vmem:[%s94_s0 + $0x8] sm:$0xff]  ;;  %v16_v6 = vld [vmem:[%s94_s0 + $0x10] sm:$0xff] }
   0x2   :  { %v42_v1 = vld [vmem:[%s95_s1] ss:$0 sm:$0xff]  ;;  %v17_v7 = vld [vmem:[%s94_s0 + $0x18] sm:$0xff] }
   0x3   :  { %v43_v2 = vld [vmem:[%s96_s2] ss:$0 sm:$0xff]  ;;  %v22_v4 = vmul.f32 %v42_v1, %v14_v0  ;;  %v23_v5 = vmul.f32 %v42_v1, %v15_v3  ;;  %v24_v8 = vmul.f32 %v42_v1, %v16_v6  ;;  %v25_v9 = vmul.f32 %v42_v1, %v17_v7 }
   0x5   :  { %v30_v10 = vadd.f32 %v43_v2, %v22_v4  ;;  %v31_v11 = vadd.f32 %v43_v2, %v23_v5  ;;  %v32_v12 = vadd.f32 %v43_v2, %v24_v8  ;;  %v33_v13 = vadd.f32 %v43_v2, %v25_v9 }
   0x7   :  { %34 = vst [vmem:[%s97_s3] sm:$0xff] %v30_v10 }
   0x8   :  { %35 = vst [vmem:[%s97_s3 + $0x8] sm:$0xff] %v31_v11 }
   0x9   :  { %36 = vst [vmem:[%s97_s3 + $0x10] sm:$0xff] %v32_v12 }
   0xa   :  { %37 = vst [vmem:[%s97_s3 + $0x18] sm:$0xff] %v33_v13 }

// kernel: resnet18_apply.79
= control target key start
LH: loop header
LB: loop body
LE: loop exit
PB: predicated region body
PF: predicated region fallthrough
CT: control target
= control target key end

     0   :  { %s665_s9 = smov 0   ;;  %s667_s10 = smov 0   ;;  %s761_s0 = inlined_call_operand.vmem [shape: bf16[32,640], index: 0, kind: input, shape index: {}]   ;;  %s762_s1 = inlined_call_operand.vmem [shape: bf16[640,128], index: 1, kind: input, shape index: {}]   ;;  %s763_s2 = inlined_call_operand.vmem [shape: f32[32,128], index: 2, kind: output, shape index: {}]  }
   0x1   :  { %s669_s11 = smov 0   ;;  %s671_s12 = smov 0  }
   0x2   :  { %s673_s13 = smov 0  }
   0x3 LB: > { %s24_s14 = sadd.s32 1, %s643_s12  ;;  %p47_p1 = scmp.ne.s32.totalorder %s635_s10, %s631_s9  ;;  %s647_s13 = sphi %s673_s13, %s12_s13   ;;  %s643_s12 = sphi %s671_s12, %s767_s12   ;;  %s639_s11 = sphi %s669_s11, %s766_s11   ;;  %s635_s10 = sphi %s667_s10, %s765_s10   ;;  %s631_s9 = sphi %s665_s9, %s764_s9  }
   0x4   : > { %p25_p0 = scmp.ge.s32.totalorder %s24_s14, 5  ;;  %p48_p2 = scmp.eq.s32.totalorder %s647_s13, 0 }
   0x5   : > { %s40_s16 = sadd.s32 1, %s635_s10  ;;  %p497_p5 = scmp.ge.s32.totalorder %s647_s13, 5 }
   0x6   : > { %s769_s14 = smov (%p25_p0, %s24_s14), 0  ;;  %p49_p3 = por %p48_p2, %p47_p1 }
   0x7   : > { %s36_s15 = ssub.s32 %s643_s12, %s769_s14  ;;  %129 = sbr.rel (%p497_p5) target bundleno = 20 (0x14), region = 16 }
   0x8   : > { %p38_p4 = scmp.eq.s32.totalorder %s36_s15, 0 }
   0xa   : > { %s700_s17 = scalar_select %p38_p4, %s635_s10, %s40_s16  }
   0xc   : > { %132 = sbr.rel (!%p49_p3) target bundleno = 20 (0x14), region = 20  ;;  %s134_s18 = sand.u32 (%p49_p3), 1, %s635_s10  }
   0xd   : > { %s499_s19 = sshll.u32 (%p49_p3), %s643_s12, 2  ;;  %s498_s20 = sshll.u32 (%p49_p3), %s134_s18, 4 }
   0xe   : > { %s141_s23 = scalar_lea.vmem (%p49_p3), %s761_s0, %s499_s19  ;;  %s136_s24 = scalar_lea.vmem (%p49_p3), [#allocation3], %s498_s20 }
   0xf   : > { %v158_v0 = vld [vmem:[%s141_s23] sm:$0xf] (%p49_p3)  ;;  %v160_v1 = vld [vmem:[%s141_s23 + $0x14] sm:$0xf] (%p49_p3)  ;;  %v162_v2 = vld [vmem:[%s141_s23 + $0x28] sm:$0xf] (%p49_p3) }
  0x10   : > { %159 = vst [vmem:[%s136_s24] sm:$0xf] (%p49_p3), %v158_v0  ;;  %v164_v3 = vld [vmem:[%s141_s23 + $0x3c] sm:$0xf] (%p49_p3) }
  0x11   : > { %161 = vst [vmem:[%s136_s24 + $0x4] sm:$0xf] %v160_v1 }
  0x12   : > { %163 = vst [vmem:[%s136_s24 + $0x8] sm:$0xf] %v162_v2 }
  0x13   : > { %165 = vst [vmem:[%s136_s24 + $0xc] sm:$0xf] %v164_v3 }
  0x14 PF: > { %p500_p6 = scmp.ge.s32.totalorder %s647_s13, 1  ;;  %p208_p7 = scmp.lt.s32.totalorder %s647_s13, 6 }
  0x16   : > { %p209_p8 = pnand %p500_p6, %p208_p7 }
  0x17   : > { %s215_s25 = sand.u32 (!%p209_p8), 1, %s631_s9   ;;  %s502_s26 = sshll.u32 (!%p209_p8), %s639_s11, 4 }
  0x18   : > { %212 = sbr.rel (%p209_p8) target bundleno = 217 (0xd9), region = 65  ;;  %s712_s27 = sshll.u32 (!%p209_p8), %s215_s25, 4 }
  0x19   : > { %p249_p9 = scmp.lt.s32.totalorder (!%p209_p8), %s502_s26, 79  ;;  %s217_s4 = scalar_lea.vmem (!%p209_p8), [#allocation3], %s712_s27 }
  0x1a   : > { %p504_p10 = scmp.ne.s32.totalorder (!%p209_p8), %s639_s11, 0 }
  0x1d   : > { %s771_s26 = smov (!%p249_p9, %s502_s26), 79  ;;  %269 = sbr.rel (%p504_p10) target bundleno = 39 (0x27), region = 73 }
  0x1e   : > { %s503_s28 = sshll.u32 %s771_s26, 2 }
  0x1f   : > { %s717_s3 = scalar_lea.vmem %s762_s1, %s503_s28 }
  0x22   : > { %v649_v4 = vmov 0.0  }
  0x23   : > { %270 = vst [vmem:[#allocation2 + $0x10] sm:$0xff] %v649_v4 }
  0x24   : > { %271 = vst [vmem:[#allocation2] sm:$0xff] %v649_v4 }
  0x25   : > { %272 = vst [vmem:[#allocation2 + $0x18] sm:$0xff] %v649_v4 }
  0x26   : > { %273 = vst [vmem:[#allocation2 + $0x8] sm:$0xff] %v649_v4 }
  0x27 PF: > { %v559_v5 = vld [vmem:[%s717_s3 + $0x38] sm:$0xff]  ;;  %v558_v6 = vld [vmem:[%s717_s3 + $0x30] sm:$0xff]  ;;  %v557_v7 = vld [vmem:[%s717_s3 + $0x28] sm:$0xff]  ;;  %p545_p11 = scmp.ne.s32.totalorder %s639_s11, 4 }
  0x28   : > { %358 = vmatpush.bf16.msra.mxu0 %v559_v5  ;;  %560 = vmatpush.bf16.msra.mxu1 %v559_v5  ;;  %v556_v8 = vld [vmem:[%s717_s3 + $0x20] sm:$0xff]  ;;  %v555_v9 = vld [vmem:[%s717_s3 + $0x18] sm:$0xff]  ;;  %v554_v10 = vld [vmem:[%s717_s3 + $0x10] sm:$0xff] }
  0x29   : > { %v553_v11 = vld [vmem:[%s717_s3 + $0x8] sm:$0xff]  ;;  %v552_v12 = vld [vmem:[%s717_s3] sm:$0xff] }
  0x2a   : > { %v550_v13 = vld [vmem:[%s217_s4] sm:$0xff]  ;;  %v551_v14 = vld [vmem:[%s217_s4 + $0x8] sm:$0xff] }
  0x2b   : > { %v274_v15 = vld [vmem:[#allocation2 + $0x10] sm:$0xff]  ;;  %v275_v21 = vld [vmem:[#allocation2] sm:$0xff] }
  0x2c   : > { %359 = vmatpush.bf16.msra.mxu0 %v558_v6  ;;  %561 = vmatpush.bf16.msra.mxu1 %v558_v6  ;;  %v276_v16 = vld [vmem:[#allocation2 + $0x18] sm:$0xff] }
  0x2d   : > { %v277_v22 = vld [vmem:[#allocation2 + $0x8] sm:$0xff] }
  0x30   : > { %360 = vmatpush.bf16.msra.mxu0 %v557_v7  ;;  %562 = vmatpush.bf16.msra.mxu1 %v557_v7 }
  0x34   : > { %361 = vmatpush.bf16.msra.mxu0 %v556_v8  ;;  %563 = vmatpush.bf16.msra.mxu1 %v556_v8 }
  0x38   : > { %362 = vmatpush.bf16.msra.mxu0 %v555_v9  ;;  %564 = vmatpush.bf16.msra.mxu1 %v555_v9 }
  0x3c   : > { %363 = vmatpush.bf16.msra.mxu0 %v554_v10  ;;  %565 = vmatpush.bf16.msra.mxu1 %v554_v10 }
  0x40   : > { %364 = vmatpush.bf16.msra.mxu0 %v553_v11  ;;  %566 = vmatpush.bf16.msra.mxu1 %v553_v11 }
  0x44   : > { %365 = vmatpush.bf16.msra.mxu0 %v552_v12  ;;  %567 = vmatpush.bf16.msra.mxu1 %v552_v12 }
  0x47   : > { %366 = vmatmul.bf16.vlgmr.msra.gmra.mxu0 %v550_v13  ;;  %371 = vmatmul.bf16.vlgmr.msra.gmra.mxu1 %v551_v14 }
  0xc4   : > { %v367_v17 = vpop.f32.mrf.mxu0  ;;  %v372_v18 = vpop.f32.mrf.mxu1 }
  0xc5   : > { %v377_v19 = vadd.f32 %v367_v17, %v274_v15  ;;  %v379_v20 = vadd.f32 %v372_v18, %v276_v16 }
  0xc7   : > { %381 = vst [vmem:[#allocation2 + $0x10] sm:$0xff] %v377_v19 }
  0xc8   : > { %383 = vst [vmem:[#allocation2 + $0x18] sm:$0xff] %v379_v20 }
  0xcc   : > { %v369_v23 = vpop.f32.mrf.mxu0  ;;  %v374_v24 = vpop.f32.mrf.mxu1  ;;  %388 = sbr.rel (%p545_p11) target bundleno = 217 (0xd9), region = 77 }
  0xcd   : > { %v378_v25 = vadd.f32 %v369_v23, %v275_v21  ;;  %v380_v26 = vadd.f32 %v374_v24, %v277_v22 }
  0xcf   : > { %382 = vst [vmem:[#allocation2] sm:$0xff] %v378_v25 }
  0xd0   : > { %384 = vst [vmem:[#allocation2 + $0x8] sm:$0xff] %v380_v26 }
  0xd1   : > { %v389_v27 = vld [vmem:[#allocation2 + $0x10] sm:$0xff]  ;;  %v391_v29 = vld [vmem:[#allocation2 + $0x18] sm:$0xff] }
  0xd2   : > { %393 = vst [vmem:[%s763_s2] sm:$0xff] %v389_v27 }
  0xd3   : > { %395 = vst [vmem:[%s763_s2 + $0x10] sm:$0xff] %v391_v29 }
  0xd6   : > { %v390_v28 = vld [vmem:[#allocation2] sm:$0xff] }
  0xd7   : > { %v392_v30 = vld [vmem:[#allocation2 + $0x8] sm:$0xff]  ;;  %394 = vst [vmem:[%s763_s2 + $0x8] sm:$0xff] %v390_v28 }
  0xd8   : > { %396 = vst [vmem:[%s763_s2 + $0x18] sm:$0xff] %v392_v30 }
  0xd9 PF: > { %s12_s13 = sadd.s32 1, %s647_s13   ;;  %s764_s9 = smov %s635_s10 }
  0xda   : > { %p9_p12 = scmp.ge.s32.totalorder %s12_s13, 7   ;;  %s765_s10 = smov %s700_s17 }
  0xdb   : > { %s766_s11 = smov %s643_s12  ;;  %s767_s12 = smov %s769_s14 }
  0xdc   :  { %11 = sbr.rel (!%p9_p12) target bundleno = 3 (0x3), region = 115 }

// kernel: resnet18_apply.81
= control target key start
LH: loop header
LB: loop body
LE: loop exit
PB: predicated region body
PF: predicated region fallthrough
CT: control target
= control target key end

     0   :  { %s98_s0 = inlined_call_operand.vmem [shape: f32[32,128], index: 0, kind: input, shape index: {}]   ;;  %s99_s1 = inlined_call_operand.vmem [shape: f32[1,128], index: 1, kind: input, shape index: {}]   ;;  %s100_s2 = inlined_call_operand.vmem [shape: f32[1,128], index: 2, kind: input, shape index: {}]   ;;  %s101_s3 = inlined_call_operand.vmem [shape: f32[32,128], index: 3, kind: output, shape index: {}]  }
   0x1   :  { %v14_v0 = vld [vmem:[%s98_s0] sm:$0xff]  ;;  %v15_v3 = vld [vmem:[%s98_s0 + $0x8] sm:$0xff]  ;;  %v16_v6 = vld [vmem:[%s98_s0 + $0x10] sm:$0xff] }
   0x2   :  { %v46_v1 = vld [vmem:[%s99_s1] ss:$0 sm:$0xff]  ;;  %v17_v7 = vld [vmem:[%s98_s0 + $0x18] sm:$0xff] }
   0x3   :  { %v47_v2 = vld [vmem:[%s100_s2] ss:$0 sm:$0xff]  ;;  %v22_v4 = vmul.f32 %v46_v1, %v14_v0  ;;  %v23_v5 = vmul.f32 %v46_v1, %v15_v3  ;;  %v24_v8 = vmul.f32 %v46_v1, %v16_v6  ;;  %v25_v9 = vmul.f32 %v46_v1, %v17_v7 }
   0x5   :  { %v30_v10 = vadd.f32 %v47_v2, %v22_v4  ;;  %v31_v11 = vadd.f32 %v47_v2, %v23_v5  ;;  %v32_v12 = vadd.f32 %v47_v2, %v24_v8  ;;  %v33_v13 = vadd.f32 %v47_v2, %v25_v9 }
   0x7   :  { %v34_v14 = vmax.f32 %v30_v10, 0.0  ;;  %v35_v15 = vmax.f32 %v31_v11, 0.0  ;;  %v36_v16 = vmax.f32 %v32_v12, 0.0  ;;  %v37_v17 = vmax.f32 %v33_v13, 0.0 }
   0x9   :  { %38 = vst [vmem:[%s101_s3] sm:$0xff] %v34_v14 }
   0xa   :  { %39 = vst [vmem:[%s101_s3 + $0x8] sm:$0xff] %v35_v15 }
   0xb   :  { %40 = vst [vmem:[%s101_s3 + $0x10] sm:$0xff] %v36_v16 }
   0xc   :  { %41 = vst [vmem:[%s101_s3 + $0x18] sm:$0xff] %v37_v17 }

// kernel: resnet18_apply.87
= control target key start
LH: loop header
LB: loop body
LE: loop exit
PB: predicated region body
PF: predicated region fallthrough
CT: control target
= control target key end

     0   :  { %s126_s0 = inlined_call_operand.vmem [shape: f32[32,128], index: 0, kind: input, shape index: {}]   ;;  %s127_s1 = inlined_call_operand.vmem [shape: f32[1,128], index: 1, kind: input, shape index: {}]   ;;  %s128_s2 = inlined_call_operand.vmem [shape: f32[1,128], index: 2, kind: input, shape index: {}]   ;;  %s129_s3 = inlined_call_operand.vmem [shape: f32[32,128], index: 3, kind: input, shape index: {}]   ;;  %s130_s4 = inlined_call_operand.vmem [shape: f32[32,128], index: 4, kind: output, shape index: {}]  }
   0x1   :  { %v17_v0 = vld [vmem:[%s126_s0] sm:$0xff]  ;;  %v18_v4 = vld [vmem:[%s126_s0 + $0x8] sm:$0xff]  ;;  %v19_v5 = vld [vmem:[%s126_s0 + $0x10] sm:$0xff] }
   0x2   :  { %v57_v1 = vld [vmem:[%s127_s1] ss:$0 sm:$0xff]  ;;  %v20_v9 = vld [vmem:[%s126_s0 + $0x18] sm:$0xff]  ;;  %v38_v11 = vld [vmem:[%s129_s3 + $0x8] sm:$0xff] }
   0x3   :  { %v58_v2 = vld [vmem:[%s128_s2] ss:$0 sm:$0xff]  ;;  %v25_v3 = vmul.f32 %v57_v1, %v17_v0  ;;  %v26_v7 = vmul.f32 %v57_v1, %v18_v4  ;;  %v27_v8 = vmul.f32 %v57_v1, %v19_v5  ;;  %v39_v12 = vld [vmem:[%s129_s3 + $0x10] sm:$0xff]  ;;  %v28_v13 = vmul.f32 %v57_v1, %v20_v9  ;;  %v40_v16 = vld [vmem:[%s129_s3 + $0x18] sm:$0xff] }
   0x4   :  { %v37_v6 = vld [vmem:[%s129_s3] sm:$0xff] }
   0x5   :  { %v33_v10 = vadd.f32 %v58_v2, %v25_v3  ;;  %v34_v14 = vadd.f32 %v58_v2, %v26_v7  ;;  %v35_v15 = vadd.f32 %v58_v2, %v27_v8  ;;  %v36_v18 = vadd.f32 %v58_v2, %v28_v13 }
   0x7   :  { %v41_v17 = vadd.f32 %v37_v6, %v33_v10  ;;  %v42_v19 = vadd.f32 %v38_v11, %v34_v14  ;;  %v43_v20 = vadd.f32 %v39_v12, %v35_v15  ;;  %v44_v22 = vadd.f32 %v40_v16, %v36_v18 }
   0x9   :  { %v45_v21 = vmax.f32 %v41_v17, 0.0  ;;  %v46_v23 = vmax.f32 %v42_v19, 0.0  ;;  %v47_v24 = vmax.f32 %v43_v20, 0.0  ;;  %v48_v25 = vmax.f32 %v44_v22, 0.0 }
   0xb   :  { %49 = vst [vmem:[%s130_s4] sm:$0xff] %v45_v21 }
   0xc   :  { %50 = vst [vmem:[%s130_s4 + $0x8] sm:$0xff] %v46_v23 }
   0xd   :  { %51 = vst [vmem:[%s130_s4 + $0x10] sm:$0xff] %v47_v24 }
   0xe   :  { %52 = vst [vmem:[%s130_s4 + $0x18] sm:$0xff] %v48_v25 }

// kernel: resnet18_apply.82
= control target key start
LH: loop header
LB: loop body
LE: loop exit
PB: predicated region body
PF: predicated region fallthrough
CT: control target
= control target key end

     0   :  { %s958_s9 = smov 0   ;;  %s960_s10 = smov 0   ;;  %s1077_s0 = inlined_call_operand.vmem [shape: bf16[32,1152], index: 0, kind: input, shape index: {}]   ;;  %s1078_s1 = inlined_call_operand.vmem [shape: bf16[1152,128], index: 1, kind: input, shape index: {}]   ;;  %s1079_s2 = inlined_call_operand.vmem [shape: f32[32,128], index: 2, kind: output, shape index: {}]  }
   0x1   :  { %s962_s11 = smov 0   ;;  %s964_s12 = smov 0  }
   0x2   :  { %s966_s13 = smov 0  }
   0x3 LB: > { %s24_s14 = sadd.s32 1, %s936_s12  ;;  %p47_p1 = scmp.ne.s32.totalorder %s928_s10, %s924_s9  ;;  %s940_s13 = sphi %s966_s13, %s12_s13   ;;  %s936_s12 = sphi %s964_s12, %s1083_s12   ;;  %s932_s11 = sphi %s962_s11, %s1082_s11   ;;  %s928_s10 = sphi %s960_s10, %s1081_s10   ;;  %s924_s9 = sphi %s958_s9, %s1080_s9  }
   0x4   : > { %p25_p0 = scmp.ge.s32.totalorder %s24_s14, 3  ;;  %p48_p2 = scmp.eq.s32.totalorder %s940_s13, 0 }
   0x5   : > { %s40_s16 = sadd.s32 1, %s928_s10  ;;  %p682_p5 = scmp.ge.s32.totalorder %s940_s13, 3 }
   0x6   : > { %s1085_s14 = smov (%p25_p0, %s24_s14), 0  ;;  %p49_p3 = por %p48_p2, %p47_p1 }
   0x7   : > { %s36_s15 = ssub.s32 %s936_s12, %s1085_s14  ;;  %129 = sbr.rel (%p682_p5) target bundleno = 25 (0x19), region = 16 }
   0x8   : > { %p38_p4 = scmp.eq.s32.totalorder %s36_s15, 0 }
   0xa   : > { %s993_s17 = scalar_select %p38_p4, %s928_s10, %s40_s16  }
   0xc   : > { %132 = sbr.rel (!%p49_p3) target bundleno = 25 (0x19), region = 20  ;;  %s134_s18 = sand.u32 (%p49_p3), 1, %s928_s10  }
   0xd   : > { %s820_s19 = smul.u32 (%p49_p3), 12, %s936_s12 }
   0xe   : > { %s859_s20 = smul.u32 (%p49_p3), 48, %s134_s18 }
   0xf   : > { %s142_s23 = scalar_lea.vmem (%p49_p3), %s1077_s0, %s820_s19 }
  0x10   : > { %v157_v0 = vld [vmem:[%s142_s23] sm:$0xff] (%p49_p3)  ;;  %v161_v2 = vld [vmem:[%s142_s23 + $0x48] sm:$0xff] (%p49_p3)  ;;  %s136_s24 = scalar_lea.vmem (%p49_p3), [#allocation3], %s859_s20  ;;  %v688_v6 = vld [vmem:[%s142_s23 + $0x50] sm:$0xf] (%p49_p3) }
  0x11   : > { %v159_v1 = vld [vmem:[%s142_s23 + $0x24] sm:$0xff]  ;;  %158 = vst [vmem:[%s136_s24] sm:$0xff] %v157_v0  ;;  %v163_v3 = vld [vmem:[%s142_s23 + $0x6c] sm:$0xff]  ;;  %v690_v7 = vld [vmem:[%s142_s23 + $0x74] sm:$0xf] }
  0x12   : > { %160 = vst [vmem:[%s136_s24 + $0xc] sm:$0xff] %v159_v1  ;;  %v684_v4 = vld [vmem:[%s142_s23 + $0x8] sm:$0xf]  ;;  %v686_v5 = vld [vmem:[%s142_s23 + $0x2c] sm:$0xf] }
  0x13   : > { %162 = vst [vmem:[%s136_s24 + $0x18] sm:$0xff] %v161_v2 }
  0x14   : > { %164 = vst [vmem:[%s136_s24 + $0x24] sm:$0xff] %v163_v3 }
  0x15   : > { %685 = vst [vmem:[%s136_s24 + $0x8] sm:$0xf] %v684_v4 }
  0x16   : > { %687 = vst [vmem:[%s136_s24 + $0x14] sm:$0xf] %v686_v5 }
  0x17   : > { %689 = vst [vmem:[%s136_s24 + $0x20] sm:$0xf] %v688_v6 }
  0x18   : > { %691 = vst [vmem:[%s136_s24 + $0x2c] sm:$0xf] %v690_v7 }
  0x19 PF: > { %p692_p6 = scmp.ge.s32.totalorder %s940_s13, 1  ;;  %p197_p7 = scmp.lt.s32.totalorder %s940_s13, 4 }
  0x1b   : > { %p198_p8 = pnand %p692_p6, %p197_p7 }
  0x1c   : > { %s204_s25 = sand.u32 (!%p198_p8), 1, %s924_s9   ;;  %s238_s26 = smul.u32 (!%p198_p8), 48, %s932_s11 }
  0x1d   : > { %201 = sbr.rel (%p198_p8) target bundleno = 247 (0xf7), region = 50  ;;  %p694_p10 = scmp.ne.s32.totalorder (!%p198_p8), %s932_s11, 0 }
  0x1e   : > { %s860_s27 = smul.u32 (!%p198_p8), 48, %s204_s25  ;;  %p239_p9 = scmp.lt.s32.totalorder (!%p198_p8), %s238_s26, 143 }
  0x20   : > { %s1010_s4 = scalar_lea.vmem (!%p198_p8), [#allocation3], %s860_s27 }
  0x22   : > { %s1087_s26 = smov (!%p239_p9, %s238_s26), 143  ;;  %259 = sbr.rel (%p694_p10) target bundleno = 44 (0x2c), region = 58 }
  0x23   : > { %s693_s28 = sshll.u32 %s1087_s26, 2 }
  0x24   : > { %s1008_s3 = scalar_lea.vmem %s1078_s1, %s693_s28 }
  0x27   : > { %v942_v8 = vmov 0.0  }
  0x28   : > { %260 = vst [vmem:[#allocation2 + $0x10] sm:$0xff] %v942_v8 }
  0x29   : > { %261 = vst [vmem:[#allocation2] sm:$0xff] %v942_v8 }
  0x2a   : > { %262 = vst [vmem:[#allocation2 + $0x18] sm:$0xff] %v942_v8 }
  0x2b   : > { %263 = vst [vmem:[#allocation2 + $0x8] sm:$0xff] %v942_v8 }
  0x2c PF: > { %v834_v9 = vld [vmem:[%s1008_s3 + $0x38] sm:$0xff]  ;;  %v833_v12 = vld [vmem:[%s1008_s3 + $0x30] sm:$0xff]  ;;  %v832_v15 = vld [vmem:[%s1008_s3 + $0x28] sm:$0xff]  ;;  %p815_p11 = scmp.ne.s32.totalorder %s932_s11, 2 }
  0x2d   : > { %v842_v10 = vld [vmem:[%s1008_s3 + $0x78] sm:$0xff]  ;;  %500 = vmatpush.bf16.msra.mxu0 %v834_v9  ;;  %v841_v13 = vld [vmem:[%s1008_s3 + $0x70] sm:$0xff]  ;;  %851 = vmatpush.bf16.msra.mxu3 %v834_v9  ;;  %v840_v16 = vld [vmem:[%s1008_s3 + $0x68] sm:$0xff] }
  0x2e   : > { %v850_v11 = vld [vmem:[%s1008_s3 + $0xb8] sm:$0xff]  ;;  %519 = vmatpush.bf16.msra.mxu1 %v842_v10  ;;  %v849_v14 = vld [vmem:[%s1008_s3 + $0xb0] sm:$0xff]  ;;  %v848_v17 = vld [vmem:[%s1008_s3 + $0xa8] sm:$0xff] }
  0x2f   : > { %538 = vmatpush.bf16.msra.mxu2 %v850_v11  ;;  %v831_v18 = vld [vmem:[%s1008_s3 + $0x20] sm:$0xff]  ;;  %v830_v21 = vld [vmem:[%s1008_s3 + $0x18] sm:$0xff]  ;;  %v829_v24 = vld [vmem:[%s1008_s3 + $0x10] sm:$0xff] }
  0x30   : > { %v839_v19 = vld [vmem:[%s1008_s3 + $0x60] sm:$0xff]  ;;  %v838_v22 = vld [vmem:[%s1008_s3 + $0x58] sm:$0xff]  ;;  %v837_v25 = vld [vmem:[%s1008_s3 + $0x50] sm:$0xff] }
  0x31   : > { %501 = vmatpush.bf16.msra.mxu0 %v833_v12  ;;  %852 = vmatpush.bf16.msra.mxu3 %v833_v12  ;;  %v847_v20 = vld [vmem:[%s1008_s3 + $0xa0] sm:$0xff]  ;;  %v846_v23 = vld [vmem:[%s1008_s3 + $0x98] sm:$0xff]  ;;  %v845_v26 = vld [vmem:[%s1008_s3 + $0x90] sm:$0xff] }
  0x32   : > { %520 = vmatpush.bf16.msra.mxu1 %v841_v13  ;;  %v828_v27 = vld [vmem:[%s1008_s3 + $0x8] sm:$0xff]  ;;  %v827_v30 = vld [vmem:[%s1008_s3] sm:$0xff]  ;;  %v264_v54 = vld [vmem:[#allocation2 + $0x10] sm:$0xff] }
  0x33   : > { %539 = vmatpush.bf16.msra.mxu2 %v849_v14  ;;  %v836_v28 = vld [vmem:[%s1008_s3 + $0x48] sm:$0xff]  ;;  %v835_v31 = vld [vmem:[%s1008_s3 + $0x40] sm:$0xff]  ;;  %v266_v4 = vld [vmem:[#allocation2 + $0x18] sm:$0xff] }
  0x34   : > { %v844_v29 = vld [vmem:[%s1008_s3 + $0x88] sm:$0xff]  ;;  %v843_v32 = vld [vmem:[%s1008_s3 + $0x80] sm:$0xff] }
  0x35   : > { %502 = vmatpush.bf16.msra.mxu0 %v832_v15  ;;  %853 = vmatpush.bf16.msra.mxu3 %v832_v15  ;;  %v697_v33 = vld [vmem:[%s1010_s4] sm:$0xf]  ;;  %v822_v34 = vld [vmem:[%s1010_s4 + $0x8] sm:$0xf0]  ;;  %v821_v35 = vld [vmem:[%s1010_s4 + $0x4] sm:$0xf] }
  0x36   : > { %521 = vmatpush.bf16.msra.mxu1 %v840_v16  ;;  %v699_v36 = vld [vmem:[%s1010_s4 + $0xc] sm:$0xf0]  ;;  %v705_v37 = vld [vmem:[%s1010_s4 + $0x8] sm:$0xf]  ;;  %v823_v38 = vld [vmem:[%s1010_s4 + $0x10] sm:$0xf0]  ;;  %v698_v41 = vor.u32 %v822_v34, %v697_v33 }
  0x37   : > { %540 = vmatpush.bf16.msra.mxu2 %v848_v17  ;;  %v709_v39 = vld [vmem:[%s1010_s4 + $0x18] sm:$0xf]  ;;  %v825_v40 = vld [vmem:[%s1010_s4 + $0x20] sm:$0xf0]  ;;  %v702_v42 = vor.u32 %v821_v35, %v699_v36  ;;  %v706_v43 = vor.u32 %v823_v38, %v705_v37  ;;  %v824_v45 = vld [vmem:[%s1010_s4 + $0x1c] sm:$0xf] }
  0x38   : > { %v710_v44 = vor.u32 %v825_v40, %v709_v39  ;;  %v711_v46 = vld [vmem:[%s1010_s4 + $0x24] sm:$0xf0]  ;;  %v717_v47 = vld [vmem:[%s1010_s4 + $0x20] sm:$0xf]  ;;  %v826_v48 = vld [vmem:[%s1010_s4 + $0x28] sm:$0xf0] }
  0x39   : > { %503 = vmatpush.bf16.msra.mxu0 %v831_v18  ;;  %854 = vmatpush.bf16.msra.mxu3 %v831_v18  ;;  %v714_v49 = vor.u32 %v824_v45, %v711_v46  ;;  %v718_v50 = vor.u32 %v826_v48, %v717_v47  ;;  %v265_v61 = vld [vmem:[#allocation2] sm:$0xff]  ;;  %v267_v11 = vld [vmem:[#allocation2 + $0x8] sm:$0xff] }
  0x3a   : > { %522 = vmatpush.bf16.msra.mxu1 %v839_v19 }
  0x3b   : > { %541 = vmatpush.bf16.msra.mxu2 %v847_v20 }
  0x3d   : > { %504 = vmatpush.bf16.msra.mxu0 %v830_v21  ;;  %855 = vmatpush.bf16.msra.mxu3 %v830_v21 }
  0x3e   : > { %523 = vmatpush.bf16.msra.mxu1 %v838_v22 }
  0x3f   : > { %542 = vmatpush.bf16.msra.mxu2 %v846_v23 }
  0x41   : > { %505 = vmatpush.bf16.msra.mxu0 %v829_v24  ;;  %856 = vmatpush.bf16.msra.mxu3 %v829_v24 }
  0x42   : > { %524 = vmatpush.bf16.msra.mxu1 %v837_v25 }
  0x43   : > { %543 = vmatpush.bf16.msra.mxu2 %v845_v26 }
  0x45   : > { %506 = vmatpush.bf16.msra.mxu0 %v828_v27  ;;  %857 = vmatpush.bf16.msra.mxu3 %v828_v27 }
  0x46   : > { %525 = vmatpush.bf16.msra.mxu1 %v836_v28 }
  0x47   : > { %544 = vmatpush.bf16.msra.mxu2 %v844_v29 }
  0x49   : > { %507 = vmatpush.bf16.msra.mxu0 %v827_v30  ;;  %858 = vmatpush.bf16.msra.mxu3 %v827_v30 }
  0x4a   : > { %526 = vmatpush.bf16.msra.mxu1 %v835_v31 }
  0x4b   : > { %545 = vmatpush.bf16.msra.mxu2 %v843_v32 }
  0x4c   : > { %508 = vmatmul.bf16.vlgmr.msra.gmra.mxu0 %v698_v41  ;;  %513 = vmatmul.bf16.vlgmr.msra.gmra.mxu3 %v710_v44 }
  0x4d   : > { %527 = vmatmul.bf16.vlgmr.msra.gmra.mxu1 %v702_v42 }
  0x4e   : > { %546 = vmatmul.bf16.vlgmr.msra.gmra.mxu2 %v706_v43 }
  0x5d   : > { %532 = vmatmul.bf16.gmra.mxu1 %v714_v49 }
  0x5e   : > { %551 = vmatmul.bf16.gmra.mxu2 %v718_v50 }
  0xc9   : > { %v509_v52 = vpop.f32.mrf.mxu0 }
  0xca   : > { %v528_v51 = vpop.f32.mrf.mxu1 }
  0xcb   : > { %v529_v53 = vadd.f32 %v528_v51, %v509_v52 }
  0xcf   : > { %v514_v2 = vpop.f32.mrf.mxu3 }
  0xd1   : > { %v547_v55 = vpop.f32.mrf.mxu2  ;;  %v511_v59 = vpop.f32.mrf.mxu0 }
  0xd2   : > { %v548_v56 = vadd.f32 %v547_v55, %v529_v53  ;;  %v530_v57 = vpop.f32.mrf.mxu1 }
  0xd3   : > { %v531_v60 = vadd.f32 %v530_v57, %v511_v59 }
  0xd4   : > { %v557_v58 = vadd.f32 %v548_v56, %v264_v54 }
  0xd6   : > { %561 = vst [vmem:[#allocation2 + $0x10] sm:$0xff] %v557_v58 }
  0xd7   : > { %v516_v9 = vpop.f32.mrf.mxu3 }
  0xd9   : > { %v549_v62 = vpop.f32.mrf.mxu2 }
  0xda   : > { %v550_v63 = vadd.f32 %v549_v62, %v531_v60  ;;  %v533_v0 = vpop.f32.mrf.mxu1 }
  0xdb   : > { %v534_v3 = vadd.f32 %v533_v0, %v514_v2 }
  0xdc   : > { %v558_v1 = vadd.f32 %v550_v63, %v265_v61 }
  0xde   : > { %562 = vst [vmem:[#allocation2] sm:$0xff] %v558_v1 }
  0xe1   : > { %v552_v5 = vpop.f32.mrf.mxu2 }
  0xe2   : > { %v553_v6 = vadd.f32 %v552_v5, %v534_v3  ;;  %v535_v8 = vpop.f32.mrf.mxu1 }
  0xe3   : > { %v536_v10 = vadd.f32 %v535_v8, %v516_v9 }
  0xe4   : > { %v559_v7 = vadd.f32 %v553_v6, %v266_v4 }
  0xe6   : > { %563 = vst [vmem:[#allocation2 + $0x18] sm:$0xff] %v559_v7 }
  0xe9   : > { %v554_v12 = vpop.f32.mrf.mxu2 }
  0xea   : > { %v555_v13 = vadd.f32 %v554_v12, %v536_v10  ;;  %568 = sbr.rel (%p815_p11) target bundleno = 247 (0xf7), region = 62 }
  0xec   : > { %v560_v14 = vadd.f32 %v555_v13, %v267_v11 }
  0xee   : > { %564 = vst [vmem:[#allocation2 + $0x8] sm:$0xff] %v560_v14 }
  0xef   : > { %v569_v15 = vld [vmem:[#allocation2 + $0x10] sm:$0xff]  ;;  %v570_v16 = vld [vmem:[#allocation2] sm:$0xff]  ;;  %v571_v17 = vld [vmem:[#allocation2 + $0x18] sm:$0xff] }
  0xf0   : > { %573 = vst [vmem:[%s1079_s2] sm:$0xff] %v569_v15 }
  0xf1   : > { %574 = vst [vmem:[%s1079_s2 + $0x8] sm:$0xff] %v570_v16 }
  0xf2   : > { %575 = vst [vmem:[%s1079_s2 + $0x10] sm:$0xff] %v571_v17 }
  0xf5   : > { %v572_v18 = vld [vmem:[#allocation2 + $0x8] sm:$0xff] }
  0xf6   : > { %576 = vst [vmem:[%s1079_s2 + $0x18] sm:$0xff] %v572_v18 }
  0xf7 PF: > { %s12_s13 = sadd.s32 1, %s940_s13   ;;  %s1080_s9 = smov %s928_s10 }
  0xf8   : > { %p9_p12 = scmp.ge.s32.totalorder %s12_s13, 5   ;;  %s1081_s10 = smov %s993_s17 }
  0xf9   : > { %s1082_s11 = smov %s936_s12  ;;  %s1083_s12 = smov %s1085_s14 }
  0xfa   :  { %11 = sbr.rel (!%p9_p12) target bundleno = 3 (0x3), region = 106 }

// kernel: resnet18_apply.99
= control target key start
LH: loop header
LB: loop body
LE: loop exit
PB: predicated region body
PF: predicated region fallthrough
CT: control target
= control target key end

     0   :  { %v14_v0 = vlaneseq  ;;  %v78_v7 = vmov 0.0   ;;  %vm38_vm1 = vcmask 1040384   ;;  %s130_s0 = inlined_call_operand.vmem [shape: f32[8,256], index: 0, kind: input, shape index: {}]   ;;  %s131_s1 = inlined_call_operand.vmem [shape: f32[1,256], index: 1, kind: output, shape index: {0}]   ;;  %s132_s2 = inlined_call_operand.vmem [shape: f32[1,256], index: 2, kind: output, shape index: {1}]  }
   0x1   :  { %v20_v1 = vld [vmem:[%s130_s0] sm:$0xff]  ;;  %v21_v2 = vld [vmem:[%s130_s0 + $0x8] sm:$0xff] }
   0x2   :  { %vm100_vm0 = vcmp.lt.s32.totalorder %v14_v0, 256  ;;  %v23_v4 = vrot.slane %v20_v1, 4  ;;  %v29_v5 = vrot.slane %v21_v2, 4  ;;  %v48_v6 = vmul.f32 %v20_v1, %v20_v1 }
   0x3   :  { %18 = vst.msk [vmem:[%s131_s1] sm:$0x3] %vm100_vm0, %v78_v7  ;;  %v49_v8 = vmul.f32 %v21_v2, %v21_v2 }
   0x4   :  { %v24_v9 = vadd.f32 %v23_v4, %v20_v1  ;;  %v30_v10 = vadd.f32 %v29_v5, %v21_v2  ;;  %19 = vst.msk [vmem:[%s132_s2] sm:$0x3] %vm100_vm0, %v78_v7  ;;  %v50_v11 = vrot.slane %v48_v6, 4 }
   0x5   :  { %v56_v12 = vrot.slane %v49_v8, 4 }
   0x6   :  { %v25_v13 = vrot.slane %v24_v9, 2  ;;  %v31_v14 = vrot.slane %v30_v10, 2  ;;  %v51_v15 = vadd.f32 %v50_v11, %v48_v6 }
   0x7   :  { %v57_v16 = vadd.f32 %v56_v12, %v49_v8 }
   0x8   :  { %v26_v17 = vadd.f32 %v25_v13, %v24_v9  ;;  %v32_v18 = vadd.f32 %v31_v14, %v30_v10  ;;  %v52_v19 = vrot.slane %v51_v15, 2 }
   0x9   :  { %v58_v20 = vrot.slane %v57_v16, 2 }
   0xa   :  { %v27_v21 = vrot.slane %v26_v17, 1  ;;  %v33_v22 = vrot.slane %v32_v18, 1  ;;  %v53_v23 = vadd.f32 %v52_v19, %v51_v15  ;;  %v22_v29 = vld [vmem:[%s131_s1] sm:$0x3] }
   0xb   :  { %v59_v24 = vadd.f32 %v58_v20, %v57_v16  ;;  %v47_v35 = vld [vmem:[%s132_s2] sm:$0x3] }
   0xc   :  { %v28_v25 = vadd.f32 %v27_v21, %v26_v17  ;;  %v34_v26 = vadd.f32 %v33_v22, %v32_v18  ;;  %v54_v27 = vrot.slane %v53_v23, 1 }
   0xd   :  { %v60_v28 = vrot.slane %v59_v24, 1 }
   0xe   :  { %v37_v30 = vrot.slane %v34_v26, 7  ;;  %v55_v31 = vadd.f32 %v54_v27, %v53_v23 }
   0xf   :  { %v61_v32 = vadd.f32 %v60_v28, %v59_v24 }
  0x10   :  { %v39_v33 = vsel %vm38_vm1, %v28_v25, %v37_v30 }
  0x11   :  { %v41_v34 = vadd.f32 %v39_v33, %v22_v29  ;;  %v64_v36 = vrot.slane %v61_v32, 7 }
  0x13   :  { %46 = vst.msk [vmem:[%s131_s1] sm:$0x3] %vm100_vm0, %v41_v34  ;;  %v65_v37 = vsel %vm38_vm1, %v55_v31, %v64_v36 }
  0x14   :  { %v67_v38 = vadd.f32 %v65_v37, %v47_v35 }
  0x16   :  { %68 = vst.msk [vmem:[%s132_s2] sm:$0x3] %vm100_vm0, %v67_v38 }

// kernel: resnet18_apply.98
= control target key start
LH: loop header
LB: loop body
LE: loop exit
PB: predicated region body
PF: predicated region fallthrough
CT: control target
= control target key end

     0   :  { %s357_s1 = inlined_call_operand.vmem [shape: bf16[128,256], index: 1, kind: input, shape index: {}]   ;;  %s358_s0 = inlined_call_operand.vmem [shape: bf16[8,128], index: 0, kind: input, shape index: {}]   ;;  %s359_s2 = inlined_call_operand.vmem [shape: f32[8,256], index: 2, kind: output, shape index: {}]  }
   0x1   :  { %v215_v0 = vld [vmem:[%s357_s1 + $0x70] sm:$0xf]  ;;  %v236_v1 = vld [vmem:[%s357_s1 + $0x74] sm:$0xf0]  ;;  %v235_v2 = vld [vmem:[%s357_s1 + $0x74] sm:$0xf] }
   0x2   :  { %v216_v3 = vor.u32 %v236_v1, %v215_v0  ;;  %v217_v4 = vld [vmem:[%s357_s1 + $0x78] sm:$0xf0]  ;;  %v207_v5 = vld [vmem:[%s357_s1 + $0x60] sm:$0xf]  ;;  %v234_v6 = vld [vmem:[%s357_s1 + $0x64] sm:$0xf0] }
   0x3   :  { %v220_v7 = vor.u32 %v235_v2, %v217_v4  ;;  %v233_v8 = vld [vmem:[%s357_s1 + $0x64] sm:$0xf]  ;;  %v209_v9 = vld [vmem:[%s357_s1 + $0x68] sm:$0xf0]  ;;  %v208_v10 = vor.u32 %v234_v6, %v207_v5  ;;  %v199_v12 = vld [vmem:[%s357_s1 + $0x50] sm:$0xf] }
   0x4   :  { %116 = vmatpush.bf16.msra.mxu0 %v216_v3  ;;  %v212_v11 = vor.u32 %v233_v8, %v209_v9  ;;  %v232_v13 = vld [vmem:[%s357_s1 + $0x54] sm:$0xf0]  ;;  %v231_v14 = vld [vmem:[%s357_s1 + $0x54] sm:$0xf]  ;;  %v201_v15 = vld [vmem:[%s357_s1 + $0x58] sm:$0xf0] }
   0x5   :  { %129 = vmatpush.bf16.msra.mxu1 %v220_v7  ;;  %v200_v16 = vor.u32 %v232_v13, %v199_v12  ;;  %v204_v17 = vor.u32 %v231_v14, %v201_v15  ;;  %v191_v18 = vld [vmem:[%s357_s1 + $0x40] sm:$0xf]  ;;  %v230_v19 = vld [vmem:[%s357_s1 + $0x44] sm:$0xf0]  ;;  %v229_v20 = vld [vmem:[%s357_s1 + $0x44] sm:$0xf] }
   0x6   :  { %v193_v21 = vld [vmem:[%s357_s1 + $0x48] sm:$0xf0]  ;;  %v192_v22 = vor.u32 %v230_v19, %v191_v18  ;;  %v183_v24 = vld [vmem:[%s357_s1 + $0x30] sm:$0xf]  ;;  %v228_v25 = vld [vmem:[%s357_s1 + $0x34] sm:$0xf0] }
   0x7   :  { %v196_v23 = vor.u32 %v229_v20, %v193_v21  ;;  %v227_v26 = vld [vmem:[%s357_s1 + $0x34] sm:$0xf]  ;;  %v185_v27 = vld [vmem:[%s357_s1 + $0x38] sm:$0xf0]  ;;  %v184_v28 = vor.u32 %v228_v25, %v183_v24  ;;  %v175_v30 = vld [vmem:[%s357_s1 + $0x20] sm:$0xf] }
   0x8   :  { %117 = vmatpush.bf16.msra.mxu0 %v208_v10  ;;  %v188_v29 = vor.u32 %v227_v26, %v185_v27  ;;  %v226_v31 = vld [vmem:[%s357_s1 + $0x24] sm:$0xf0]  ;;  %v225_v32 = vld [vmem:[%s357_s1 + $0x24] sm:$0xf]  ;;  %v177_v33 = vld [vmem:[%s357_s1 + $0x28] sm:$0xf0] }
   0x9   :  { %130 = vmatpush.bf16.msra.mxu1 %v212_v11  ;;  %v176_v34 = vor.u32 %v226_v31, %v175_v30  ;;  %v180_v35 = vor.u32 %v225_v32, %v177_v33  ;;  %v167_v36 = vld [vmem:[%s357_s1 + $0x10] sm:$0xf]  ;;  %v224_v37 = vld [vmem:[%s357_s1 + $0x14] sm:$0xf0]  ;;  %v223_v38 = vld [vmem:[%s357_s1 + $0x14] sm:$0xf] }
   0xa   :  { %v169_v39 = vld [vmem:[%s357_s1 + $0x18] sm:$0xf0]  ;;  %v168_v40 = vor.u32 %v224_v37, %v167_v36  ;;  %v159_v42 = vld [vmem:[%s357_s1] sm:$0xf]  ;;  %v222_v43 = vld [vmem:[%s357_s1 + $0x4] sm:$0xf0] }
   0xb   :  { %v172_v41 = vor.u32 %v223_v38, %v169_v39  ;;  %v221_v44 = vld [vmem:[%s357_s1 + $0x4] sm:$0xf]  ;;  %v161_v45 = vld [vmem:[%s357_s1 + $0x8] sm:$0xf0]  ;;  %v160_v46 = vor.u32 %v222_v43, %v159_v42  ;;  %v19_v48 = vld [vmem:[%s358_s0] sm:$0xf] }
   0xc   :  { %118 = vmatpush.bf16.msra.mxu0 %v200_v16  ;;  %v164_v47 = vor.u32 %v221_v44, %v161_v45 }
   0xd   :  { %131 = vmatpush.bf16.msra.mxu1 %v204_v17 }
  0x10   :  { %119 = vmatpush.bf16.msra.mxu0 %v192_v22 }
  0x11   :  { %132 = vmatpush.bf16.msra.mxu1 %v196_v23 }
  0x14   :  { %120 = vmatpush.bf16.msra.mxu0 %v184_v28 }
  0x15   :  { %133 = vmatpush.bf16.msra.mxu1 %v188_v29 }
  0x18   :  { %121 = vmatpush.bf16.msra.mxu0 %v176_v34 }
  0x19   :  { %134 = vmatpush.bf16.msra.mxu1 %v180_v35 }
  0x1c   :  { %122 = vmatpush.bf16.msra.mxu0 %v168_v40 }
  0x1d   :  { %135 = vmatpush.bf16.msra.mxu1 %v172_v41 }
  0x20   :  { %123 = vmatpush.bf16.msra.mxu0 %v160_v46 }
  0x21   :  { %136 = vmatpush.bf16.msra.mxu1 %v164_v47 }
  0x23   :  { %124 = vmatmul.bf16.vlgmr.msra.gmra.mxu0 %v19_v48 }
  0x24   :  { %137 = vmatmul.bf16.vlgmr.msra.gmra.mxu1 %v19_v48 }
  0xa0   :  { %v125_v49 = vpop.f32.mrf.mxu0 }
  0xa1   :  { %151 = vst [vmem:[%s359_s2] sm:$0xff] %v125_v49  ;;  %v138_v50 = vpop.f32.mrf.mxu1 }
  0xa2   :  { %152 = vst [vmem:[%s359_s2 + $0x8] sm:$0xff] %v138_v50 }
  0xa8   :  { %v127_v51 = vpop.f32.mrf.mxu0 }
  0xa9   :  { %v140_v52 = vpop.f32.mrf.mxu1 }

// kernel: resnet18_apply.100
= control target key start
LH: loop header
LB: loop body
LE: loop exit
PB: predicated region body
PF: predicated region fallthrough
CT: control target
= control target key end

     0   :  { %s76_s0 = inlined_call_operand.vmem [shape: f32[8,256], index: 0, kind: input, shape index: {}]   ;;  %s77_s1 = inlined_call_operand.vmem [shape: f32[1,256], index: 1, kind: input, shape index: {}]   ;;  %s78_s2 = inlined_call_operand.vmem [shape: f32[1,256], index: 2, kind: input, shape index: {}]   ;;  %s79_s3 = inlined_call_operand.vmem [shape: f32[8,256], index: 3, kind: output, shape index: {}]  }
   0x1   :  { %v14_v0 = vld [vmem:[%s76_s0] sm:$0xff]  ;;  %v15_v5 = vld [vmem:[%s76_s0 + $0x8] sm:$0xff] }
   0x2   :  { %v16_v1 = vld [vmem:[%s77_s1] sm:$0x3] }
   0x3   :  { %v24_v2 = vld [vmem:[%s78_s2] sm:$0x3]  ;;  %v18_v3 = vperm.slane %v16_v1, 0  ;;  %v19_v6 = vperm.slane %v16_v1, 1 }
   0x4   :  { %v26_v4 = vperm.slane %v24_v2, 0  ;;  %v27_v7 = vperm.slane %v24_v2, 1 }
   0x5   :  { %v22_v8 = vmul.f32 %v18_v3, %v14_v0  ;;  %v23_v9 = vmul.f32 %v19_v6, %v15_v5 }
   0x7   :  { %v30_v10 = vadd.f32 %v26_v4, %v22_v8  ;;  %v31_v11 = vadd.f32 %v27_v7, %v23_v9 }
   0x9   :  { %32 = vst [vmem:[%s79_s3] sm:$0xff] %v30_v10 }
   0xa   :  { %33 = vst [vmem:[%s79_s3 + $0x8] sm:$0xff] %v31_v11 }

// kernel: resnet18_apply.94
= control target key start
LH: loop header
LB: loop body
LE: loop exit
PB: predicated region body
PF: predicated region fallthrough
CT: control target
= control target key end

     0   :  { %s1054_s9 = smov 0   ;;  %s1056_s10 = smov 0   ;;  %s1205_s0 = inlined_call_operand.vmem [shape: bf16[8,1152], index: 0, kind: input, shape index: {}]   ;;  %s1206_s1 = inlined_call_operand.vmem [shape: bf16[1152,256], index: 1, kind: input, shape index: {}]   ;;  %s1207_s2 = inlined_call_operand.vmem [shape: f32[8,256], index: 2, kind: output, shape index: {}]  }
   0x1   :  { %s1058_s11 = smov 0  }
   0x2 LB: > { %s24_s12 = sadd.s32 1, %s1032_s10  ;;  %p738_p0 = scmp.ge.s32.totalorder %s1036_s11, 1  ;;  %s1036_s11 = sphi %s1058_s11, %s12_s11   ;;  %s1032_s10 = sphi %s1056_s10, %s1209_s10   ;;  %s1028_s9 = sphi %s1054_s9, %s1208_s9  }
   0x3   : > { %p25_p1 = scmp.ge.s32.totalorder %s24_s12, 3  ;;  %p159_p2 = scmp.lt.s32.totalorder %s1036_s11, 4 }
   0x5   : > { %s1211_s12 = smov (%p25_p1, %s24_s12), 0  ;;  %p160_p3 = pnand %p738_p0, %p159_p2 }
   0x6   : > { %s199_s13 = smul.u32 (!%p160_p3), 3, %s1028_s9  ;;  %p742_p6 = scmp.ne.s32.totalorder (!%p160_p3), %s1028_s9, 0 }
   0x7   : > { %163 = sbr.rel (%p160_p3) target bundleno = 230 (0xe6), region = 28 }
   0x8   : > { %s209_s14 = smul.u32 (!%p160_p3), 48, %s1028_s9  ;;  %p202_p4 = scmp.lt.s32.totalorder (!%p160_p3), %s199_s13, 8 }
   0xa   : > { %p211_p5 = scmp.lt.s32.totalorder (!%p160_p3), %s209_s14, 143 }
   0xc   : > { %s1213_s13 = smov (!%p202_p4, %s199_s13), 8  ;;  %s1215_s14 = smov (!%p211_p5, %s209_s14), 143 }
   0xd   : > { %s739_s15 = sshll.u32 %s1213_s13, 2  ;;  %s940_s19 = sshll.u32 %s1215_s14, 3 }
   0xe   : > { %s1079_s18 = scalar_lea.vmem %s1205_s0, %s739_s15  ;;  %s1084_s22 = scalar_lea.vmem %s1206_s1, %s940_s19 }
   0xf   : > { %234 = sbr.rel (%p742_p6) target bundleno = 23 (0x17), region = 32 }
  0x14   : > { %v1038_v0 = vmov 0.0  }
  0x15   : > { %235 = vst [vmem:[#allocation2] sm:$0xff] %v1038_v0 }
  0x16   : > { %236 = vst [vmem:[#allocation2 + $0x8] sm:$0xff] %v1038_v0 }
  0x17 PF: > { %v801_v1 = vld [vmem:[%s1084_s22 + $0x70] sm:$0xf]  ;;  %v956_v2 = vld [vmem:[%s1084_s22 + $0x74] sm:$0xf0]  ;;  %v793_v6 = vld [vmem:[%s1084_s22 + $0x60] sm:$0xf] }
  0x18   : > { %v865_v3 = vld [vmem:[%s1084_s22 + $0xf0] sm:$0xf]  ;;  %v802_v4 = vor.u32 %v956_v2, %v801_v1  ;;  %v972_v5 = vld [vmem:[%s1084_s22 + $0xf4] sm:$0xf0]  ;;  %v954_v7 = vld [vmem:[%s1084_s22 + $0x64] sm:$0xf0] }
  0x19   : > { %v866_v8 = vor.u32 %v972_v5, %v865_v3  ;;  %v857_v9 = vld [vmem:[%s1084_s22 + $0xe0] sm:$0xf]  ;;  %v970_v10 = vld [vmem:[%s1084_s22 + $0xe4] sm:$0xf0]  ;;  %v794_v11 = vor.u32 %v954_v7, %v793_v6  ;;  %v785_v12 = vld [vmem:[%s1084_s22 + $0x50] sm:$0xf] }
  0x1a   : > { %540 = vmatpush.bf16.msra.mxu0 %v802_v4  ;;  %v858_v13 = vor.u32 %v970_v10, %v857_v9  ;;  %v952_v14 = vld [vmem:[%s1084_s22 + $0x54] sm:$0xf0]  ;;  %v929_v15 = vld [vmem:[%s1084_s22 + $0x170] sm:$0xf]  ;;  %v921_v20 = vld [vmem:[%s1084_s22 + $0x160] sm:$0xf] }
  0x1b   : > { %553 = vmatpush.bf16.msra.mxu1 %v866_v8  ;;  %v988_v16 = vld [vmem:[%s1084_s22 + $0x174] sm:$0xf0]  ;;  %v849_v17 = vld [vmem:[%s1084_s22 + $0xd0] sm:$0xf]  ;;  %v986_v21 = vld [vmem:[%s1084_s22 + $0x164] sm:$0xf0]  ;;  %v786_v23 = vor.u32 %v952_v14, %v785_v12 }
  0x1c   : > { %v968_v18 = vld [vmem:[%s1084_s22 + $0xd4] sm:$0xf0]  ;;  %v930_v19 = vor.u32 %v988_v16, %v929_v15  ;;  %v955_v22 = vld [vmem:[%s1084_s22 + $0x74] sm:$0xf]  ;;  %v777_v24 = vld [vmem:[%s1084_s22 + $0x40] sm:$0xf]  ;;  %v922_v26 = vor.u32 %v986_v21, %v921_v20 }
  0x1d   : > { %v950_v25 = vld [vmem:[%s1084_s22 + $0x44] sm:$0xf0]  ;;  %v803_v27 = vld [vmem:[%s1084_s22 + $0x78] sm:$0xf0]  ;;  %v850_v28 = vor.u32 %v968_v18, %v849_v17  ;;  %v841_v29 = vld [vmem:[%s1084_s22 + $0xc0] sm:$0xf] }
  0x1e   : > { %541 = vmatpush.bf16.msra.mxu0 %v794_v11  ;;  %566 = vmatpush.bf16.msra.mxu2 %v930_v19  ;;  %v966_v30 = vld [vmem:[%s1084_s22 + $0xc4] sm:$0xf0]  ;;  %v806_v31 = vor.u32 %v955_v22, %v803_v27  ;;  %v913_v32 = vld [vmem:[%s1084_s22 + $0x150] sm:$0xf]  ;;  %v984_v33 = vld [vmem:[%s1084_s22 + $0x154] sm:$0xf0]  ;;  %v778_v37 = vor.u32 %v950_v25, %v777_v24 }
  0x1f   : > { %554 = vmatpush.bf16.msra.mxu1 %v858_v13  ;;  %v953_v34 = vld [vmem:[%s1084_s22 + $0x64] sm:$0xf]  ;;  %v795_v35 = vld [vmem:[%s1084_s22 + $0x68] sm:$0xf0]  ;;  %v769_v38 = vld [vmem:[%s1084_s22 + $0x30] sm:$0xf]  ;;  %v914_v40 = vor.u32 %v984_v33, %v913_v32  ;;  %v842_v42 = vor.u32 %v966_v30, %v841_v29 }
  0x20   : > { %579 = vmatpush.bf16.msra.mxu3 %v806_v31  ;;  %v798_v36 = vor.u32 %v953_v34, %v795_v35  ;;  %v948_v39 = vld [vmem:[%s1084_s22 + $0x34] sm:$0xf0]  ;;  %v905_v41 = vld [vmem:[%s1084_s22 + $0x140] sm:$0xf]  ;;  %v982_v43 = vld [vmem:[%s1084_s22 + $0x144] sm:$0xf0] }
  0x21   : > { %v951_v44 = vld [vmem:[%s1084_s22 + $0x54] sm:$0xf]  ;;  %v787_v45 = vld [vmem:[%s1084_s22 + $0x58] sm:$0xf0]  ;;  %v833_v46 = vld [vmem:[%s1084_s22 + $0xb0] sm:$0xf]  ;;  %v770_v49 = vor.u32 %v948_v39, %v769_v38  ;;  %v906_v51 = vor.u32 %v982_v43, %v905_v41 }
  0x22   : > { %542 = vmatpush.bf16.msra.mxu0 %v786_v23  ;;  %567 = vmatpush.bf16.msra.mxu2 %v922_v26  ;;  %v964_v47 = vld [vmem:[%s1084_s22 + $0xb4] sm:$0xf0]  ;;  %v790_v48 = vor.u32 %v951_v44, %v787_v45  ;;  %v761_v50 = vld [vmem:[%s1084_s22 + $0x20] sm:$0xf]  ;;  %v949_v52 = vld [vmem:[%s1084_s22 + $0x44] sm:$0xf] }
  0x23   : > { %555 = vmatpush.bf16.msra.mxu1 %v850_v28  ;;  %v779_v53 = vld [vmem:[%s1084_s22 + $0x48] sm:$0xf0]  ;;  %v834_v54 = vor.u32 %v964_v47, %v833_v46  ;;  %v946_v55 = vld [vmem:[%s1084_s22 + $0x24] sm:$0xf0]  ;;  %v897_v56 = vld [vmem:[%s1084_s22 + $0x130] sm:$0xf] }
  0x24   : > { %580 = vmatpush.bf16.msra.mxu3 %v798_v36  ;;  %v980_v57 = vld [vmem:[%s1084_s22 + $0x134] sm:$0xf0]  ;;  %v825_v58 = vld [vmem:[%s1084_s22 + $0xa0] sm:$0xf]  ;;  %v962_v59 = vld [vmem:[%s1084_s22 + $0xa4] sm:$0xf0]  ;;  %v782_v60 = vor.u32 %v949_v52, %v779_v53  ;;  %v762_v61 = vor.u32 %v946_v55, %v761_v50 }
  0x25   : > { %v753_v62 = vld [vmem:[%s1084_s22 + $0x10] sm:$0xf]  ;;  %v898_v63 = vor.u32 %v980_v57, %v897_v56  ;;  %v947_v0 = vld [vmem:[%s1084_s22 + $0x34] sm:$0xf]  ;;  %v771_v1 = vld [vmem:[%s1084_s22 + $0x38] sm:$0xf0]  ;;  %v826_v2 = vor.u32 %v962_v59, %v825_v58 }
  0x26   : > { %543 = vmatpush.bf16.msra.mxu0 %v778_v37  ;;  %568 = vmatpush.bf16.msra.mxu2 %v914_v40  ;;  %v944_v3 = vld [vmem:[%s1084_s22 + $0x14] sm:$0xf0]  ;;  %v889_v4 = vld [vmem:[%s1084_s22 + $0x120] sm:$0xf]  ;;  %v978_v5 = vld [vmem:[%s1084_s22 + $0x124] sm:$0xf0]  ;;  %v774_v10 = vor.u32 %v947_v0, %v771_v1 }
  0x27   : > { %556 = vmatpush.bf16.msra.mxu1 %v842_v42  ;;  %v817_v6 = vld [vmem:[%s1084_s22 + $0x90] sm:$0xf]  ;;  %v960_v7 = vld [vmem:[%s1084_s22 + $0x94] sm:$0xf0]  ;;  %v745_v8 = vld [vmem:[%s1084_s22] sm:$0xf]  ;;  %v754_v11 = vor.u32 %v944_v3, %v753_v62  ;;  %v890_v12 = vor.u32 %v978_v5, %v889_v4 }
  0x28   : > { %581 = vmatpush.bf16.msra.mxu3 %v790_v48  ;;  %v942_v9 = vld [vmem:[%s1084_s22 + $0x4] sm:$0xf0]  ;;  %v945_v13 = vld [vmem:[%s1084_s22 + $0x24] sm:$0xf]  ;;  %v763_v14 = vld [vmem:[%s1084_s22 + $0x28] sm:$0xf0]  ;;  %v818_v16 = vor.u32 %v960_v7, %v817_v6 }
  0x29   : > { %v239_v15 = vld [vmem:[%s1079_s18] sm:$0xff]  ;;  %v881_v18 = vld [vmem:[%s1084_s22 + $0x110] sm:$0xf]  ;;  %v976_v19 = vld [vmem:[%s1084_s22 + $0x114] sm:$0xf0]  ;;  %v766_v25 = vor.u32 %v945_v13, %v763_v14  ;;  %v746_v27 = vor.u32 %v942_v9, %v745_v8  ;;  %p935_p7 = scmp.ne.s32.totalorder %s1028_s9, 2 }
  0x2a   : > { %544 = vmatpush.bf16.msra.mxu0 %v770_v49  ;;  %569 = vmatpush.bf16.msra.mxu2 %v906_v51  ;;  %v809_v17 = vld [vmem:[%s1084_s22 + $0x80] sm:$0xf]  ;;  %v958_v20 = vld [vmem:[%s1084_s22 + $0x84] sm:$0xf0]  ;;  %v971_v21 = vld [vmem:[%s1084_s22 + $0xf4] sm:$0xf]  ;;  %v291_v26 = vunpack.c.l.b16 %v239_v15  ;;  %v882_v28 = vor.u32 %v976_v19, %v881_v18  ;;  %v292_v29 = vunpack.c.h.b16 %v239_v15 }
  0x2b   : > { %557 = vmatpush.bf16.msra.mxu1 %v834_v54  ;;  %v867_v22 = vld [vmem:[%s1084_s22 + $0xf8] sm:$0xf0]  ;;  %v987_v23 = vld [vmem:[%s1084_s22 + $0x174] sm:$0xf]  ;;  %v240_v32 = vld [vmem:[%s1079_s18 + $0x8] sm:$0xf]  ;;  %v810_v33 = vor.u32 %v958_v20, %v809_v17 }
  0x2c   : > { %582 = vmatpush.bf16.msra.mxu3 %v782_v60  ;;  %v931_v24 = vld [vmem:[%s1084_s22 + $0x178] sm:$0xf0]  ;;  %v943_v30 = vld [vmem:[%s1084_s22 + $0x14] sm:$0xf]  ;;  %v870_v34 = vor.u32 %v971_v21, %v867_v22  ;;  %v873_v35 = vld [vmem:[%s1084_s22 + $0x100] sm:$0xf]  ;;  %v294_v42 = vpack.c.b16 %v291_v26, %v291_v26  ;;  %v293_v44 = vunpack.c.l.b16 %v240_v32  ;;  %v1159_v45 = vpack.c.b16 %v292_v29, %v292_v29 }
  0x2d   : > { %v755_v31 = vld [vmem:[%s1084_s22 + $0x18] sm:$0xf0]  ;;  %v974_v36 = vld [vmem:[%s1084_s22 + $0x104] sm:$0xf0]  ;;  %v934_v37 = vor.u32 %v987_v23, %v931_v24  ;;  %v969_v38 = vld [vmem:[%s1084_s22 + $0xe4] sm:$0xf] }
  0x2e   : > { %545 = vmatpush.bf16.msra.mxu0 %v762_v61  ;;  %570 = vmatpush.bf16.msra.mxu2 %v898_v63  ;;  %v859_v39 = vld [vmem:[%s1084_s22 + $0xe8] sm:$0xf0]  ;;  %v985_v40 = vld [vmem:[%s1084_s22 + $0x164] sm:$0xf]  ;;  %v758_v43 = vor.u32 %v943_v30, %v755_v31  ;;  %v874_v46 = vor.u32 %v974_v36, %v873_v35  ;;  %v967_v51 = vld [vmem:[%s1084_s22 + $0xd4] sm:$0xf]  ;;  %v296_v55 = vpack.c.b16 %v293_v44, %v293_v44 }
  0x2f   : > { %558 = vmatpush.bf16.msra.mxu1 %v826_v2  ;;  %v923_v41 = vld [vmem:[%s1084_s22 + $0x168] sm:$0xf0]  ;;  %v941_v47 = vld [vmem:[%s1084_s22 + $0x4] sm:$0xf]  ;;  %v862_v49 = vor.u32 %v969_v38, %v859_v39  ;;  %v851_v52 = vld [vmem:[%s1084_s22 + $0xd8] sm:$0xf0] }
  0x30   : > { %583 = vmatpush.bf16.msra.mxu3 %v774_v10  ;;  %v747_v48 = vld [vmem:[%s1084_s22 + $0x8] sm:$0xf0]  ;;  %v926_v50 = vor.u32 %v985_v40, %v923_v41  ;;  %v983_v53 = vld [vmem:[%s1084_s22 + $0x154] sm:$0xf]  ;;  %v915_v54 = vld [vmem:[%s1084_s22 + $0x158] sm:$0xf0]  ;;  %v854_v57 = vor.u32 %v967_v51, %v851_v52 }
  0x31   : > { %v750_v56 = vor.u32 %v941_v47, %v747_v48  ;;  %v918_v58 = vor.u32 %v983_v53, %v915_v54  ;;  %v965_v59 = vld [vmem:[%s1084_s22 + $0xc4] sm:$0xf]  ;;  %v843_v60 = vld [vmem:[%s1084_s22 + $0xc8] sm:$0xf0]  ;;  %v963_v1 = vld [vmem:[%s1084_s22 + $0xb4] sm:$0xf] }
  0x32   : > { %546 = vmatpush.bf16.msra.mxu0 %v754_v11  ;;  %571 = vmatpush.bf16.msra.mxu2 %v890_v12  ;;  %v981_v61 = vld [vmem:[%s1084_s22 + $0x144] sm:$0xf]  ;;  %v907_v62 = vld [vmem:[%s1084_s22 + $0x148] sm:$0xf0]  ;;  %v846_v63 = vor.u32 %v965_v59, %v843_v60  ;;  %v835_v2 = vld [vmem:[%s1084_s22 + $0xb8] sm:$0xf0] }
  0x33   : > { %559 = vmatpush.bf16.msra.mxu1 %v818_v16  ;;  %v910_v0 = vor.u32 %v981_v61, %v907_v62  ;;  %v979_v3 = vld [vmem:[%s1084_s22 + $0x134] sm:$0xf]  ;;  %v899_v4 = vld [vmem:[%s1084_s22 + $0x138] sm:$0xf0]  ;;  %v838_v5 = vor.u32 %v963_v1, %v835_v2  ;;  %v961_v7 = vld [vmem:[%s1084_s22 + $0xa4] sm:$0xf] }
  0x34   : > { %584 = vmatpush.bf16.msra.mxu3 %v766_v25  ;;  %v902_v6 = vor.u32 %v979_v3, %v899_v4  ;;  %v827_v8 = vld [vmem:[%s1084_s22 + $0xa8] sm:$0xf0]  ;;  %v977_v9 = vld [vmem:[%s1084_s22 + $0x124] sm:$0xf]  ;;  %v959_v13 = vld [vmem:[%s1084_s22 + $0x94] sm:$0xf] }
  0x35   : > { %v891_v10 = vld [vmem:[%s1084_s22 + $0x128] sm:$0xf0]  ;;  %v830_v11 = vor.u32 %v961_v7, %v827_v8  ;;  %v819_v14 = vld [vmem:[%s1084_s22 + $0x98] sm:$0xf0]  ;;  %v975_v15 = vld [vmem:[%s1084_s22 + $0x114] sm:$0xf] }
  0x36   : > { %547 = vmatpush.bf16.msra.mxu0 %v746_v27  ;;  %572 = vmatpush.bf16.msra.mxu2 %v882_v28  ;;  %v894_v12 = vor.u32 %v977_v9, %v891_v10  ;;  %v883_v16 = vld [vmem:[%s1084_s22 + $0x118] sm:$0xf0]  ;;  %v822_v17 = vor.u32 %v959_v13, %v819_v14  ;;  %v957_v19 = vld [vmem:[%s1084_s22 + $0x84] sm:$0xf]  ;;  %v811_v20 = vld [vmem:[%s1084_s22 + $0x88] sm:$0xf0] }
  0x37   : > { %560 = vmatpush.bf16.msra.mxu1 %v810_v33  ;;  %v886_v18 = vor.u32 %v975_v15, %v883_v16  ;;  %v973_v21 = vld [vmem:[%s1084_s22 + $0x104] sm:$0xf]  ;;  %v875_v22 = vld [vmem:[%s1084_s22 + $0x108] sm:$0xf0]  ;;  %v814_v23 = vor.u32 %v957_v19, %v811_v20 }
  0x38   : > { %585 = vmatpush.bf16.msra.mxu3 %v758_v43  ;;  %v878_v24 = vor.u32 %v973_v21, %v875_v22  ;;  %v237_v30 = vld [vmem:[#allocation2] sm:$0xff]  ;;  %v238_v40 = vld [vmem:[#allocation2 + $0x8] sm:$0xff] }
  0x39   : > { %548 = vmatmul.bf16.vlgmr.msra.gmra.mxu0 %v294_v42 }
  0x3a   : > { %592 = vmatpush.bf16.msrb.mxu0 %v870_v34  ;;  %561 = vmatmul.bf16.vlgmr.msra.gmra.mxu1 %v1159_v45 }
  0x3b   : > { %605 = vmatpush.bf16.msrb.mxu1 %v934_v37  ;;  %573 = vmatpush.bf16.msra.mxu2 %v874_v46 }
  0x3c   : > { %586 = vmatpush.bf16.msra.mxu3 %v750_v56 }
  0x3e   : > { %593 = vmatpush.bf16.msrb.mxu0 %v862_v49  ;;  %574 = vmatmul.bf16.vlgmr.msra.gmra.mxu2 %v296_v55 }
  0x3f   : > { %606 = vmatpush.bf16.msrb.mxu1 %v926_v50  ;;  %587 = vmatmul.bf16.vlgmr.msra.gmra.mxu3 %v294_v42 }
  0x42   : > { %594 = vmatpush.bf16.msrb.mxu0 %v854_v57 }
  0x43   : > { %607 = vmatpush.bf16.msrb.mxu1 %v918_v58 }
  0x46   : > { %595 = vmatpush.bf16.msrb.mxu0 %v846_v63 }
  0x47   : > { %608 = vmatpush.bf16.msrb.mxu1 %v910_v0 }
  0x4a   : > { %596 = vmatpush.bf16.msrb.mxu0 %v838_v5 }
  0x4b   : > { %609 = vmatpush.bf16.msrb.mxu1 %v902_v6 }
  0x4e   : > { %597 = vmatpush.bf16.msrb.mxu0 %v830_v11 }
  0x4f   : > { %610 = vmatpush.bf16.msrb.mxu1 %v894_v12 }
  0x52   : > { %598 = vmatpush.bf16.msrb.mxu0 %v822_v17 }
  0x53   : > { %611 = vmatpush.bf16.msrb.mxu1 %v886_v18 }
  0x56   : > { %599 = vmatpush.bf16.msrb.mxu0 %v814_v23 }
  0x57   : > { %612 = vmatpush.bf16.msrb.mxu1 %v878_v24 }
  0x59   : > { %600 = vmatmul.bf16.vlgmr.msrb.gmra.mxu0 %v1159_v45 }
  0x5a   : > { %613 = vmatmul.bf16.vlgmr.msrb.gmra.mxu1 %v296_v55 }
  0xb6   : > { %v549_v25 = vpop.f32.mrf.mxu0 }
  0xb7   : > { %v562_v26 = vpop.f32.mrf.mxu1 }
  0xb8   : > { %v563_v27 = vadd.f32 %v562_v26, %v549_v25 }
  0xbe   : > { %v551_v28 = vpop.f32.mrf.mxu0 }
  0xbf   : > { %v564_v29 = vpop.f32.mrf.mxu1 }
  0xc1   : > { %v575_v31 = vpop.f32.mrf.mxu2 }
  0xc2   : > { %v576_v32 = vadd.f32 %v575_v31, %v563_v27  ;;  %v588_v34 = vpop.f32.mrf.mxu3 }
  0xc4   : > { %v618_v33 = vadd.f32 %v576_v32, %v237_v30 }
  0xc6   : > { %620 = vst [vmem:[#allocation2] sm:$0xff] %v618_v33 }
  0xc9   : > { %v577_v35 = vpop.f32.mrf.mxu2 }
  0xca   : > { %v590_v36 = vpop.f32.mrf.mxu3 }
  0xd6   : > { %v601_v37 = vpop.f32.mrf.mxu0 }
  0xd7   : > { %v602_v38 = vadd.f32 %v601_v37, %v588_v34  ;;  %v614_v39 = vpop.f32.mrf.mxu1 }
  0xd9   : > { %v615_v41 = vadd.f32 %v614_v39, %v602_v38 }
  0xdb   : > { %v619_v42 = vadd.f32 %v615_v41, %v238_v40  ;;  %625 = sbr.rel (%p935_p7) target bundleno = 230 (0xe6), region = 36 }
  0xdd   : > { %621 = vst [vmem:[#allocation2 + $0x8] sm:$0xff] %v619_v42 }
  0xde   : > { %v603_v43 = vpop.f32.mrf.mxu0 }
  0xdf   : > { %v616_v44 = vpop.f32.mrf.mxu1 }
  0xe0   : > { %v626_v45 = vld [vmem:[#allocation2] sm:$0xff] }
  0xe1   : > { %628 = vst [vmem:[%s1207_s2] sm:$0xff] %v626_v45 }
  0xe4   : > { %v627_v46 = vld [vmem:[#allocation2 + $0x8] sm:$0xff] }
  0xe5   : > { %629 = vst [vmem:[%s1207_s2 + $0x8] sm:$0xff] %v627_v46 }
  0xe6 PF: > { %s12_s11 = sadd.s32 1, %s1036_s11   ;;  %s1208_s9 = smov %s1032_s10 }
  0xe7   : > { %p9_p8 = scmp.ge.s32.totalorder %s12_s11, 5   ;;  %s1209_s10 = smov %s1211_s12 }
  0xe9   :  { %11 = sbr.rel (!%p9_p8) target bundleno = 2 (0x2), region = 69 }

// kernel: resnet18_apply.96
= control target key start
LH: loop header
LB: loop body
LE: loop exit
PB: predicated region body
PF: predicated region fallthrough
CT: control target
= control target key end

     0   :  { %s78_s0 = inlined_call_operand.vmem [shape: f32[8,256], index: 0, kind: input, shape index: {}]   ;;  %s79_s1 = inlined_call_operand.vmem [shape: f32[1,256], index: 1, kind: input, shape index: {}]   ;;  %s80_s2 = inlined_call_operand.vmem [shape: f32[1,256], index: 2, kind: input, shape index: {}]   ;;  %s81_s3 = inlined_call_operand.vmem [shape: f32[8,256], index: 3, kind: output, shape index: {}]  }
   0x1   :  { %v14_v0 = vld [vmem:[%s78_s0] sm:$0xff]  ;;  %v15_v5 = vld [vmem:[%s78_s0 + $0x8] sm:$0xff] }
   0x2   :  { %v16_v1 = vld [vmem:[%s79_s1] sm:$0x3] }
   0x3   :  { %v24_v2 = vld [vmem:[%s80_s2] sm:$0x3]  ;;  %v18_v3 = vperm.slane %v16_v1, 0  ;;  %v19_v6 = vperm.slane %v16_v1, 1 }
   0x4   :  { %v26_v4 = vperm.slane %v24_v2, 0  ;;  %v27_v7 = vperm.slane %v24_v2, 1 }
   0x5   :  { %v22_v8 = vmul.f32 %v18_v3, %v14_v0  ;;  %v23_v9 = vmul.f32 %v19_v6, %v15_v5 }
   0x7   :  { %v30_v10 = vadd.f32 %v26_v4, %v22_v8  ;;  %v31_v11 = vadd.f32 %v27_v7, %v23_v9 }
   0x9   :  { %v32_v12 = vmax.f32 %v30_v10, 0.0  ;;  %v33_v13 = vmax.f32 %v31_v11, 0.0 }
   0xb   :  { %34 = vst [vmem:[%s81_s3] sm:$0xff] %v32_v12 }
   0xc   :  { %35 = vst [vmem:[%s81_s3 + $0x8] sm:$0xff] %v33_v13 }

// kernel: resnet18_apply.97
= control target key start
LH: loop header
LB: loop body
LE: loop exit
PB: predicated region body
PF: predicated region fallthrough
CT: control target
= control target key end

     0   :  { %s1054_s9 = smov 0   ;;  %s1056_s10 = smov 0   ;;  %s1205_s0 = inlined_call_operand.vmem [shape: bf16[8,2304], index: 0, kind: input, shape index: {}]   ;;  %s1206_s1 = inlined_call_operand.vmem [shape: bf16[2304,256], index: 1, kind: input, shape index: {}]   ;;  %s1207_s2 = inlined_call_operand.vmem [shape: f32[8,256], index: 2, kind: output, shape index: {}]  }
   0x1   :  { %s1058_s11 = smov 0  }
   0x2 LB: > { %s24_s12 = sadd.s32 1, %s1032_s10  ;;  %p738_p0 = scmp.ge.s32.totalorder %s1036_s11, 1  ;;  %s1036_s11 = sphi %s1058_s11, %s12_s11   ;;  %s1032_s10 = sphi %s1056_s10, %s1209_s10   ;;  %s1028_s9 = sphi %s1054_s9, %s1208_s9  }
   0x3   : > { %p25_p1 = scmp.ge.s32.totalorder %s24_s12, 6  ;;  %p159_p2 = scmp.lt.s32.totalorder %s1036_s11, 7 }
   0x5   : > { %s1211_s12 = smov (%p25_p1, %s24_s12), 0  ;;  %p160_p3 = pnand %p738_p0, %p159_p2 }
   0x6   : > { %s199_s13 = smul.u32 (!%p160_p3), 3, %s1028_s9  ;;  %p742_p6 = scmp.ne.s32.totalorder (!%p160_p3), %s1028_s9, 0 }
   0x7   : > { %163 = sbr.rel (%p160_p3) target bundleno = 230 (0xe6), region = 28 }
   0x8   : > { %s209_s14 = smul.u32 (!%p160_p3), 48, %s1028_s9  ;;  %p202_p4 = scmp.lt.s32.totalorder (!%p160_p3), %s199_s13, 17 }
   0xa   : > { %p211_p5 = scmp.lt.s32.totalorder (!%p160_p3), %s209_s14, 287 }
   0xc   : > { %s1213_s13 = smov (!%p202_p4, %s199_s13), 17  ;;  %s1215_s14 = smov (!%p211_p5, %s209_s14), 287 }
   0xd   : > { %s739_s15 = sshll.u32 %s1213_s13, 2  ;;  %s940_s19 = sshll.u32 %s1215_s14, 3 }
   0xe   : > { %s1079_s18 = scalar_lea.vmem %s1205_s0, %s739_s15  ;;  %s1084_s22 = scalar_lea.vmem %s1206_s1, %s940_s19 }
   0xf   : > { %234 = sbr.rel (%p742_p6) target bundleno = 23 (0x17), region = 32 }
  0x14   : > { %v1038_v0 = vmov 0.0  }
  0x15   : > { %235 = vst [vmem:[#allocation2] sm:$0xff] %v1038_v0 }
  0x16   : > { %236 = vst [vmem:[#allocation2 + $0x8] sm:$0xff] %v1038_v0 }
  0x17 PF: > { %v801_v1 = vld [vmem:[%s1084_s22 + $0x70] sm:$0xf]  ;;  %v956_v2 = vld [vmem:[%s1084_s22 + $0x74] sm:$0xf0]  ;;  %v793_v6 = vld [vmem:[%s1084_s22 + $0x60] sm:$0xf] }
  0x18   : > { %v865_v3 = vld [vmem:[%s1084_s22 + $0xf0] sm:$0xf]  ;;  %v802_v4 = vor.u32 %v956_v2, %v801_v1  ;;  %v972_v5 = vld [vmem:[%s1084_s22 + $0xf4] sm:$0xf0]  ;;  %v954_v7 = vld [vmem:[%s1084_s22 + $0x64] sm:$0xf0] }
  0x19   : > { %v866_v8 = vor.u32 %v972_v5, %v865_v3  ;;  %v857_v9 = vld [vmem:[%s1084_s22 + $0xe0] sm:$0xf]  ;;  %v970_v10 = vld [vmem:[%s1084_s22 + $0xe4] sm:$0xf0]  ;;  %v794_v11 = vor.u32 %v954_v7, %v793_v6  ;;  %v785_v12 = vld [vmem:[%s1084_s22 + $0x50] sm:$0xf] }
  0x1a   : > { %540 = vmatpush.bf16.msra.mxu0 %v802_v4  ;;  %v858_v13 = vor.u32 %v970_v10, %v857_v9  ;;  %v952_v14 = vld [vmem:[%s1084_s22 + $0x54] sm:$0xf0]  ;;  %v929_v15 = vld [vmem:[%s1084_s22 + $0x170] sm:$0xf]  ;;  %v921_v20 = vld [vmem:[%s1084_s22 + $0x160] sm:$0xf] }
  0x1b   : > { %553 = vmatpush.bf16.msra.mxu1 %v866_v8  ;;  %v988_v16 = vld [vmem:[%s1084_s22 + $0x174] sm:$0xf0]  ;;  %v849_v17 = vld [vmem:[%s1084_s22 + $0xd0] sm:$0xf]  ;;  %v986_v21 = vld [vmem:[%s1084_s22 + $0x164] sm:$0xf0]  ;;  %v786_v23 = vor.u32 %v952_v14, %v785_v12 }
  0x1c   : > { %v968_v18 = vld [vmem:[%s1084_s22 + $0xd4] sm:$0xf0]  ;;  %v930_v19 = vor.u32 %v988_v16, %v929_v15  ;;  %v955_v22 = vld [vmem:[%s1084_s22 + $0x74] sm:$0xf]  ;;  %v777_v24 = vld [vmem:[%s1084_s22 + $0x40] sm:$0xf]  ;;  %v922_v26 = vor.u32 %v986_v21, %v921_v20 }
  0x1d   : > { %v950_v25 = vld [vmem:[%s1084_s22 + $0x44] sm:$0xf0]  ;;  %v803_v27 = vld [vmem:[%s1084_s22 + $0x78] sm:$0xf0]  ;;  %v850_v28 = vor.u32 %v968_v18, %v849_v17  ;;  %v841_v29 = vld [vmem:[%s1084_s22 + $0xc0] sm:$0xf] }
  0x1e   : > { %541 = vmatpush.bf16.msra.mxu0 %v794_v11  ;;  %566 = vmatpush.bf16.msra.mxu2 %v930_v19  ;;  %v966_v30 = vld [vmem:[%s1084_s22 + $0xc4] sm:$0xf0]  ;;  %v806_v31 = vor.u32 %v955_v22, %v803_v27  ;;  %v913_v32 = vld [vmem:[%s1084_s22 + $0x150] sm:$0xf]  ;;  %v984_v33 = vld [vmem:[%s1084_s22 + $0x154] sm:$0xf0]  ;;  %v778_v37 = vor.u32 %v950_v25, %v777_v24 }
  0x1f   : > { %554 = vmatpush.bf16.msra.mxu1 %v858_v13  ;;  %v953_v34 = vld [vmem:[%s1084_s22 + $0x64] sm:$0xf]  ;;  %v795_v35 = vld [vmem:[%s1084_s22 + $0x68] sm:$0xf0]  ;;  %v769_v38 = vld [vmem:[%s1084_s22 + $0x30] sm:$0xf]  ;;  %v914_v40 = vor.u32 %v984_v33, %v913_v32  ;;  %v842_v42 = vor.u32 %v966_v30, %v841_v29 }
  0x20   : > { %579 = vmatpush.bf16.msra.mxu3 %v806_v31  ;;  %v798_v36 = vor.u32 %v953_v34, %v795_v35  ;;  %v948_v39 = vld [vmem:[%s1084_s22 + $0x34] sm:$0xf0]  ;;  %v905_v41 = vld [vmem:[%s1084_s22 + $0x140] sm:$0xf]  ;;  %v982_v43 = vld [vmem:[%s1084_s22 + $0x144] sm:$0xf0] }
  0x21   : > { %v951_v44 = vld [vmem:[%s1084_s22 + $0x54] sm:$0xf]  ;;  %v787_v45 = vld [vmem:[%s1084_s22 + $0x58] sm:$0xf0]  ;;  %v833_v46 = vld [vmem:[%s1084_s22 + $0xb0] sm:$0xf]  ;;  %v770_v49 = vor.u32 %v948_v39, %v769_v38  ;;  %v906_v51 = vor.u32 %v982_v43, %v905_v41 }
  0x22   : > { %542 = vmatpush.bf16.msra.mxu0 %v786_v23  ;;  %567 = vmatpush.bf16.msra.mxu2 %v922_v26  ;;  %v964_v47 = vld [vmem:[%s1084_s22 + $0xb4] sm:$0xf0]  ;;  %v790_v48 = vor.u32 %v951_v44, %v787_v45  ;;  %v761_v50 = vld [vmem:[%s1084_s22 + $0x20] sm:$0xf]  ;;  %v949_v52 = vld [vmem:[%s1084_s22 + $0x44] sm:$0xf] }
  0x23   : > { %555 = vmatpush.bf16.msra.mxu1 %v850_v28  ;;  %v779_v53 = vld [vmem:[%s1084_s22 + $0x48] sm:$0xf0]  ;;  %v834_v54 = vor.u32 %v964_v47, %v833_v46  ;;  %v946_v55 = vld [vmem:[%s1084_s22 + $0x24] sm:$0xf0]  ;;  %v897_v56 = vld [vmem:[%s1084_s22 + $0x130] sm:$0xf] }
  0x24   : > { %580 = vmatpush.bf16.msra.mxu3 %v798_v36  ;;  %v980_v57 = vld [vmem:[%s1084_s22 + $0x134] sm:$0xf0]  ;;  %v825_v58 = vld [vmem:[%s1084_s22 + $0xa0] sm:$0xf]  ;;  %v962_v59 = vld [vmem:[%s1084_s22 + $0xa4] sm:$0xf0]  ;;  %v782_v60 = vor.u32 %v949_v52, %v779_v53  ;;  %v762_v61 = vor.u32 %v946_v55, %v761_v50 }
  0x25   : > { %v753_v62 = vld [vmem:[%s1084_s22 + $0x10] sm:$0xf]  ;;  %v898_v63 = vor.u32 %v980_v57, %v897_v56  ;;  %v947_v0 = vld [vmem:[%s1084_s22 + $0x34] sm:$0xf]  ;;  %v771_v1 = vld [vmem:[%s1084_s22 + $0x38] sm:$0xf0]  ;;  %v826_v2 = vor.u32 %v962_v59, %v825_v58 }
  0x26   : > { %543 = vmatpush.bf16.msra.mxu0 %v778_v37  ;;  %568 = vmatpush.bf16.msra.mxu2 %v914_v40  ;;  %v944_v3 = vld [vmem:[%s1084_s22 + $0x14] sm:$0xf0]  ;;  %v889_v4 = vld [vmem:[%s1084_s22 + $0x120] sm:$0xf]  ;;  %v978_v5 = vld [vmem:[%s1084_s22 + $0x124] sm:$0xf0]  ;;  %v774_v10 = vor.u32 %v947_v0, %v771_v1 }
  0x27   : > { %556 = vmatpush.bf16.msra.mxu1 %v842_v42  ;;  %v817_v6 = vld [vmem:[%s1084_s22 + $0x90] sm:$0xf]  ;;  %v960_v7 = vld [vmem:[%s1084_s22 + $0x94] sm:$0xf0]  ;;  %v745_v8 = vld [vmem:[%s1084_s22] sm:$0xf]  ;;  %v754_v11 = vor.u32 %v944_v3, %v753_v62  ;;  %v890_v12 = vor.u32 %v978_v5, %v889_v4 }
  0x28   : > { %581 = vmatpush.bf16.msra.mxu3 %v790_v48  ;;  %v942_v9 = vld [vmem:[%s1084_s22 + $0x4] sm:$0xf0]  ;;  %v945_v13 = vld [vmem:[%s1084_s22 + $0x24] sm:$0xf]  ;;  %v763_v14 = vld [vmem:[%s1084_s22 + $0x28] sm:$0xf0]  ;;  %v818_v16 = vor.u32 %v960_v7, %v817_v6 }
  0x29   : > { %v239_v15 = vld [vmem:[%s1079_s18] sm:$0xff]  ;;  %v881_v18 = vld [vmem:[%s1084_s22 + $0x110] sm:$0xf]  ;;  %v976_v19 = vld [vmem:[%s1084_s22 + $0x114] sm:$0xf0]  ;;  %v766_v25 = vor.u32 %v945_v13, %v763_v14  ;;  %v746_v27 = vor.u32 %v942_v9, %v745_v8  ;;  %p935_p7 = scmp.ne.s32.totalorder %s1028_s9, 5 }
  0x2a   : > { %544 = vmatpush.bf16.msra.mxu0 %v770_v49  ;;  %569 = vmatpush.bf16.msra.mxu2 %v906_v51  ;;  %v809_v17 = vld [vmem:[%s1084_s22 + $0x80] sm:$0xf]  ;;  %v958_v20 = vld [vmem:[%s1084_s22 + $0x84] sm:$0xf0]  ;;  %v971_v21 = vld [vmem:[%s1084_s22 + $0xf4] sm:$0xf]  ;;  %v291_v26 = vunpack.c.l.b16 %v239_v15  ;;  %v882_v28 = vor.u32 %v976_v19, %v881_v18  ;;  %v292_v29 = vunpack.c.h.b16 %v239_v15 }
  0x2b   : > { %557 = vmatpush.bf16.msra.mxu1 %v834_v54  ;;  %v867_v22 = vld [vmem:[%s1084_s22 + $0xf8] sm:$0xf0]  ;;  %v987_v23 = vld [vmem:[%s1084_s22 + $0x174] sm:$0xf]  ;;  %v240_v32 = vld [vmem:[%s1079_s18 + $0x8] sm:$0xf]  ;;  %v810_v33 = vor.u32 %v958_v20, %v809_v17 }
  0x2c   : > { %582 = vmatpush.bf16.msra.mxu3 %v782_v60  ;;  %v931_v24 = vld [vmem:[%s1084_s22 + $0x178] sm:$0xf0]  ;;  %v943_v30 = vld [vmem:[%s1084_s22 + $0x14] sm:$0xf]  ;;  %v870_v34 = vor.u32 %v971_v21, %v867_v22  ;;  %v873_v35 = vld [vmem:[%s1084_s22 + $0x100] sm:$0xf]  ;;  %v294_v42 = vpack.c.b16 %v291_v26, %v291_v26  ;;  %v293_v44 = vunpack.c.l.b16 %v240_v32  ;;  %v1159_v45 = vpack.c.b16 %v292_v29, %v292_v29 }
  0x2d   : > { %v755_v31 = vld [vmem:[%s1084_s22 + $0x18] sm:$0xf0]  ;;  %v974_v36 = vld [vmem:[%s1084_s22 + $0x104] sm:$0xf0]  ;;  %v934_v37 = vor.u32 %v987_v23, %v931_v24  ;;  %v969_v38 = vld [vmem:[%s1084_s22 + $0xe4] sm:$0xf] }
  0x2e   : > { %545 = vmatpush.bf16.msra.mxu0 %v762_v61  ;;  %570 = vmatpush.bf16.msra.mxu2 %v898_v63  ;;  %v859_v39 = vld [vmem:[%s1084_s22 + $0xe8] sm:$0xf0]  ;;  %v985_v40 = vld [vmem:[%s1084_s22 + $0x164] sm:$0xf]  ;;  %v758_v43 = vor.u32 %v943_v30, %v755_v31  ;;  %v874_v46 = vor.u32 %v974_v36, %v873_v35  ;;  %v967_v51 = vld [vmem:[%s1084_s22 + $0xd4] sm:$0xf]  ;;  %v296_v55 = vpack.c.b16 %v293_v44, %v293_v44 }
  0x2f   : > { %558 = vmatpush.bf16.msra.mxu1 %v826_v2  ;;  %v923_v41 = vld [vmem:[%s1084_s22 + $0x168] sm:$0xf0]  ;;  %v941_v47 = vld [vmem:[%s1084_s22 + $0x4] sm:$0xf]  ;;  %v862_v49 = vor.u32 %v969_v38, %v859_v39  ;;  %v851_v52 = vld [vmem:[%s1084_s22 + $0xd8] sm:$0xf0] }
  0x30   : > { %583 = vmatpush.bf16.msra.mxu3 %v774_v10  ;;  %v747_v48 = vld [vmem:[%s1084_s22 + $0x8] sm:$0xf0]  ;;  %v926_v50 = vor.u32 %v985_v40, %v923_v41  ;;  %v983_v53 = vld [vmem:[%s1084_s22 + $0x154] sm:$0xf]  ;;  %v915_v54 = vld [vmem:[%s1084_s22 + $0x158] sm:$0xf0]  ;;  %v854_v57 = vor.u32 %v967_v51, %v851_v52 }
  0x31   : > { %v750_v56 = vor.u32 %v941_v47, %v747_v48  ;;  %v918_v58 = vor.u32 %v983_v53, %v915_v54  ;;  %v965_v59 = vld [vmem:[%s1084_s22 + $0xc4] sm:$0xf]  ;;  %v843_v60 = vld [vmem:[%s1084_s22 + $0xc8] sm:$0xf0]  ;;  %v963_v1 = vld [vmem:[%s1084_s22 + $0xb4] sm:$0xf] }
  0x32   : > { %546 = vmatpush.bf16.msra.mxu0 %v754_v11  ;;  %571 = vmatpush.bf16.msra.mxu2 %v890_v12  ;;  %v981_v61 = vld [vmem:[%s1084_s22 + $0x144] sm:$0xf]  ;;  %v907_v62 = vld [vmem:[%s1084_s22 + $0x148] sm:$0xf0]  ;;  %v846_v63 = vor.u32 %v965_v59, %v843_v60  ;;  %v835_v2 = vld [vmem:[%s1084_s22 + $0xb8] sm:$0xf0] }
  0x33   : > { %559 = vmatpush.bf16.msra.mxu1 %v818_v16  ;;  %v910_v0 = vor.u32 %v981_v61, %v907_v62  ;;  %v979_v3 = vld [vmem:[%s1084_s22 + $0x134] sm:$0xf]  ;;  %v899_v4 = vld [vmem:[%s1084_s22 + $0x138] sm:$0xf0]  ;;  %v838_v5 = vor.u32 %v963_v1, %v835_v2  ;;  %v961_v7 = vld [vmem:[%s1084_s22 + $0xa4] sm:$0xf] }
  0x34   : > { %584 = vmatpush.bf16.msra.mxu3 %v766_v25  ;;  %v902_v6 = vor.u32 %v979_v3, %v899_v4  ;;  %v827_v8 = vld [vmem:[%s1084_s22 + $0xa8] sm:$0xf0]  ;;  %v977_v9 = vld [vmem:[%s1084_s22 + $0x124] sm:$0xf]  ;;  %v959_v13 = vld [vmem:[%s1084_s22 + $0x94] sm:$0xf] }
  0x35   : > { %v891_v10 = vld [vmem:[%s1084_s22 + $0x128] sm:$0xf0]  ;;  %v830_v11 = vor.u32 %v961_v7, %v827_v8  ;;  %v819_v14 = vld [vmem:[%s1084_s22 + $0x98] sm:$0xf0]  ;;  %v975_v15 = vld [vmem:[%s1084_s22 + $0x114] sm:$0xf] }
  0x36   : > { %547 = vmatpush.bf16.msra.mxu0 %v746_v27  ;;  %572 = vmatpush.bf16.msra.mxu2 %v882_v28  ;;  %v894_v12 = vor.u32 %v977_v9, %v891_v10  ;;  %v883_v16 = vld [vmem:[%s1084_s22 + $0x118] sm:$0xf0]  ;;  %v822_v17 = vor.u32 %v959_v13, %v819_v14  ;;  %v957_v19 = vld [vmem:[%s1084_s22 + $0x84] sm:$0xf]  ;;  %v811_v20 = vld [vmem:[%s1084_s22 + $0x88] sm:$0xf0] }
  0x37   : > { %560 = vmatpush.bf16.msra.mxu1 %v810_v33  ;;  %v886_v18 = vor.u32 %v975_v15, %v883_v16  ;;  %v973_v21 = vld [vmem:[%s1084_s22 + $0x104] sm:$0xf]  ;;  %v875_v22 = vld [vmem:[%s1084_s22 + $0x108] sm:$0xf0]  ;;  %v814_v23 = vor.u32 %v957_v19, %v811_v20 }
  0x38   : > { %585 = vmatpush.bf16.msra.mxu3 %v758_v43  ;;  %v878_v24 = vor.u32 %v973_v21, %v875_v22  ;;  %v237_v30 = vld [vmem:[#allocation2] sm:$0xff]  ;;  %v238_v40 = vld [vmem:[#allocation2 + $0x8] sm:$0xff] }
  0x39   : > { %548 = vmatmul.bf16.vlgmr.msra.gmra.mxu0 %v294_v42 }
  0x3a   : > { %592 = vmatpush.bf16.msrb.mxu0 %v870_v34  ;;  %561 = vmatmul.bf16.vlgmr.msra.gmra.mxu1 %v1159_v45 }
  0x3b   : > { %605 = vmatpush.bf16.msrb.mxu1 %v934_v37  ;;  %573 = vmatpush.bf16.msra.mxu2 %v874_v46 }
  0x3c   : > { %586 = vmatpush.bf16.msra.mxu3 %v750_v56 }
  0x3e   : > { %593 = vmatpush.bf16.msrb.mxu0 %v862_v49  ;;  %574 = vmatmul.bf16.vlgmr.msra.gmra.mxu2 %v296_v55 }
  0x3f   : > { %606 = vmatpush.bf16.msrb.mxu1 %v926_v50  ;;  %587 = vmatmul.bf16.vlgmr.msra.gmra.mxu3 %v294_v42 }
  0x42   : > { %594 = vmatpush.bf16.msrb.mxu0 %v854_v57 }
  0x43   : > { %607 = vmatpush.bf16.msrb.mxu1 %v918_v58 }
  0x46   : > { %595 = vmatpush.bf16.msrb.mxu0 %v846_v63 }
  0x47   : > { %608 = vmatpush.bf16.msrb.mxu1 %v910_v0 }
  0x4a   : > { %596 = vmatpush.bf16.msrb.mxu0 %v838_v5 }
  0x4b   : > { %609 = vmatpush.bf16.msrb.mxu1 %v902_v6 }
  0x4e   : > { %597 = vmatpush.bf16.msrb.mxu0 %v830_v11 }
  0x4f   : > { %610 = vmatpush.bf16.msrb.mxu1 %v894_v12 }
  0x52   : > { %598 = vmatpush.bf16.msrb.mxu0 %v822_v17 }
  0x53   : > { %611 = vmatpush.bf16.msrb.mxu1 %v886_v18 }
  0x56   : > { %599 = vmatpush.bf16.msrb.mxu0 %v814_v23 }
  0x57   : > { %612 = vmatpush.bf16.msrb.mxu1 %v878_v24 }
  0x59   : > { %600 = vmatmul.bf16.vlgmr.msrb.gmra.mxu0 %v1159_v45 }
  0x5a   : > { %613 = vmatmul.bf16.vlgmr.msrb.gmra.mxu1 %v296_v55 }
  0xb6   : > { %v549_v25 = vpop.f32.mrf.mxu0 }
  0xb7   : > { %v562_v26 = vpop.f32.mrf.mxu1 }
  0xb8   : > { %v563_v27 = vadd.f32 %v562_v26, %v549_v25 }
  0xbe   : > { %v551_v28 = vpop.f32.mrf.mxu0 }
  0xbf   : > { %v564_v29 = vpop.f32.mrf.mxu1 }
  0xc1   : > { %v575_v31 = vpop.f32.mrf.mxu2 }
  0xc2   : > { %v576_v32 = vadd.f32 %v575_v31, %v563_v27  ;;  %v588_v34 = vpop.f32.mrf.mxu3 }
  0xc4   : > { %v618_v33 = vadd.f32 %v576_v32, %v237_v30 }
  0xc6   : > { %620 = vst [vmem:[#allocation2] sm:$0xff] %v618_v33 }
  0xc9   : > { %v577_v35 = vpop.f32.mrf.mxu2 }
  0xca   : > { %v590_v36 = vpop.f32.mrf.mxu3 }
  0xd6   : > { %v601_v37 = vpop.f32.mrf.mxu0 }
  0xd7   : > { %v602_v38 = vadd.f32 %v601_v37, %v588_v34  ;;  %v614_v39 = vpop.f32.mrf.mxu1 }
  0xd9   : > { %v615_v41 = vadd.f32 %v614_v39, %v602_v38 }
  0xdb   : > { %v619_v42 = vadd.f32 %v615_v41, %v238_v40  ;;  %625 = sbr.rel (%p935_p7) target bundleno = 230 (0xe6), region = 36 }
  0xdd   : > { %621 = vst [vmem:[#allocation2 + $0x8] sm:$0xff] %v619_v42 }
  0xde   : > { %v603_v43 = vpop.f32.mrf.mxu0 }
  0xdf   : > { %v616_v44 = vpop.f32.mrf.mxu1 }
  0xe0   : > { %v626_v45 = vld [vmem:[#allocation2] sm:$0xff] }
  0xe1   : > { %628 = vst [vmem:[%s1207_s2] sm:$0xff] %v626_v45 }
  0xe4   : > { %v627_v46 = vld [vmem:[#allocation2 + $0x8] sm:$0xff] }
  0xe5   : > { %629 = vst [vmem:[%s1207_s2 + $0x8] sm:$0xff] %v627_v46 }
  0xe6 PF: > { %s12_s11 = sadd.s32 1, %s1036_s11   ;;  %s1208_s9 = smov %s1032_s10 }
  0xe7   : > { %p9_p8 = scmp.ge.s32.totalorder %s12_s11, 8   ;;  %s1209_s10 = smov %s1211_s12 }
  0xe9   :  { %11 = sbr.rel (!%p9_p8) target bundleno = 2 (0x2), region = 69 }

// kernel: resnet18_apply.102
= control target key start
LH: loop header
LB: loop body
LE: loop exit
PB: predicated region body
PF: predicated region fallthrough
CT: control target
= control target key end

     0   :  { %s96_s0 = inlined_call_operand.vmem [shape: f32[8,256], index: 0, kind: input, shape index: {}]   ;;  %s97_s1 = inlined_call_operand.vmem [shape: f32[1,256], index: 1, kind: input, shape index: {}]   ;;  %s98_s2 = inlined_call_operand.vmem [shape: f32[1,256], index: 2, kind: input, shape index: {}]   ;;  %s99_s3 = inlined_call_operand.vmem [shape: f32[8,256], index: 3, kind: input, shape index: {}]   ;;  %s100_s4 = inlined_call_operand.vmem [shape: f32[8,256], index: 4, kind: output, shape index: {}]  }
   0x1   :  { %v17_v0 = vld [vmem:[%s96_s0] sm:$0xff]  ;;  %v18_v5 = vld [vmem:[%s96_s0 + $0x8] sm:$0xff] }
   0x2   :  { %v19_v1 = vld [vmem:[%s97_s1] sm:$0x3]  ;;  %v36_v11 = vld [vmem:[%s99_s3 + $0x8] sm:$0xff] }
   0x3   :  { %v27_v2 = vld [vmem:[%s98_s2] sm:$0x3]  ;;  %v21_v3 = vperm.slane %v19_v1, 0  ;;  %v22_v6 = vperm.slane %v19_v1, 1 }
   0x4   :  { %v29_v4 = vperm.slane %v27_v2, 0  ;;  %v30_v7 = vperm.slane %v27_v2, 1  ;;  %v35_v10 = vld [vmem:[%s99_s3] sm:$0xff] }
   0x5   :  { %v25_v8 = vmul.f32 %v21_v3, %v17_v0  ;;  %v26_v9 = vmul.f32 %v22_v6, %v18_v5 }
   0x7   :  { %v33_v12 = vadd.f32 %v29_v4, %v25_v8  ;;  %v34_v13 = vadd.f32 %v30_v7, %v26_v9 }
   0x9   :  { %v37_v14 = vadd.f32 %v35_v10, %v33_v12  ;;  %v38_v15 = vadd.f32 %v36_v11, %v34_v13 }
   0xb   :  { %v39_v16 = vmax.f32 %v37_v14, 0.0  ;;  %v40_v17 = vmax.f32 %v38_v15, 0.0 }
   0xd   :  { %41 = vst [vmem:[%s100_s4] sm:$0xff] %v39_v16 }
   0xe   :  { %42 = vst [vmem:[%s100_s4 + $0x8] sm:$0xff] %v40_v17 }

// kernel: resnet18_apply.114
= control target key start
LH: loop header
LB: loop body
LE: loop exit
PB: predicated region body
PF: predicated region fallthrough
CT: control target
= control target key end

     0   :  { %v14_v0 = vlaneseq  ;;  %v142_v3 = vmov 0.0   ;;  %vm32_vm1 = vcmask 1041408   ;;  %vm68_vm2 = vcmask 1040384   ;;  %s205_s0 = inlined_call_operand.vmem [shape: f32[2,512], index: 0, kind: input, shape index: {}]   ;;  %s206_s1 = inlined_call_operand.vmem [shape: f32[1,512], index: 1, kind: output, shape index: {0}]   ;;  %s207_s2 = inlined_call_operand.vmem [shape: f32[1,512], index: 2, kind: output, shape index: {1}]  }
   0x1   :  { %v20_v1 = vld [vmem:[%s205_s0] sm:$0xff]  ;;  %vm70_vm3 = vcmask 1042434  }
   0x2   :  { %23 = vst [vmem:[#allocation1] ss:$4 sm:$0xff] %v20_v1  ;;  %vm161_vm0 = vcmp.lt.s32.totalorder %v14_v0, 512  ;;  %v81_v4 = vmul.f32 %v20_v1, %v20_v1 }
   0x3   :  { %18 = vst.msk [vmem:[%s206_s1] sm:$0xf] %vm161_vm0, %v142_v3 }
   0x4   :  { %19 = vst.msk [vmem:[%s207_s2] sm:$0xf] %vm161_vm0, %v142_v3 }
   0x9   :  { %v24_v5 = vld.sshfl [vmem:[#allocation1] sm:$0xff pattern:$0x73625140]  ;;  %v25_v6 = vld.sshfl [vmem:[#allocation1 + $0x8] sm:$0xff pattern:$0x73625140] }
   0xa   :  { %v26_v7 = vld.sshfl [vmem:[#allocation1 + $0x10] sm:$0xff pattern:$0x73625140]  ;;  %v27_v8 = vld.sshfl [vmem:[#allocation1 + $0x18] sm:$0xff pattern:$0x73625140] }
   0xb   :  { %v33_v9 = vsel %vm32_vm1, %v24_v5, 0.0  ;;  %v40_v10 = vsel %vm32_vm1, %v25_v6, 0.0  ;;  %v47_v11 = vsel %vm32_vm1, %v26_v7, 0.0  ;;  %v54_v12 = vsel %vm32_vm1, %v27_v8, 0.0  ;;  %83 = vst [vmem:[#allocation1] ss:$4 sm:$0xff] %v81_v4 }
   0xc   :  { %v34_v13 = vrot.slane %v33_v9, 4  ;;  %v41_v14 = vrot.slane %v40_v10, 4  ;;  %v48_v15 = vrot.slane %v47_v11, 4  ;;  %v55_v16 = vrot.slane %v54_v12, 4  ;;  %v21_v52 = vld [vmem:[%s206_s1] sm:$0xf] }
   0xe   :  { %v35_v17 = vadd.f32 %v34_v13, %v33_v9  ;;  %v42_v18 = vadd.f32 %v41_v14, %v40_v10  ;;  %v49_v19 = vadd.f32 %v48_v15, %v47_v11  ;;  %v56_v20 = vadd.f32 %v55_v16, %v54_v12 }
  0x10   :  { %v36_v21 = vrot.slane %v35_v17, 2  ;;  %v43_v22 = vrot.slane %v42_v18, 2  ;;  %v50_v23 = vrot.slane %v49_v19, 2  ;;  %v57_v24 = vrot.slane %v56_v20, 2 }
  0x12   :  { %v37_v25 = vadd.f32 %v36_v21, %v35_v17  ;;  %v44_v26 = vadd.f32 %v43_v22, %v42_v18  ;;  %v51_v27 = vadd.f32 %v50_v23, %v49_v19  ;;  %v58_v28 = vadd.f32 %v57_v24, %v56_v20  ;;  %v84_v29 = vld.sshfl [vmem:[#allocation1] sm:$0xff pattern:$0x73625140]  ;;  %v85_v30 = vld.sshfl [vmem:[#allocation1 + $0x8] sm:$0xff pattern:$0x73625140] }
  0x13   :  { %v86_v31 = vld.sshfl [vmem:[#allocation1 + $0x10] sm:$0xff pattern:$0x73625140]  ;;  %v87_v32 = vld.sshfl [vmem:[#allocation1 + $0x18] sm:$0xff pattern:$0x73625140] }
  0x14   :  { %v38_v33 = vrot.slane %v37_v25, 1  ;;  %v45_v34 = vrot.slane %v44_v26, 1  ;;  %v52_v35 = vrot.slane %v51_v27, 1  ;;  %v59_v36 = vrot.slane %v58_v28, 1  ;;  %v80_v17 = vld [vmem:[%s207_s2] sm:$0xf] }
  0x15   :  { %v92_v37 = vsel %vm32_vm1, %v84_v29, 0.0  ;;  %v99_v38 = vsel %vm32_vm1, %v85_v30, 0.0  ;;  %v106_v39 = vsel %vm32_vm1, %v86_v31, 0.0  ;;  %v113_v40 = vsel %vm32_vm1, %v87_v32, 0.0 }
  0x16   :  { %v46_v41 = vadd.f32 %v45_v34, %v44_v26  ;;  %v53_v42 = vadd.f32 %v52_v35, %v51_v27  ;;  %v60_v43 = vadd.f32 %v59_v36, %v58_v28  ;;  %v93_v44 = vrot.slane %v92_v37, 4 }
  0x17   :  { %v100_v45 = vrot.slane %v99_v38, 4  ;;  %v107_v46 = vrot.slane %v106_v39, 4  ;;  %v114_v47 = vrot.slane %v113_v40, 4  ;;  %v39_v48 = vadd.f32 %v38_v33, %v37_v25 }
  0x18   :  { %v65_v49 = vrot.slane %v46_v41, 7  ;;  %v66_v50 = vrot.slane %v53_v42, 6  ;;  %v67_v51 = vrot.slane %v60_v43, 5  ;;  %v94_v53 = vadd.f32 %v93_v44, %v92_v37 }
  0x19   :  { %v101_v54 = vadd.f32 %v100_v45, %v99_v38  ;;  %v108_v55 = vadd.f32 %v107_v46, %v106_v39  ;;  %v115_v56 = vadd.f32 %v114_v47, %v113_v40 }
  0x1a   :  { %v69_v57 = vsel %vm68_vm2, %v39_v48, %v65_v49  ;;  %v71_v58 = vsel %vm70_vm3, %v66_v50, %v67_v51  ;;  %v95_v60 = vrot.slane %v94_v53, 2 }
  0x1b   :  { %v72_v59 = vsel %vm32_vm1, %v69_v57, %v71_v58  ;;  %v102_v61 = vrot.slane %v101_v54, 2  ;;  %v109_v62 = vrot.slane %v108_v55, 2  ;;  %v116_v0 = vrot.slane %v115_v56, 2 }
  0x1c   :  { %v74_v63 = vadd.f32 %v72_v59, %v21_v52  ;;  %v96_v1 = vadd.f32 %v95_v60, %v94_v53 }
  0x1d   :  { %v103_v3 = vadd.f32 %v102_v61, %v101_v54  ;;  %v110_v4 = vadd.f32 %v109_v62, %v108_v55  ;;  %v117_v5 = vadd.f32 %v116_v0, %v115_v56 }
  0x1e   :  { %79 = vst.msk [vmem:[%s206_s1] sm:$0xf] %vm161_vm0, %v74_v63  ;;  %v97_v6 = vrot.slane %v96_v1, 1 }
  0x1f   :  { %v104_v7 = vrot.slane %v103_v3, 1  ;;  %v111_v8 = vrot.slane %v110_v4, 1  ;;  %v118_v9 = vrot.slane %v117_v5, 1 }
  0x20   :  { %v98_v13 = vadd.f32 %v97_v6, %v96_v1 }
  0x21   :  { %v105_v10 = vadd.f32 %v104_v7, %v103_v3  ;;  %v112_v11 = vadd.f32 %v111_v8, %v110_v4  ;;  %v119_v12 = vadd.f32 %v118_v9, %v117_v5 }
  0x23   :  { %v124_v14 = vrot.slane %v105_v10, 7  ;;  %v125_v15 = vrot.slane %v112_v11, 6  ;;  %v126_v16 = vrot.slane %v119_v12, 5 }
  0x25   :  { %v127_v18 = vsel %vm68_vm2, %v98_v13, %v124_v14  ;;  %v128_v19 = vsel %vm70_vm3, %v125_v15, %v126_v16 }
  0x26   :  { %v129_v20 = vsel %vm32_vm1, %v127_v18, %v128_v19 }
  0x27   :  { %v131_v21 = vadd.f32 %v129_v20, %v80_v17 }
  0x29   :  { %132 = vst.msk [vmem:[%s207_s2] sm:$0xf] %vm161_vm0, %v131_v21 }

// kernel: resnet18_apply.113
= control target key start
LH: loop header
LB: loop body
LE: loop exit
PB: predicated region body
PF: predicated region fallthrough
CT: control target
= control target key end

     0   :  { %s1027_s9 = smov 0   ;;  %s1029_s10 = smov 0   ;;  %s1229_s0 = inlined_call_operand.vmem [shape: bf16[2,256], index: 0, kind: input, shape index: {}]   ;;  %s1230_s1 = inlined_call_operand.vmem [shape: bf16[256,512], index: 1, kind: input, shape index: {}]   ;;  %s1231_s2 = inlined_call_operand.vmem [shape: f32[2,512], index: 2, kind: output, shape index: {}]  }
   0x1   :  { %s1031_s11 = smov 0   ;;  %s1033_s12 = smov 0  }
   0x2   :  { %s1035_s13 = smov 0  }
   0x3 LB: > { %s27_s14 = sadd.s32 1, %s1005_s12  ;;  %p75_p1 = scmp.ne.s32.totalorder %s997_s10, %s993_s9  ;;  %s1009_s13 = sphi %s1035_s13, %s12_s13   ;;  %s1005_s12 = sphi %s1033_s12, %s1235_s12   ;;  %s1001_s11 = sphi %s1031_s11, %s1234_s11   ;;  %s997_s10 = sphi %s1029_s10, %s1233_s10   ;;  %s993_s9 = sphi %s1027_s9, %s1232_s9  }
   0x4   : > { %p29_p0 = scmp.ge.s32.totalorder %s27_s14, 2  ;;  %p76_p2 = scmp.eq.s32.totalorder %s1009_s13, 0 }
   0x5   : > { %s68_s16 = sadd.s32 1, %s997_s10  ;;  %p759_p5 = scmp.ge.s32.totalorder %s1009_s13, 2 }
   0x6   : > { %s1237_s14 = smov (%p29_p0, %s27_s14), 0  ;;  %p77_p3 = por %p76_p2, %p75_p1 }
   0x7   : > { %s64_s15 = ssub.s32 %s1005_s12, %s1237_s14  ;;  %141 = sbr.rel (%p759_p5) target bundleno = 48 (0x30), region = 20 }
   0x8   : > { %p66_p4 = scmp.eq.s32.totalorder %s64_s15, 0 }
   0xa   : > { %s1062_s17 = scalar_select %p66_p4, %s997_s10, %s68_s16  }
   0xc   : > { %144 = sbr.rel (!%p77_p3) target bundleno = 48 (0x30), region = 24  ;;  %s146_s18 = sand.u32 (%p77_p3), 1, %s997_s10  }
   0xd   : > { %s897_s19 = sshll.u32 (%p77_p3), %s1005_s12, 3  ;;  %s760_s20 = sshll.u32 (%p77_p3), %s146_s18, 8 }
   0xe   : > { %s1070_s23 = scalar_lea.vmem (%p77_p3), %s1230_s1, %s897_s19  ;;  %s1075_s24 = scalar_lea.vmem (%p77_p3), [#allocation3], %s760_s20 }
   0xf   : > { %v245_v0 = vld [vmem:[%s1070_s23] sm:$0xff] (%p77_p3)  ;;  %v247_v1 = vld [vmem:[%s1070_s23 + $0x10] sm:$0xff] (%p77_p3) }
  0x10   : > { %v249_v2 = vld [vmem:[%s1070_s23 + $0x20] sm:$0xff] (%p77_p3)  ;;  %246 = vst [vmem:[%s1075_s24] sm:$0xff] (%p77_p3), %v245_v0  ;;  %v251_v3 = vld [vmem:[%s1070_s23 + $0x30] sm:$0xff] (%p77_p3) }
  0x11   : > { %248 = vst [vmem:[%s1075_s24 + $0x8] sm:$0xff] %v247_v1  ;;  %v253_v4 = vld [vmem:[%s1070_s23 + $0x40] sm:$0xff]  ;;  %v255_v5 = vld [vmem:[%s1070_s23 + $0x50] sm:$0xff] }
  0x12   : > { %250 = vst [vmem:[%s1075_s24 + $0x10] sm:$0xff] %v249_v2  ;;  %v257_v6 = vld [vmem:[%s1070_s23 + $0x60] sm:$0xff]  ;;  %v259_v7 = vld [vmem:[%s1070_s23 + $0x70] sm:$0xff] }
  0x13   : > { %252 = vst [vmem:[%s1075_s24 + $0x18] sm:$0xff] %v251_v3  ;;  %v261_v8 = vld [vmem:[%s1070_s23 + $0x80] sm:$0xff]  ;;  %v263_v9 = vld [vmem:[%s1070_s23 + $0x90] sm:$0xff] }
  0x14   : > { %254 = vst [vmem:[%s1075_s24 + $0x20] sm:$0xff] %v253_v4  ;;  %v265_v10 = vld [vmem:[%s1070_s23 + $0xa0] sm:$0xff]  ;;  %v267_v11 = vld [vmem:[%s1070_s23 + $0xb0] sm:$0xff] }
  0x15   : > { %256 = vst [vmem:[%s1075_s24 + $0x28] sm:$0xff] %v255_v5  ;;  %v269_v12 = vld [vmem:[%s1070_s23 + $0xc0] sm:$0xff]  ;;  %v271_v13 = vld [vmem:[%s1070_s23 + $0xd0] sm:$0xff] }
  0x16   : > { %258 = vst [vmem:[%s1075_s24 + $0x30] sm:$0xff] %v257_v6  ;;  %v273_v14 = vld [vmem:[%s1070_s23 + $0xe0] sm:$0xff]  ;;  %v275_v15 = vld [vmem:[%s1070_s23 + $0xf0] sm:$0xff] }
  0x17   : > { %260 = vst [vmem:[%s1075_s24 + $0x38] sm:$0xff] %v259_v7  ;;  %v277_v16 = vld [vmem:[%s1070_s23 + $0x100] sm:$0xff]  ;;  %v279_v17 = vld [vmem:[%s1070_s23 + $0x110] sm:$0xff] }
  0x18   : > { %262 = vst [vmem:[%s1075_s24 + $0x40] sm:$0xff] %v261_v8  ;;  %v281_v18 = vld [vmem:[%s1070_s23 + $0x120] sm:$0xff]  ;;  %v283_v19 = vld [vmem:[%s1070_s23 + $0x130] sm:$0xff] }
  0x19   : > { %264 = vst [vmem:[%s1075_s24 + $0x48] sm:$0xff] %v263_v9  ;;  %v285_v20 = vld [vmem:[%s1070_s23 + $0x140] sm:$0xff]  ;;  %v287_v21 = vld [vmem:[%s1070_s23 + $0x150] sm:$0xff] }
  0x1a   : > { %266 = vst [vmem:[%s1075_s24 + $0x50] sm:$0xff] %v265_v10  ;;  %v289_v22 = vld [vmem:[%s1070_s23 + $0x160] sm:$0xff]  ;;  %v291_v23 = vld [vmem:[%s1070_s23 + $0x170] sm:$0xff] }
  0x1b   : > { %268 = vst [vmem:[%s1075_s24 + $0x58] sm:$0xff] %v267_v11  ;;  %v293_v24 = vld [vmem:[%s1070_s23 + $0x180] sm:$0xff]  ;;  %v295_v25 = vld [vmem:[%s1070_s23 + $0x190] sm:$0xff] }
  0x1c   : > { %270 = vst [vmem:[%s1075_s24 + $0x60] sm:$0xff] %v269_v12  ;;  %v297_v26 = vld [vmem:[%s1070_s23 + $0x1a0] sm:$0xff]  ;;  %v299_v27 = vld [vmem:[%s1070_s23 + $0x1b0] sm:$0xff] }
  0x1d   : > { %272 = vst [vmem:[%s1075_s24 + $0x68] sm:$0xff] %v271_v13  ;;  %v301_v28 = vld [vmem:[%s1070_s23 + $0x1c0] sm:$0xff]  ;;  %v303_v29 = vld [vmem:[%s1070_s23 + $0x1d0] sm:$0xff] }
  0x1e   : > { %274 = vst [vmem:[%s1075_s24 + $0x70] sm:$0xff] %v273_v14  ;;  %v305_v30 = vld [vmem:[%s1070_s23 + $0x1e0] sm:$0xff]  ;;  %v307_v31 = vld [vmem:[%s1070_s23 + $0x1f0] sm:$0xff] }
  0x1f   : > { %276 = vst [vmem:[%s1075_s24 + $0x78] sm:$0xff] %v275_v15 }
  0x20   : > { %278 = vst [vmem:[%s1075_s24 + $0x80] sm:$0xff] %v277_v16 }
  0x21   : > { %280 = vst [vmem:[%s1075_s24 + $0x88] sm:$0xff] %v279_v17 }
  0x22   : > { %282 = vst [vmem:[%s1075_s24 + $0x90] sm:$0xff] %v281_v18 }
  0x23   : > { %284 = vst [vmem:[%s1075_s24 + $0x98] sm:$0xff] %v283_v19 }
  0x24   : > { %286 = vst [vmem:[%s1075_s24 + $0xa0] sm:$0xff] %v285_v20 }
  0x25   : > { %288 = vst [vmem:[%s1075_s24 + $0xa8] sm:$0xff] %v287_v21 }
  0x26   : > { %290 = vst [vmem:[%s1075_s24 + $0xb0] sm:$0xff] %v289_v22 }
  0x27   : > { %292 = vst [vmem:[%s1075_s24 + $0xb8] sm:$0xff] %v291_v23 }
  0x28   : > { %294 = vst [vmem:[%s1075_s24 + $0xc0] sm:$0xff] %v293_v24 }
  0x29   : > { %296 = vst [vmem:[%s1075_s24 + $0xc8] sm:$0xff] %v295_v25 }
  0x2a   : > { %298 = vst [vmem:[%s1075_s24 + $0xd0] sm:$0xff] %v297_v26 }
  0x2b   : > { %300 = vst [vmem:[%s1075_s24 + $0xd8] sm:$0xff] %v299_v27 }
  0x2c   : > { %302 = vst [vmem:[%s1075_s24 + $0xe0] sm:$0xff] %v301_v28 }
  0x2d   : > { %304 = vst [vmem:[%s1075_s24 + $0xe8] sm:$0xff] %v303_v29 }
  0x2e   : > { %306 = vst [vmem:[%s1075_s24 + $0xf0] sm:$0xff] %v305_v30 }
  0x2f   : > { %308 = vst [vmem:[%s1075_s24 + $0xf8] sm:$0xff] %v307_v31 }
  0x30 PF: > { %p763_p6 = scmp.ge.s32.totalorder %s1009_s13, 1  ;;  %p313_p7 = scmp.lt.s32.totalorder %s1009_s13, 3 }
  0x32   : > { %p314_p8 = pnand %p763_p6, %p313_p7 }
  0x33   : > { %s320_s25 = sand.u32 (!%p314_p8), 1, %s993_s9   ;;  %s765_s30 = sshll.u32 (!%p314_p8), %s1001_s11, 1 }
  0x34   : > { %317 = sbr.rel (%p314_p8) target bundleno = 242 (0xf2), region = 62  ;;  %s764_s28 = sshll.u32 (!%p314_p8), %s320_s25, 8 }
  0x35   : > { %s1144_s29 = scalar_lea.vmem (!%p314_p8), [#allocation3], %s764_s28  ;;  %p367_p9 = scmp.lt.s32.totalorder (!%p314_p8), %s765_s30, 3 }
  0x39   : > { %v380_v32 = vld [vmem:[%s1229_s0] sm:$0x3]  ;;  %v825_v33 = vld [vmem:[%s1144_s29 + $0x70] sm:$0xf]  ;;  %v913_v34 = vld [vmem:[%s1144_s29 + $0x74] sm:$0xf0] }
  0x3a   : > { %414 = vst [vmem:[#allocation1] ss:$9 sm:$0xff] %v380_v32  ;;  %v889_v35 = vld [vmem:[%s1144_s29 + $0xf0] sm:$0xf]  ;;  %v826_v36 = vor.u32 %v913_v34, %v825_v33  ;;  %v929_v37 = vld [vmem:[%s1144_s29 + $0xf4] sm:$0xf0] }
  0x3b   : > { %v912_v38 = vld [vmem:[%s1144_s29 + $0x74] sm:$0xf]  ;;  %v827_v39 = vld [vmem:[%s1144_s29 + $0x78] sm:$0xf0]  ;;  %v890_v40 = vor.u32 %v929_v37, %v889_v35  ;;  %v817_v44 = vld [vmem:[%s1144_s29 + $0x60] sm:$0xf] }
  0x3c   : > { %v830_v41 = vor.u32 %v912_v38, %v827_v39  ;;  %v928_v42 = vld [vmem:[%s1144_s29 + $0xf4] sm:$0xf]  ;;  %v891_v43 = vld [vmem:[%s1144_s29 + $0xf8] sm:$0xf0]  ;;  %579 = vmatpush.bf16.msra.mxu0 %v826_v36  ;;  %v911_v46 = vld [vmem:[%s1144_s29 + $0x64] sm:$0xf0] }
  0x3d   : > { %v894_v45 = vor.u32 %v928_v42, %v891_v43  ;;  %v881_v47 = vld [vmem:[%s1144_s29 + $0xe0] sm:$0xf]  ;;  %v927_v48 = vld [vmem:[%s1144_s29 + $0xe4] sm:$0xf0]  ;;  %592 = vmatpush.bf16.msra.mxu1 %v890_v40  ;;  %v818_v49 = vor.u32 %v911_v46, %v817_v44  ;;  %v910_v51 = vld [vmem:[%s1144_s29 + $0x64] sm:$0xf] }
  0x3e   : > { %605 = vmatpush.bf16.msra.mxu2 %v830_v41  ;;  %v882_v50 = vor.u32 %v927_v48, %v881_v47  ;;  %v819_v52 = vld [vmem:[%s1144_s29 + $0x68] sm:$0xf0]  ;;  %v926_v53 = vld [vmem:[%s1144_s29 + $0xe4] sm:$0xf]  ;;  %v809_v56 = vld [vmem:[%s1144_s29 + $0x50] sm:$0xf] }
  0x3f   : > { %618 = vmatpush.bf16.msra.mxu3 %v894_v45  ;;  %v822_v54 = vor.u32 %v910_v51, %v819_v52  ;;  %v883_v55 = vld [vmem:[%s1144_s29 + $0xe8] sm:$0xf0]  ;;  %v909_v57 = vld [vmem:[%s1144_s29 + $0x54] sm:$0xf0]  ;;  %v873_v59 = vld [vmem:[%s1144_s29 + $0xd0] sm:$0xf] }
  0x40   : > { %v886_v58 = vor.u32 %v926_v53, %v883_v55  ;;  %v925_v60 = vld [vmem:[%s1144_s29 + $0xd4] sm:$0xf0]  ;;  %v908_v61 = vld [vmem:[%s1144_s29 + $0x54] sm:$0xf]  ;;  %580 = vmatpush.bf16.msra.mxu0 %v818_v49  ;;  %v810_v62 = vor.u32 %v909_v57, %v809_v56  ;;  %v811_v63 = vld [vmem:[%s1144_s29 + $0x58] sm:$0xf0] }
  0x41   : > { %v924_v0 = vld [vmem:[%s1144_s29 + $0xd4] sm:$0xf]  ;;  %v875_v1 = vld [vmem:[%s1144_s29 + $0xd8] sm:$0xf0]  ;;  %593 = vmatpush.bf16.msra.mxu1 %v882_v50  ;;  %v874_v2 = vor.u32 %v925_v60, %v873_v59  ;;  %v814_v3 = vor.u32 %v908_v61, %v811_v63  ;;  %v801_v4 = vld [vmem:[%s1144_s29 + $0x40] sm:$0xf] }
  0x42   : > { %606 = vmatpush.bf16.msra.mxu2 %v822_v54  ;;  %v907_v5 = vld [vmem:[%s1144_s29 + $0x44] sm:$0xf0]  ;;  %v865_v6 = vld [vmem:[%s1144_s29 + $0xc0] sm:$0xf]  ;;  %v878_v7 = vor.u32 %v924_v0, %v875_v1  ;;  %v906_v9 = vld [vmem:[%s1144_s29 + $0x44] sm:$0xf] }
  0x43   : > { %619 = vmatpush.bf16.msra.mxu3 %v886_v58  ;;  %v923_v8 = vld [vmem:[%s1144_s29 + $0xc4] sm:$0xf0]  ;;  %v803_v10 = vld [vmem:[%s1144_s29 + $0x48] sm:$0xf0]  ;;  %v922_v11 = vld [vmem:[%s1144_s29 + $0xc4] sm:$0xf]  ;;  %v802_v13 = vor.u32 %v907_v5, %v801_v4 }
  0x44   : > { %v867_v12 = vld [vmem:[%s1144_s29 + $0xc8] sm:$0xf0]  ;;  %581 = vmatpush.bf16.msra.mxu0 %v810_v62  ;;  %v866_v14 = vor.u32 %v923_v8, %v865_v6  ;;  %v806_v15 = vor.u32 %v906_v9, %v803_v10  ;;  %v793_v16 = vld [vmem:[%s1144_s29 + $0x30] sm:$0xf]  ;;  %v905_v17 = vld [vmem:[%s1144_s29 + $0x34] sm:$0xf0] }
  0x45   : > { %594 = vmatpush.bf16.msra.mxu1 %v874_v2  ;;  %v857_v18 = vld [vmem:[%s1144_s29 + $0xb0] sm:$0xf]  ;;  %v870_v19 = vor.u32 %v922_v11, %v867_v12  ;;  %v921_v20 = vld [vmem:[%s1144_s29 + $0xb4] sm:$0xf0]  ;;  %v904_v21 = vld [vmem:[%s1144_s29 + $0x34] sm:$0xf]  ;;  %v794_v25 = vor.u32 %v905_v17, %v793_v16 }
  0x46   : > { %607 = vmatpush.bf16.msra.mxu2 %v814_v3  ;;  %v795_v22 = vld [vmem:[%s1144_s29 + $0x38] sm:$0xf0]  ;;  %v920_v23 = vld [vmem:[%s1144_s29 + $0xb4] sm:$0xf]  ;;  %v858_v26 = vor.u32 %v921_v20, %v857_v18  ;;  %v785_v28 = vld [vmem:[%s1144_s29 + $0x20] sm:$0xf] }
  0x47   : > { %620 = vmatpush.bf16.msra.mxu3 %v878_v7  ;;  %v859_v24 = vld [vmem:[%s1144_s29 + $0xb8] sm:$0xf0]  ;;  %v798_v27 = vor.u32 %v904_v21, %v795_v22  ;;  %v903_v29 = vld [vmem:[%s1144_s29 + $0x24] sm:$0xf0]  ;;  %v849_v30 = vld [vmem:[%s1144_s29 + $0xa0] sm:$0xf] }
  0x48   : > { %582 = vmatpush.bf16.msra.mxu0 %v802_v13  ;;  %v862_v31 = vor.u32 %v920_v23, %v859_v24  ;;  %v919_v32 = vld [vmem:[%s1144_s29 + $0xa4] sm:$0xf0]  ;;  %v902_v33 = vld [vmem:[%s1144_s29 + $0x24] sm:$0xf]  ;;  %v787_v34 = vld [vmem:[%s1144_s29 + $0x28] sm:$0xf0]  ;;  %v786_v37 = vor.u32 %v903_v29, %v785_v28 }
  0x49   : > { %595 = vmatpush.bf16.msra.mxu1 %v866_v14  ;;  %v918_v35 = vld [vmem:[%s1144_s29 + $0xa4] sm:$0xf]  ;;  %v851_v36 = vld [vmem:[%s1144_s29 + $0xa8] sm:$0xf0]  ;;  %v850_v38 = vor.u32 %v919_v32, %v849_v30  ;;  %v790_v39 = vor.u32 %v902_v33, %v787_v34  ;;  %v777_v40 = vld [vmem:[%s1144_s29 + $0x10] sm:$0xf] }
  0x4a   : > { %608 = vmatpush.bf16.msra.mxu2 %v806_v15  ;;  %v901_v41 = vld [vmem:[%s1144_s29 + $0x14] sm:$0xf0]  ;;  %v841_v42 = vld [vmem:[%s1144_s29 + $0x90] sm:$0xf]  ;;  %v854_v43 = vor.u32 %v918_v35, %v851_v36  ;;  %v900_v45 = vld [vmem:[%s1144_s29 + $0x14] sm:$0xf] }
  0x4b   : > { %621 = vmatpush.bf16.msra.mxu3 %v870_v19  ;;  %v917_v44 = vld [vmem:[%s1144_s29 + $0x94] sm:$0xf0]  ;;  %v779_v46 = vld [vmem:[%s1144_s29 + $0x18] sm:$0xf0]  ;;  %v916_v47 = vld [vmem:[%s1144_s29 + $0x94] sm:$0xf]  ;;  %v778_v49 = vor.u32 %v901_v41, %v777_v40 }
  0x4c   : > { %583 = vmatpush.bf16.msra.mxu0 %v794_v25  ;;  %v843_v48 = vld [vmem:[%s1144_s29 + $0x98] sm:$0xf0]  ;;  %v842_v50 = vor.u32 %v917_v44, %v841_v42  ;;  %v782_v51 = vor.u32 %v900_v45, %v779_v46  ;;  %v769_v52 = vld [vmem:[%s1144_s29] sm:$0xf]  ;;  %v899_v53 = vld [vmem:[%s1144_s29 + $0x4] sm:$0xf0] }
  0x4d   : > { %596 = vmatpush.bf16.msra.mxu1 %v858_v26  ;;  %v833_v54 = vld [vmem:[%s1144_s29 + $0x80] sm:$0xf]  ;;  %v846_v55 = vor.u32 %v916_v47, %v843_v48  ;;  %v915_v56 = vld [vmem:[%s1144_s29 + $0x84] sm:$0xf0]  ;;  %v898_v57 = vld [vmem:[%s1144_s29 + $0x4] sm:$0xf]  ;;  %v770_v61 = vor.u32 %v899_v53, %v769_v52 }
  0x4e   : > { %609 = vmatpush.bf16.msra.mxu2 %v798_v27  ;;  %v771_v58 = vld [vmem:[%s1144_s29 + $0x8] sm:$0xf0]  ;;  %v914_v59 = vld [vmem:[%s1144_s29 + $0x84] sm:$0xf]  ;;  %v834_v62 = vor.u32 %v915_v56, %v833_v54  ;;  %v415_v1 = vld [vmem:[#allocation1] sm:$0xff]  ;;  %v1011_v3 = vmov 0.0  }
  0x4f   : > { %622 = vmatpush.bf16.msra.mxu3 %v862_v31  ;;  %v835_v60 = vld [vmem:[%s1144_s29 + $0x88] sm:$0xf0]  ;;  %v774_v63 = vor.u32 %v898_v57, %v771_v58  ;;  %v416_v2 = vld [vmem:[#allocation1 + $0x9] sm:$0xff]  ;;  %378 = vst [vmem:[#allocation2] sm:$0xf] %v1011_v3  ;;  %vm634_vm0 = vcmask 1041408  }
  0x50   : > { %584 = vmatpush.bf16.msra.mxu0 %v786_v37  ;;  %v838_v0 = vor.u32 %v914_v59, %v835_v60  ;;  %s1239_s30 = smov (!%p367_p9, %s765_s30), 3 }
  0x51   : > { %597 = vmatpush.bf16.msra.mxu1 %v850_v38  ;;  %s766_s3 = sshll.u32 %s1239_s30, 1 }
  0x52   : > { %610 = vmatpush.bf16.msra.mxu2 %v790_v39  ;;  %s372_s6 = scalar_lea.vmem %s1231_s2, %s766_s3 }
  0x53   : > { %623 = vmatpush.bf16.msra.mxu3 %v854_v43 }
  0x54   : > { %585 = vmatpush.bf16.msra.mxu0 %v778_v49 }
  0x55   : > { %598 = vmatpush.bf16.msra.mxu1 %v842_v50 }
  0x56   : > { %611 = vmatpush.bf16.msra.mxu2 %v782_v51  ;;  %v379_v12 = vld [vmem:[#allocation2] sm:$0xf] }
  0x57   : > { %624 = vmatpush.bf16.msra.mxu3 %v846_v55 }
  0x58   : > { %586 = vmatpush.bf16.msra.mxu0 %v770_v61 }
  0x59   : > { %599 = vmatpush.bf16.msra.mxu1 %v834_v62 }
  0x5a   : > { %612 = vmatpush.bf16.msra.mxu2 %v774_v63 }
  0x5b   : > { %625 = vmatpush.bf16.msra.mxu3 %v838_v0  ;;  %587 = vmatmul.bf16.vlgmr.msra.gmra.mxu0 %v415_v1 }
  0x5c   : > { %600 = vmatmul.bf16.vlgmr.msra.gmra.mxu1 %v416_v2 }
  0x5d   : > { %613 = vmatmul.bf16.vlgmr.msra.gmra.mxu2 %v415_v1 }
  0x5e   : > { %626 = vmatmul.bf16.vlgmr.msra.gmra.mxu3 %v416_v2 }
  0xd8   : > { %v588_v4 = vpop.f32.mrf.mxu0 }
  0xd9   : > { %v601_v5 = vpop.f32.mrf.mxu1 }
  0xda   : > { %v602_v9 = vadd.f32 %v601_v5, %v588_v4 }
  0xe0   : > { %v614_v6 = vpop.f32.mrf.mxu2  ;;  %v590_v8 = vpop.f32.mrf.mxu0 }
  0xe1   : > { %v627_v7 = vpop.f32.mrf.mxu3  ;;  %v603_v11 = vpop.f32.mrf.mxu1 }
  0xe2   : > { %v628_v10 = vadd.f32 %v627_v7, %v614_v6 }
  0xe4   : > { %v633_v13 = vrot.slane %v628_v10, 6 }
  0xe6   : > { %v635_v14 = vsel %vm634_vm0, %v602_v9, %v633_v13 }
  0xe7   : > { %v637_v15 = vadd.f32 %v635_v14, %v379_v12 }
  0xe8   : > { %v616_v16 = vpop.f32.mrf.mxu2 }
  0xe9   : > { %638 = vst [vmem:[#allocation2] sm:$0xf] %v637_v15  ;;  %v629_v17 = vpop.f32.mrf.mxu3 }
  0xf0   : > { %v642_v18 = vld [vmem:[#allocation2] sm:$0xf] }
  0xf1   : > { %643 = vst [vmem:[%s372_s6] sm:$0xf] %v642_v18 }
  0xf2 PF: > { %s12_s13 = sadd.s32 1, %s1009_s13   ;;  %s1232_s9 = smov %s997_s10 }
  0xf3   : > { %p9_p10 = scmp.ge.s32.totalorder %s12_s13, 4   ;;  %s1233_s10 = smov %s1062_s17 }
  0xf4   : > { %s1234_s11 = smov %s1005_s12  ;;  %s1235_s12 = smov %s1237_s14 }
  0xf5   :  { %11 = sbr.rel (!%p9_p10) target bundleno = 3 (0x3), region = 112 }

// kernel: resnet18_apply.115
= control target key start
LH: loop header
LB: loop body
LE: loop exit
PB: predicated region body
PF: predicated region fallthrough
CT: control target
= control target key end

     0   :  { %vm24_vm0 = vcmask 1041408   ;;  %vm26_vm1 = vcmask 1045508   ;;  %vm28_vm2 = vcmask 1043456   ;;  %s87_s1 = inlined_call_operand.vmem [shape: f32[1,512], index: 1, kind: input, shape index: {}]   ;;  %s88_s2 = inlined_call_operand.vmem [shape: f32[1,512], index: 2, kind: input, shape index: {}]   ;;  %s89_s0 = inlined_call_operand.vmem [shape: f32[2,512], index: 0, kind: input, shape index: {}]   ;;  %s90_s3 = inlined_call_operand.vmem [shape: f32[2,512], index: 3, kind: output, shape index: {}]  }
   0x1   :  { %v15_v0 = vld [vmem:[%s87_s1] sm:$0xf] }
   0x2   :  { %v32_v1 = vld [vmem:[%s88_s2] sm:$0xf]  ;;  %v17_v2 = vperm.slane %v15_v0, 0  ;;  %v18_v3 = vperm.slane %v15_v0, 1  ;;  %v19_v4 = vperm.slane %v15_v0, 2  ;;  %v20_v5 = vperm.slane %v15_v0, 3 }
   0x3   :  { %v34_v6 = vperm.slane %v32_v1, 0  ;;  %v35_v7 = vperm.slane %v32_v1, 1  ;;  %v36_v8 = vperm.slane %v32_v1, 2  ;;  %v37_v9 = vperm.slane %v32_v1, 3  ;;  %v14_v13 = vld [vmem:[%s89_s0] sm:$0xff] }
   0x4   :  { %v21_v10 = vrot.slane %v18_v3, 6  ;;  %v22_v11 = vrot.slane %v19_v4, 4  ;;  %v23_v12 = vrot.slane %v20_v5, 2 }
   0x5   :  { %v38_v14 = vrot.slane %v35_v7, 6  ;;  %v39_v15 = vrot.slane %v36_v8, 4  ;;  %v40_v16 = vrot.slane %v37_v9, 2 }
   0x6   :  { %v25_v17 = vsel %vm24_vm0, %v17_v2, %v21_v10  ;;  %v27_v18 = vsel %vm26_vm1, %v22_v11, %v23_v12 }
   0x7   :  { %v29_v19 = vsel %vm28_vm2, %v25_v17, %v27_v18  ;;  %v41_v20 = vsel %vm24_vm0, %v34_v6, %v38_v14  ;;  %v42_v21 = vsel %vm26_vm1, %v39_v15, %v40_v16 }
   0x8   :  { %v31_v22 = vmul.f32 %v29_v19, %v14_v13  ;;  %v43_v23 = vsel %vm28_vm2, %v41_v20, %v42_v21 }
   0xa   :  { %v45_v24 = vadd.f32 %v43_v23, %v31_v22 }
   0xc   :  { %46 = vst [vmem:[%s90_s3] sm:$0xff] %v45_v24 }

// kernel: resnet18_apply.109
= control target key start
LH: loop header
LB: loop body
LE: loop exit
PB: predicated region body
PF: predicated region fallthrough
CT: control target
= control target key end

     0   :  { %s1330_s9 = smov 0   ;;  %s1332_s10 = smov 0   ;;  %s1633_s0 = inlined_call_operand.vmem [shape: bf16[2,2304], index: 0, kind: input, shape index: {}]   ;;  %s1634_s1 = inlined_call_operand.vmem [shape: bf16[2304,512], index: 1, kind: input, shape index: {}]   ;;  %s1635_s2 = inlined_call_operand.vmem [shape: f32[2,512], index: 2, kind: output, shape index: {}]  }
   0x1   :  { %s1334_s11 = smov 0   ;;  %s1336_s12 = smov 0  }
   0x2   :  { %s1338_s13 = smov 0   ;;  %s1340_s14 = smov 0  }
   0x3   :  { %s1342_s15 = smov 0  }
   0x4 LB: > { %s24_s16 = sadd.s32 1, %s1304_s13  ;;  %s27_s17 = sadd.s32 1, %s1308_s14  ;;  %s1312_s15 = sphi %s1342_s15, %s12_s15   ;;  %s1308_s14 = sphi %s1340_s14, %s1641_s14   ;;  %s1304_s13 = sphi %s1338_s13, %s1640_s13   ;;  %s1300_s12 = sphi %s1336_s12, %s1639_s12   ;;  %s1296_s11 = sphi %s1334_s11, %s1638_s11   ;;  %s1292_s10 = sphi %s1332_s10, %s1637_s10   ;;  %s1288_s9 = sphi %s1330_s9, %s1636_s9  }
   0x5   : > { %p25_p0 = scmp.ge.s32.totalorder %s24_s16, 6  ;;  %p75_p1 = scmp.ne.s32.totalorder %s1292_s10, %s1288_s9 }
   0x6   : > { %p76_p2 = scmp.eq.s32.totalorder %s1312_s15, 0  ;;  %s68_s21 = sadd.s32 1, %s1292_s10 }
   0x7   : > { %s1643_s16 = smov (%p25_p0, %s24_s16), 0  ;;  %s1645_s17 = smov (!%p25_p0, %s27_s17), %s1308_s14 }
   0x8   : > { %p77_p3 = por %p76_p2, %p75_p1  ;;  %p29_p4 = scmp.ge.s32.totalorder %s1645_s17, 2 }
   0x9   : > { %s63_s18 = ssub.s32 %s1304_s13, %s1643_s16  ;;  %p947_p6 = scmp.ge.s32.totalorder %s1312_s15, 12 }
   0xa   : > { %s1647_s17 = smov (%p29_p4, %s1645_s17), 0 }
   0xb   : > { %s64_s19 = ssub.s32 %s1308_s14, %s1647_s17  ;;  %129 = sbr.rel (%p947_p6) target bundleno = 72 (0x48), region = 16 }
   0xc   : > { %s65_s20 = sor.u32 %s64_s19, %s63_s18 }
   0xd   : > { %p66_p5 = scmp.eq.s32.totalorder %s65_s20, 0 }
   0xf   : > { %s1381_s22 = scalar_select %p66_p5, %s1292_s10, %s68_s21  }
  0x10   : > { %144 = sbr.rel (!%p77_p3) target bundleno = 72 (0x48), region = 24  ;;  %s146_s23 = sand.u32 (%p77_p3), 1, %s1292_s10  }
  0x11   : > { %s1199_s24 = smul.u32 (%p77_p3), 384, %s146_s23  ;;  %s948_s25 = sshll.u32 (%p77_p3), %s1308_s14, 1 }
  0x12   : > { %s1150_s26 = smul.u32 (%p77_p3), 192, %s1304_s13 }
  0x13   : > { %s1395_s4 = scalar_lea.vmem (%p77_p3), [#allocation3], %s1199_s24 }
  0x14   : > { %s152_s27 = sadd.s32 (%p77_p3), %s1150_s26, %s948_s25 }
  0x15   : > { %s950_s28 = sshll.u32 %s152_s27, 2 }
  0x16   : > { %s1390_s3 = scalar_lea.vmem %s1634_s1, %s950_s28 }
  0x17   : > { %v277_v0 = vld [vmem:[%s1390_s3] sm:$0xff]  ;;  %v279_v1 = vld [vmem:[%s1390_s3 + $0x10] sm:$0xff] }
  0x18   : > { %v281_v2 = vld [vmem:[%s1390_s3 + $0x20] sm:$0xff]  ;;  %278 = vst [vmem:[%s1395_s4] sm:$0xff] %v277_v0  ;;  %v283_v3 = vld [vmem:[%s1390_s3 + $0x30] sm:$0xff] }
  0x19   : > { %280 = vst [vmem:[%s1395_s4 + $0x8] sm:$0xff] %v279_v1  ;;  %v285_v4 = vld [vmem:[%s1390_s3 + $0x40] sm:$0xff]  ;;  %v287_v5 = vld [vmem:[%s1390_s3 + $0x50] sm:$0xff] }
  0x1a   : > { %282 = vst [vmem:[%s1395_s4 + $0x10] sm:$0xff] %v281_v2  ;;  %v289_v6 = vld [vmem:[%s1390_s3 + $0x60] sm:$0xff]  ;;  %v291_v7 = vld [vmem:[%s1390_s3 + $0x70] sm:$0xff] }
  0x1b   : > { %284 = vst [vmem:[%s1395_s4 + $0x18] sm:$0xff] %v283_v3  ;;  %v293_v8 = vld [vmem:[%s1390_s3 + $0x80] sm:$0xff]  ;;  %v295_v9 = vld [vmem:[%s1390_s3 + $0x90] sm:$0xff] }
  0x1c   : > { %286 = vst [vmem:[%s1395_s4 + $0x20] sm:$0xff] %v285_v4  ;;  %v297_v10 = vld [vmem:[%s1390_s3 + $0xa0] sm:$0xff]  ;;  %v299_v11 = vld [vmem:[%s1390_s3 + $0xb0] sm:$0xff] }
  0x1d   : > { %288 = vst [vmem:[%s1395_s4 + $0x28] sm:$0xff] %v287_v5  ;;  %v301_v12 = vld [vmem:[%s1390_s3 + $0xc0] sm:$0xff]  ;;  %v303_v13 = vld [vmem:[%s1390_s3 + $0xd0] sm:$0xff] }
  0x1e   : > { %290 = vst [vmem:[%s1395_s4 + $0x30] sm:$0xff] %v289_v6  ;;  %v305_v14 = vld [vmem:[%s1390_s3 + $0xe0] sm:$0xff]  ;;  %v307_v15 = vld [vmem:[%s1390_s3 + $0xf0] sm:$0xff] }
  0x1f   : > { %292 = vst [vmem:[%s1395_s4 + $0x38] sm:$0xff] %v291_v7  ;;  %v309_v16 = vld [vmem:[%s1390_s3 + $0x100] sm:$0xff]  ;;  %v311_v17 = vld [vmem:[%s1390_s3 + $0x110] sm:$0xff] }
  0x20   : > { %294 = vst [vmem:[%s1395_s4 + $0x40] sm:$0xff] %v293_v8  ;;  %v313_v18 = vld [vmem:[%s1390_s3 + $0x120] sm:$0xff]  ;;  %v315_v19 = vld [vmem:[%s1390_s3 + $0x130] sm:$0xff] }
  0x21   : > { %296 = vst [vmem:[%s1395_s4 + $0x48] sm:$0xff] %v295_v9  ;;  %v317_v20 = vld [vmem:[%s1390_s3 + $0x140] sm:$0xff]  ;;  %v319_v21 = vld [vmem:[%s1390_s3 + $0x150] sm:$0xff] }
  0x22   : > { %298 = vst [vmem:[%s1395_s4 + $0x50] sm:$0xff] %v297_v10  ;;  %v321_v22 = vld [vmem:[%s1390_s3 + $0x160] sm:$0xff]  ;;  %v323_v23 = vld [vmem:[%s1390_s3 + $0x170] sm:$0xff] }
  0x23   : > { %300 = vst [vmem:[%s1395_s4 + $0x58] sm:$0xff] %v299_v11  ;;  %v325_v24 = vld [vmem:[%s1390_s3 + $0x180] sm:$0xff]  ;;  %v327_v25 = vld [vmem:[%s1390_s3 + $0x190] sm:$0xff] }
  0x24   : > { %302 = vst [vmem:[%s1395_s4 + $0x60] sm:$0xff] %v301_v12  ;;  %v329_v26 = vld [vmem:[%s1390_s3 + $0x1a0] sm:$0xff]  ;;  %v331_v27 = vld [vmem:[%s1390_s3 + $0x1b0] sm:$0xff] }
  0x25   : > { %304 = vst [vmem:[%s1395_s4 + $0x68] sm:$0xff] %v303_v13  ;;  %v333_v28 = vld [vmem:[%s1390_s3 + $0x1c0] sm:$0xff]  ;;  %v335_v29 = vld [vmem:[%s1390_s3 + $0x1d0] sm:$0xff] }
  0x26   : > { %306 = vst [vmem:[%s1395_s4 + $0x70] sm:$0xff] %v305_v14  ;;  %v337_v30 = vld [vmem:[%s1390_s3 + $0x1e0] sm:$0xff]  ;;  %v339_v31 = vld [vmem:[%s1390_s3 + $0x1f0] sm:$0xff] }
  0x27   : > { %308 = vst [vmem:[%s1395_s4 + $0x78] sm:$0xff] %v307_v15  ;;  %v341_v32 = vld [vmem:[%s1390_s3 + $0x200] sm:$0xff]  ;;  %v343_v33 = vld [vmem:[%s1390_s3 + $0x210] sm:$0xff] }
  0x28   : > { %310 = vst [vmem:[%s1395_s4 + $0x80] sm:$0xff] %v309_v16  ;;  %v345_v34 = vld [vmem:[%s1390_s3 + $0x220] sm:$0xff]  ;;  %v347_v35 = vld [vmem:[%s1390_s3 + $0x230] sm:$0xff] }
  0x29   : > { %312 = vst [vmem:[%s1395_s4 + $0x88] sm:$0xff] %v311_v17  ;;  %v349_v36 = vld [vmem:[%s1390_s3 + $0x240] sm:$0xff]  ;;  %v351_v37 = vld [vmem:[%s1390_s3 + $0x250] sm:$0xff] }
  0x2a   : > { %314 = vst [vmem:[%s1395_s4 + $0x90] sm:$0xff] %v313_v18  ;;  %v353_v38 = vld [vmem:[%s1390_s3 + $0x260] sm:$0xff]  ;;  %v355_v39 = vld [vmem:[%s1390_s3 + $0x270] sm:$0xff] }
  0x2b   : > { %316 = vst [vmem:[%s1395_s4 + $0x98] sm:$0xff] %v315_v19  ;;  %v357_v40 = vld [vmem:[%s1390_s3 + $0x280] sm:$0xff]  ;;  %v359_v41 = vld [vmem:[%s1390_s3 + $0x290] sm:$0xff] }
  0x2c   : > { %318 = vst [vmem:[%s1395_s4 + $0xa0] sm:$0xff] %v317_v20  ;;  %v361_v42 = vld [vmem:[%s1390_s3 + $0x2a0] sm:$0xff]  ;;  %v363_v43 = vld [vmem:[%s1390_s3 + $0x2b0] sm:$0xff] }
  0x2d   : > { %320 = vst [vmem:[%s1395_s4 + $0xa8] sm:$0xff] %v319_v21  ;;  %v365_v44 = vld [vmem:[%s1390_s3 + $0x2c0] sm:$0xff]  ;;  %v367_v45 = vld [vmem:[%s1390_s3 + $0x2d0] sm:$0xff] }
  0x2e   : > { %322 = vst [vmem:[%s1395_s4 + $0xb0] sm:$0xff] %v321_v22  ;;  %v369_v46 = vld [vmem:[%s1390_s3 + $0x2e0] sm:$0xff]  ;;  %v371_v47 = vld [vmem:[%s1390_s3 + $0x2f0] sm:$0xff] }
  0x2f   : > { %324 = vst [vmem:[%s1395_s4 + $0xb8] sm:$0xff] %v323_v23 }
  0x30   : > { %326 = vst [vmem:[%s1395_s4 + $0xc0] sm:$0xff] %v325_v24 }
  0x31   : > { %328 = vst [vmem:[%s1395_s4 + $0xc8] sm:$0xff] %v327_v25 }
  0x32   : > { %330 = vst [vmem:[%s1395_s4 + $0xd0] sm:$0xff] %v329_v26 }
  0x33   : > { %332 = vst [vmem:[%s1395_s4 + $0xd8] sm:$0xff] %v331_v27 }
  0x34   : > { %334 = vst [vmem:[%s1395_s4 + $0xe0] sm:$0xff] %v333_v28 }
  0x35   : > { %336 = vst [vmem:[%s1395_s4 + $0xe8] sm:$0xff] %v335_v29 }
  0x36   : > { %338 = vst [vmem:[%s1395_s4 + $0xf0] sm:$0xff] %v337_v30 }
  0x37   : > { %340 = vst [vmem:[%s1395_s4 + $0xf8] sm:$0xff] %v339_v31 }
  0x38   : > { %342 = vst [vmem:[%s1395_s4 + $0x100] sm:$0xff] %v341_v32 }
  0x39   : > { %344 = vst [vmem:[%s1395_s4 + $0x108] sm:$0xff] %v343_v33 }
  0x3a   : > { %346 = vst [vmem:[%s1395_s4 + $0x110] sm:$0xff] %v345_v34 }
  0x3b   : > { %348 = vst [vmem:[%s1395_s4 + $0x118] sm:$0xff] %v347_v35 }
  0x3c   : > { %350 = vst [vmem:[%s1395_s4 + $0x120] sm:$0xff] %v349_v36 }
  0x3d   : > { %352 = vst [vmem:[%s1395_s4 + $0x128] sm:$0xff] %v351_v37 }
  0x3e   : > { %354 = vst [vmem:[%s1395_s4 + $0x130] sm:$0xff] %v353_v38 }
  0x3f   : > { %356 = vst [vmem:[%s1395_s4 + $0x138] sm:$0xff] %v355_v39 }
  0x40   : > { %358 = vst [vmem:[%s1395_s4 + $0x140] sm:$0xff] %v357_v40 }
  0x41   : > { %360 = vst [vmem:[%s1395_s4 + $0x148] sm:$0xff] %v359_v41 }
  0x42   : > { %362 = vst [vmem:[%s1395_s4 + $0x150] sm:$0xff] %v361_v42 }
  0x43   : > { %364 = vst [vmem:[%s1395_s4 + $0x158] sm:$0xff] %v363_v43 }
  0x44   : > { %366 = vst [vmem:[%s1395_s4 + $0x160] sm:$0xff] %v365_v44 }
  0x45   : > { %368 = vst [vmem:[%s1395_s4 + $0x168] sm:$0xff] %v367_v45 }
  0x46   : > { %370 = vst [vmem:[%s1395_s4 + $0x170] sm:$0xff] %v369_v46 }
  0x47   : > { %372 = vst [vmem:[%s1395_s4 + $0x178] sm:$0xff] %v371_v47 }
  0x48 PF: > { %p951_p7 = scmp.ge.s32.totalorder %s1312_s15, 1  ;;  %p377_p8 = scmp.lt.s32.totalorder %s1312_s15, 13 }
  0x4a   : > { %p378_p9 = pnand %p951_p7, %p377_p8 }
  0x4b   : > { %s384_s5 = sand.u32 (!%p378_p9), 1, %s1288_s9   ;;  %s417_s6 = smul.u32 (!%p378_p9), 3, %s1296_s11 }
  0x4c   : > { %381 = sbr.rel (%p378_p9) target bundleno = 300 (0x12c), region = 62  ;;  %s952_s8 = sshll.u32 (!%p378_p9), %s1300_s12, 1 }
  0x4d   : > { %s1200_s7 = smul.u32 (!%p378_p9), 384, %s384_s5  ;;  %p420_p10 = scmp.lt.s32.totalorder (!%p378_p9), %s417_s6, 17 }
  0x4e   : > { %p431_p11 = scmp.lt.s32.totalorder (!%p378_p9), %s952_s8, 3  ;;  %p954_p12 = scmp.ne.s32.totalorder (!%p378_p9), %s1296_s11, 0 }
  0x4f   : > { %s1506_s9 = scalar_lea.vmem (!%p378_p9), [#allocation3], %s1200_s7 }
  0x51   : > { %s1649_s6 = smov (!%p420_p10, %s417_s6), 17  ;;  %s1651_s8 = smov (!%p431_p11, %s952_s8), 3 }
  0x52   : > { %s424_s20 = scalar_lea.vmem %s1633_s0, %s1649_s6  ;;  %s953_s21 = sshll.u32 %s1651_s8, 1 }
  0x53   : > { %s1504_s25 = scalar_lea.vmem %s1635_s2, %s953_s21  ;;  %441 = sbr.rel (%p954_p12) target bundleno = 90 (0x5a), region = 70 }
  0x58   : > { %v1314_v48 = vmov 0.0  }
  0x59   : > { %442 = vst [vmem:[#allocation2] sm:$0xf] %v1314_v48 }
  0x5a PF: > { %v1013_v49 = vld [vmem:[%s1506_s9 + $0x70] sm:$0xf]  ;;  %v1166_v50 = vld [vmem:[%s1506_s9 + $0x74] sm:$0xf0]  ;;  %v1005_v54 = vld [vmem:[%s1506_s9 + $0x60] sm:$0xf] }
  0x5b   : > { %v1077_v51 = vld [vmem:[%s1506_s9 + $0xf0] sm:$0xf]  ;;  %v1014_v52 = vor.u32 %v1166_v50, %v1013_v49  ;;  %v1182_v53 = vld [vmem:[%s1506_s9 + $0xf4] sm:$0xf0]  ;;  %v1164_v55 = vld [vmem:[%s1506_s9 + $0x64] sm:$0xf0] }
  0x5c   : > { %v1078_v56 = vor.u32 %v1182_v53, %v1077_v51  ;;  %v1069_v57 = vld [vmem:[%s1506_s9 + $0xe0] sm:$0xf]  ;;  %v1180_v58 = vld [vmem:[%s1506_s9 + $0xe4] sm:$0xf0]  ;;  %v1006_v59 = vor.u32 %v1164_v55, %v1005_v54  ;;  %v997_v60 = vld [vmem:[%s1506_s9 + $0x50] sm:$0xf] }
  0x5d   : > { %741 = vmatpush.bf16.msra.mxu0 %v1014_v52  ;;  %v1070_v61 = vor.u32 %v1180_v58, %v1069_v57  ;;  %v1162_v62 = vld [vmem:[%s1506_s9 + $0x54] sm:$0xf0]  ;;  %v1141_v63 = vld [vmem:[%s1506_s9 + $0x170] sm:$0xf]  ;;  %v1133_v4 = vld [vmem:[%s1506_s9 + $0x160] sm:$0xf] }
  0x5e   : > { %754 = vmatpush.bf16.msra.mxu1 %v1078_v56  ;;  %v1198_v0 = vld [vmem:[%s1506_s9 + $0x174] sm:$0xf0]  ;;  %v1061_v1 = vld [vmem:[%s1506_s9 + $0xd0] sm:$0xf]  ;;  %v1196_v5 = vld [vmem:[%s1506_s9 + $0x164] sm:$0xf0]  ;;  %v998_v7 = vor.u32 %v1162_v62, %v997_v60 }
  0x5f   : > { %v1178_v2 = vld [vmem:[%s1506_s9 + $0xd4] sm:$0xf0]  ;;  %v1142_v3 = vor.u32 %v1198_v0, %v1141_v63  ;;  %v1165_v6 = vld [vmem:[%s1506_s9 + $0x74] sm:$0xf]  ;;  %v989_v8 = vld [vmem:[%s1506_s9 + $0x40] sm:$0xf]  ;;  %v1134_v10 = vor.u32 %v1196_v5, %v1133_v4 }
  0x60   : > { %v1160_v9 = vld [vmem:[%s1506_s9 + $0x44] sm:$0xf0]  ;;  %v1015_v11 = vld [vmem:[%s1506_s9 + $0x78] sm:$0xf0]  ;;  %v1062_v12 = vor.u32 %v1178_v2, %v1061_v1  ;;  %v1053_v13 = vld [vmem:[%s1506_s9 + $0xc0] sm:$0xf] }
  0x61   : > { %742 = vmatpush.bf16.msra.mxu0 %v1006_v59  ;;  %767 = vmatpush.bf16.msra.mxu2 %v1142_v3  ;;  %v1176_v14 = vld [vmem:[%s1506_s9 + $0xc4] sm:$0xf0]  ;;  %v1018_v15 = vor.u32 %v1165_v6, %v1015_v11  ;;  %v1125_v16 = vld [vmem:[%s1506_s9 + $0x150] sm:$0xf]  ;;  %v1194_v17 = vld [vmem:[%s1506_s9 + $0x154] sm:$0xf0]  ;;  %v990_v21 = vor.u32 %v1160_v9, %v989_v8 }
  0x62   : > { %755 = vmatpush.bf16.msra.mxu1 %v1070_v61  ;;  %v1163_v18 = vld [vmem:[%s1506_s9 + $0x64] sm:$0xf]  ;;  %v1007_v19 = vld [vmem:[%s1506_s9 + $0x68] sm:$0xf0]  ;;  %v981_v22 = vld [vmem:[%s1506_s9 + $0x30] sm:$0xf]  ;;  %v1126_v24 = vor.u32 %v1194_v17, %v1125_v16  ;;  %v1054_v26 = vor.u32 %v1176_v14, %v1053_v13 }
  0x63   : > { %780 = vmatpush.bf16.msra.mxu3 %v1018_v15  ;;  %v1010_v20 = vor.u32 %v1163_v18, %v1007_v19  ;;  %v1158_v23 = vld [vmem:[%s1506_s9 + $0x34] sm:$0xf0]  ;;  %v1117_v25 = vld [vmem:[%s1506_s9 + $0x140] sm:$0xf]  ;;  %v1192_v27 = vld [vmem:[%s1506_s9 + $0x144] sm:$0xf0] }
  0x64   : > { %v1161_v28 = vld [vmem:[%s1506_s9 + $0x54] sm:$0xf]  ;;  %v999_v29 = vld [vmem:[%s1506_s9 + $0x58] sm:$0xf0]  ;;  %v1045_v30 = vld [vmem:[%s1506_s9 + $0xb0] sm:$0xf]  ;;  %v982_v33 = vor.u32 %v1158_v23, %v981_v22  ;;  %v1118_v35 = vor.u32 %v1192_v27, %v1117_v25 }
  0x65   : > { %743 = vmatpush.bf16.msra.mxu0 %v998_v7  ;;  %768 = vmatpush.bf16.msra.mxu2 %v1134_v10  ;;  %v1174_v31 = vld [vmem:[%s1506_s9 + $0xb4] sm:$0xf0]  ;;  %v1002_v32 = vor.u32 %v1161_v28, %v999_v29  ;;  %v973_v34 = vld [vmem:[%s1506_s9 + $0x20] sm:$0xf]  ;;  %v1159_v36 = vld [vmem:[%s1506_s9 + $0x44] sm:$0xf] }
  0x66   : > { %756 = vmatpush.bf16.msra.mxu1 %v1062_v12  ;;  %v991_v37 = vld [vmem:[%s1506_s9 + $0x48] sm:$0xf0]  ;;  %v1046_v38 = vor.u32 %v1174_v31, %v1045_v30  ;;  %v1156_v39 = vld [vmem:[%s1506_s9 + $0x24] sm:$0xf0]  ;;  %v1109_v40 = vld [vmem:[%s1506_s9 + $0x130] sm:$0xf] }
  0x67   : > { %781 = vmatpush.bf16.msra.mxu3 %v1010_v20  ;;  %v1190_v41 = vld [vmem:[%s1506_s9 + $0x134] sm:$0xf0]  ;;  %v1037_v42 = vld [vmem:[%s1506_s9 + $0xa0] sm:$0xf]  ;;  %v1172_v43 = vld [vmem:[%s1506_s9 + $0xa4] sm:$0xf0]  ;;  %v994_v44 = vor.u32 %v1159_v36, %v991_v37  ;;  %v974_v45 = vor.u32 %v1156_v39, %v973_v34 }
  0x68   : > { %v965_v46 = vld [vmem:[%s1506_s9 + $0x10] sm:$0xf]  ;;  %v1110_v47 = vor.u32 %v1190_v41, %v1109_v40  ;;  %v1157_v48 = vld [vmem:[%s1506_s9 + $0x34] sm:$0xf]  ;;  %v983_v49 = vld [vmem:[%s1506_s9 + $0x38] sm:$0xf0]  ;;  %v1038_v50 = vor.u32 %v1172_v43, %v1037_v42 }
  0x69   : > { %744 = vmatpush.bf16.msra.mxu0 %v990_v21  ;;  %769 = vmatpush.bf16.msra.mxu2 %v1126_v24  ;;  %v1154_v51 = vld [vmem:[%s1506_s9 + $0x14] sm:$0xf0]  ;;  %v1101_v52 = vld [vmem:[%s1506_s9 + $0x120] sm:$0xf]  ;;  %v1188_v53 = vld [vmem:[%s1506_s9 + $0x124] sm:$0xf0]  ;;  %v986_v58 = vor.u32 %v1157_v48, %v983_v49 }
  0x6a   : > { %757 = vmatpush.bf16.msra.mxu1 %v1054_v26  ;;  %v1029_v54 = vld [vmem:[%s1506_s9 + $0x90] sm:$0xf]  ;;  %v1170_v55 = vld [vmem:[%s1506_s9 + $0x94] sm:$0xf0]  ;;  %v957_v56 = vld [vmem:[%s1506_s9] sm:$0xf]  ;;  %v966_v60 = vor.u32 %v1154_v51, %v965_v46  ;;  %v1102_v61 = vor.u32 %v1188_v53, %v1101_v52 }
  0x6b   : > { %782 = vmatpush.bf16.msra.mxu3 %v1002_v32  ;;  %v1152_v57 = vld [vmem:[%s1506_s9 + $0x4] sm:$0xf0]  ;;  %v444_v59 = vld [vmem:[%s424_s20] sm:$0x7]  ;;  %v1155_v62 = vld [vmem:[%s1506_s9 + $0x24] sm:$0xf]  ;;  %v1030_v0 = vor.u32 %v1170_v55, %v1029_v54 }
  0x6c   : > { %v975_v63 = vld [vmem:[%s1506_s9 + $0x28] sm:$0xf0]  ;;  %494 = vst [vmem:[#allocation1] ss:$9 sm:$0xff] %v444_v59  ;;  %v1021_v1 = vld [vmem:[%s1506_s9 + $0x80] sm:$0xf]  ;;  %v958_v10 = vor.u32 %v1152_v57, %v957_v56 }
  0x6d   : > { %745 = vmatpush.bf16.msra.mxu0 %v982_v33  ;;  %770 = vmatpush.bf16.msra.mxu2 %v1118_v35  ;;  %v1093_v2 = vld [vmem:[%s1506_s9 + $0x110] sm:$0xf]  ;;  %v1186_v3 = vld [vmem:[%s1506_s9 + $0x114] sm:$0xf0]  ;;  %v1168_v4 = vld [vmem:[%s1506_s9 + $0x84] sm:$0xf0]  ;;  %v978_v9 = vor.u32 %v1155_v62, %v975_v63 }
  0x6e   : > { %758 = vmatpush.bf16.msra.mxu1 %v1046_v38  ;;  %v1181_v5 = vld [vmem:[%s1506_s9 + $0xf4] sm:$0xf]  ;;  %v1079_v6 = vld [vmem:[%s1506_s9 + $0xf8] sm:$0xf0]  ;;  %v1094_v11 = vor.u32 %v1186_v3, %v1093_v2  ;;  %v1022_v14 = vor.u32 %v1168_v4, %v1021_v1  ;;  %v1085_v16 = vld [vmem:[%s1506_s9 + $0x100] sm:$0xf] }
  0x6f   : > { %783 = vmatpush.bf16.msra.mxu3 %v994_v44  ;;  %v1197_v7 = vld [vmem:[%s1506_s9 + $0x174] sm:$0xf]  ;;  %v1143_v8 = vld [vmem:[%s1506_s9 + $0x178] sm:$0xf0]  ;;  %v1082_v15 = vor.u32 %v1181_v5, %v1079_v6  ;;  %v1184_v17 = vld [vmem:[%s1506_s9 + $0x104] sm:$0xf0] }
  0x70   : > { %v1153_v12 = vld [vmem:[%s1506_s9 + $0x14] sm:$0xf]  ;;  %v967_v13 = vld [vmem:[%s1506_s9 + $0x18] sm:$0xf0]  ;;  %v1146_v18 = vor.u32 %v1197_v7, %v1143_v8  ;;  %v1179_v19 = vld [vmem:[%s1506_s9 + $0xe4] sm:$0xf]  ;;  %v1086_v25 = vor.u32 %v1184_v17, %v1085_v16 }
  0x71   : > { %746 = vmatpush.bf16.msra.mxu0 %v974_v45  ;;  %771 = vmatpush.bf16.msra.mxu2 %v1110_v47  ;;  %v1071_v20 = vld [vmem:[%s1506_s9 + $0xe8] sm:$0xf0]  ;;  %v1195_v21 = vld [vmem:[%s1506_s9 + $0x164] sm:$0xf]  ;;  %v970_v23 = vor.u32 %v1153_v12, %v967_v13  ;;  %v1177_v31 = vld [vmem:[%s1506_s9 + $0xd4] sm:$0xf] }
  0x72   : > { %759 = vmatpush.bf16.msra.mxu1 %v1038_v50  ;;  %v1135_v22 = vld [vmem:[%s1506_s9 + $0x168] sm:$0xf0]  ;;  %v1151_v26 = vld [vmem:[%s1506_s9 + $0x4] sm:$0xf]  ;;  %v1074_v28 = vor.u32 %v1179_v19, %v1071_v20  ;;  %v1063_v32 = vld [vmem:[%s1506_s9 + $0xd8] sm:$0xf0] }
  0x73   : > { %784 = vmatpush.bf16.msra.mxu3 %v986_v58  ;;  %v495_v24 = vld [vmem:[#allocation1] sm:$0xff]  ;;  %v959_v27 = vld [vmem:[%s1506_s9 + $0x8] sm:$0xf0]  ;;  %v496_v29 = vld [vmem:[#allocation1 + $0x9] sm:$0xff]  ;;  %v1138_v30 = vor.u32 %v1195_v21, %v1135_v22  ;;  %v1066_v37 = vor.u32 %v1177_v31, %v1063_v32  ;;  %vm822_vm0 = vcmask 1041408   ;;  %p1147_p13 = scmp.ne.s32.totalorder %s1296_s11, 5 }
  0x74   : > { %v1193_v33 = vld [vmem:[%s1506_s9 + $0x154] sm:$0xf]  ;;  %v1127_v34 = vld [vmem:[%s1506_s9 + $0x158] sm:$0xf0]  ;;  %v962_v35 = vor.u32 %v1151_v26, %v959_v27  ;;  %v497_v36 = vld [vmem:[#allocation1 + $0x12] sm:$0xff] }
  0x75   : > { %747 = vmatpush.bf16.msra.mxu0 %v966_v60  ;;  %772 = vmatpush.bf16.msra.mxu2 %v1102_v61  ;;  %v1130_v38 = vor.u32 %v1193_v33, %v1127_v34  ;;  %v1175_v39 = vld [vmem:[%s1506_s9 + $0xc4] sm:$0xf]  ;;  %v1055_v40 = vld [vmem:[%s1506_s9 + $0xc8] sm:$0xf0]  ;;  %v1173_v45 = vld [vmem:[%s1506_s9 + $0xb4] sm:$0xf] }
  0x76   : > { %760 = vmatpush.bf16.msra.mxu1 %v1030_v0  ;;  %v1191_v41 = vld [vmem:[%s1506_s9 + $0x144] sm:$0xf]  ;;  %v1119_v42 = vld [vmem:[%s1506_s9 + $0x148] sm:$0xf0]  ;;  %v1058_v43 = vor.u32 %v1175_v39, %v1055_v40  ;;  %v1047_v46 = vld [vmem:[%s1506_s9 + $0xb8] sm:$0xf0] }
  0x77   : > { %785 = vmatpush.bf16.msra.mxu3 %v978_v9  ;;  %v1122_v44 = vor.u32 %v1191_v41, %v1119_v42  ;;  %v1189_v47 = vld [vmem:[%s1506_s9 + $0x134] sm:$0xf]  ;;  %v1111_v48 = vld [vmem:[%s1506_s9 + $0x138] sm:$0xf0]  ;;  %v1050_v49 = vor.u32 %v1173_v45, %v1047_v46  ;;  %v1171_v51 = vld [vmem:[%s1506_s9 + $0xa4] sm:$0xf] }
  0x78   : > { %v1114_v50 = vor.u32 %v1189_v47, %v1111_v48  ;;  %v1039_v52 = vld [vmem:[%s1506_s9 + $0xa8] sm:$0xf0]  ;;  %v1187_v53 = vld [vmem:[%s1506_s9 + $0x124] sm:$0xf]  ;;  %v1169_v57 = vld [vmem:[%s1506_s9 + $0x94] sm:$0xf] }
  0x79   : > { %748 = vmatpush.bf16.msra.mxu0 %v958_v10  ;;  %773 = vmatpush.bf16.msra.mxu2 %v1094_v11  ;;  %v1103_v54 = vld [vmem:[%s1506_s9 + $0x128] sm:$0xf0]  ;;  %v1042_v55 = vor.u32 %v1171_v51, %v1039_v52  ;;  %v1031_v58 = vld [vmem:[%s1506_s9 + $0x98] sm:$0xf0]  ;;  %v1185_v59 = vld [vmem:[%s1506_s9 + $0x114] sm:$0xf] }
  0x7a   : > { %761 = vmatpush.bf16.msra.mxu1 %v1022_v14  ;;  %v1106_v56 = vor.u32 %v1187_v53, %v1103_v54  ;;  %v1095_v60 = vld [vmem:[%s1506_s9 + $0x118] sm:$0xf0]  ;;  %v1034_v61 = vor.u32 %v1169_v57, %v1031_v58  ;;  %v1167_v63 = vld [vmem:[%s1506_s9 + $0x84] sm:$0xf]  ;;  %v1023_v0 = vld [vmem:[%s1506_s9 + $0x88] sm:$0xf0] }
  0x7b   : > { %786 = vmatpush.bf16.msra.mxu3 %v970_v23  ;;  %v1098_v62 = vor.u32 %v1185_v59, %v1095_v60  ;;  %v1183_v1 = vld [vmem:[%s1506_s9 + $0x104] sm:$0xf]  ;;  %v1087_v2 = vld [vmem:[%s1506_s9 + $0x108] sm:$0xf0]  ;;  %v1026_v3 = vor.u32 %v1167_v63, %v1023_v0  ;;  %v443_v19 = vld [vmem:[#allocation2] sm:$0xf] }
  0x7c   : > { %749 = vmatmul.bf16.vlgmr.msra.gmra.mxu0 %v495_v24  ;;  %v1090_v4 = vor.u32 %v1183_v1, %v1087_v2 }
  0x7d   : > { %793 = vmatpush.bf16.msrb.mxu0 %v1082_v15  ;;  %774 = vmatpush.bf16.msra.mxu2 %v1086_v25 }
  0x7e   : > { %806 = vmatpush.bf16.msrb.mxu1 %v1146_v18 }
  0x7f   : > { %762 = vmatmul.bf16.vlgmr.msra.gmra.mxu1 %v496_v29  ;;  %787 = vmatpush.bf16.msra.mxu3 %v962_v35 }
  0x80   : > { %775 = vmatmul.bf16.vlgmr.msra.gmra.mxu2 %v497_v36 }
  0x81   : > { %794 = vmatpush.bf16.msrb.mxu0 %v1074_v28 }
  0x82   : > { %807 = vmatpush.bf16.msrb.mxu1 %v1138_v30  ;;  %788 = vmatmul.bf16.vlgmr.msra.gmra.mxu3 %v495_v24 }
  0x85   : > { %795 = vmatpush.bf16.msrb.mxu0 %v1066_v37 }
  0x86   : > { %808 = vmatpush.bf16.msrb.mxu1 %v1130_v38 }
  0x89   : > { %796 = vmatpush.bf16.msrb.mxu0 %v1058_v43 }
  0x8a   : > { %809 = vmatpush.bf16.msrb.mxu1 %v1122_v44 }
  0x8d   : > { %797 = vmatpush.bf16.msrb.mxu0 %v1050_v49 }
  0x8e   : > { %810 = vmatpush.bf16.msrb.mxu1 %v1114_v50 }
  0x91   : > { %798 = vmatpush.bf16.msrb.mxu0 %v1042_v55 }
  0x92   : > { %811 = vmatpush.bf16.msrb.mxu1 %v1106_v56 }
  0x95   : > { %799 = vmatpush.bf16.msrb.mxu0 %v1034_v61 }
  0x96   : > { %812 = vmatpush.bf16.msrb.mxu1 %v1098_v62 }
  0x99   : > { %800 = vmatpush.bf16.msrb.mxu0 %v1026_v3 }
  0x9a   : > { %813 = vmatpush.bf16.msrb.mxu1 %v1090_v4 }
  0x9c   : > { %801 = vmatmul.bf16.vlgmr.msrb.gmra.mxu0 %v496_v29 }
  0x9d   : > { %814 = vmatmul.bf16.vlgmr.msrb.gmra.mxu1 %v497_v36 }
  0xf9   : > { %v750_v5 = vpop.f32.mrf.mxu0 }
  0xfc   : > { %v763_v6 = vpop.f32.mrf.mxu1 }
  0xfd   : > { %v764_v14 = vadd.f32 %v763_v6, %v750_v5 }
 0x101   : > { %v752_v7 = vpop.f32.mrf.mxu0 }
 0x103   : > { %v776_v9 = vpop.f32.mrf.mxu2 }
 0x104   : > { %v765_v8 = vpop.f32.mrf.mxu1  ;;  %v777_v18 = vadd.f32 %v776_v9, %v764_v14 }
 0x105   : > { %v789_v10 = vpop.f32.mrf.mxu3 }
 0x10b   : > { %v778_v11 = vpop.f32.mrf.mxu2 }
 0x10d   : > { %v791_v12 = vpop.f32.mrf.mxu3 }
 0x119   : > { %v802_v13 = vpop.f32.mrf.mxu0 }
 0x11a   : > { %v803_v15 = vadd.f32 %v802_v13, %v789_v10  ;;  %v815_v16 = vpop.f32.mrf.mxu1 }
 0x11c   : > { %v816_v17 = vadd.f32 %v815_v16, %v803_v15 }
 0x11e   : > { %v821_v20 = vrot.slane %v816_v17, 6 }
 0x11f   : > { %830 = sbr.rel (%p1147_p13) target bundleno = 300 (0x12c), region = 74 }
 0x120   : > { %v823_v21 = vsel %vm822_vm0, %v777_v18, %v821_v20 }
 0x121   : > { %v825_v22 = vadd.f32 %v823_v21, %v443_v19  ;;  %v804_v23 = vpop.f32.mrf.mxu0 }
 0x122   : > { %v817_v24 = vpop.f32.mrf.mxu1 }
 0x123   : > { %826 = vst [vmem:[#allocation2] sm:$0xf] %v825_v22 }
 0x12a   : > { %v831_v25 = vld [vmem:[#allocation2] sm:$0xf] }
 0x12b   : > { %832 = vst [vmem:[%s1504_s25] sm:$0xf] %v831_v25 }
 0x12c PF: > { %s12_s15 = sadd.s32 1, %s1312_s15   ;;  %s1636_s9 = smov %s1292_s10 }
 0x12d   : > { %p9_p0 = scmp.ge.s32.totalorder %s12_s15, 14   ;;  %s1637_s10 = smov %s1381_s22 }
 0x12e   : > { %s1638_s11 = smov %s1304_s13  ;;  %s1639_s12 = smov %s1308_s14 }
 0x12f   : > { %s1640_s13 = smov %s1643_s16  ;;  %s1641_s14 = smov %s1647_s17 }
 0x130   :  { %11 = sbr.rel (!%p9_p0) target bundleno = 4 (0x4), region = 112 }

// kernel: resnet18_apply.111
= control target key start
LH: loop header
LB: loop body
LE: loop exit
PB: predicated region body
PF: predicated region fallthrough
CT: control target
= control target key end

     0   :  { %vm24_vm0 = vcmask 1041408   ;;  %vm26_vm1 = vcmask 1045508   ;;  %vm28_vm2 = vcmask 1043456   ;;  %s88_s1 = inlined_call_operand.vmem [shape: f32[1,512], index: 1, kind: input, shape index: {}]   ;;  %s89_s2 = inlined_call_operand.vmem [shape: f32[1,512], index: 2, kind: input, shape index: {}]   ;;  %s90_s0 = inlined_call_operand.vmem [shape: f32[2,512], index: 0, kind: input, shape index: {}]   ;;  %s91_s3 = inlined_call_operand.vmem [shape: f32[2,512], index: 3, kind: output, shape index: {}]  }
   0x1   :  { %v15_v0 = vld [vmem:[%s88_s1] sm:$0xf] }
   0x2   :  { %v32_v1 = vld [vmem:[%s89_s2] sm:$0xf]  ;;  %v17_v2 = vperm.slane %v15_v0, 0  ;;  %v18_v3 = vperm.slane %v15_v0, 1  ;;  %v19_v4 = vperm.slane %v15_v0, 2  ;;  %v20_v5 = vperm.slane %v15_v0, 3 }
   0x3   :  { %v34_v6 = vperm.slane %v32_v1, 0  ;;  %v35_v7 = vperm.slane %v32_v1, 1  ;;  %v36_v8 = vperm.slane %v32_v1, 2  ;;  %v37_v9 = vperm.slane %v32_v1, 3  ;;  %v14_v13 = vld [vmem:[%s90_s0] sm:$0xff] }
   0x4   :  { %v21_v10 = vrot.slane %v18_v3, 6  ;;  %v22_v11 = vrot.slane %v19_v4, 4  ;;  %v23_v12 = vrot.slane %v20_v5, 2 }
   0x5   :  { %v38_v14 = vrot.slane %v35_v7, 6  ;;  %v39_v15 = vrot.slane %v36_v8, 4  ;;  %v40_v16 = vrot.slane %v37_v9, 2 }
   0x6   :  { %v25_v17 = vsel %vm24_vm0, %v17_v2, %v21_v10  ;;  %v27_v18 = vsel %vm26_vm1, %v22_v11, %v23_v12 }
   0x7   :  { %v29_v19 = vsel %vm28_vm2, %v25_v17, %v27_v18  ;;  %v41_v20 = vsel %vm24_vm0, %v34_v6, %v38_v14  ;;  %v42_v21 = vsel %vm26_vm1, %v39_v15, %v40_v16 }
   0x8   :  { %v31_v22 = vmul.f32 %v29_v19, %v14_v13  ;;  %v43_v23 = vsel %vm28_vm2, %v41_v20, %v42_v21 }
   0xa   :  { %v45_v24 = vadd.f32 %v43_v23, %v31_v22 }
   0xc   :  { %v46_v25 = vmax.f32 %v45_v24, 0.0 }
   0xe   :  { %47 = vst [vmem:[%s91_s3] sm:$0xff] %v46_v25 }

// kernel: resnet18_apply.112
= control target key start
LH: loop header
LB: loop body
LE: loop exit
PB: predicated region body
PF: predicated region fallthrough
CT: control target
= control target key end

     0   :  { %s1600_s9 = smov 0   ;;  %s1602_s10 = smov 0   ;;  %s1983_s0 = inlined_call_operand.vmem [shape: bf16[2,4608], index: 0, kind: input, shape index: {}]   ;;  %s1984_s1 = inlined_call_operand.vmem [shape: bf16[4608,512], index: 1, kind: input, shape index: {}]   ;;  %s1985_s2 = inlined_call_operand.vmem [shape: f32[2,512], index: 2, kind: output, shape index: {}]  }
   0x1   :  { %s1604_s11 = smov 0   ;;  %s1606_s12 = smov 0  }
   0x2   :  { %s1608_s13 = smov 0   ;;  %s1610_s14 = smov 0  }
   0x3   :  { %s1612_s15 = smov 0  }
   0x4 LB: > { %s24_s16 = sadd.s32 1, %s1574_s13  ;;  %s27_s17 = sadd.s32 1, %s1578_s14  ;;  %s1582_s15 = sphi %s1612_s15, %s12_s15   ;;  %s1578_s14 = sphi %s1610_s14, %s1991_s14   ;;  %s1574_s13 = sphi %s1608_s13, %s1990_s13   ;;  %s1570_s12 = sphi %s1606_s12, %s1989_s12   ;;  %s1566_s11 = sphi %s1604_s11, %s1988_s11   ;;  %s1562_s10 = sphi %s1602_s10, %s1987_s10   ;;  %s1558_s9 = sphi %s1600_s9, %s1986_s9  }
   0x5   : > { %p25_p0 = scmp.ge.s32.totalorder %s24_s16, 9  ;;  %p75_p1 = scmp.ne.s32.totalorder %s1562_s10, %s1558_s9 }
   0x6   : > { %p76_p2 = scmp.eq.s32.totalorder %s1582_s15, 0  ;;  %s68_s21 = sadd.s32 1, %s1562_s10 }
   0x7   : > { %s1993_s16 = smov (%p25_p0, %s24_s16), 0  ;;  %s1995_s17 = smov (!%p25_p0, %s27_s17), %s1578_s14 }
   0x8   : > { %p77_p3 = por %p76_p2, %p75_p1  ;;  %p29_p4 = scmp.ge.s32.totalorder %s1995_s17, 2 }
   0x9   : > { %s63_s18 = ssub.s32 %s1574_s13, %s1993_s16  ;;  %p1135_p6 = scmp.ge.s32.totalorder %s1582_s15, 18 }
   0xa   : > { %s1997_s17 = smov (%p29_p4, %s1995_s17), 0 }
   0xb   : > { %s64_s19 = ssub.s32 %s1578_s14, %s1997_s17  ;;  %129 = sbr.rel (%p1135_p6) target bundleno = 87 (0x57), region = 16 }
   0xc   : > { %s65_s20 = sor.u32 %s64_s19, %s63_s18 }
   0xd   : > { %p66_p5 = scmp.eq.s32.totalorder %s65_s20, 0 }
   0xf   : > { %s1651_s22 = scalar_select %p66_p5, %s1562_s10, %s68_s21  }
  0x10   : > { %144 = sbr.rel (!%p77_p3) target bundleno = 87 (0x57), region = 24  ;;  %s146_s23 = sand.u32 (%p77_p3), 1, %s1562_s10  }
  0x11   : > { %s1138_s24 = sshll.u32 (%p77_p3), %s1578_s14, 1  ;;  %s1136_s25 = sshll.u32 (%p77_p3), %s146_s23, 9 }
  0x12   : > { %s1406_s26 = sshll.u32 (%p77_p3), %s1574_s13, 8  ;;  %s1665_s4 = scalar_lea.vmem (%p77_p3), [#allocation3], %s1136_s25 }
  0x13   : > { %s152_s27 = sadd.s32 (%p77_p3), %s1406_s26, %s1138_s24 }
  0x14   : > { %s1140_s28 = sshll.u32 (%p77_p3), %s152_s27, 2 }
  0x15   : > { %s1660_s3 = scalar_lea.vmem %s1984_s1, %s1140_s28 }
  0x16   : > { %v309_v0 = vld [vmem:[%s1660_s3] sm:$0xff]  ;;  %v311_v1 = vld [vmem:[%s1660_s3 + $0x10] sm:$0xff] }
  0x17   : > { %v313_v2 = vld [vmem:[%s1660_s3 + $0x20] sm:$0xff]  ;;  %310 = vst [vmem:[%s1665_s4] sm:$0xff] %v309_v0  ;;  %v315_v3 = vld [vmem:[%s1660_s3 + $0x30] sm:$0xff] }
  0x18   : > { %312 = vst [vmem:[%s1665_s4 + $0x8] sm:$0xff] %v311_v1  ;;  %v317_v4 = vld [vmem:[%s1660_s3 + $0x40] sm:$0xff]  ;;  %v319_v5 = vld [vmem:[%s1660_s3 + $0x50] sm:$0xff] }
  0x19   : > { %314 = vst [vmem:[%s1665_s4 + $0x10] sm:$0xff] %v313_v2  ;;  %v321_v6 = vld [vmem:[%s1660_s3 + $0x60] sm:$0xff]  ;;  %v323_v7 = vld [vmem:[%s1660_s3 + $0x70] sm:$0xff] }
  0x1a   : > { %316 = vst [vmem:[%s1665_s4 + $0x18] sm:$0xff] %v315_v3  ;;  %v325_v8 = vld [vmem:[%s1660_s3 + $0x80] sm:$0xff]  ;;  %v327_v9 = vld [vmem:[%s1660_s3 + $0x90] sm:$0xff] }
  0x1b   : > { %318 = vst [vmem:[%s1665_s4 + $0x20] sm:$0xff] %v317_v4  ;;  %v329_v10 = vld [vmem:[%s1660_s3 + $0xa0] sm:$0xff]  ;;  %v331_v11 = vld [vmem:[%s1660_s3 + $0xb0] sm:$0xff] }
  0x1c   : > { %320 = vst [vmem:[%s1665_s4 + $0x28] sm:$0xff] %v319_v5  ;;  %v333_v12 = vld [vmem:[%s1660_s3 + $0xc0] sm:$0xff]  ;;  %v335_v13 = vld [vmem:[%s1660_s3 + $0xd0] sm:$0xff] }
  0x1d   : > { %322 = vst [vmem:[%s1665_s4 + $0x30] sm:$0xff] %v321_v6  ;;  %v337_v14 = vld [vmem:[%s1660_s3 + $0xe0] sm:$0xff]  ;;  %v339_v15 = vld [vmem:[%s1660_s3 + $0xf0] sm:$0xff] }
  0x1e   : > { %324 = vst [vmem:[%s1665_s4 + $0x38] sm:$0xff] %v323_v7  ;;  %v341_v16 = vld [vmem:[%s1660_s3 + $0x100] sm:$0xff]  ;;  %v343_v17 = vld [vmem:[%s1660_s3 + $0x110] sm:$0xff] }
  0x1f   : > { %326 = vst [vmem:[%s1665_s4 + $0x40] sm:$0xff] %v325_v8  ;;  %v345_v18 = vld [vmem:[%s1660_s3 + $0x120] sm:$0xff]  ;;  %v347_v19 = vld [vmem:[%s1660_s3 + $0x130] sm:$0xff] }
  0x20   : > { %328 = vst [vmem:[%s1665_s4 + $0x48] sm:$0xff] %v327_v9  ;;  %v349_v20 = vld [vmem:[%s1660_s3 + $0x140] sm:$0xff]  ;;  %v351_v21 = vld [vmem:[%s1660_s3 + $0x150] sm:$0xff] }
  0x21   : > { %330 = vst [vmem:[%s1665_s4 + $0x50] sm:$0xff] %v329_v10  ;;  %v353_v22 = vld [vmem:[%s1660_s3 + $0x160] sm:$0xff]  ;;  %v355_v23 = vld [vmem:[%s1660_s3 + $0x170] sm:$0xff] }
  0x22   : > { %332 = vst [vmem:[%s1665_s4 + $0x58] sm:$0xff] %v331_v11  ;;  %v357_v24 = vld [vmem:[%s1660_s3 + $0x180] sm:$0xff]  ;;  %v359_v25 = vld [vmem:[%s1660_s3 + $0x190] sm:$0xff] }
  0x23   : > { %334 = vst [vmem:[%s1665_s4 + $0x60] sm:$0xff] %v333_v12  ;;  %v361_v26 = vld [vmem:[%s1660_s3 + $0x1a0] sm:$0xff]  ;;  %v363_v27 = vld [vmem:[%s1660_s3 + $0x1b0] sm:$0xff] }
  0x24   : > { %336 = vst [vmem:[%s1665_s4 + $0x68] sm:$0xff] %v335_v13  ;;  %v365_v28 = vld [vmem:[%s1660_s3 + $0x1c0] sm:$0xff]  ;;  %v367_v29 = vld [vmem:[%s1660_s3 + $0x1d0] sm:$0xff] }
  0x25   : > { %338 = vst [vmem:[%s1665_s4 + $0x70] sm:$0xff] %v337_v14  ;;  %v369_v30 = vld [vmem:[%s1660_s3 + $0x1e0] sm:$0xff]  ;;  %v371_v31 = vld [vmem:[%s1660_s3 + $0x1f0] sm:$0xff] }
  0x26   : > { %340 = vst [vmem:[%s1665_s4 + $0x78] sm:$0xff] %v339_v15  ;;  %v373_v32 = vld [vmem:[%s1660_s3 + $0x200] sm:$0xff]  ;;  %v375_v33 = vld [vmem:[%s1660_s3 + $0x210] sm:$0xff] }
  0x27   : > { %342 = vst [vmem:[%s1665_s4 + $0x80] sm:$0xff] %v341_v16  ;;  %v377_v34 = vld [vmem:[%s1660_s3 + $0x220] sm:$0xff]  ;;  %v379_v35 = vld [vmem:[%s1660_s3 + $0x230] sm:$0xff] }
  0x28   : > { %344 = vst [vmem:[%s1665_s4 + $0x88] sm:$0xff] %v343_v17  ;;  %v381_v36 = vld [vmem:[%s1660_s3 + $0x240] sm:$0xff]  ;;  %v383_v37 = vld [vmem:[%s1660_s3 + $0x250] sm:$0xff] }
  0x29   : > { %346 = vst [vmem:[%s1665_s4 + $0x90] sm:$0xff] %v345_v18  ;;  %v385_v38 = vld [vmem:[%s1660_s3 + $0x260] sm:$0xff]  ;;  %v387_v39 = vld [vmem:[%s1660_s3 + $0x270] sm:$0xff] }
  0x2a   : > { %348 = vst [vmem:[%s1665_s4 + $0x98] sm:$0xff] %v347_v19  ;;  %v389_v40 = vld [vmem:[%s1660_s3 + $0x280] sm:$0xff]  ;;  %v391_v41 = vld [vmem:[%s1660_s3 + $0x290] sm:$0xff] }
  0x2b   : > { %350 = vst [vmem:[%s1665_s4 + $0xa0] sm:$0xff] %v349_v20  ;;  %v393_v42 = vld [vmem:[%s1660_s3 + $0x2a0] sm:$0xff]  ;;  %v395_v43 = vld [vmem:[%s1660_s3 + $0x2b0] sm:$0xff] }
  0x2c   : > { %352 = vst [vmem:[%s1665_s4 + $0xa8] sm:$0xff] %v351_v21  ;;  %v397_v44 = vld [vmem:[%s1660_s3 + $0x2c0] sm:$0xff]  ;;  %v399_v45 = vld [vmem:[%s1660_s3 + $0x2d0] sm:$0xff] }
  0x2d   : > { %354 = vst [vmem:[%s1665_s4 + $0xb0] sm:$0xff] %v353_v22  ;;  %v401_v46 = vld [vmem:[%s1660_s3 + $0x2e0] sm:$0xff]  ;;  %v403_v47 = vld [vmem:[%s1660_s3 + $0x2f0] sm:$0xff] }
  0x2e   : > { %356 = vst [vmem:[%s1665_s4 + $0xb8] sm:$0xff] %v355_v23  ;;  %v405_v48 = vld [vmem:[%s1660_s3 + $0x300] sm:$0xff]  ;;  %v407_v49 = vld [vmem:[%s1660_s3 + $0x310] sm:$0xff] }
  0x2f   : > { %358 = vst [vmem:[%s1665_s4 + $0xc0] sm:$0xff] %v357_v24  ;;  %v409_v50 = vld [vmem:[%s1660_s3 + $0x320] sm:$0xff]  ;;  %v411_v51 = vld [vmem:[%s1660_s3 + $0x330] sm:$0xff] }
  0x30   : > { %360 = vst [vmem:[%s1665_s4 + $0xc8] sm:$0xff] %v359_v25  ;;  %v413_v52 = vld [vmem:[%s1660_s3 + $0x340] sm:$0xff]  ;;  %v415_v53 = vld [vmem:[%s1660_s3 + $0x350] sm:$0xff] }
  0x31   : > { %362 = vst [vmem:[%s1665_s4 + $0xd0] sm:$0xff] %v361_v26  ;;  %v417_v54 = vld [vmem:[%s1660_s3 + $0x360] sm:$0xff]  ;;  %v419_v55 = vld [vmem:[%s1660_s3 + $0x370] sm:$0xff] }
  0x32   : > { %364 = vst [vmem:[%s1665_s4 + $0xd8] sm:$0xff] %v363_v27  ;;  %v421_v56 = vld [vmem:[%s1660_s3 + $0x380] sm:$0xff]  ;;  %v423_v57 = vld [vmem:[%s1660_s3 + $0x390] sm:$0xff] }
  0x33   : > { %366 = vst [vmem:[%s1665_s4 + $0xe0] sm:$0xff] %v365_v28  ;;  %v425_v58 = vld [vmem:[%s1660_s3 + $0x3a0] sm:$0xff]  ;;  %v427_v59 = vld [vmem:[%s1660_s3 + $0x3b0] sm:$0xff] }
  0x34   : > { %368 = vst [vmem:[%s1665_s4 + $0xe8] sm:$0xff] %v367_v29  ;;  %v429_v60 = vld [vmem:[%s1660_s3 + $0x3c0] sm:$0xff]  ;;  %v431_v61 = vld [vmem:[%s1660_s3 + $0x3d0] sm:$0xff] }
  0x35   : > { %370 = vst [vmem:[%s1665_s4 + $0xf0] sm:$0xff] %v369_v30  ;;  %v433_v62 = vld [vmem:[%s1660_s3 + $0x3e0] sm:$0xff]  ;;  %v435_v63 = vld [vmem:[%s1660_s3 + $0x3f0] sm:$0xff] }
  0x36   : > { %372 = vst [vmem:[%s1665_s4 + $0xf8] sm:$0xff] %v371_v31 }
  0x37   : > { %374 = vst [vmem:[%s1665_s4 + $0x100] sm:$0xff] %v373_v32 }
  0x38   : > { %376 = vst [vmem:[%s1665_s4 + $0x108] sm:$0xff] %v375_v33 }
  0x39   : > { %378 = vst [vmem:[%s1665_s4 + $0x110] sm:$0xff] %v377_v34 }
  0x3a   : > { %380 = vst [vmem:[%s1665_s4 + $0x118] sm:$0xff] %v379_v35 }
  0x3b   : > { %382 = vst [vmem:[%s1665_s4 + $0x120] sm:$0xff] %v381_v36 }
  0x3c   : > { %384 = vst [vmem:[%s1665_s4 + $0x128] sm:$0xff] %v383_v37 }
  0x3d   : > { %386 = vst [vmem:[%s1665_s4 + $0x130] sm:$0xff] %v385_v38 }
  0x3e   : > { %388 = vst [vmem:[%s1665_s4 + $0x138] sm:$0xff] %v387_v39 }
  0x3f   : > { %390 = vst [vmem:[%s1665_s4 + $0x140] sm:$0xff] %v389_v40 }
  0x40   : > { %392 = vst [vmem:[%s1665_s4 + $0x148] sm:$0xff] %v391_v41 }
  0x41   : > { %394 = vst [vmem:[%s1665_s4 + $0x150] sm:$0xff] %v393_v42 }
  0x42   : > { %396 = vst [vmem:[%s1665_s4 + $0x158] sm:$0xff] %v395_v43 }
  0x43   : > { %398 = vst [vmem:[%s1665_s4 + $0x160] sm:$0xff] %v397_v44 }
  0x44   : > { %400 = vst [vmem:[%s1665_s4 + $0x168] sm:$0xff] %v399_v45 }
  0x45   : > { %402 = vst [vmem:[%s1665_s4 + $0x170] sm:$0xff] %v401_v46 }
  0x46   : > { %404 = vst [vmem:[%s1665_s4 + $0x178] sm:$0xff] %v403_v47 }
  0x47   : > { %406 = vst [vmem:[%s1665_s4 + $0x180] sm:$0xff] %v405_v48 }
  0x48   : > { %408 = vst [vmem:[%s1665_s4 + $0x188] sm:$0xff] %v407_v49 }
  0x49   : > { %410 = vst [vmem:[%s1665_s4 + $0x190] sm:$0xff] %v409_v50 }
  0x4a   : > { %412 = vst [vmem:[%s1665_s4 + $0x198] sm:$0xff] %v411_v51 }
  0x4b   : > { %414 = vst [vmem:[%s1665_s4 + $0x1a0] sm:$0xff] %v413_v52 }
  0x4c   : > { %416 = vst [vmem:[%s1665_s4 + $0x1a8] sm:$0xff] %v415_v53 }
  0x4d   : > { %418 = vst [vmem:[%s1665_s4 + $0x1b0] sm:$0xff] %v417_v54 }
  0x4e   : > { %420 = vst [vmem:[%s1665_s4 + $0x1b8] sm:$0xff] %v419_v55 }
  0x4f   : > { %422 = vst [vmem:[%s1665_s4 + $0x1c0] sm:$0xff] %v421_v56 }
  0x50   : > { %424 = vst [vmem:[%s1665_s4 + $0x1c8] sm:$0xff] %v423_v57 }
  0x51   : > { %426 = vst [vmem:[%s1665_s4 + $0x1d0] sm:$0xff] %v425_v58 }
  0x52   : > { %428 = vst [vmem:[%s1665_s4 + $0x1d8] sm:$0xff] %v427_v59 }
  0x53   : > { %430 = vst [vmem:[%s1665_s4 + $0x1e0] sm:$0xff] %v429_v60 }
  0x54   : > { %432 = vst [vmem:[%s1665_s4 + $0x1e8] sm:$0xff] %v431_v61 }
  0x55   : > { %434 = vst [vmem:[%s1665_s4 + $0x1f0] sm:$0xff] %v433_v62 }
  0x56   : > { %436 = vst [vmem:[%s1665_s4 + $0x1f8] sm:$0xff] %v435_v63 }
  0x57 PF: > { %p1141_p7 = scmp.ge.s32.totalorder %s1582_s15, 1  ;;  %p441_p8 = scmp.lt.s32.totalorder %s1582_s15, 19 }
  0x59   : > { %p442_p9 = pnand %p1141_p7, %p441_p8 }
  0x5a   : > { %s448_s5 = sand.u32 (!%p442_p9), 1, %s1558_s9   ;;  %s1143_s6 = sshll.u32 (!%p442_p9), %s1566_s11, 2 }
  0x5b   : > { %445 = sbr.rel (%p442_p9) target bundleno = 323 (0x143), region = 62  ;;  %s1142_s7 = sshll.u32 (!%p442_p9), %s448_s5, 9 }
  0x5c   : > { %p484_p10 = scmp.lt.s32.totalorder (!%p442_p9), %s1143_s6, 35  ;;  %s1144_s8 = sshll.u32 (!%p442_p9), %s1570_s12, 1 }
  0x5d   : > { %p495_p11 = scmp.lt.s32.totalorder (!%p442_p9), %s1144_s8, 3  ;;  %s1808_s9 = scalar_lea.vmem (!%p442_p9), [#allocation3], %s1142_s7 }
  0x5e   : > { %p1146_p12 = scmp.ne.s32.totalorder (!%p442_p9), %s1566_s11, 0 }
  0x60   : > { %s1999_s6 = smov (!%p484_p10, %s1143_s6), 35  ;;  %s2001_s8 = smov (!%p495_p11, %s1144_s8), 3 }
  0x61   : > { %s488_s20 = scalar_lea.vmem %s1983_s0, %s1999_s6  ;;  %s1145_s21 = sshll.u32 %s2001_s8, 1 }
  0x62   : > { %s1806_s25 = scalar_lea.vmem %s1985_s2, %s1145_s21  ;;  %505 = sbr.rel (%p1146_p12) target bundleno = 105 (0x69), region = 70 }
  0x67   : > { %v1584_v0 = vmov 0.0  }
  0x68   : > { %506 = vst [vmem:[#allocation2] sm:$0xf] %v1584_v0 }
  0x69 PF: > { %v1205_v1 = vld [vmem:[%s1808_s9 + $0x70] sm:$0xf]  ;;  %v1422_v2 = vld [vmem:[%s1808_s9 + $0x74] sm:$0xf0]  ;;  %v1197_v12 = vld [vmem:[%s1808_s9 + $0x60] sm:$0xf] }
  0x6a   : > { %v1269_v3 = vld [vmem:[%s1808_s9 + $0xf0] sm:$0xf]  ;;  %v1206_v4 = vor.u32 %v1422_v2, %v1205_v1  ;;  %v1438_v5 = vld [vmem:[%s1808_s9 + $0xf4] sm:$0xf0]  ;;  %v1420_v14 = vld [vmem:[%s1808_s9 + $0x64] sm:$0xf0] }
  0x6b   : > { %v1333_v6 = vld [vmem:[%s1808_s9 + $0x170] sm:$0xf]  ;;  %v1454_v7 = vld [vmem:[%s1808_s9 + $0x174] sm:$0xf0]  ;;  %v1270_v8 = vor.u32 %v1438_v5, %v1269_v3  ;;  %v1261_v15 = vld [vmem:[%s1808_s9 + $0xe0] sm:$0xf]  ;;  %v1198_v17 = vor.u32 %v1420_v14, %v1197_v12 }
  0x6c   : > { %v1334_v9 = vor.u32 %v1454_v7, %v1333_v6  ;;  %v1397_v10 = vld [vmem:[%s1808_s9 + $0x1f0] sm:$0xf]  ;;  %v1470_v11 = vld [vmem:[%s1808_s9 + $0x1f4] sm:$0xf0]  ;;  %903 = vmatpush.bf16.msra.mxu0 %v1206_v4  ;;  %v1436_v16 = vld [vmem:[%s1808_s9 + $0xe4] sm:$0xf0] }
  0x6d   : > { %v1398_v13 = vor.u32 %v1470_v11, %v1397_v10  ;;  %916 = vmatpush.bf16.msra.mxu1 %v1270_v8  ;;  %v1262_v18 = vor.u32 %v1436_v16, %v1261_v15  ;;  %v1325_v19 = vld [vmem:[%s1808_s9 + $0x160] sm:$0xf]  ;;  %v1452_v20 = vld [vmem:[%s1808_s9 + $0x164] sm:$0xf0]  ;;  %v1189_v24 = vld [vmem:[%s1808_s9 + $0x50] sm:$0xf] }
  0x6e   : > { %929 = vmatpush.bf16.msra.mxu2 %v1334_v9  ;;  %v1389_v21 = vld [vmem:[%s1808_s9 + $0x1e0] sm:$0xf]  ;;  %v1326_v22 = vor.u32 %v1452_v20, %v1325_v19  ;;  %v1468_v23 = vld [vmem:[%s1808_s9 + $0x1e4] sm:$0xf0]  ;;  %v1418_v25 = vld [vmem:[%s1808_s9 + $0x54] sm:$0xf0] }
  0x6f   : > { %942 = vmatpush.bf16.msra.mxu3 %v1398_v13  ;;  %v1390_v26 = vor.u32 %v1468_v23, %v1389_v21  ;;  %v1253_v27 = vld [vmem:[%s1808_s9 + $0xd0] sm:$0xf]  ;;  %v1434_v28 = vld [vmem:[%s1808_s9 + $0xd4] sm:$0xf0]  ;;  %v1190_v30 = vor.u32 %v1418_v25, %v1189_v24  ;;  %v1181_v36 = vld [vmem:[%s1808_s9 + $0x40] sm:$0xf] }
  0x70   : > { %v1317_v29 = vld [vmem:[%s1808_s9 + $0x150] sm:$0xf]  ;;  %904 = vmatpush.bf16.msra.mxu0 %v1198_v17  ;;  %v1450_v31 = vld [vmem:[%s1808_s9 + $0x154] sm:$0xf0]  ;;  %v1254_v34 = vor.u32 %v1434_v28, %v1253_v27  ;;  %v1416_v37 = vld [vmem:[%s1808_s9 + $0x44] sm:$0xf0] }
  0x71   : > { %v1381_v32 = vld [vmem:[%s1808_s9 + $0x1d0] sm:$0xf]  ;;  %v1466_v33 = vld [vmem:[%s1808_s9 + $0x1d4] sm:$0xf0]  ;;  %917 = vmatpush.bf16.msra.mxu1 %v1262_v18  ;;  %v1318_v35 = vor.u32 %v1450_v31, %v1317_v29  ;;  %v1245_v38 = vld [vmem:[%s1808_s9 + $0xc0] sm:$0xf]  ;;  %v1182_v45 = vor.u32 %v1416_v37, %v1181_v36 }
  0x72   : > { %930 = vmatpush.bf16.msra.mxu2 %v1326_v22  ;;  %v1382_v39 = vor.u32 %v1466_v33, %v1381_v32  ;;  %v1432_v40 = vld [vmem:[%s1808_s9 + $0xc4] sm:$0xf0]  ;;  %v1309_v41 = vld [vmem:[%s1808_s9 + $0x140] sm:$0xf]  ;;  %v1173_v48 = vld [vmem:[%s1808_s9 + $0x30] sm:$0xf] }
  0x73   : > { %943 = vmatpush.bf16.msra.mxu3 %v1390_v26  ;;  %v1448_v42 = vld [vmem:[%s1808_s9 + $0x144] sm:$0xf0]  ;;  %v1373_v43 = vld [vmem:[%s1808_s9 + $0x1c0] sm:$0xf]  ;;  %v1246_v46 = vor.u32 %v1432_v40, %v1245_v38  ;;  %v1414_v49 = vld [vmem:[%s1808_s9 + $0x34] sm:$0xf0] }
  0x74   : > { %v1464_v44 = vld [vmem:[%s1808_s9 + $0x1c4] sm:$0xf0]  ;;  %905 = vmatpush.bf16.msra.mxu0 %v1190_v30  ;;  %v1310_v47 = vor.u32 %v1448_v42, %v1309_v41  ;;  %v1237_v50 = vld [vmem:[%s1808_s9 + $0xb0] sm:$0xf]  ;;  %v1430_v52 = vld [vmem:[%s1808_s9 + $0xb4] sm:$0xf0]  ;;  %v1174_v57 = vor.u32 %v1414_v49, %v1173_v48 }
  0x75   : > { %918 = vmatpush.bf16.msra.mxu1 %v1254_v34  ;;  %v1374_v51 = vor.u32 %v1464_v44, %v1373_v43  ;;  %v1301_v53 = vld [vmem:[%s1808_s9 + $0x130] sm:$0xf]  ;;  %v1446_v54 = vld [vmem:[%s1808_s9 + $0x134] sm:$0xf0]  ;;  %v1238_v58 = vor.u32 %v1430_v52, %v1237_v50  ;;  %v1165_v60 = vld [vmem:[%s1808_s9 + $0x20] sm:$0xf] }
  0x76   : > { %931 = vmatpush.bf16.msra.mxu2 %v1318_v35  ;;  %v1365_v55 = vld [vmem:[%s1808_s9 + $0x1b0] sm:$0xf]  ;;  %v1462_v56 = vld [vmem:[%s1808_s9 + $0x1b4] sm:$0xf0]  ;;  %v1302_v59 = vor.u32 %v1446_v54, %v1301_v53  ;;  %v1412_v61 = vld [vmem:[%s1808_s9 + $0x24] sm:$0xf0] }
  0x77   : > { %944 = vmatpush.bf16.msra.mxu3 %v1382_v39  ;;  %v1229_v62 = vld [vmem:[%s1808_s9 + $0xa0] sm:$0xf]  ;;  %v1366_v63 = vor.u32 %v1462_v56, %v1365_v55  ;;  %v1428_v0 = vld [vmem:[%s1808_s9 + $0xa4] sm:$0xf0]  ;;  %v1166_v5 = vor.u32 %v1412_v61, %v1165_v60  ;;  %v1157_v8 = vld [vmem:[%s1808_s9 + $0x10] sm:$0xf] }
  0x78   : > { %906 = vmatpush.bf16.msra.mxu0 %v1182_v45  ;;  %v1293_v1 = vld [vmem:[%s1808_s9 + $0x120] sm:$0xf]  ;;  %v1444_v2 = vld [vmem:[%s1808_s9 + $0x124] sm:$0xf0]  ;;  %v1230_v6 = vor.u32 %v1428_v0, %v1229_v62  ;;  %v1410_v9 = vld [vmem:[%s1808_s9 + $0x14] sm:$0xf0] }
  0x79   : > { %919 = vmatpush.bf16.msra.mxu1 %v1246_v46  ;;  %v1357_v3 = vld [vmem:[%s1808_s9 + $0x1a0] sm:$0xf]  ;;  %v1460_v4 = vld [vmem:[%s1808_s9 + $0x1a4] sm:$0xf0]  ;;  %v1294_v7 = vor.u32 %v1444_v2, %v1293_v1  ;;  %v1221_v10 = vld [vmem:[%s1808_s9 + $0x90] sm:$0xf]  ;;  %v1158_v18 = vor.u32 %v1410_v9, %v1157_v8 }
  0x7a   : > { %932 = vmatpush.bf16.msra.mxu2 %v1310_v47  ;;  %v1358_v11 = vor.u32 %v1460_v4, %v1357_v3  ;;  %v1426_v12 = vld [vmem:[%s1808_s9 + $0x94] sm:$0xf0]  ;;  %v1285_v13 = vld [vmem:[%s1808_s9 + $0x110] sm:$0xf]  ;;  %v1149_v17 = vld [vmem:[%s1808_s9] sm:$0xf] }
  0x7b   : > { %945 = vmatpush.bf16.msra.mxu3 %v1374_v51  ;;  %v1442_v14 = vld [vmem:[%s1808_s9 + $0x114] sm:$0xf0]  ;;  %v1349_v15 = vld [vmem:[%s1808_s9 + $0x190] sm:$0xf]  ;;  %v1408_v19 = vld [vmem:[%s1808_s9 + $0x4] sm:$0xf0]  ;;  %v1222_v22 = vor.u32 %v1426_v12, %v1221_v10 }
  0x7c   : > { %907 = vmatpush.bf16.msra.mxu0 %v1174_v57  ;;  %v1458_v16 = vld [vmem:[%s1808_s9 + $0x194] sm:$0xf0]  ;;  %v1213_v20 = vld [vmem:[%s1808_s9 + $0x80] sm:$0xf]  ;;  %v1424_v21 = vld [vmem:[%s1808_s9 + $0x84] sm:$0xf0]  ;;  %v1286_v23 = vor.u32 %v1442_v14, %v1285_v13  ;;  %v1150_v34 = vor.u32 %v1408_v19, %v1149_v17 }
  0x7d   : > { %920 = vmatpush.bf16.msra.mxu1 %v1238_v58  ;;  %v1277_v24 = vld [vmem:[%s1808_s9 + $0x100] sm:$0xf]  ;;  %v1440_v25 = vld [vmem:[%s1808_s9 + $0x104] sm:$0xf0]  ;;  %v1350_v27 = vor.u32 %v1458_v16, %v1349_v15  ;;  %v1421_v29 = vld [vmem:[%s1808_s9 + $0x74] sm:$0xf]  ;;  %v1214_v37 = vor.u32 %v1424_v21, %v1213_v20 }
  0x7e   : > { %933 = vmatpush.bf16.msra.mxu2 %v1302_v59  ;;  %v1341_v26 = vld [vmem:[%s1808_s9 + $0x180] sm:$0xf]  ;;  %v1456_v28 = vld [vmem:[%s1808_s9 + $0x184] sm:$0xf0]  ;;  %v1207_v30 = vld [vmem:[%s1808_s9 + $0x78] sm:$0xf0]  ;;  %v1278_v38 = vor.u32 %v1440_v25, %v1277_v24 }
  0x7f   : > { %946 = vmatpush.bf16.msra.mxu3 %v1366_v63  ;;  %v1437_v31 = vld [vmem:[%s1808_s9 + $0xf4] sm:$0xf]  ;;  %v1271_v32 = vld [vmem:[%s1808_s9 + $0xf8] sm:$0xf0]  ;;  %v1342_v41 = vor.u32 %v1456_v28, %v1341_v26  ;;  %v1210_v42 = vor.u32 %v1421_v29, %v1207_v30  ;;  %v1419_v45 = vld [vmem:[%s1808_s9 + $0x64] sm:$0xf] }
  0x80   : > { %908 = vmatpush.bf16.msra.mxu0 %v1166_v5  ;;  %v508_v33 = vld [vmem:[%s488_s20] sm:$0xf]  ;;  %v1335_v36 = vld [vmem:[%s1808_s9 + $0x178] sm:$0xf0]  ;;  %v1274_v43 = vor.u32 %v1437_v31, %v1271_v32  ;;  %v1199_v46 = vld [vmem:[%s1808_s9 + $0x68] sm:$0xf0] }
  0x81   : > { %921 = vmatpush.bf16.msra.mxu1 %v1230_v6  ;;  %v1453_v35 = vld [vmem:[%s1808_s9 + $0x174] sm:$0xf]  ;;  %574 = vst [vmem:[#allocation1] ss:$9 sm:$0xff] %v508_v33  ;;  %v1399_v40 = vld [vmem:[%s1808_s9 + $0x1f8] sm:$0xf0]  ;;  %v1202_v55 = vor.u32 %v1419_v45, %v1199_v46 }
  0x82   : > { %934 = vmatpush.bf16.msra.mxu2 %v1294_v7  ;;  %v1469_v39 = vld [vmem:[%s1808_s9 + $0x1f4] sm:$0xf]  ;;  %v1338_v44 = vor.u32 %v1453_v35, %v1335_v36  ;;  %v1435_v47 = vld [vmem:[%s1808_s9 + $0xe4] sm:$0xf]  ;;  %v1263_v49 = vld [vmem:[%s1808_s9 + $0xe8] sm:$0xf0] }
  0x83   : > { %947 = vmatpush.bf16.msra.mxu3 %v1358_v11  ;;  %v1402_v48 = vor.u32 %v1469_v39, %v1399_v40  ;;  %v1451_v50 = vld [vmem:[%s1808_s9 + $0x164] sm:$0xf]  ;;  %v1327_v51 = vld [vmem:[%s1808_s9 + $0x168] sm:$0xf0]  ;;  %v1417_v54 = vld [vmem:[%s1808_s9 + $0x54] sm:$0xf]  ;;  %v1266_v59 = vor.u32 %v1435_v47, %v1263_v49 }
  0x84   : > { %909 = vmatpush.bf16.msra.mxu0 %v1158_v18  ;;  %v1467_v52 = vld [vmem:[%s1808_s9 + $0x1e4] sm:$0xf]  ;;  %v1391_v53 = vld [vmem:[%s1808_s9 + $0x1e8] sm:$0xf0]  ;;  %v1191_v56 = vld [vmem:[%s1808_s9 + $0x58] sm:$0xf0]  ;;  %v1330_v60 = vor.u32 %v1451_v50, %v1327_v51 }
  0x85   : > { %922 = vmatpush.bf16.msra.mxu1 %v1222_v22  ;;  %v1433_v57 = vld [vmem:[%s1808_s9 + $0xd4] sm:$0xf]  ;;  %v1255_v58 = vld [vmem:[%s1808_s9 + $0xd8] sm:$0xf0]  ;;  %v1394_v0 = vor.u32 %v1467_v52, %v1391_v53  ;;  %v1194_v6 = vor.u32 %v1417_v54, %v1191_v56  ;;  %v1415_v9 = vld [vmem:[%s1808_s9 + $0x44] sm:$0xf] }
  0x86   : > { %935 = vmatpush.bf16.msra.mxu2 %v1286_v23  ;;  %v1449_v1 = vld [vmem:[%s1808_s9 + $0x154] sm:$0xf]  ;;  %v1319_v2 = vld [vmem:[%s1808_s9 + $0x158] sm:$0xf0]  ;;  %v1258_v7 = vor.u32 %v1433_v57, %v1255_v58  ;;  %v1183_v10 = vld [vmem:[%s1808_s9 + $0x48] sm:$0xf0] }
  0x87   : > { %948 = vmatpush.bf16.msra.mxu3 %v1350_v27  ;;  %v1465_v4 = vld [vmem:[%s1808_s9 + $0x1d4] sm:$0xf]  ;;  %v1383_v5 = vld [vmem:[%s1808_s9 + $0x1d8] sm:$0xf0]  ;;  %v1322_v8 = vor.u32 %v1449_v1, %v1319_v2  ;;  %v1431_v11 = vld [vmem:[%s1808_s9 + $0xc4] sm:$0xf]  ;;  %v1186_v18 = vor.u32 %v1415_v9, %v1183_v10 }
  0x88   : > { %910 = vmatpush.bf16.msra.mxu0 %v1150_v34  ;;  %v1900_v61 = vld [vmem:[#allocation1 + $0x12] sm:$0xff]  ;;  %v1902_v62 = vld [vmem:[#allocation1 + $0x1b] sm:$0xff]  ;;  %v1909_v3 = vld [vmem:[#allocation1 + $0x9] sm:$0xff]  ;;  %v1386_v12 = vor.u32 %v1465_v4, %v1383_v5  ;;  %vm1010_vm0 = vcmask 1041408   ;;  %p1403_p13 = scmp.ne.s32.totalorder %s1566_s11, 8 }
  0x89   : > { %923 = vmatpush.bf16.msra.mxu1 %v1214_v37  ;;  %v1904_v63 = vld [vmem:[#allocation1] sm:$0xff]  ;;  %v1247_v13 = vld [vmem:[%s1808_s9 + $0xc8] sm:$0xf0]  ;;  %v1447_v14 = vld [vmem:[%s1808_s9 + $0x144] sm:$0xf] }
  0x8a   : > { %936 = vmatpush.bf16.msra.mxu2 %v1278_v38  ;;  %v1311_v15 = vld [vmem:[%s1808_s9 + $0x148] sm:$0xf0]  ;;  %v1463_v16 = vld [vmem:[%s1808_s9 + $0x1c4] sm:$0xf]  ;;  %v1250_v19 = vor.u32 %v1431_v11, %v1247_v13  ;;  %v1413_v21 = vld [vmem:[%s1808_s9 + $0x34] sm:$0xf] }
  0x8b   : > { %949 = vmatpush.bf16.msra.mxu3 %v1342_v41  ;;  %911 = vmatmul.bf16.vlgmr.msra.gmra.mxu0 %v1904_v63  ;;  %v1375_v17 = vld [vmem:[%s1808_s9 + $0x1c8] sm:$0xf0]  ;;  %v1314_v20 = vor.u32 %v1447_v14, %v1311_v15  ;;  %v1175_v22 = vld [vmem:[%s1808_s9 + $0x38] sm:$0xf0]  ;;  %v1429_v23 = vld [vmem:[%s1808_s9 + $0xb4] sm:$0xf] }
  0x8c   : > { %955 = vmatpush.bf16.msrb.mxu0 %v1210_v42  ;;  %924 = vmatmul.bf16.vlgmr.msra.gmra.mxu1 %v1909_v3  ;;  %v1378_v24 = vor.u32 %v1463_v16, %v1375_v17  ;;  %v1239_v25 = vld [vmem:[%s1808_s9 + $0xb8] sm:$0xf0]  ;;  %v1445_v26 = vld [vmem:[%s1808_s9 + $0x134] sm:$0xf]  ;;  %v1178_v30 = vor.u32 %v1413_v21, %v1175_v22  ;;  %v1411_v33 = vld [vmem:[%s1808_s9 + $0x24] sm:$0xf] }
  0x8d   : > { %968 = vmatpush.bf16.msrb.mxu1 %v1274_v43  ;;  %937 = vmatmul.bf16.vlgmr.msra.gmra.mxu2 %v1900_v61  ;;  %v1303_v27 = vld [vmem:[%s1808_s9 + $0x138] sm:$0xf0]  ;;  %v1461_v28 = vld [vmem:[%s1808_s9 + $0x1b4] sm:$0xf]  ;;  %v1242_v31 = vor.u32 %v1429_v23, %v1239_v25  ;;  %v1167_v34 = vld [vmem:[%s1808_s9 + $0x28] sm:$0xf0] }
  0x8e   : > { %981 = vmatpush.bf16.msrb.mxu2 %v1338_v44  ;;  %950 = vmatmul.bf16.vlgmr.msra.gmra.mxu3 %v1902_v62  ;;  %v1367_v29 = vld [vmem:[%s1808_s9 + $0x1b8] sm:$0xf0]  ;;  %v1306_v32 = vor.u32 %v1445_v26, %v1303_v27  ;;  %v1427_v35 = vld [vmem:[%s1808_s9 + $0xa4] sm:$0xf]  ;;  %v1231_v37 = vld [vmem:[%s1808_s9 + $0xa8] sm:$0xf0]  ;;  %v1170_v42 = vor.u32 %v1411_v33, %v1167_v34 }
  0x8f   : > { %994 = vmatpush.bf16.msrb.mxu3 %v1402_v48  ;;  %v1370_v36 = vor.u32 %v1461_v28, %v1367_v29  ;;  %v1443_v38 = vld [vmem:[%s1808_s9 + $0x124] sm:$0xf]  ;;  %v1295_v39 = vld [vmem:[%s1808_s9 + $0x128] sm:$0xf0]  ;;  %v1234_v43 = vor.u32 %v1427_v35, %v1231_v37  ;;  %v1409_v45 = vld [vmem:[%s1808_s9 + $0x14] sm:$0xf] }
  0x90   : > { %956 = vmatpush.bf16.msrb.mxu0 %v1202_v55  ;;  %v1459_v40 = vld [vmem:[%s1808_s9 + $0x1a4] sm:$0xf]  ;;  %v1359_v41 = vld [vmem:[%s1808_s9 + $0x1a8] sm:$0xf0]  ;;  %v1298_v44 = vor.u32 %v1443_v38, %v1295_v39  ;;  %v1159_v46 = vld [vmem:[%s1808_s9 + $0x18] sm:$0xf0] }
  0x91   : > { %969 = vmatpush.bf16.msrb.mxu1 %v1266_v59  ;;  %v1425_v47 = vld [vmem:[%s1808_s9 + $0x94] sm:$0xf]  ;;  %v1362_v48 = vor.u32 %v1459_v40, %v1359_v41  ;;  %v1223_v49 = vld [vmem:[%s1808_s9 + $0x98] sm:$0xf0]  ;;  %v1162_v54 = vor.u32 %v1409_v45, %v1159_v46  ;;  %v1407_v57 = vld [vmem:[%s1808_s9 + $0x4] sm:$0xf] }
  0x92   : > { %982 = vmatpush.bf16.msrb.mxu2 %v1330_v60  ;;  %v1441_v50 = vld [vmem:[%s1808_s9 + $0x114] sm:$0xf]  ;;  %v1287_v51 = vld [vmem:[%s1808_s9 + $0x118] sm:$0xf0]  ;;  %v1226_v55 = vor.u32 %v1425_v47, %v1223_v49  ;;  %v1151_v58 = vld [vmem:[%s1808_s9 + $0x8] sm:$0xf0] }
  0x93   : > { %995 = vmatpush.bf16.msrb.mxu3 %v1394_v0  ;;  %v1457_v52 = vld [vmem:[%s1808_s9 + $0x194] sm:$0xf]  ;;  %v1351_v53 = vld [vmem:[%s1808_s9 + $0x198] sm:$0xf0]  ;;  %v1290_v56 = vor.u32 %v1441_v50, %v1287_v51  ;;  %v1423_v59 = vld [vmem:[%s1808_s9 + $0x84] sm:$0xf] }
  0x94   : > { %957 = vmatpush.bf16.msrb.mxu0 %v1194_v6  ;;  %v1354_v60 = vor.u32 %v1457_v52, %v1351_v53  ;;  %v1215_v0 = vld [vmem:[%s1808_s9 + $0x88] sm:$0xf0]  ;;  %v1439_v1 = vld [vmem:[%s1808_s9 + $0x104] sm:$0xf]  ;;  %v1154_v6 = vor.u32 %v1407_v57, %v1151_v58  ;;  %v507_v26 = vld [vmem:[#allocation2] sm:$0xf] }
  0x95   : > { %970 = vmatpush.bf16.msrb.mxu1 %v1258_v7  ;;  %v1279_v2 = vld [vmem:[%s1808_s9 + $0x108] sm:$0xf0]  ;;  %v1455_v4 = vld [vmem:[%s1808_s9 + $0x184] sm:$0xf]  ;;  %v1218_v7 = vor.u32 %v1423_v59, %v1215_v0 }
  0x96   : > { %983 = vmatpush.bf16.msrb.mxu2 %v1322_v8  ;;  %v1343_v5 = vld [vmem:[%s1808_s9 + $0x188] sm:$0xf0]  ;;  %v1282_v8 = vor.u32 %v1439_v1, %v1279_v2 }
  0x97   : > { %996 = vmatpush.bf16.msrb.mxu3 %v1386_v12  ;;  %v1346_v9 = vor.u32 %v1455_v4, %v1343_v5 }
  0x98   : > { %958 = vmatpush.bf16.msrb.mxu0 %v1186_v18 }
  0x99   : > { %971 = vmatpush.bf16.msrb.mxu1 %v1250_v19 }
  0x9a   : > { %984 = vmatpush.bf16.msrb.mxu2 %v1314_v20 }
  0x9b   : > { %997 = vmatpush.bf16.msrb.mxu3 %v1378_v24 }
  0x9c   : > { %959 = vmatpush.bf16.msrb.mxu0 %v1178_v30 }
  0x9d   : > { %972 = vmatpush.bf16.msrb.mxu1 %v1242_v31 }
  0x9e   : > { %985 = vmatpush.bf16.msrb.mxu2 %v1306_v32 }
  0x9f   : > { %998 = vmatpush.bf16.msrb.mxu3 %v1370_v36 }
  0xa0   : > { %960 = vmatpush.bf16.msrb.mxu0 %v1170_v42 }
  0xa1   : > { %973 = vmatpush.bf16.msrb.mxu1 %v1234_v43 }
  0xa2   : > { %986 = vmatpush.bf16.msrb.mxu2 %v1298_v44 }
  0xa3   : > { %999 = vmatpush.bf16.msrb.mxu3 %v1362_v48 }
  0xa4   : > { %961 = vmatpush.bf16.msrb.mxu0 %v1162_v54 }
  0xa5   : > { %974 = vmatpush.bf16.msrb.mxu1 %v1226_v55 }
  0xa6   : > { %987 = vmatpush.bf16.msrb.mxu2 %v1290_v56 }
  0xa7   : > { %1000 = vmatpush.bf16.msrb.mxu3 %v1354_v60 }
  0xa8   : > { %962 = vmatpush.bf16.msrb.mxu0 %v1154_v6 }
  0xa9   : > { %975 = vmatpush.bf16.msrb.mxu1 %v1218_v7 }
  0xaa   : > { %988 = vmatpush.bf16.msrb.mxu2 %v1282_v8 }
  0xab   : > { %1001 = vmatpush.bf16.msrb.mxu3 %v1346_v9  ;;  %963 = vmatmul.bf16.vlgmr.msrb.gmra.mxu0 %v1904_v63 }
  0xac   : > { %976 = vmatmul.bf16.vlgmr.msrb.gmra.mxu1 %v1909_v3 }
  0xad   : > { %989 = vmatmul.bf16.vlgmr.msrb.gmra.mxu2 %v1900_v61 }
  0xae   : > { %1002 = vmatmul.bf16.vlgmr.msrb.gmra.mxu3 %v1902_v62 }
 0x108   : > { %v912_v10 = vpop.f32.mrf.mxu0 }
 0x109   : > { %v925_v11 = vpop.f32.mrf.mxu1 }
 0x10a   : > { %v926_v20 = vadd.f32 %v925_v11, %v912_v10 }
 0x110   : > { %v938_v12 = vpop.f32.mrf.mxu2  ;;  %v914_v14 = vpop.f32.mrf.mxu0 }
 0x111   : > { %v951_v13 = vpop.f32.mrf.mxu3  ;;  %v927_v15 = vpop.f32.mrf.mxu1  ;;  %v939_v63 = vadd.f32 %v938_v12, %v926_v20 }
 0x113   : > { %v952_v62 = vadd.f32 %v951_v13, %v939_v63 }
 0x118   : > { %v940_v16 = vpop.f32.mrf.mxu2 }
 0x119   : > { %v953_v17 = vpop.f32.mrf.mxu3 }
 0x128   : > { %v964_v18 = vpop.f32.mrf.mxu0 }
 0x129   : > { %v977_v19 = vpop.f32.mrf.mxu1 }
 0x12a   : > { %v978_v21 = vadd.f32 %v977_v19, %v964_v18 }
 0x130   : > { %v990_v22 = vpop.f32.mrf.mxu2  ;;  %v966_v24 = vpop.f32.mrf.mxu0 }
 0x131   : > { %v991_v23 = vadd.f32 %v990_v22, %v978_v21  ;;  %v1003_v3 = vpop.f32.mrf.mxu3  ;;  %v979_v61 = vpop.f32.mrf.mxu1 }
 0x133   : > { %v1004_v25 = vadd.f32 %v1003_v3, %v991_v23 }
 0x135   : > { %v1009_v27 = vrot.slane %v1004_v25, 6 }
 0x136   : > { %1018 = sbr.rel (%p1403_p13) target bundleno = 323 (0x143), region = 74 }
 0x137   : > { %v1011_v28 = vsel %vm1010_vm0, %v952_v62, %v1009_v27 }
 0x138   : > { %v1013_v29 = vadd.f32 %v1011_v28, %v507_v26  ;;  %v992_v30 = vpop.f32.mrf.mxu2 }
 0x139   : > { %v1005_v31 = vpop.f32.mrf.mxu3 }
 0x13a   : > { %1014 = vst [vmem:[#allocation2] sm:$0xf] %v1013_v29 }
 0x141   : > { %v1019_v32 = vld [vmem:[#allocation2] sm:$0xf] }
 0x142   : > { %1020 = vst [vmem:[%s1806_s25] sm:$0xf] %v1019_v32 }
 0x143 PF: > { %s12_s15 = sadd.s32 1, %s1582_s15   ;;  %s1986_s9 = smov %s1562_s10 }
 0x144   : > { %p9_p0 = scmp.ge.s32.totalorder %s12_s15, 20   ;;  %s1987_s10 = smov %s1651_s22 }
 0x145   : > { %s1988_s11 = smov %s1574_s13  ;;  %s1989_s12 = smov %s1578_s14 }
 0x146   : > { %s1990_s13 = smov %s1993_s16  ;;  %s1991_s14 = smov %s1997_s17 }
 0x147   :  { %11 = sbr.rel (!%p9_p0) target bundleno = 4 (0x4), region = 112 }

// kernel: resnet18_apply.117
= control target key start
LH: loop header
LB: loop body
LE: loop exit
PB: predicated region body
PF: predicated region fallthrough
CT: control target
= control target key end

     0   :  { %vm27_vm0 = vcmask 1041408   ;;  %vm29_vm1 = vcmask 1045508   ;;  %vm31_vm2 = vcmask 1043456   ;;  %s101_s1 = inlined_call_operand.vmem [shape: f32[1,512], index: 1, kind: input, shape index: {}]   ;;  %s102_s2 = inlined_call_operand.vmem [shape: f32[1,512], index: 2, kind: input, shape index: {}]   ;;  %s103_s0 = inlined_call_operand.vmem [shape: f32[2,512], index: 0, kind: input, shape index: {}]   ;;  %s104_s3 = inlined_call_operand.vmem [shape: f32[2,512], index: 3, kind: input, shape index: {}]   ;;  %s105_s4 = inlined_call_operand.vmem [shape: f32[2,512], index: 4, kind: output, shape index: {}]  }
   0x1   :  { %v18_v0 = vld [vmem:[%s101_s1] sm:$0xf] }
   0x2   :  { %v35_v1 = vld [vmem:[%s102_s2] sm:$0xf]  ;;  %v20_v2 = vperm.slane %v18_v0, 0  ;;  %v21_v3 = vperm.slane %v18_v0, 1  ;;  %v22_v4 = vperm.slane %v18_v0, 2  ;;  %v23_v5 = vperm.slane %v18_v0, 3 }
   0x3   :  { %v37_v6 = vperm.slane %v35_v1, 0  ;;  %v38_v7 = vperm.slane %v35_v1, 1  ;;  %v39_v8 = vperm.slane %v35_v1, 2  ;;  %v40_v9 = vperm.slane %v35_v1, 3  ;;  %v17_v13 = vld [vmem:[%s103_s0] sm:$0xff] }
   0x4   :  { %v24_v10 = vrot.slane %v21_v3, 6  ;;  %v25_v11 = vrot.slane %v22_v4, 4  ;;  %v26_v12 = vrot.slane %v23_v5, 2  ;;  %v49_v24 = vld [vmem:[%s104_s3] sm:$0xff] }
   0x5   :  { %v41_v14 = vrot.slane %v38_v7, 6  ;;  %v42_v15 = vrot.slane %v39_v8, 4  ;;  %v43_v16 = vrot.slane %v40_v9, 2 }
   0x6   :  { %v28_v17 = vsel %vm27_vm0, %v20_v2, %v24_v10  ;;  %v30_v18 = vsel %vm29_vm1, %v25_v11, %v26_v12 }
   0x7   :  { %v32_v19 = vsel %vm31_vm2, %v28_v17, %v30_v18  ;;  %v44_v20 = vsel %vm27_vm0, %v37_v6, %v41_v14  ;;  %v45_v21 = vsel %vm29_vm1, %v42_v15, %v43_v16 }
   0x8   :  { %v34_v22 = vmul.f32 %v32_v19, %v17_v13  ;;  %v46_v23 = vsel %vm31_vm2, %v44_v20, %v45_v21 }
   0xa   :  { %v48_v25 = vadd.f32 %v46_v23, %v34_v22 }
   0xc   :  { %v50_v26 = vadd.f32 %v49_v24, %v48_v25 }
   0xe   :  { %v51_v27 = vmax.f32 %v50_v26, 0.0 }
  0x10   :  { %52 = vst [vmem:[%s105_s4] sm:$0xff] %v51_v27 }

// kernel: resnet18_apply.124
= control target key start
LH: loop header
LB: loop body
LE: loop exit
PB: predicated region body
PF: predicated region fallthrough
CT: control target
= control target key end

     0   :  { %s43_s0 = inlined_call_operand.vmem [shape: f32[2,1,512], index: 0, kind: input, shape index: {}]   ;;  %s44_s1 = inlined_call_operand.vmem [shape: f32[2,512], index: 1, kind: output, shape index: {}]  }
   0x1   :  { %v8_v0 = vld [vmem:[%s43_s0] sm:$0xf]  ;;  %v9_v1 = vld [vmem:[%s43_s0 + $0x4] sm:$0xf] }
   0x2   :  { %14 = vst [vmem:[#allocation1] ss:$2 sm:$0xff] %v8_v0 }
   0x3   :  { %16 = vst [vmem:[#allocation1 + $0x1] ss:$2 sm:$0xff] %v9_v1 }
   0xa   :  { %v17_v2 = vld [vmem:[#allocation1] sm:$0xff] }
   0xb   :  { %19 = vst [vmem:[%s44_s1] sm:$0xff] %v17_v2 }

// kernel: resnet18_apply.125
= control target key start
LH: loop header
LB: loop body
LE: loop exit
PB: predicated region body
PF: predicated region fallthrough
CT: control target
= control target key end

     0   :  { %s684_s0 = inlined_call_operand.vmem [shape: bf16[2,512], index: 0, kind: input, shape index: {}]   ;;  %s685_s1 = inlined_call_operand.vmem [shape: bf16[512,128], index: 1, kind: input, shape index: {}]   ;;  %s686_s2 = inlined_call_operand.vmem [shape: f32[1,128], index: 2, kind: input, shape index: {}]   ;;  %s687_s3 = inlined_call_operand.hbm [shape: f32[2,128], index: 3, kind: output, shape index: {}]  }
   0x1   :  { %v503_v0 = vld [vmem:[%s685_s1 + $0x38] sm:$0xff]  ;;  %v502_v4 = vld [vmem:[%s685_s1 + $0x30] sm:$0xff]  ;;  %v501_v8 = vld [vmem:[%s685_s1 + $0x28] sm:$0xff] }
   0x2   :  { %v511_v1 = vld [vmem:[%s685_s1 + $0x78] sm:$0xff]  ;;  %288 = vmatpush.bf16.msra.mxu0 %v503_v0  ;;  %v510_v5 = vld [vmem:[%s685_s1 + $0x70] sm:$0xff]  ;;  %v509_v9 = vld [vmem:[%s685_s1 + $0x68] sm:$0xff] }
   0x3   :  { %v519_v2 = vld [vmem:[%s685_s1 + $0xb8] sm:$0xff]  ;;  %301 = vmatpush.bf16.msra.mxu1 %v511_v1  ;;  %v518_v6 = vld [vmem:[%s685_s1 + $0xb0] sm:$0xff]  ;;  %v517_v10 = vld [vmem:[%s685_s1 + $0xa8] sm:$0xff] }
   0x4   :  { %v527_v3 = vld [vmem:[%s685_s1 + $0xf8] sm:$0xff]  ;;  %314 = vmatpush.bf16.msra.mxu2 %v519_v2  ;;  %v526_v7 = vld [vmem:[%s685_s1 + $0xf0] sm:$0xff]  ;;  %v525_v11 = vld [vmem:[%s685_s1 + $0xe8] sm:$0xff] }
   0x5   :  { %327 = vmatpush.bf16.msra.mxu3 %v527_v3  ;;  %v500_v12 = vld [vmem:[%s685_s1 + $0x20] sm:$0xff] }
   0x6   :  { %289 = vmatpush.bf16.msra.mxu0 %v502_v4  ;;  %v508_v13 = vld [vmem:[%s685_s1 + $0x60] sm:$0xff] }
   0x7   :  { %302 = vmatpush.bf16.msra.mxu1 %v510_v5  ;;  %v516_v14 = vld [vmem:[%s685_s1 + $0xa0] sm:$0xff] }
   0x8   :  { %315 = vmatpush.bf16.msra.mxu2 %v518_v6  ;;  %v524_v15 = vld [vmem:[%s685_s1 + $0xe0] sm:$0xff] }
   0x9   :  { %328 = vmatpush.bf16.msra.mxu3 %v526_v7  ;;  %v21_v16 = vld [vmem:[%s684_s0] sm:$0xf] }
   0xa   :  { %290 = vmatpush.bf16.msra.mxu0 %v501_v8  ;;  %87 = vst [vmem:[#allocation1] ss:$9 sm:$0xff] %v21_v16 }
   0xb   :  { %303 = vmatpush.bf16.msra.mxu1 %v509_v9 }
   0xc   :  { %316 = vmatpush.bf16.msra.mxu2 %v517_v10 }
   0xd   :  { %329 = vmatpush.bf16.msra.mxu3 %v525_v11 }
   0xe   :  { %8 = vsyncpa [#allocation4], 0  ;;  %291 = vmatpush.bf16.msra.mxu0 %v500_v12  ;;  %v499_v17 = vld [vmem:[%s685_s1 + $0x18] sm:$0xff]  ;;  %v498_v21 = vld [vmem:[%s685_s1 + $0x10] sm:$0xff]  ;;  %v557_v37 = vmov 0.0   ;;  %s558_s24 = smov [#allocation3]  }
   0xf   :  { %304 = vmatpush.bf16.msra.mxu1 %v508_v13  ;;  %v507_v18 = vld [vmem:[%s685_s1 + $0x58] sm:$0xff]  ;;  %v506_v22 = vld [vmem:[%s685_s1 + $0x50] sm:$0xff]  ;;  %v497_v25 = vld [vmem:[%s685_s1 + $0x8] sm:$0xff]  ;;  %19 = vst [vmem:[#allocation2] sm:$0x3] %v557_v37  ;;  %s357_s0 = sshll.u32 %s558_s24, 4  ;;  %s358_s0 = int_to_ptr.vmem [resolvable:$true] %s357_s0 }
  0x10   :  { %317 = vmatpush.bf16.msra.mxu2 %v516_v14  ;;  %v515_v19 = vld [vmem:[%s685_s1 + $0x98] sm:$0xff]  ;;  %v514_v23 = vld [vmem:[%s685_s1 + $0x90] sm:$0xff]  ;;  %v505_v26 = vld [vmem:[%s685_s1 + $0x48] sm:$0xff]  ;;  %s359_s27 = sshll.u32 %s687_s3, 4  ;;  %s360_s27 = int_to_ptr.hbm [resolvable:$true] %s359_s27 }
  0x11   :  { %330 = vmatpush.bf16.msra.mxu3 %v524_v15  ;;  %v523_v20 = vld [vmem:[%s685_s1 + $0xd8] sm:$0xff]  ;;  %v522_v24 = vld [vmem:[%s685_s1 + $0xd0] sm:$0xff]  ;;  %v513_v27 = vld [vmem:[%s685_s1 + $0x88] sm:$0xff] }
  0x12   :  { %292 = vmatpush.bf16.msra.mxu0 %v499_v17  ;;  %v521_v28 = vld [vmem:[%s685_s1 + $0xc8] sm:$0xff]  ;;  %v496_v29 = vld [vmem:[%s685_s1] sm:$0xff]  ;;  %v90_v35 = vld [vmem:[#allocation1 + $0x12] sm:$0xff] }
  0x13   :  { %305 = vmatpush.bf16.msra.mxu1 %v507_v18  ;;  %v504_v30 = vld [vmem:[%s685_s1 + $0x40] sm:$0xff]  ;;  %v89_v34 = vld [vmem:[#allocation1 + $0x9] sm:$0xff] }
  0x14   :  { %318 = vmatpush.bf16.msra.mxu2 %v515_v19  ;;  %v512_v31 = vld [vmem:[%s685_s1 + $0x80] sm:$0xff] }
  0x15   :  { %331 = vmatpush.bf16.msra.mxu3 %v523_v20  ;;  %v520_v32 = vld [vmem:[%s685_s1 + $0xc0] sm:$0xff] }
  0x16   :  { %293 = vmatpush.bf16.msra.mxu0 %v498_v21  ;;  %v88_v33 = vld [vmem:[#allocation1] sm:$0xff]  ;;  %v20_v46 = vld [vmem:[#allocation2] sm:$0x3] }
  0x17   :  { %306 = vmatpush.bf16.msra.mxu1 %v506_v22  ;;  %v91_v36 = vld [vmem:[#allocation1 + $0x1b] sm:$0xff] }
  0x18   :  { %319 = vmatpush.bf16.msra.mxu2 %v514_v23  ;;  %v530_v51 = vld [vmem:[%s686_s2] ss:$0 sm:$0xff] }
  0x19   :  { %332 = vmatpush.bf16.msra.mxu3 %v522_v24 }
  0x1a   :  { %294 = vmatpush.bf16.msra.mxu0 %v497_v25 }
  0x1b   :  { %307 = vmatpush.bf16.msra.mxu1 %v505_v26 }
  0x1c   :  { %320 = vmatpush.bf16.msra.mxu2 %v513_v27 }
  0x1d   :  { %333 = vmatpush.bf16.msra.mxu3 %v521_v28 }
  0x1e   :  { %295 = vmatpush.bf16.msra.mxu0 %v496_v29 }
  0x1f   :  { %308 = vmatpush.bf16.msra.mxu1 %v504_v30 }
  0x20   :  { %321 = vmatpush.bf16.msra.mxu2 %v512_v31 }
  0x21   :  { %334 = vmatpush.bf16.msra.mxu3 %v520_v32  ;;  %296 = vmatmul.bf16.vlgmr.msra.gmra.mxu0 %v88_v33 }
  0x22   :  { %309 = vmatmul.bf16.vlgmr.msra.gmra.mxu1 %v89_v34 }
  0x23   :  { %322 = vmatmul.bf16.vlgmr.msra.gmra.mxu2 %v90_v35 }
  0x24   :  { %335 = vmatmul.bf16.vlgmr.msra.gmra.mxu3 %v91_v36 }
  0x9e   :  { %v297_v38 = vpop.f32.mrf.mxu0 }
  0x9f   :  { %v310_v39 = vpop.f32.mrf.mxu1 }
  0xa0   :  { %v311_v40 = vadd.f32 %v310_v39, %v297_v38 }
  0xa6   :  { %v323_v41 = vpop.f32.mrf.mxu2  ;;  %v299_v44 = vpop.f32.mrf.mxu0 }
  0xa7   :  { %v336_v42 = vpop.f32.mrf.mxu3  ;;  %v324_v43 = vadd.f32 %v323_v41, %v311_v40  ;;  %v312_v45 = vpop.f32.mrf.mxu1 }
  0xa9   :  { %v337_v47 = vadd.f32 %v336_v42, %v324_v43 }
  0xab   :  { %v340_v48 = vadd.f32 %v337_v47, %v20_v46 }
  0xad   :  { %341 = vst [vmem:[#allocation2] sm:$0x3] %v340_v48 }
  0xae   :  { %v325_v49 = vpop.f32.mrf.mxu2 }
  0xaf   :  { %v338_v50 = vpop.f32.mrf.mxu3 }
  0xb4   :  { %v345_v52 = vld [vmem:[#allocation2] sm:$0x3] }
  0xb5   :  { %v350_v53 = vadd.f32 %v530_v51, %v345_v52 }
  0xb7   :  { %351 = vst [vmem:[#allocation3] sm:$0x3] %v350_v53 }
  0xb8   :  { %362 = dma.vmem_to_hbm [thread:$0]  %s358_s0, 32, %s360_s27, [#allocation4]  }
  0xb9   :  { %555 = dma.done.wait [#allocation4], 32  }
  0xba   :  { %556 = vsyncadd [#allocation4], 4294967264 }
  0xbb   :  { %367 = vsyncpa [#allocation4], 1 }

</bundles_post_ra>
